<compile_context>
chip_gen: v5e
topology: v5e:2x2
jax: 0.10.0
libtpu: 0.0.40
codegen_flags: <defaults>
</compile_context>

<pallas_src>
import functools

import jax
import jax.numpy as jnp
from jax.experimental import pallas as pl
from jax.experimental.pallas import tpu as pltpu

BN_EPS = 1e-5


def _vmem_spec():
    # whole-array block, resident in VMEM (shapes here are tiny)
    return pl.BlockSpec(memory_space=pltpu.MemorySpace.VMEM)


# ----------------------------- Pallas kernels ------------------------------


def _make_conv_stack_kernel(R, H, W, offs, counts, pad_rows):
    """Fused conv1/bn1/relu -> conv2/bn2/relu -> conv3/bn3/relu.

    p1_ref  : (R, 4*Cin)  folded layer-1 patches (padded spatial layout)
    w1_ref  : (4*Cin, C1) layer-1 weight, taps folded into K
    w2_ref  : (4, C1, C2) layer-2 weight, one slab per (dy, dx) tap
    w3_ref  : (4, C2, C3) layer-3 weight
    bn_ref  : (8, maxC)   packed BN params, rows = g1,b1,g2,b2,g3,b3,0,0
    out_ref : (R, C3)     layer-3 activation, invalid rows zeroed
    a1/a2   : VMEM scratch (R+pad_rows rows) holding intermediate activations
    """
    HW = H * W
    pow2 = (HW & (HW - 1)) == 0 and (W & (W - 1)) == 0

    def kernel(p1_ref, w1_ref, w2_ref, w3_ref, bn_ref, out_ref, a1_ref, a2_ref):
        c1 = a1_ref.shape[1]
        c2 = a2_ref.shape[1]
        c3 = out_ref.shape[1]

        # Zero ONLY the scratch tail rows read by the shifted taps past row R
        # (rows 0:R are fully overwritten below).
        a1_ref[R:R + pad_rows, :] = jnp.zeros((pad_rows, c1), jnp.float32)
        a2_ref[R:R + pad_rows, :] = jnp.zeros((pad_rows, c2), jnp.float32)

        # Validity masks computed in-kernel from a row iota (no HBM operands).
        row = jax.lax.broadcasted_iota(jnp.int32, (R, 1), 0)
        if pow2:
            p = row & (HW - 1)          # position within sample
            x = p & (W - 1)             # column index

            def mask(k):                # valid iff y < H-k and x < W-k
                return ((p < (H - k) * W) & (x < (W - k))).astype(jnp.float32)
        else:
            p = jax.lax.rem(row, HW)
            y = jax.lax.div(p, W)
            x = jax.lax.rem(p, W)

            def mask(k):
                return ((y < (H - k)) & (x < (W - k))).astype(jnp.float32)

        m1, m2, m3 = mask(1), mask(2), mask(3)

        # Packed BN params: rows g1,b1,g2,b2,g3,b3.
        g1 = bn_ref[0:1, 0:c1]
        b1 = bn_ref[1:2, 0:c1]
        g2 = bn_ref[2:3, 0:c2]
        b2 = bn_ref[3:4, 0:c2]
        g3 = bn_ref[4:5, 0:c3]
        b3 = bn_ref[5:6, 0:c3]

        def bn_relu(acc, m, gamma, beta, count):
            # Training-mode BatchNorm2d over the valid (N, H, W) positions,
            # single pass (sum / sum-of-squares), biased variance, all f32.
            # The conv bias is omitted on purpose: the batch-mean subtraction
            # cancels a per-channel bias exactly.
            accm = acc * m
            mean = jnp.sum(accm, axis=0, keepdims=True) * (1.0 / count)
            ex2 = jnp.sum(accm * accm, axis=0, keepdims=True) * (1.0 / count)
            var = jnp.maximum(ex2 - mean * mean, 0.0)
            yv = (acc - mean) * jax.lax.rsqrt(var + BN_EPS) * gamma + beta
            # ReLU, then zero the invalid (padded) rows.
            return jnp.maximum(yv, 0.0) * m

        # ---- layer 1: taps folded into the contraction dim (K = 4*Cin) ----
        acc = jnp.dot(p1_ref[...], w1_ref[...],
                      preferred_element_type=jnp.float32)
        a1 = bn_relu(acc, m1, g1, b1, counts[0])
        a1_ref[0:R, :] = a1

        # ---- layer 2: taps = row-shifted views of the VMEM activation ----
        acc = jnp.zeros((R, c2), jnp.float32)
        for t, off in enumerate(offs):          # static unroll over 2x2 taps
            tap = a1_ref[off:off + R, :].astype(jnp.bfloat16)
            acc = acc + jnp.dot(tap, w2_ref[t],
                                preferred_element_type=jnp.float32)
        a2 = bn_relu(acc, m2, g2, b2, counts[1])
        a2_ref[0:R, :] = a2

        # ---- layer 3 ----
        acc = jnp.zeros((R, c3), jnp.float32)
        for t, off in enumerate(offs):
            tap = a2_ref[off:off + R, :].astype(jnp.bfloat16)
            acc = acc + jnp.dot(tap, w3_ref[t],
                                preferred_element_type=jnp.float32)
        a3 = bn_relu(acc, m3, g3, b3, counts[2])
        out_ref[...] = a3.astype(out_ref.dtype)

    return kernel


def head_kernel(x_ref, w_ref, b_ref, o_ref):
    """Linear head on the compact, lane-dense (128-wide, K%128==0) weight."""
    o_ref[...] = (
        jnp.dot(x_ref[...], w_ref[...], preferred_element_type=jnp.float32)
        + b_ref[...]
    )


# --------------------------- parameter plumbing -----------------------------


def _conv2d_size_out(size, kernel_size=2, stride=1):
    return (size - (kernel_size - 1) - 1) // stride + 1


def init_dqn_params(key, h, w, outputs):
    """Parameters in PyTorch layout (conv OIHW, head = torch weight.T)."""
    convw = _conv2d_size_out(_conv2d_size_out(_conv2d_size_out(w)))
    convh = _conv2d_size_out(_conv2d_size_out(_conv2d_size_out(h)))
    linear_input_size = convw * convh * 32

    ks = jax.random.split(key, 14)

    def nrm(k, shape, scale):
        return (scale * jax.random.normal(k, shape)).astype(jnp.float32)

    return {
        "conv1_w": nrm(ks[0], (16, 3, 2, 2), 0.2),
        "conv1_b": nrm(ks[1], (16,), 0.1),      # unused by the kernel (BN cancels it)
        "conv2_w": nrm(ks[2], (32, 16, 2, 2), 0.1),
        "conv2_b": nrm(ks[3], (32,), 0.1),
        "conv3_w": nrm(ks[4], (32, 32, 2, 2), 0.1),
        "conv3_b": nrm(ks[5], (32,), 0.1),
        "bn1_g": 1.0 + nrm(ks[6], (16,), 0.05),
        "bn1_b": nrm(ks[7], (16,), 0.05),
        "bn2_g": 1.0 + nrm(ks[8], (32,), 0.05),
        "bn2_b": nrm(ks[9], (32,), 0.05),
        "bn3_g": 1.0 + nrm(ks[10], (32,), 0.05),
        "bn3_b": nrm(ks[11], (32,), 0.05),
        "head_w": nrm(ks[12], (linear_input_size, outputs), 0.05),  # torch weight.T
        "head_b": nrm(ks[13], (outputs,), 0.05),
    }


def prepare_kernel_params(params, h, w):
    """One-time conversion of torch-layout parameters into kernel layout.

    * conv weights: (Cout, Cin, 2, 2) -> per-tap (4, Cin, Cout); layer 1 is
      further folded to (4*Cin, Cout) since its patches arrive tap-folded.
    * conv biases are dropped: training-mode BN cancels them exactly.
    * BN gamma/beta packed into a single (8, maxC) array (one DMA descriptor).
    * head weight: rows permuted from torch's NCHW flatten order to NHWC
      flatten order over the VALID (h-3, w-3) window only (compact, no zero
      rows for padded spatial positions); K padded to a multiple of 128 and
      outputs to a lane-dense 128.
    """
    outputs = params["head_b"].shape[0]
    opad = ((outputs + 127) // 128) * 128

    def taps_last(w_oihw):  # (Cout, Cin, 2, 2) -> (4, Cin, Cout), tap = dy*2+dx
        co, ci = w_oihw.shape[0], w_oihw.shape[1]
        return jnp.transpose(w_oihw, (2, 3, 1, 0)).reshape(4, ci, co)

    c1i, c1o = params["conv1_w"].shape[1], params["conv1_w"].shape[0]
    c2o = params["conv2_w"].shape[0]
    c3o = params["conv3_w"].shape[0]

    w1 = taps_last(params["conv1_w"]).reshape(4 * c1i, c1o).astype(jnp.bfloat16)
    w2 = taps_last(params["conv2_w"]).astype(jnp.bfloat16)
    w3 = taps_last(params["conv3_w"]).astype(jnp.bfloat16)

    # Packed BatchNorm scale/shift: rows = g1, b1, g2, b2, g3, b3, 0, 0.
    maxc = max(c1o, c2o, c3o)
    bn = jnp.zeros((8, maxc), jnp.float32)
    bn = bn.at[0, :c1o].set(params["bn1_g"])
    bn = bn.at[1, :c1o].set(params["bn1_b"])
    bn = bn.at[2, :c2o].set(params["bn2_g"])
    bn = bn.at[3, :c2o].set(params["bn2_b"])
    bn = bn.at[4, :c3o].set(params["bn3_g"])
    bn = bn.at[5, :c3o].set(params["bn3_b"])

    # Compact head weight over the valid window, in (y, x, c) row order.
    convh, convw = h - 3, w - 3
    k_valid = convh * convw * c3o
    kpad = ((k_valid + 127) // 128) * 128
    hw_t = params["head_w"].reshape(c3o, convh, convw, outputs)  # torch NCHW order
    hw_t = jnp.transpose(hw_t, (1, 2, 0, 3)).reshape(k_valid, outputs)
    hw_t = jnp.pad(hw_t, ((0, kpad - k_valid), (0, opad - outputs)))
    hb = jnp.pad(params["head_b"], (0, opad - outputs)).reshape(1, opad)

    return {
        "w1": w1, "w2": w2, "w3": w3, "bn": bn,
        "head_w": hw_t.astype(jnp.bfloat16),
        "head_b": hb.astype(jnp.float32),
    }


# ------------------------------- forward ------------------------------------


@functools.partial(jax.jit, static_argnames=("outputs",))
def dqn_forward(kp, x_nchw, *, outputs):
    n, cin, h, w = x_nchw.shape
    c3 = kp["w3"].shape[2]   # 32
    r = n * h * w

    # NCHW -> NHWC; im2col of the FIRST layer only, emitted as a single
    # lane-dense (R, 4*Cin) tensor in the padded spatial layout.
    x = jnp.transpose(x_nchw, (0, 2, 3, 1)).astype(jnp.float32)
    hv, wv = h - 1, w - 1
    taps = [x[:, dy:dy + hv, dx:dx + wv, :] for dy in (0, 1) for dx in (0, 1)]
    p1 = jnp.concatenate(taps, axis=-1)                   # (N, H-1, W-1, 4*Cin)
    p1 = jnp.pad(p1, ((0, 0), (0, 1), (0, 1), (0, 0)))    # back to (N, H, W, .)
    p1 = p1.reshape(r, 4 * cin).astype(jnp.bfloat16)

    counts = (float(n * (h - 1) * (w - 1)),
              float(n * (h - 2) * (w - 2)),
              float(n * (h - 3) * (w - 3)))
    offs = (0, 1, w, w + 1)                    # 2x2 tap row offsets
    pad_rows = ((w + 1 + 7) // 8) * 8          # scratch tail covering max shift

    c1 = kp["w1"].shape[1]
    c2 = kp["w2"].shape[2]

    act3 = pl.pallas_call(
        _make_conv_stack_kernel(r, h, w, offs, counts, pad_rows),
        out_shape=jax.ShapeDtypeStruct((r, c3), jnp.bfloat16),
        in_specs=[_vmem_spec()] * 5,
        out_specs=_vmem_spec(),
        scratch_shapes=[
            pltpu.VMEM((r + pad_rows, c1), jnp.float32),
            pltpu.VMEM((r + pad_rows, c2), jnp.float32),
        ],
    )(p1, kp["w1"], kp["w2"], kp["w3"], kp["bn"])

    # Compact head input: slice the valid (h-3, w-3) window, flatten NHWC,
    # pad K to the (multiple-of-128) width of the compact head weight.
    ch, cw = h - 3, w - 3
    k_valid = ch * cw * c3
    x_valid = act3.reshape(n, h, w, c3)[:, :ch, :cw, :].reshape(n, k_valid)
    kpad = kp["head_w"].shape[0]
    x_flat = jnp.pad(x_valid, ((0, 0), (0, kpad - k_valid)))

    opad = kp["head_w"].shape[1]
    q = pl.pallas_call(
        head_kernel,
        out_shape=jax.ShapeDtypeStruct((n, opad), jnp.float32),
        in_specs=[_vmem_spec()] * 3,
        out_specs=_vmem_spec(),
    )(x_flat, kp["head_w"], kp["head_b"])
    return q[:, :outputs]


if __name__ == "__main__":
    H = W = 16
    OUTPUTS = 6
    BATCH = 2

    key = jax.random.PRNGKey(0)
    kx, kparam = jax.random.split(key)
    params = init_dqn_params(kparam, H, W, OUTPUTS)
    kp = prepare_kernel_params(params, H, W)
    x = jax.random.normal(kx, (BATCH, 3, H, W), dtype=jnp.float32)  # NCHW

    q = dqn_forward(kp, x, outputs=OUTPUTS)
    jax.block_until_ready(q)
    assert q.shape == (BATCH, OUTPUTS) and q.dtype == jnp.float32
    print("KERNEL_OK")
</pallas_src>

<mosaic_0001>
module attributes {stable_mosaic.version = 11 : i64} {
  func.func @kernel(%arg0: memref<512x12xbf16, #tpu.memory_space<vmem>>, %arg1: memref<12x16xbf16, #tpu.memory_space<vmem>>, %arg2: memref<4x16x32xbf16, #tpu.memory_space<vmem>>, %arg3: memref<4x32x32xbf16, #tpu.memory_space<vmem>>, %arg4: memref<8x32xf32, #tpu.memory_space<vmem>>, %arg5: memref<512x32xbf16, #tpu.memory_space<vmem>>, %arg6: memref<536x16xf32, #tpu.memory_space<vmem>>, %arg7: memref<536x32xf32, #tpu.memory_space<vmem>>) attributes {dimension_semantics = [], scalar_prefetch = 0 : i64, scratch_operands = 2 : i64, tpu.core_type = #tpu.core_type<tc>} {
    %cst = arith.constant 0.000000e+00 : f32
    %0 = vector.broadcast %cst : f32 to vector<24x16xf32>
    %c512 = arith.constant 512 : index
    %c0 = arith.constant 0 : index
    %1 = vector.load %arg6[%c512, %c0] : memref<536x16xf32, #tpu.memory_space<vmem>>, vector<24x16xf32>
    tpu.vector_store %arg6[%c512, %c0], %0 {strides = array<i32>} : memref<536x16xf32, #tpu.memory_space<vmem>>, vector<24x16xf32>,
    %cst_0 = arith.constant 0.000000e+00 : f32
    %2 = vector.broadcast %cst_0 : f32 to vector<24x32xf32>
    %c512_1 = arith.constant 512 : index
    %c0_2 = arith.constant 0 : index
    %3 = vector.load %arg7[%c512_1, %c0_2] : memref<536x32xf32, #tpu.memory_space<vmem>>, vector<24x32xf32>
    tpu.vector_store %arg7[%c512_1, %c0_2], %2 {strides = array<i32>} : memref<536x32xf32, #tpu.memory_space<vmem>>, vector<24x32xf32>,
    %4 = tpu.iota {dimensions = array<i32: 0>} : vector<512x1xi32>
    %c255_i32 = arith.constant 255 : i32
    %5 = vector.broadcast %c255_i32 : i32 to vector<512x1xi32>
    %6 = arith.andi %4, %5 : vector<512x1xi32>
    %c15_i32 = arith.constant 15 : i32
    %7 = vector.broadcast %c15_i32 : i32 to vector<512x1xi32>
    %8 = arith.andi %6, %7 : vector<512x1xi32>
    %c240_i32 = arith.constant 240 : i32
    %9 = vector.broadcast %c240_i32 : i32 to vector<512x1xi32>
    %10 = arith.cmpi slt, %6, %9 : vector<512x1xi32>
    %c15_i32_3 = arith.constant 15 : i32
    %11 = vector.broadcast %c15_i32_3 : i32 to vector<512x1xi32>
    %12 = arith.cmpi slt, %8, %11 : vector<512x1xi32>
    %13 = arith.andi %10, %12 : vector<512x1xi1>
    %14 = arith.extui %13 : vector<512x1xi1> to vector<512x1xi32>
    %15 = arith.sitofp %14 : vector<512x1xi32> to vector<512x1xf32>
    %c224_i32 = arith.constant 224 : i32
    %16 = vector.broadcast %c224_i32 : i32 to vector<512x1xi32>
    %17 = arith.cmpi slt, %6, %16 : vector<512x1xi32>
    %c14_i32 = arith.constant 14 : i32
    %18 = vector.broadcast %c14_i32 : i32 to vector<512x1xi32>
    %19 = arith.cmpi slt, %8, %18 : vector<512x1xi32>
    %20 = arith.andi %17, %19 : vector<512x1xi1>
    %21 = arith.extui %20 : vector<512x1xi1> to vector<512x1xi32>
    %22 = arith.sitofp %21 : vector<512x1xi32> to vector<512x1xf32>
    %c208_i32 = arith.constant 208 : i32
    %23 = vector.broadcast %c208_i32 : i32 to vector<512x1xi32>
    %24 = arith.cmpi slt, %6, %23 : vector<512x1xi32>
    %c13_i32 = arith.constant 13 : i32
    %25 = vector.broadcast %c13_i32 : i32 to vector<512x1xi32>
    %26 = arith.cmpi slt, %8, %25 : vector<512x1xi32>
    %27 = arith.andi %24, %26 : vector<512x1xi1>
    %28 = arith.extui %27 : vector<512x1xi1> to vector<512x1xi32>
    %29 = arith.sitofp %28 : vector<512x1xi32> to vector<512x1xf32>
    %c0_4 = arith.constant 0 : index
    %c0_5 = arith.constant 0 : index
    %30 = vector.load %arg4[%c0_4, %c0_5] : memref<8x32xf32, #tpu.memory_space<vmem>>, vector<1x16xf32>
    %c1 = arith.constant 1 : index
    %c0_6 = arith.constant 0 : index
    %31 = vector.load %arg4[%c1, %c0_6] : memref<8x32xf32, #tpu.memory_space<vmem>>, vector<1x16xf32>
    %c2 = arith.constant 2 : index
    %c0_7 = arith.constant 0 : index
    %32 = vector.load %arg4[%c2, %c0_7] : memref<8x32xf32, #tpu.memory_space<vmem>>, vector<1x32xf32>
    %c3 = arith.constant 3 : index
    %c0_8 = arith.constant 0 : index
    %33 = vector.load %arg4[%c3, %c0_8] : memref<8x32xf32, #tpu.memory_space<vmem>>, vector<1x32xf32>
    %c4 = arith.constant 4 : index
    %c0_9 = arith.constant 0 : index
    %34 = vector.load %arg4[%c4, %c0_9] : memref<8x32xf32, #tpu.memory_space<vmem>>, vector<1x32xf32>
    %c5 = arith.constant 5 : index
    %c0_10 = arith.constant 0 : index
    %35 = vector.load %arg4[%c5, %c0_10] : memref<8x32xf32, #tpu.memory_space<vmem>>, vector<1x32xf32>
    %c0_11 = arith.constant 0 : index
    %c0_12 = arith.constant 0 : index
    %36 = vector.load %arg0[%c0_11, %c0_12] : memref<512x12xbf16, #tpu.memory_space<vmem>>, vector<512x12xbf16>
    %c0_13 = arith.constant 0 : index
    %c0_14 = arith.constant 0 : index
    %37 = vector.load %arg1[%c0_13, %c0_14] : memref<12x16xbf16, #tpu.memory_space<vmem>>, vector<12x16xbf16>
    %cst_15 = arith.constant dense<0.000000e+00> : vector<512x16xf32>
    %38 = tpu.matmul %36, %37, %cst_15 {dimension_numbers = #tpu.dot_dimension_numbers<[1], [0], [0], [1], [0, 0, 1, 1], [], []>} : vector<512x12xbf16>, vector<12x16xbf16>, vector<512x16xf32> -> vector<512x16xf32>
    %39 = vector.broadcast %15 : vector<512x1xf32> to vector<512x16xf32>
    %40 = arith.mulf %38, %39 : vector<512x16xf32>
    %cst_16 = arith.constant dense<0.000000e+00> : vector<16xf32>
    %41 = vector.multi_reduction <add>, %40, %cst_16 [0] : vector<512x16xf32> to vector<16xf32>
    %42 = vector.shape_cast %41 : vector<16xf32> to vector<1x16xf32>
    %cst_17 = arith.constant 0.00222222228 : f32
    %43 = vector.broadcast %cst_17 : f32 to vector<1x16xf32>
    %44 = arith.mulf %42, %43 : vector<1x16xf32>
    %45 = arith.mulf %40, %40 : vector<512x16xf32>
    %cst_18 = arith.constant dense<0.000000e+00> : vector<16xf32>
    %46 = vector.multi_reduction <add>, %45, %cst_18 [0] : vector<512x16xf32> to vector<16xf32>
    %47 = vector.shape_cast %46 : vector<16xf32> to vector<1x16xf32>
    %cst_19 = arith.constant 0.00222222228 : f32
    %48 = vector.broadcast %cst_19 : f32 to vector<1x16xf32>
    %49 = arith.mulf %47, %48 : vector<1x16xf32>
    %50 = arith.mulf %44, %44 : vector<1x16xf32>
    %51 = arith.subf %49, %50 : vector<1x16xf32>
    %cst_20 = arith.constant 0.000000e+00 : f32
    %52 = vector.broadcast %cst_20 : f32 to vector<1x16xf32>
    %53 = arith.maximumf %51, %52 : vector<1x16xf32>
    %54 = vector.broadcast %44 : vector<1x16xf32> to vector<512x16xf32>
    %55 = arith.subf %38, %54 : vector<512x16xf32>
    %cst_21 = arith.constant 9.99999974E-6 : f32
    %56 = vector.broadcast %cst_21 : f32 to vector<1x16xf32>
    %57 = arith.addf %53, %56 : vector<1x16xf32>
    %58 = math.rsqrt %57 : vector<1x16xf32>
    %59 = vector.broadcast %58 : vector<1x16xf32> to vector<512x16xf32>
    %60 = arith.mulf %55, %59 : vector<512x16xf32>
    %61 = vector.broadcast %30 : vector<1x16xf32> to vector<512x16xf32>
    %62 = arith.mulf %60, %61 : vector<512x16xf32>
    %63 = vector.broadcast %31 : vector<1x16xf32> to vector<512x16xf32>
    %64 = arith.addf %62, %63 : vector<512x16xf32>
    %cst_22 = arith.constant 0.000000e+00 : f32
    %65 = vector.broadcast %cst_22 : f32 to vector<512x16xf32>
    %66 = arith.maximumf %64, %65 : vector<512x16xf32>
    %67 = vector.broadcast %15 : vector<512x1xf32> to vector<512x16xf32>
    %68 = arith.mulf %66, %67 : vector<512x16xf32>
    %c0_23 = arith.constant 0 : index
    %c0_24 = arith.constant 0 : index
    %69 = vector.load %arg6[%c0_23, %c0_24] : memref<536x16xf32, #tpu.memory_space<vmem>>, vector<512x16xf32>
    tpu.vector_store %arg6[%c0_23, %c0_24], %68 {strides = array<i32>} : memref<536x16xf32, #tpu.memory_space<vmem>>, vector<512x16xf32>,
    %cst_25 = arith.constant 0.000000e+00 : f32
    %70 = vector.broadcast %cst_25 : f32 to vector<512x32xf32>
    %c0_26 = arith.constant 0 : index
    %c0_27 = arith.constant 0 : index
    %71 = vector.load %arg6[%c0_26, %c0_27] : memref<536x16xf32, #tpu.memory_space<vmem>>, vector<512x16xf32>
    %72 = arith.truncf %71 : vector<512x16xf32> to vector<512x16xbf16>
    %c0_28 = arith.constant 0 : index
    %c0_29 = arith.constant 0 : index
    %c0_30 = arith.constant 0 : index
    %73 = vector.load %arg2[%c0_28, %c0_29, %c0_30] : memref<4x16x32xbf16, #tpu.memory_space<vmem>>, vector<1x16x32xbf16>
    %74 = vector.shape_cast %73 : vector<1x16x32xbf16> to vector<16x32xbf16>
    %cst_31 = arith.constant dense<0.000000e+00> : vector<512x32xf32>
    %75 = tpu.matmul %72, %74, %cst_31 {dimension_numbers = #tpu.dot_dimension_numbers<[1], [0], [0], [1], [0, 0, 1, 1], [], []>} : vector<512x16xbf16>, vector<16x32xbf16>, vector<512x32xf32> -> vector<512x32xf32>
    %76 = arith.addf %70, %75 : vector<512x32xf32>
    %c1_32 = arith.constant 1 : index
    %c0_33 = arith.constant 0 : index
    %77 = vector.load %arg6[%c1_32, %c0_33] : memref<536x16xf32, #tpu.memory_space<vmem>>, vector<512x16xf32>
    %78 = arith.truncf %77 : vector<512x16xf32> to vector<512x16xbf16>
    %c1_34 = arith.constant 1 : index
    %c0_35 = arith.constant 0 : index
    %c0_36 = arith.constant 0 : index
    %79 = vector.load %arg2[%c1_34, %c0_35, %c0_36] : memref<4x16x32xbf16, #tpu.memory_space<vmem>>, vector<1x16x32xbf16>
    %80 = vector.shape_cast %79 : vector<1x16x32xbf16> to vector<16x32xbf16>
    %cst_37 = arith.constant dense<0.000000e+00> : vector<512x32xf32>
    %81 = tpu.matmul %78, %80, %cst_37 {dimension_numbers = #tpu.dot_dimension_numbers<[1], [0], [0], [1], [0, 0, 1, 1], [], []>} : vector<512x16xbf16>, vector<16x32xbf16>, vector<512x32xf32> -> vector<512x32xf32>
    %82 = arith.addf %76, %81 : vector<512x32xf32>
    %c16 = arith.constant 16 : index
    %c0_38 = arith.constant 0 : index
    %83 = vector.load %arg6[%c16, %c0_38] : memref<536x16xf32, #tpu.memory_space<vmem>>, vector<512x16xf32>
    %84 = arith.truncf %83 : vector<512x16xf32> to vector<512x16xbf16>
    %c2_39 = arith.constant 2 : index
    %c0_40 = arith.constant 0 : index
    %c0_41 = arith.constant 0 : index
    %85 = vector.load %arg2[%c2_39, %c0_40, %c0_41] : memref<4x16x32xbf16, #tpu.memory_space<vmem>>, vector<1x16x32xbf16>
    %86 = vector.shape_cast %85 : vector<1x16x32xbf16> to vector<16x32xbf16>
    %cst_42 = arith.constant dense<0.000000e+00> : vector<512x32xf32>
    %87 = tpu.matmul %84, %86, %cst_42 {dimension_numbers = #tpu.dot_dimension_numbers<[1], [0], [0], [1], [0, 0, 1, 1], [], []>} : vector<512x16xbf16>, vector<16x32xbf16>, vector<512x32xf32> -> vector<512x32xf32>
    %88 = arith.addf %82, %87 : vector<512x32xf32>
    %c17 = arith.constant 17 : index
    %c0_43 = arith.constant 0 : index
    %89 = vector.load %arg6[%c17, %c0_43] : memref<536x16xf32, #tpu.memory_space<vmem>>, vector<512x16xf32>
    %90 = arith.truncf %89 : vector<512x16xf32> to vector<512x16xbf16>
    %c3_44 = arith.constant 3 : index
    %c0_45 = arith.constant 0 : index
    %c0_46 = arith.constant 0 : index
    %91 = vector.load %arg2[%c3_44, %c0_45, %c0_46] : memref<4x16x32xbf16, #tpu.memory_space<vmem>>, vector<1x16x32xbf16>
    %92 = vector.shape_cast %91 : vector<1x16x32xbf16> to vector<16x32xbf16>
    %cst_47 = arith.constant dense<0.000000e+00> : vector<512x32xf32>
    %93 = tpu.matmul %90, %92, %cst_47 {dimension_numbers = #tpu.dot_dimension_numbers<[1], [0], [0], [1], [0, 0, 1, 1], [], []>} : vector<512x16xbf16>, vector<16x32xbf16>, vector<512x32xf32> -> vector<512x32xf32>
    %94 = arith.addf %88, %93 : vector<512x32xf32>
    %95 = vector.broadcast %22 : vector<512x1xf32> to vector<512x32xf32>
    %96 = arith.mulf %94, %95 : vector<512x32xf32>
    %cst_48 = arith.constant dense<0.000000e+00> : vector<32xf32>
    %97 = vector.multi_reduction <add>, %96, %cst_48 [0] : vector<512x32xf32> to vector<32xf32>
    %98 = vector.shape_cast %97 : vector<32xf32> to vector<1x32xf32>
    %cst_49 = arith.constant 0.00255102036 : f32
    %99 = vector.broadcast %cst_49 : f32 to vector<1x32xf32>
    %100 = arith.mulf %98, %99 : vector<1x32xf32>
    %101 = arith.mulf %96, %96 : vector<512x32xf32>
    %cst_50 = arith.constant dense<0.000000e+00> : vector<32xf32>
    %102 = vector.multi_reduction <add>, %101, %cst_50 [0] : vector<512x32xf32> to vector<32xf32>
    %103 = vector.shape_cast %102 : vector<32xf32> to vector<1x32xf32>
    %cst_51 = arith.constant 0.00255102036 : f32
    %104 = vector.broadcast %cst_51 : f32 to vector<1x32xf32>
    %105 = arith.mulf %103, %104 : vector<1x32xf32>
    %106 = arith.mulf %100, %100 : vector<1x32xf32>
    %107 = arith.subf %105, %106 : vector<1x32xf32>
    %cst_52 = arith.constant 0.000000e+00 : f32
    %108 = vector.broadcast %cst_52 : f32 to vector<1x32xf32>
    %109 = arith.maximumf %107, %108 : vector<1x32xf32>
    %110 = vector.broadcast %100 : vector<1x32xf32> to vector<512x32xf32>
    %111 = arith.subf %94, %110 : vector<512x32xf32>
    %cst_53 = arith.constant 9.99999974E-6 : f32
    %112 = vector.broadcast %cst_53 : f32 to vector<1x32xf32>
    %113 = arith.addf %109, %112 : vector<1x32xf32>
    %114 = math.rsqrt %113 : vector<1x32xf32>
    %115 = vector.broadcast %114 : vector<1x32xf32> to vector<512x32xf32>
    %116 = arith.mulf %111, %115 : vector<512x32xf32>
    %117 = vector.broadcast %32 : vector<1x32xf32> to vector<512x32xf32>
    %118 = arith.mulf %116, %117 : vector<512x32xf32>
    %119 = vector.broadcast %33 : vector<1x32xf32> to vector<512x32xf32>
    %120 = arith.addf %118, %119 : vector<512x32xf32>
    %cst_54 = arith.constant 0.000000e+00 : f32
    %121 = vector.broadcast %cst_54 : f32 to vector<512x32xf32>
    %122 = arith.maximumf %120, %121 : vector<512x32xf32>
    %123 = vector.broadcast %22 : vector<512x1xf32> to vector<512x32xf32>
    %124 = arith.mulf %122, %123 : vector<512x32xf32>
    %c0_55 = arith.constant 0 : index
    %c0_56 = arith.constant 0 : index
    %125 = vector.load %arg7[%c0_55, %c0_56] : memref<536x32xf32, #tpu.memory_space<vmem>>, vector<512x32xf32>
    tpu.vector_store %arg7[%c0_55, %c0_56], %124 {strides = array<i32>} : memref<536x32xf32, #tpu.memory_space<vmem>>, vector<512x32xf32>,
    %cst_57 = arith.constant 0.000000e+00 : f32
    %126 = vector.broadcast %cst_57 : f32 to vector<512x32xf32>
    %c0_58 = arith.constant 0 : index
    %c0_59 = arith.constant 0 : index
    %127 = vector.load %arg7[%c0_58, %c0_59] : memref<536x32xf32, #tpu.memory_space<vmem>>, vector<512x32xf32>
    %128 = arith.truncf %127 : vector<512x32xf32> to vector<512x32xbf16>
    %c0_60 = arith.constant 0 : index
    %c0_61 = arith.constant 0 : index
    %c0_62 = arith.constant 0 : index
    %129 = vector.load %arg3[%c0_60, %c0_61, %c0_62] : memref<4x32x32xbf16, #tpu.memory_space<vmem>>, vector<1x32x32xbf16>
    %130 = vector.shape_cast %129 : vector<1x32x32xbf16> to vector<32x32xbf16>
    %cst_63 = arith.constant dense<0.000000e+00> : vector<512x32xf32>
    %131 = tpu.matmul %128, %130, %cst_63 {dimension_numbers = #tpu.dot_dimension_numbers<[1], [0], [0], [1], [0, 0, 1, 1], [], []>} : vector<512x32xbf16>, vector<32x32xbf16>, vector<512x32xf32> -> vector<512x32xf32>
    %132 = arith.addf %126, %131 : vector<512x32xf32>
    %c1_64 = arith.constant 1 : index
    %c0_65 = arith.constant 0 : index
    %133 = vector.load %arg7[%c1_64, %c0_65] : memref<536x32xf32, #tpu.memory_space<vmem>>, vector<512x32xf32>
    %134 = arith.truncf %133 : vector<512x32xf32> to vector<512x32xbf16>
    %c1_66 = arith.constant 1 : index
    %c0_67 = arith.constant 0 : index
    %c0_68 = arith.constant 0 : index
    %135 = vector.load %arg3[%c1_66, %c0_67, %c0_68] : memref<4x32x32xbf16, #tpu.memory_space<vmem>>, vector<1x32x32xbf16>
    %136 = vector.shape_cast %135 : vector<1x32x32xbf16> to vector<32x32xbf16>
    %cst_69 = arith.constant dense<0.000000e+00> : vector<512x32xf32>
    %137 = tpu.matmul %134, %136, %cst_69 {dimension_numbers = #tpu.dot_dimension_numbers<[1], [0], [0], [1], [0, 0, 1, 1], [], []>} : vector<512x32xbf16>, vector<32x32xbf16>, vector<512x32xf32> -> vector<512x32xf32>
    %138 = arith.addf %132, %137 : vector<512x32xf32>
    %c16_70 = arith.constant 16 : index
    %c0_71 = arith.constant 0 : index
    %139 = vector.load %arg7[%c16_70, %c0_71] : memref<536x32xf32, #tpu.memory_space<vmem>>, vector<512x32xf32>
    %140 = arith.truncf %139 : vector<512x32xf32> to vector<512x32xbf16>
    %c2_72 = arith.constant 2 : index
    %c0_73 = arith.constant 0 : index
    %c0_74 = arith.constant 0 : index
    %141 = vector.load %arg3[%c2_72, %c0_73, %c0_74] : memref<4x32x32xbf16, #tpu.memory_space<vmem>>, vector<1x32x32xbf16>
    %142 = vector.shape_cast %141 : vector<1x32x32xbf16> to vector<32x32xbf16>
    %cst_75 = arith.constant dense<0.000000e+00> : vector<512x32xf32>
    %143 = tpu.matmul %140, %142, %cst_75 {dimension_numbers = #tpu.dot_dimension_numbers<[1], [0], [0], [1], [0, 0, 1, 1], [], []>} : vector<512x32xbf16>, vector<32x32xbf16>, vector<512x32xf32> -> vector<512x32xf32>
    %144 = arith.addf %138, %143 : vector<512x32xf32>
    %c17_76 = arith.constant 17 : index
    %c0_77 = arith.constant 0 : index
    %145 = vector.load %arg7[%c17_76, %c0_77] : memref<536x32xf32, #tpu.memory_space<vmem>>, vector<512x32xf32>
    %146 = arith.truncf %145 : vector<512x32xf32> to vector<512x32xbf16>
    %c3_78 = arith.constant 3 : index
    %c0_79 = arith.constant 0 : index
    %c0_80 = arith.constant 0 : index
    %147 = vector.load %arg3[%c3_78, %c0_79, %c0_80] : memref<4x32x32xbf16, #tpu.memory_space<vmem>>, vector<1x32x32xbf16>
    %148 = vector.shape_cast %147 : vector<1x32x32xbf16> to vector<32x32xbf16>
    %cst_81 = arith.constant dense<0.000000e+00> : vector<512x32xf32>
    %149 = tpu.matmul %146, %148, %cst_81 {dimension_numbers = #tpu.dot_dimension_numbers<[1], [0], [0], [1], [0, 0, 1, 1], [], []>} : vector<512x32xbf16>, vector<32x32xbf16>, vector<512x32xf32> -> vector<512x32xf32>
    %150 = arith.addf %144, %149 : vector<512x32xf32>
    %151 = vector.broadcast %29 : vector<512x1xf32> to vector<512x32xf32>
    %152 = arith.mulf %150, %151 : vector<512x32xf32>
    %cst_82 = arith.constant dense<0.000000e+00> : vector<32xf32>
    %153 = vector.multi_reduction <add>, %152, %cst_82 [0] : vector<512x32xf32> to vector<32xf32>
    %154 = vector.shape_cast %153 : vector<32xf32> to vector<1x32xf32>
    %cst_83 = arith.constant 2.958580e-03 : f32
    %155 = vector.broadcast %cst_83 : f32 to vector<1x32xf32>
    %156 = arith.mulf %154, %155 : vector<1x32xf32>
    %157 = arith.mulf %152, %152 : vector<512x32xf32>
    %cst_84 = arith.constant dense<0.000000e+00> : vector<32xf32>
    %158 = vector.multi_reduction <add>, %157, %cst_84 [0] : vector<512x32xf32> to vector<32xf32>
    %159 = vector.shape_cast %158 : vector<32xf32> to vector<1x32xf32>
    %cst_85 = arith.constant 2.958580e-03 : f32
    %160 = vector.broadcast %cst_85 : f32 to vector<1x32xf32>
    %161 = arith.mulf %159, %160 : vector<1x32xf32>
    %162 = arith.mulf %156, %156 : vector<1x32xf32>
    %163 = arith.subf %161, %162 : vector<1x32xf32>
    %cst_86 = arith.constant 0.000000e+00 : f32
    %164 = vector.broadcast %cst_86 : f32 to vector<1x32xf32>
    %165 = arith.maximumf %163, %164 : vector<1x32xf32>
    %166 = vector.broadcast %156 : vector<1x32xf32> to vector<512x32xf32>
    %167 = arith.subf %150, %166 : vector<512x32xf32>
    %cst_87 = arith.constant 9.99999974E-6 : f32
    %168 = vector.broadcast %cst_87 : f32 to vector<1x32xf32>
    %169 = arith.addf %165, %168 : vector<1x32xf32>
    %170 = math.rsqrt %169 : vector<1x32xf32>
    %171 = vector.broadcast %170 : vector<1x32xf32> to vector<512x32xf32>
    %172 = arith.mulf %167, %171 : vector<512x32xf32>
    %173 = vector.broadcast %34 : vector<1x32xf32> to vector<512x32xf32>
    %174 = arith.mulf %172, %173 : vector<512x32xf32>
    %175 = vector.broadcast %35 : vector<1x32xf32> to vector<512x32xf32>
    %176 = arith.addf %174, %175 : vector<512x32xf32>
    %cst_88 = arith.constant 0.000000e+00 : f32
    %177 = vector.broadcast %cst_88 : f32 to vector<512x32xf32>
    %178 = arith.maximumf %176, %177 : vector<512x32xf32>
    %179 = vector.broadcast %29 : vector<512x1xf32> to vector<512x32xf32>
    %180 = arith.mulf %178, %179 : vector<512x32xf32>
    %181 = arith.truncf %180 : vector<512x32xf32> to vector<512x32xbf16>
    %c0_89 = arith.constant 0 : index
    %c0_90 = arith.constant 0 : index
    %182 = vector.load %arg5[%c0_89, %c0_90] : memref<512x32xbf16, #tpu.memory_space<vmem>>, vector<512x32xbf16>
    tpu.vector_store %arg5[%c0_89, %c0_90], %181 {strides = array<i32>} : memref<512x32xbf16, #tpu.memory_space<vmem>>, vector<512x32xbf16>,
    return
  }
}

module attributes {stable_mosaic.version = 11 : i64} {
  func.func @head_kernel(%arg0: memref<2x5504xbf16, #tpu.memory_space<vmem>>, %arg1: memref<5504x128xbf16, #tpu.memory_space<vmem>>, %arg2: memref<1x128xf32, #tpu.memory_space<vmem>>, %arg3: memref<2x128xf32, #tpu.memory_space<vmem>>) attributes {dimension_semantics = [], scalar_prefetch = 0 : i64, scratch_operands = 0 : i64, tpu.core_type = #tpu.core_type<tc>} {
    %c0 = arith.constant 0 : index
    %c0_0 = arith.constant 0 : index
    %0 = vector.load %arg0[%c0, %c0_0] : memref<2x5504xbf16, #tpu.memory_space<vmem>>, vector<2x5504xbf16>
    %c0_1 = arith.constant 0 : index
    %c0_2 = arith.constant 0 : index
    %1 = vector.load %arg1[%c0_1, %c0_2] : memref<5504x128xbf16, #tpu.memory_space<vmem>>, vector<5504x128xbf16>
    %cst = arith.constant dense<0.000000e+00> : vector<2x128xf32>
    %2 = tpu.matmul %0, %1, %cst {dimension_numbers = #tpu.dot_dimension_numbers<[1], [0], [0], [1], [0, 0, 1, 1], [], []>} : vector<2x5504xbf16>, vector<5504x128xbf16>, vector<2x128xf32> -> vector<2x128xf32>
    %c0_3 = arith.constant 0 : index
    %c0_4 = arith.constant 0 : index
    %3 = vector.load %arg2[%c0_3, %c0_4] : memref<1x128xf32, #tpu.memory_space<vmem>>, vector<1x128xf32>
    %4 = vector.broadcast %3 : vector<1x128xf32> to vector<2x128xf32>
    %5 = arith.addf %2, %4 : vector<2x128xf32>
    %c0_5 = arith.constant 0 : index
    %c0_6 = arith.constant 0 : index
    %6 = vector.load %arg3[%c0_5, %c0_6] : memref<2x128xf32, #tpu.memory_space<vmem>>, vector<2x128xf32>
    tpu.vector_store %arg3[%c0_5, %c0_6], %5 {strides = array<i32>} : memref<2x128xf32, #tpu.memory_space<vmem>>, vector<2x128xf32>,
    return
  }
}

</mosaic_0001>

<bundles_post_ra>
// kernel: dqn_forward.3
= control target key start
LH: loop header
LB: loop body
LE: loop exit
PB: predicated region body
PF: predicated region fallthrough
CT: control target
= control target key end

     0   :  { %8 = vsyncpa [#allocation3], 0  ;;  %s5339_s0 = inlined_call_operand.vmem [shape: bf16[2,5504], index: 0, kind: input, shape index: {}]   ;;  %s5340_s1 = inlined_call_operand.hbm [shape: bf16[5504,128], index: 1, kind: input, shape index: {}]   ;;  %s5341_s2 = inlined_call_operand.hbm [shape: f32[1,128], index: 2, kind: input, shape index: {}]   ;;  %s5342_s3 = inlined_call_operand.hbm [shape: f32[2,128], index: 3, kind: output, shape index: {}]  }
   0x1   :  { %9 = vsyncpa [#allocation6], 0 }
   0x2   :  { %10 = vsyncpa [#allocation4], 0  ;;  %s17_s14 = sshll.u32 %s5340_s1, 4  ;;  %s5287_s15 = smov [#allocation2]   ;;  %s18_s14 = int_to_ptr.hbm [resolvable:$true] %s17_s14 }
   0x3   :  { %s19_s16 = sshll.u32 %s5287_s15, 4  ;;  %s31_s19 = sshll.u32 %s5341_s2, 4  ;;  %s20_s16 = int_to_ptr.vmem [resolvable:$true] %s19_s16  ;;  %s32_s19 = int_to_ptr.hbm [resolvable:$true] %s31_s19 }
   0x4   :  { %s5288_s20 = smov 64   ;;  %s5289_s21 = smov 4  }
   0x5   :  { %25 = dma.hbm_to_vmem [thread:$0]  %s18_s14, 44032, %s20_s16, [#allocation3], %s5288_s20, %s5288_s20, %s5289_s21  }
   0x6   :  { %s5290_s22 = smov [#allocation5]  }
   0x7   :  { %s33_s23 = sshll.u32 %s5290_s22, 4  ;;  %s34_s23 = int_to_ptr.vmem [resolvable:$true] %s33_s23 }
   0x8   :  { %36 = dma.hbm_to_vmem [thread:$0]  %s32_s19, 16, %s34_s23, [#allocation6]  }
   0x9   :  { %5281 = dma.done.wait [#allocation3], 44032  }
   0xa   :  { %5282 = vsyncadd [#allocation3], 4294923264 }
   0xb   :  { %5283 = dma.done.wait [#allocation6], 16  }
   0xc   :  { %5284 = vsyncadd [#allocation6], 4294967280  ;;  %v4866_v0 = vld [vmem:[#allocation2 + $0x38] sm:$0xff]  ;;  %v4865_v4 = vld [vmem:[#allocation2 + $0x30] sm:$0xff]  ;;  %s3472_s10 = sshll.u32 %s5342_s3, 4  ;;  %s3473_s10 = int_to_ptr.hbm [resolvable:$true] %s3472_s10 }
   0xd   :  { %v4874_v1 = vld [vmem:[#allocation2 + $0x78] sm:$0xff]  ;;  %2905 = vmatpush.bf16.msra.mxu0 %v4866_v0  ;;  %v4873_v5 = vld [vmem:[#allocation2 + $0x70] sm:$0xff]  ;;  %v4864_v8 = vld [vmem:[#allocation2 + $0x28] sm:$0xff] }
   0xe   :  { %v4882_v2 = vld [vmem:[#allocation2 + $0xb8] sm:$0xff]  ;;  %2918 = vmatpush.bf16.msra.mxu1 %v4874_v1  ;;  %v4881_v6 = vld [vmem:[#allocation2 + $0xb0] sm:$0xff]  ;;  %v4872_v9 = vld [vmem:[#allocation2 + $0x68] sm:$0xff] }
   0xf   :  { %v4890_v3 = vld [vmem:[#allocation2 + $0xf8] sm:$0xff]  ;;  %2931 = vmatpush.bf16.msra.mxu2 %v4882_v2  ;;  %v4889_v7 = vld [vmem:[#allocation2 + $0xf0] sm:$0xff]  ;;  %v4880_v10 = vld [vmem:[#allocation2 + $0xa8] sm:$0xff] }
  0x10   :  { %2944 = vmatpush.bf16.msra.mxu3 %v4890_v3  ;;  %v4888_v11 = vld [vmem:[#allocation2 + $0xe8] sm:$0xff]  ;;  %v4863_v12 = vld [vmem:[#allocation2 + $0x20] sm:$0xff]  ;;  %v4862_v16 = vld [vmem:[#allocation2 + $0x18] sm:$0xff] }
  0x11   :  { %2906 = vmatpush.bf16.msra.mxu0 %v4865_v4  ;;  %v4871_v13 = vld [vmem:[#allocation2 + $0x60] sm:$0xff]  ;;  %v4870_v17 = vld [vmem:[#allocation2 + $0x58] sm:$0xff]  ;;  %v4861_v21 = vld [vmem:[#allocation2 + $0x10] sm:$0xff] }
  0x12   :  { %2919 = vmatpush.bf16.msra.mxu1 %v4873_v5  ;;  %v4879_v14 = vld [vmem:[#allocation2 + $0xa0] sm:$0xff]  ;;  %v4878_v18 = vld [vmem:[#allocation2 + $0x98] sm:$0xff]  ;;  %v4869_v22 = vld [vmem:[#allocation2 + $0x50] sm:$0xff] }
  0x13   :  { %2932 = vmatpush.bf16.msra.mxu2 %v4881_v6  ;;  %v4887_v15 = vld [vmem:[#allocation2 + $0xe0] sm:$0xff]  ;;  %v4886_v19 = vld [vmem:[#allocation2 + $0xd8] sm:$0xff]  ;;  %v4877_v23 = vld [vmem:[#allocation2 + $0x90] sm:$0xff] }
  0x14   :  { %2945 = vmatpush.bf16.msra.mxu3 %v4889_v7  ;;  %v45_v20 = vld [vmem:[%s5339_s0] sm:$0xff]  ;;  %v4885_v24 = vld [vmem:[#allocation2 + $0xd0] sm:$0xff]  ;;  %v4860_v25 = vld [vmem:[#allocation2 + $0x8] sm:$0xff] }
  0x15   :  { %2907 = vmatpush.bf16.msra.mxu0 %v4864_v8  ;;  %744 = vst [vmem:[#allocation1] ss:$9 sm:$0xff] %v45_v20  ;;  %v4868_v26 = vld [vmem:[#allocation2 + $0x48] sm:$0xff]  ;;  %v4859_v29 = vld [vmem:[#allocation2] sm:$0xff]  ;;  %v4898_v32 = vld [vmem:[#allocation2 + $0x138] sm:$0xff] }
  0x16   :  { %2920 = vmatpush.bf16.msra.mxu1 %v4872_v9  ;;  %v4876_v27 = vld [vmem:[#allocation2 + $0x88] sm:$0xff]  ;;  %v4867_v30 = vld [vmem:[#allocation2 + $0x40] sm:$0xff]  ;;  %v4906_v33 = vld [vmem:[#allocation2 + $0x178] sm:$0xff] }
  0x17   :  { %2933 = vmatpush.bf16.msra.mxu2 %v4880_v10  ;;  %v4884_v28 = vld [vmem:[#allocation2 + $0xc8] sm:$0xff]  ;;  %v4875_v31 = vld [vmem:[#allocation2 + $0x80] sm:$0xff]  ;;  %v4914_v34 = vld [vmem:[#allocation2 + $0x1b8] sm:$0xff] }
  0x18   :  { %2946 = vmatpush.bf16.msra.mxu3 %v4888_v11  ;;  %v4883_v35 = vld [vmem:[#allocation2 + $0xc0] sm:$0xff]  ;;  %v4922_v36 = vld [vmem:[#allocation2 + $0x1f8] sm:$0xff]  ;;  %v4897_v38 = vld [vmem:[#allocation2 + $0x130] sm:$0xff] }
  0x19   :  { %2908 = vmatpush.bf16.msra.mxu0 %v4863_v12  ;;  %v4905_v40 = vld [vmem:[#allocation2 + $0x170] sm:$0xff]  ;;  %v4896_v45 = vld [vmem:[#allocation2 + $0x128] sm:$0xff]  ;;  %v4895_v49 = vld [vmem:[#allocation2 + $0x120] sm:$0xff] }
  0x1a   :  { %2921 = vmatpush.bf16.msra.mxu1 %v4871_v13  ;;  %v4913_v41 = vld [vmem:[#allocation2 + $0x1b0] sm:$0xff]  ;;  %v4904_v46 = vld [vmem:[#allocation2 + $0x168] sm:$0xff]  ;;  %v4903_v50 = vld [vmem:[#allocation2 + $0x160] sm:$0xff] }
  0x1b   :  { %2934 = vmatpush.bf16.msra.mxu2 %v4879_v14  ;;  %v4921_v43 = vld [vmem:[#allocation2 + $0x1f0] sm:$0xff]  ;;  %v4912_v47 = vld [vmem:[#allocation2 + $0x1a8] sm:$0xff]  ;;  %v4911_v51 = vld [vmem:[#allocation2 + $0x1a0] sm:$0xff] }
  0x1c   :  { %2947 = vmatpush.bf16.msra.mxu3 %v4887_v15  ;;  %v745_v37 = vld [vmem:[#allocation1] sm:$0xff]  ;;  %v747_v39 = vld [vmem:[#allocation1 + $0x12] sm:$0xff]  ;;  %v746_v42 = vld [vmem:[#allocation1 + $0x9] sm:$0xff] }
  0x1d   :  { %2909 = vmatpush.bf16.msra.mxu0 %v4862_v16  ;;  %v748_v44 = vld [vmem:[#allocation1 + $0x1b] sm:$0xff]  ;;  %v4920_v48 = vld [vmem:[#allocation2 + $0x1e8] sm:$0xff]  ;;  %v4919_v52 = vld [vmem:[#allocation2 + $0x1e0] sm:$0xff] }
  0x1e   :  { %2922 = vmatpush.bf16.msra.mxu1 %v4870_v17  ;;  %v4894_v53 = vld [vmem:[#allocation2 + $0x118] sm:$0xff]  ;;  %v4893_v57 = vld [vmem:[#allocation2 + $0x110] sm:$0xff]  ;;  %v4892_v61 = vld [vmem:[#allocation2 + $0x108] sm:$0xff] }
  0x1f   :  { %2935 = vmatpush.bf16.msra.mxu2 %v4878_v18  ;;  %v4902_v54 = vld [vmem:[#allocation2 + $0x158] sm:$0xff]  ;;  %v4901_v58 = vld [vmem:[#allocation2 + $0x150] sm:$0xff]  ;;  %v4900_v62 = vld [vmem:[#allocation2 + $0x148] sm:$0xff] }
  0x20   :  { %2948 = vmatpush.bf16.msra.mxu3 %v4886_v19  ;;  %v4910_v55 = vld [vmem:[#allocation2 + $0x198] sm:$0xff]  ;;  %v4909_v59 = vld [vmem:[#allocation2 + $0x190] sm:$0xff]  ;;  %v4908_v63 = vld [vmem:[#allocation2 + $0x188] sm:$0xff] }
  0x21   :  { %2910 = vmatpush.bf16.msra.mxu0 %v4861_v21  ;;  %v4918_v56 = vld [vmem:[#allocation2 + $0x1d8] sm:$0xff]  ;;  %v4917_v60 = vld [vmem:[#allocation2 + $0x1d0] sm:$0xff]  ;;  %v750_v3 = vld [vmem:[#allocation1 + $0x2d] sm:$0xff] }
  0x22   :  { %2923 = vmatpush.bf16.msra.mxu1 %v4869_v22  ;;  %v751_v0 = vld [vmem:[#allocation1 + $0x36] sm:$0xff]  ;;  %v749_v1 = vld [vmem:[#allocation1 + $0x24] sm:$0xff] }
  0x23   :  { %2936 = vmatpush.bf16.msra.mxu2 %v4877_v23  ;;  %v752_v2 = vld [vmem:[#allocation1 + $0x3f] sm:$0xff]  ;;  %v46_v4 = vld [vmem:[%s5339_s0 + $0x8] sm:$0xff]  ;;  %v4916_v5 = vld [vmem:[#allocation2 + $0x1c8] sm:$0xff] }
  0x24   :  { %2949 = vmatpush.bf16.msra.mxu3 %v4885_v24  ;;  %754 = vst [vmem:[#allocation1] ss:$9 sm:$0xff] %v46_v4  ;;  %v4891_v6 = vld [vmem:[#allocation2 + $0x100] sm:$0xff]  ;;  %v4930_v9 = vld [vmem:[#allocation2 + $0x238] sm:$0xff]  ;;  %v4929_v14 = vld [vmem:[#allocation2 + $0x230] sm:$0xff] }
  0x25   :  { %2911 = vmatpush.bf16.msra.mxu0 %v4860_v25  ;;  %v4899_v7 = vld [vmem:[#allocation2 + $0x140] sm:$0xff]  ;;  %v4938_v10 = vld [vmem:[#allocation2 + $0x278] sm:$0xff]  ;;  %v4937_v15 = vld [vmem:[#allocation2 + $0x270] sm:$0xff] }
  0x26   :  { %2924 = vmatpush.bf16.msra.mxu1 %v4868_v26  ;;  %v4907_v8 = vld [vmem:[#allocation2 + $0x180] sm:$0xff]  ;;  %v4946_v11 = vld [vmem:[#allocation2 + $0x2b8] sm:$0xff]  ;;  %v4945_v16 = vld [vmem:[#allocation2 + $0x2b0] sm:$0xff] }
  0x27   :  { %2937 = vmatpush.bf16.msra.mxu2 %v4876_v27  ;;  %v4915_v12 = vld [vmem:[#allocation2 + $0x1c0] sm:$0xff]  ;;  %v4954_v13 = vld [vmem:[#allocation2 + $0x2f8] sm:$0xff]  ;;  %v4953_v17 = vld [vmem:[#allocation2 + $0x2f0] sm:$0xff] }
  0x28   :  { %2950 = vmatpush.bf16.msra.mxu3 %v4884_v28  ;;  %v4928_v18 = vld [vmem:[#allocation2 + $0x228] sm:$0xff]  ;;  %v4927_v22 = vld [vmem:[#allocation2 + $0x220] sm:$0xff]  ;;  %v4926_v26 = vld [vmem:[#allocation2 + $0x218] sm:$0xff] }
  0x29   :  { %2912 = vmatpush.bf16.msra.mxu0 %v4859_v29  ;;  %v4936_v19 = vld [vmem:[#allocation2 + $0x268] sm:$0xff]  ;;  %v4935_v23 = vld [vmem:[#allocation2 + $0x260] sm:$0xff]  ;;  %v4934_v27 = vld [vmem:[#allocation2 + $0x258] sm:$0xff] }
  0x2a   :  { %2925 = vmatpush.bf16.msra.mxu1 %v4867_v30  ;;  %v4944_v20 = vld [vmem:[#allocation2 + $0x2a8] sm:$0xff]  ;;  %v4943_v24 = vld [vmem:[#allocation2 + $0x2a0] sm:$0xff]  ;;  %v4942_v28 = vld [vmem:[#allocation2 + $0x298] sm:$0xff] }
  0x2b   :  { %2938 = vmatpush.bf16.msra.mxu2 %v4875_v31  ;;  %v4952_v21 = vld [vmem:[#allocation2 + $0x2e8] sm:$0xff]  ;;  %v4951_v25 = vld [vmem:[#allocation2 + $0x2e0] sm:$0xff]  ;;  %v4950_v29 = vld [vmem:[#allocation2 + $0x2d8] sm:$0xff] }
  0x2c   :  { %2951 = vmatpush.bf16.msra.mxu3 %v4883_v35  ;;  %2913 = vmatmul.bf16.vlgmr.msra.gmra.mxu0 %v745_v37  ;;  %v4925_v30 = vld [vmem:[#allocation2 + $0x210] sm:$0xff]  ;;  %v4932_v35 = vld [vmem:[#allocation2 + $0x248] sm:$0xff] }
  0x2d   :  { %2957 = vmatpush.bf16.msrb.mxu0 %v4898_v32  ;;  %2926 = vmatmul.bf16.vlgmr.msra.gmra.mxu1 %v746_v42  ;;  %v4933_v31 = vld [vmem:[#allocation2 + $0x250] sm:$0xff]  ;;  %v4948_v37 = vld [vmem:[#allocation2 + $0x2c8] sm:$0xff]  ;;  %v4970_v42 = vld [vmem:[#allocation2 + $0x378] sm:$0xff] }
  0x2e   :  { %2970 = vmatpush.bf16.msrb.mxu1 %v4906_v33  ;;  %2939 = vmatmul.bf16.vlgmr.msra.gmra.mxu2 %v747_v39  ;;  %v4941_v32 = vld [vmem:[#allocation2 + $0x290] sm:$0xff]  ;;  %v4931_v39 = vld [vmem:[#allocation2 + $0x240] sm:$0xff] }
  0x2f   :  { %2983 = vmatpush.bf16.msrb.mxu2 %v4914_v34  ;;  %2952 = vmatmul.bf16.vlgmr.msra.gmra.mxu3 %v748_v44  ;;  %v4949_v33 = vld [vmem:[#allocation2 + $0x2d0] sm:$0xff]  ;;  %v4924_v34 = vld [vmem:[#allocation2 + $0x208] sm:$0xff]  ;;  %v4947_v44 = vld [vmem:[#allocation2 + $0x2c0] sm:$0xff] }
  0x30   :  { %2996 = vmatpush.bf16.msrb.mxu3 %v4922_v36  ;;  %v4940_v36 = vld [vmem:[#allocation2 + $0x288] sm:$0xff]  ;;  %v4973_v4 = vld [vmem:[#allocation2 + $0x390] sm:$0xff] }
  0x31   :  { %2958 = vmatpush.bf16.msrb.mxu0 %v4897_v38  ;;  %v4923_v38 = vld [vmem:[#allocation2 + $0x200] sm:$0xff] }
  0x32   :  { %2971 = vmatpush.bf16.msrb.mxu1 %v4905_v40  ;;  %v4939_v40 = vld [vmem:[#allocation2 + $0x280] sm:$0xff] }
  0x33   :  { %2984 = vmatpush.bf16.msrb.mxu2 %v4913_v41  ;;  %v4962_v41 = vld [vmem:[#allocation2 + $0x338] sm:$0xff] }
  0x34   :  { %2997 = vmatpush.bf16.msrb.mxu3 %v4921_v43  ;;  %v4978_v43 = vld [vmem:[#allocation2 + $0x3b8] sm:$0xff] }
  0x35   :  { %2959 = vmatpush.bf16.msrb.mxu0 %v4896_v45  ;;  %v755_v45 = vld [vmem:[#allocation1] sm:$0xff] }
  0x36   :  { %2972 = vmatpush.bf16.msrb.mxu1 %v4904_v46  ;;  %v4986_v46 = vld [vmem:[#allocation2 + $0x3f8] sm:$0xff] }
  0x37   :  { %2985 = vmatpush.bf16.msrb.mxu2 %v4912_v47  ;;  %v757_v47 = vld [vmem:[#allocation1 + $0x12] sm:$0xff] }
  0x38   :  { %2998 = vmatpush.bf16.msrb.mxu3 %v4920_v48  ;;  %v4961_v48 = vld [vmem:[#allocation2 + $0x330] sm:$0xff] }
  0x39   :  { %2960 = vmatpush.bf16.msrb.mxu0 %v4895_v49  ;;  %v756_v49 = vld [vmem:[#allocation1 + $0x9] sm:$0xff] }
  0x3a   :  { %2973 = vmatpush.bf16.msrb.mxu1 %v4903_v50  ;;  %v4969_v50 = vld [vmem:[#allocation2 + $0x370] sm:$0xff] }
  0x3b   :  { %2986 = vmatpush.bf16.msrb.mxu2 %v4911_v51  ;;  %v758_v51 = vld [vmem:[#allocation1 + $0x1b] sm:$0xff] }
  0x3c   :  { %2999 = vmatpush.bf16.msrb.mxu3 %v4919_v52  ;;  %v4977_v52 = vld [vmem:[#allocation2 + $0x3b0] sm:$0xff] }
  0x3d   :  { %2961 = vmatpush.bf16.msrb.mxu0 %v4894_v53  ;;  %v4985_v53 = vld [vmem:[#allocation2 + $0x3f0] sm:$0xff] }
  0x3e   :  { %2974 = vmatpush.bf16.msrb.mxu1 %v4902_v54  ;;  %v4960_v54 = vld [vmem:[#allocation2 + $0x328] sm:$0xff] }
  0x3f   :  { %2987 = vmatpush.bf16.msrb.mxu2 %v4910_v55  ;;  %v4968_v55 = vld [vmem:[#allocation2 + $0x368] sm:$0xff] }
  0x40   :  { %3000 = vmatpush.bf16.msrb.mxu3 %v4918_v56  ;;  %v4976_v56 = vld [vmem:[#allocation2 + $0x3a8] sm:$0xff] }
  0x41   :  { %2962 = vmatpush.bf16.msrb.mxu0 %v4893_v57  ;;  %v4984_v57 = vld [vmem:[#allocation2 + $0x3e8] sm:$0xff] }
  0x42   :  { %2975 = vmatpush.bf16.msrb.mxu1 %v4901_v58  ;;  %v4959_v58 = vld [vmem:[#allocation2 + $0x320] sm:$0xff] }
  0x43   :  { %2988 = vmatpush.bf16.msrb.mxu2 %v4909_v59  ;;  %v4967_v59 = vld [vmem:[#allocation2 + $0x360] sm:$0xff] }
  0x44   :  { %3001 = vmatpush.bf16.msrb.mxu3 %v4917_v60  ;;  %v4975_v60 = vld [vmem:[#allocation2 + $0x3a0] sm:$0xff] }
  0x45   :  { %2963 = vmatpush.bf16.msrb.mxu0 %v4892_v61  ;;  %v4983_v61 = vld [vmem:[#allocation2 + $0x3e0] sm:$0xff] }
  0x46   :  { %2976 = vmatpush.bf16.msrb.mxu1 %v4900_v62  ;;  %v4958_v62 = vld [vmem:[#allocation2 + $0x318] sm:$0xff] }
  0x47   :  { %2989 = vmatpush.bf16.msrb.mxu2 %v4908_v63  ;;  %v4966_v63 = vld [vmem:[#allocation2 + $0x358] sm:$0xff] }
  0x48   :  { %3002 = vmatpush.bf16.msrb.mxu3 %v4916_v5  ;;  %v4981_v5 = vld [vmem:[#allocation2 + $0x3d0] sm:$0xff] }
  0x49   :  { %2964 = vmatpush.bf16.msrb.mxu0 %v4891_v6  ;;  %v4956_v6 = vld [vmem:[#allocation2 + $0x308] sm:$0xff] }
  0x4a   :  { %2977 = vmatpush.bf16.msrb.mxu1 %v4899_v7  ;;  %v4964_v7 = vld [vmem:[#allocation2 + $0x348] sm:$0xff] }
  0x4b   :  { %2990 = vmatpush.bf16.msrb.mxu2 %v4907_v8  ;;  %v4972_v8 = vld [vmem:[#allocation2 + $0x388] sm:$0xff] }
  0x4c   :  { %3003 = vmatpush.bf16.msrb.mxu3 %v4915_v12  ;;  %2965 = vmatmul.bf16.vlgmr.msrb.gmra.mxu0 %v749_v1  ;;  %v4982_v1 = vld [vmem:[#allocation2 + $0x3d8] sm:$0xff] }
  0x4d   :  { %3009 = vmatpush.bf16.msra.mxu0 %v4930_v9  ;;  %2978 = vmatmul.bf16.vlgmr.msrb.gmra.mxu1 %v750_v3  ;;  %v4965_v3 = vld [vmem:[#allocation2 + $0x350] sm:$0xff]  ;;  %v759_v9 = vld [vmem:[#allocation1 + $0x24] sm:$0xff] }
  0x4e   :  { %3022 = vmatpush.bf16.msra.mxu1 %v4938_v10  ;;  %2991 = vmatmul.bf16.vlgmr.msrb.gmra.mxu2 %v751_v0  ;;  %v4974_v0 = vld [vmem:[#allocation2 + $0x398] sm:$0xff]  ;;  %v761_v10 = vld [vmem:[#allocation1 + $0x36] sm:$0xff] }
  0x4f   :  { %3035 = vmatpush.bf16.msra.mxu2 %v4946_v11  ;;  %3004 = vmatmul.bf16.vlgmr.msrb.gmra.mxu3 %v752_v2  ;;  %v4957_v2 = vld [vmem:[#allocation2 + $0x310] sm:$0xff]  ;;  %v760_v11 = vld [vmem:[#allocation1 + $0x2d] sm:$0xff] }
  0x50   :  { %3048 = vmatpush.bf16.msra.mxu3 %v4954_v13  ;;  %v762_v12 = vld [vmem:[#allocation1 + $0x3f] sm:$0xff]  ;;  %v47_v13 = vld [vmem:[%s5339_s0 + $0x10] sm:$0xff] }
  0x51   :  { %3010 = vmatpush.bf16.msra.mxu0 %v4929_v14  ;;  %v4980_v14 = vld [vmem:[#allocation2 + $0x3c8] sm:$0xff]  ;;  %764 = vst [vmem:[#allocation1] ss:$9 sm:$0xff] %v47_v13  ;;  %v5030_v13 = vld [vmem:[#allocation2 + $0x558] sm:$0xff] }
  0x52   :  { %3023 = vmatpush.bf16.msra.mxu1 %v4937_v15  ;;  %v4955_v15 = vld [vmem:[#allocation2 + $0x300] sm:$0xff] }
  0x53   :  { %3036 = vmatpush.bf16.msra.mxu2 %v4945_v16  ;;  %v4963_v16 = vld [vmem:[#allocation2 + $0x340] sm:$0xff] }
  0x54   :  { %3049 = vmatpush.bf16.msra.mxu3 %v4953_v17  ;;  %v4994_v17 = vld [vmem:[#allocation2 + $0x438] sm:$0xff] }
  0x55   :  { %3011 = vmatpush.bf16.msra.mxu0 %v4928_v18  ;;  %v4971_v18 = vld [vmem:[#allocation2 + $0x380] sm:$0xff] }
  0x56   :  { %3024 = vmatpush.bf16.msra.mxu1 %v4936_v19  ;;  %v5002_v19 = vld [vmem:[#allocation2 + $0x478] sm:$0xff] }
  0x57   :  { %3037 = vmatpush.bf16.msra.mxu2 %v4944_v20  ;;  %v5010_v20 = vld [vmem:[#allocation2 + $0x4b8] sm:$0xff] }
  0x58   :  { %3050 = vmatpush.bf16.msra.mxu3 %v4952_v21  ;;  %v4979_v21 = vld [vmem:[#allocation2 + $0x3c0] sm:$0xff] }
  0x59   :  { %3012 = vmatpush.bf16.msra.mxu0 %v4927_v22  ;;  %v5018_v22 = vld [vmem:[#allocation2 + $0x4f8] sm:$0xff] }
  0x5a   :  { %3025 = vmatpush.bf16.msra.mxu1 %v4935_v23  ;;  %v4993_v23 = vld [vmem:[#allocation2 + $0x430] sm:$0xff] }
  0x5b   :  { %3038 = vmatpush.bf16.msra.mxu2 %v4943_v24  ;;  %v5001_v24 = vld [vmem:[#allocation2 + $0x470] sm:$0xff] }
  0x5c   :  { %3051 = vmatpush.bf16.msra.mxu3 %v4951_v25  ;;  %v5009_v25 = vld [vmem:[#allocation2 + $0x4b0] sm:$0xff] }
  0x5d   :  { %3013 = vmatpush.bf16.msra.mxu0 %v4926_v26  ;;  %v5017_v26 = vld [vmem:[#allocation2 + $0x4f0] sm:$0xff] }
  0x5e   :  { %3026 = vmatpush.bf16.msra.mxu1 %v4934_v27  ;;  %v4992_v27 = vld [vmem:[#allocation2 + $0x428] sm:$0xff] }
  0x5f   :  { %3039 = vmatpush.bf16.msra.mxu2 %v4942_v28  ;;  %v5000_v28 = vld [vmem:[#allocation2 + $0x468] sm:$0xff] }
  0x60   :  { %3052 = vmatpush.bf16.msra.mxu3 %v4950_v29  ;;  %v5008_v29 = vld [vmem:[#allocation2 + $0x4a8] sm:$0xff] }
  0x61   :  { %3014 = vmatpush.bf16.msra.mxu0 %v4925_v30  ;;  %v5016_v30 = vld [vmem:[#allocation2 + $0x4e8] sm:$0xff] }
  0x62   :  { %3027 = vmatpush.bf16.msra.mxu1 %v4933_v31  ;;  %v4991_v31 = vld [vmem:[#allocation2 + $0x420] sm:$0xff] }
  0x63   :  { %3040 = vmatpush.bf16.msra.mxu2 %v4941_v32  ;;  %v4999_v32 = vld [vmem:[#allocation2 + $0x460] sm:$0xff] }
  0x64   :  { %3053 = vmatpush.bf16.msra.mxu3 %v4949_v33  ;;  %v5007_v33 = vld [vmem:[#allocation2 + $0x4a0] sm:$0xff] }
  0x65   :  { %3015 = vmatpush.bf16.msra.mxu0 %v4924_v34  ;;  %v5015_v34 = vld [vmem:[#allocation2 + $0x4e0] sm:$0xff] }
  0x66   :  { %3028 = vmatpush.bf16.msra.mxu1 %v4932_v35  ;;  %v4990_v35 = vld [vmem:[#allocation2 + $0x418] sm:$0xff] }
  0x67   :  { %3041 = vmatpush.bf16.msra.mxu2 %v4940_v36  ;;  %v4998_v36 = vld [vmem:[#allocation2 + $0x458] sm:$0xff] }
  0x68   :  { %3054 = vmatpush.bf16.msra.mxu3 %v4948_v37  ;;  %v5006_v37 = vld [vmem:[#allocation2 + $0x498] sm:$0xff] }
  0x69   :  { %3016 = vmatpush.bf16.msra.mxu0 %v4923_v38  ;;  %v5014_v38 = vld [vmem:[#allocation2 + $0x4d8] sm:$0xff] }
  0x6a   :  { %3029 = vmatpush.bf16.msra.mxu1 %v4931_v39  ;;  %v4989_v39 = vld [vmem:[#allocation2 + $0x410] sm:$0xff] }
  0x6b   :  { %3042 = vmatpush.bf16.msra.mxu2 %v4939_v40  ;;  %v4997_v40 = vld [vmem:[#allocation2 + $0x450] sm:$0xff] }
  0x6c   :  { %3055 = vmatpush.bf16.msra.mxu3 %v4947_v44  ;;  %3017 = vmatmul.bf16.vlgmr.msra.gmra.mxu0 %v755_v45  ;;  %v4996_v44 = vld [vmem:[#allocation2 + $0x448] sm:$0xff] }
  0x6d   :  { %3061 = vmatpush.bf16.msrb.mxu0 %v4962_v41  ;;  %3030 = vmatmul.bf16.vlgmr.msra.gmra.mxu1 %v756_v49  ;;  %v5005_v41 = vld [vmem:[#allocation2 + $0x490] sm:$0xff]  ;;  %v5004_v45 = vld [vmem:[#allocation2 + $0x488] sm:$0xff]  ;;  %v5003_v49 = vld [vmem:[#allocation2 + $0x480] sm:$0xff] }
  0x6e   :  { %3074 = vmatpush.bf16.msrb.mxu1 %v4970_v42  ;;  %3043 = vmatmul.bf16.vlgmr.msra.gmra.mxu2 %v757_v47  ;;  %v5013_v42 = vld [vmem:[#allocation2 + $0x4d0] sm:$0xff]  ;;  %v4987_v47 = vld [vmem:[#allocation2 + $0x400] sm:$0xff] }
  0x6f   :  { %3087 = vmatpush.bf16.msrb.mxu2 %v4978_v43  ;;  %3056 = vmatmul.bf16.vlgmr.msra.gmra.mxu3 %v758_v51  ;;  %v4988_v43 = vld [vmem:[#allocation2 + $0x408] sm:$0xff]  ;;  %v5034_v51 = vld [vmem:[#allocation2 + $0x578] sm:$0xff] }
  0x70   :  { %3100 = vmatpush.bf16.msrb.mxu3 %v4986_v46  ;;  %v5012_v46 = vld [vmem:[#allocation2 + $0x4c8] sm:$0xff] }
  0x71   :  { %3062 = vmatpush.bf16.msrb.mxu0 %v4961_v48  ;;  %v4995_v48 = vld [vmem:[#allocation2 + $0x440] sm:$0xff] }
  0x72   :  { %3075 = vmatpush.bf16.msrb.mxu1 %v4969_v50  ;;  %v5026_v50 = vld [vmem:[#allocation2 + $0x538] sm:$0xff] }
  0x73   :  { %3088 = vmatpush.bf16.msrb.mxu2 %v4977_v52  ;;  %v5042_v52 = vld [vmem:[#allocation2 + $0x5b8] sm:$0xff] }
  0x74   :  { %3101 = vmatpush.bf16.msrb.mxu3 %v4985_v53  ;;  %v5011_v53 = vld [vmem:[#allocation2 + $0x4c0] sm:$0xff] }
  0x75   :  { %3063 = vmatpush.bf16.msrb.mxu0 %v4960_v54  ;;  %v765_v54 = vld [vmem:[#allocation1] sm:$0xff] }
  0x76   :  { %3076 = vmatpush.bf16.msrb.mxu1 %v4968_v55  ;;  %v767_v55 = vld [vmem:[#allocation1 + $0x12] sm:$0xff] }
  0x77   :  { %3089 = vmatpush.bf16.msrb.mxu2 %v4976_v56  ;;  %v5050_v56 = vld [vmem:[#allocation2 + $0x5f8] sm:$0xff] }
  0x78   :  { %3102 = vmatpush.bf16.msrb.mxu3 %v4984_v57  ;;  %v766_v57 = vld [vmem:[#allocation1 + $0x9] sm:$0xff] }
  0x79   :  { %3064 = vmatpush.bf16.msrb.mxu0 %v4959_v58  ;;  %v5025_v58 = vld [vmem:[#allocation2 + $0x530] sm:$0xff] }
  0x7a   :  { %3077 = vmatpush.bf16.msrb.mxu1 %v4967_v59  ;;  %v768_v59 = vld [vmem:[#allocation1 + $0x1b] sm:$0xff] }
  0x7b   :  { %3090 = vmatpush.bf16.msrb.mxu2 %v4975_v60  ;;  %v5033_v60 = vld [vmem:[#allocation2 + $0x570] sm:$0xff] }
  0x7c   :  { %3103 = vmatpush.bf16.msrb.mxu3 %v4983_v61  ;;  %v5041_v61 = vld [vmem:[#allocation2 + $0x5b0] sm:$0xff] }
  0x7d   :  { %3065 = vmatpush.bf16.msrb.mxu0 %v4958_v62  ;;  %v5049_v62 = vld [vmem:[#allocation2 + $0x5f0] sm:$0xff] }
  0x7e   :  { %3078 = vmatpush.bf16.msrb.mxu1 %v4966_v63  ;;  %v5024_v63 = vld [vmem:[#allocation2 + $0x528] sm:$0xff] }
  0x7f   :  { %3091 = vmatpush.bf16.msrb.mxu2 %v4974_v0  ;;  %v5032_v0 = vld [vmem:[#allocation2 + $0x568] sm:$0xff] }
  0x80   :  { %3104 = vmatpush.bf16.msrb.mxu3 %v4982_v1  ;;  %v5040_v1 = vld [vmem:[#allocation2 + $0x5a8] sm:$0xff] }
  0x81   :  { %3066 = vmatpush.bf16.msrb.mxu0 %v4957_v2  ;;  %v5208_v2 = vld [vmem:[#allocation5] ss:$0 sm:$0xff] }
  0x82   :  { %3079 = vmatpush.bf16.msrb.mxu1 %v4965_v3  ;;  %v5048_v3 = vld [vmem:[#allocation2 + $0x5e8] sm:$0xff] }
  0x83   :  { %3092 = vmatpush.bf16.msrb.mxu2 %v4973_v4  ;;  %v5023_v4 = vld [vmem:[#allocation2 + $0x520] sm:$0xff] }
  0x84   :  { %3105 = vmatpush.bf16.msrb.mxu3 %v4981_v5 }
  0x85   :  { %3067 = vmatpush.bf16.msrb.mxu0 %v4956_v6  ;;  %v5031_v6 = vld [vmem:[#allocation2 + $0x560] sm:$0xff] }
  0x86   :  { %3080 = vmatpush.bf16.msrb.mxu1 %v4964_v7  ;;  %v5039_v7 = vld [vmem:[#allocation2 + $0x5a0] sm:$0xff] }
  0x87   :  { %3093 = vmatpush.bf16.msrb.mxu2 %v4972_v8 }
  0x88   :  { %3106 = vmatpush.bf16.msrb.mxu3 %v4980_v14  ;;  %v5038_v14 = vld [vmem:[#allocation2 + $0x598] sm:$0xff] }
  0x89   :  { %3068 = vmatpush.bf16.msrb.mxu0 %v4955_v15  ;;  %v5046_v15 = vld [vmem:[#allocation2 + $0x5d8] sm:$0xff] }
  0x8a   :  { %3081 = vmatpush.bf16.msrb.mxu1 %v4963_v16 }
  0x8b   :  { %3094 = vmatpush.bf16.msrb.mxu2 %v4971_v18 }
  0x8c   :  { %3107 = vmatpush.bf16.msrb.mxu3 %v4979_v21  ;;  %3069 = vmatmul.bf16.vlgmr.msrb.gmra.mxu0 %v759_v9  ;;  %v5037_v21 = vld [vmem:[#allocation2 + $0x590] sm:$0xff] }
  0x8d   :  { %3113 = vmatpush.bf16.msra.mxu0 %v4994_v17  ;;  %3082 = vmatmul.bf16.vlgmr.msrb.gmra.mxu1 %v760_v11  ;;  %v5021_v17 = vld [vmem:[#allocation2 + $0x510] sm:$0xff] }
  0x8e   :  { %3126 = vmatpush.bf16.msra.mxu1 %v5002_v19  ;;  %3095 = vmatmul.bf16.vlgmr.msrb.gmra.mxu2 %v761_v10  ;;  %v5047_v10 = vld [vmem:[#allocation2 + $0x5e0] sm:$0xff] }
  0x8f   :  { %3139 = vmatpush.bf16.msra.mxu2 %v5010_v20  ;;  %3108 = vmatmul.bf16.vlgmr.msrb.gmra.mxu3 %v762_v12  ;;  %v5022_v12 = vld [vmem:[#allocation2 + $0x518] sm:$0xff]  ;;  %v5029_v20 = vld [vmem:[#allocation2 + $0x550] sm:$0xff] }
  0x90   :  { %3152 = vmatpush.bf16.msra.mxu3 %v5018_v22 }
  0x91   :  { %3114 = vmatpush.bf16.msra.mxu0 %v4993_v23 }
  0x92   :  { %3127 = vmatpush.bf16.msra.mxu1 %v5001_v24  ;;  %v5045_v24 = vld [vmem:[#allocation2 + $0x5d0] sm:$0xff] }
  0x93   :  { %3140 = vmatpush.bf16.msra.mxu2 %v5009_v25 }
  0x94   :  { %3153 = vmatpush.bf16.msra.mxu3 %v5017_v26  ;;  %v5020_v26 = vld [vmem:[#allocation2 + $0x508] sm:$0xff] }
  0x95   :  { %3115 = vmatpush.bf16.msra.mxu0 %v4992_v27  ;;  %v5028_v27 = vld [vmem:[#allocation2 + $0x548] sm:$0xff] }
  0x96   :  { %3128 = vmatpush.bf16.msra.mxu1 %v5000_v28  ;;  %v5036_v28 = vld [vmem:[#allocation2 + $0x588] sm:$0xff] }
  0x97   :  { %3141 = vmatpush.bf16.msra.mxu2 %v5008_v29  ;;  %v769_v29 = vld [vmem:[#allocation1 + $0x24] sm:$0xff] }
  0x98   :  { %3154 = vmatpush.bf16.msra.mxu3 %v5016_v30  ;;  %v771_v30 = vld [vmem:[#allocation1 + $0x36] sm:$0xff] }
  0x99   :  { %3116 = vmatpush.bf16.msra.mxu0 %v4991_v31  ;;  %v770_v31 = vld [vmem:[#allocation1 + $0x2d] sm:$0xff] }
  0x9a   :  { %3129 = vmatpush.bf16.msra.mxu1 %v4999_v32  ;;  %v772_v32 = vld [vmem:[#allocation1 + $0x3f] sm:$0xff] }
  0x9b   :  { %3142 = vmatpush.bf16.msra.mxu2 %v5007_v33  ;;  %v48_v33 = vld [vmem:[%s5339_s0 + $0x18] sm:$0xff] }
  0x9c   :  { %3155 = vmatpush.bf16.msra.mxu3 %v5015_v34  ;;  %v5044_v34 = vld [vmem:[#allocation2 + $0x5c8] sm:$0xff]  ;;  %774 = vst [vmem:[#allocation1] ss:$9 sm:$0xff] %v48_v33 }
  0x9d   :  { %3117 = vmatpush.bf16.msra.mxu0 %v4990_v35  ;;  %v5088_v33 = vld [vmem:[#allocation2 + $0x728] sm:$0xff] }
  0x9e   :  { %3130 = vmatpush.bf16.msra.mxu1 %v4998_v36  ;;  %v5019_v36 = vld [vmem:[#allocation2 + $0x500] sm:$0xff] }
  0x9f   :  { %3143 = vmatpush.bf16.msra.mxu2 %v5006_v37  ;;  %v5027_v37 = vld [vmem:[#allocation2 + $0x540] sm:$0xff] }
  0xa0   :  { %3156 = vmatpush.bf16.msra.mxu3 %v5014_v38  ;;  %v5035_v38 = vld [vmem:[#allocation2 + $0x580] sm:$0xff] }
  0xa1   :  { %3118 = vmatpush.bf16.msra.mxu0 %v4989_v39  ;;  %v5058_v39 = vld [vmem:[#allocation2 + $0x638] sm:$0xff] }
  0xa2   :  { %3131 = vmatpush.bf16.msra.mxu1 %v4997_v40  ;;  %v5066_v40 = vld [vmem:[#allocation2 + $0x678] sm:$0xff] }
  0xa3   :  { %3144 = vmatpush.bf16.msra.mxu2 %v5005_v41 }
  0xa4   :  { %3157 = vmatpush.bf16.msra.mxu3 %v5013_v42  ;;  %v5074_v42 = vld [vmem:[#allocation2 + $0x6b8] sm:$0xff] }
  0xa5   :  { %3119 = vmatpush.bf16.msra.mxu0 %v4988_v43  ;;  %v5043_v43 = vld [vmem:[#allocation2 + $0x5c0] sm:$0xff] }
  0xa6   :  { %3132 = vmatpush.bf16.msra.mxu1 %v4996_v44  ;;  %v5082_v44 = vld [vmem:[#allocation2 + $0x6f8] sm:$0xff] }
  0xa7   :  { %3145 = vmatpush.bf16.msra.mxu2 %v5004_v45  ;;  %v5057_v45 = vld [vmem:[#allocation2 + $0x630] sm:$0xff] }
  0xa8   :  { %3158 = vmatpush.bf16.msra.mxu3 %v5012_v46  ;;  %v5065_v46 = vld [vmem:[#allocation2 + $0x670] sm:$0xff] }
  0xa9   :  { %3120 = vmatpush.bf16.msra.mxu0 %v4987_v47  ;;  %v2914_v5 = vpop.f32.mrf.mxu0  ;;  %v5073_v47 = vld [vmem:[#allocation2 + $0x6b0] sm:$0xff] }
  0xaa   :  { %3133 = vmatpush.bf16.msra.mxu1 %v4995_v48  ;;  %v2915_v8 = vadd.f32 %v5208_v2, %v2914_v5  ;;  %v2927_v9 = vpop.f32.mrf.mxu1  ;;  %v5081_v48 = vld [vmem:[#allocation2 + $0x6f0] sm:$0xff] }
  0xab   :  { %3146 = vmatpush.bf16.msra.mxu2 %v5003_v49  ;;  %v5056_v49 = vld [vmem:[#allocation2 + $0x628] sm:$0xff]  ;;  %v5069_v5 = vld [vmem:[#allocation2 + $0x690] sm:$0xff] }
  0xac   :  { %3159 = vmatpush.bf16.msra.mxu3 %v5011_v53  ;;  %3121 = vmatmul.bf16.vlgmr.msra.gmra.mxu0 %v765_v54  ;;  %v2928_v11 = vadd.f32 %v2927_v9, %v2915_v8  ;;  %v5055_v53 = vld [vmem:[#allocation2 + $0x620] sm:$0xff] }
  0xad   :  { %3165 = vmatpush.bf16.msrb.mxu0 %v5026_v50  ;;  %3134 = vmatmul.bf16.vlgmr.msra.gmra.mxu1 %v766_v57  ;;  %v5064_v50 = vld [vmem:[#allocation2 + $0x668] sm:$0xff]  ;;  %v5063_v54 = vld [vmem:[#allocation2 + $0x660] sm:$0xff] }
  0xae   :  { %3178 = vmatpush.bf16.msrb.mxu1 %v5034_v51  ;;  %3147 = vmatmul.bf16.vlgmr.msra.gmra.mxu2 %v767_v55  ;;  %v5072_v51 = vld [vmem:[#allocation2 + $0x6a8] sm:$0xff]  ;;  %v5071_v55 = vld [vmem:[#allocation2 + $0x6a0] sm:$0xff] }
  0xaf   :  { %3191 = vmatpush.bf16.msrb.mxu2 %v5042_v52  ;;  %3160 = vmatmul.bf16.vlgmr.msra.gmra.mxu3 %v768_v59  ;;  %v5080_v52 = vld [vmem:[#allocation2 + $0x6e8] sm:$0xff]  ;;  %v5079_v59 = vld [vmem:[#allocation2 + $0x6e0] sm:$0xff] }
  0xb0   :  { %3204 = vmatpush.bf16.msrb.mxu3 %v5050_v56 }
  0xb1   :  { %3166 = vmatpush.bf16.msrb.mxu0 %v5025_v58  ;;  %v2940_v16 = vpop.f32.mrf.mxu2  ;;  %v2916_v19 = vpop.f32.mrf.mxu0 }
  0xb2   :  { %3179 = vmatpush.bf16.msrb.mxu1 %v5033_v60  ;;  %v2941_v18 = vadd.f32 %v2940_v16, %v2928_v11  ;;  %v2953_v22 = vpop.f32.mrf.mxu3  ;;  %v2929_v23 = vpop.f32.mrf.mxu1  ;;  %v5054_v60 = vld [vmem:[#allocation2 + $0x618] sm:$0xff]  ;;  %v5052_v11 = vld [vmem:[#allocation2 + $0x608] sm:$0xff]  ;;  %v5051_v16 = vld [vmem:[#allocation2 + $0x600] sm:$0xff] }
  0xb3   :  { %3192 = vmatpush.bf16.msrb.mxu2 %v5041_v61  ;;  %v5075_v23 = vld [vmem:[#allocation2 + $0x6c0] sm:$0xff] }
  0xb4   :  { %3205 = vmatpush.bf16.msrb.mxu3 %v5049_v62  ;;  %v2954_v25 = vadd.f32 %v2953_v22, %v2941_v18  ;;  %v5062_v62 = vld [vmem:[#allocation2 + $0x658] sm:$0xff]  ;;  %v5067_v18 = vld [vmem:[#allocation2 + $0x680] sm:$0xff] }
  0xb5   :  { %3167 = vmatpush.bf16.msrb.mxu0 %v5024_v63  ;;  %v5070_v63 = vld [vmem:[#allocation2 + $0x698] sm:$0xff] }
  0xb6   :  { %3180 = vmatpush.bf16.msrb.mxu1 %v5032_v0  ;;  %v5106_v22 = vld [vmem:[#allocation2 + $0x7b8] sm:$0xff] }
  0xb7   :  { %3193 = vmatpush.bf16.msrb.mxu2 %v5040_v1  ;;  %v5078_v1 = vld [vmem:[#allocation2 + $0x6d8] sm:$0xff] }
  0xb8   :  { %3206 = vmatpush.bf16.msrb.mxu3 %v5048_v3  ;;  %v5053_v3 = vld [vmem:[#allocation2 + $0x610] sm:$0xff] }
  0xb9   :  { %3168 = vmatpush.bf16.msrb.mxu0 %v5023_v4  ;;  %v2942_v35 = vpop.f32.mrf.mxu2  ;;  %v5061_v4 = vld [vmem:[#allocation2 + $0x650] sm:$0xff] }
  0xba   :  { %3181 = vmatpush.bf16.msrb.mxu1 %v5031_v6  ;;  %v2955_v41 = vpop.f32.mrf.mxu3  ;;  %v5104_v35 = vld [vmem:[#allocation2 + $0x7a8] sm:$0xff] }
  0xbb   :  { %3194 = vmatpush.bf16.msrb.mxu2 %v5039_v7  ;;  %v5103_v41 = vld [vmem:[#allocation2 + $0x7a0] sm:$0xff] }
  0xbc   :  { %3207 = vmatpush.bf16.msrb.mxu3 %v5047_v10  ;;  %v5077_v10 = vld [vmem:[#allocation2 + $0x6d0] sm:$0xff] }
  0xbd   :  { %3169 = vmatpush.bf16.msrb.mxu0 %v5022_v12  ;;  %v5060_v12 = vld [vmem:[#allocation2 + $0x648] sm:$0xff] }
  0xbe   :  { %3182 = vmatpush.bf16.msrb.mxu1 %v5030_v13  ;;  %v5068_v13 = vld [vmem:[#allocation2 + $0x688] sm:$0xff] }
  0xbf   :  { %3195 = vmatpush.bf16.msrb.mxu2 %v5038_v14 }
  0xc0   :  { %3208 = vmatpush.bf16.msrb.mxu3 %v5046_v15  ;;  %v5076_v15 = vld [vmem:[#allocation2 + $0x6c8] sm:$0xff] }
  0xc1   :  { %3170 = vmatpush.bf16.msrb.mxu0 %v5021_v17  ;;  %v5059_v17 = vld [vmem:[#allocation2 + $0x640] sm:$0xff] }
  0xc2   :  { %3183 = vmatpush.bf16.msrb.mxu1 %v5029_v20  ;;  %v5090_v20 = vld [vmem:[#allocation2 + $0x738] sm:$0xff] }
  0xc3   :  { %3196 = vmatpush.bf16.msrb.mxu2 %v5037_v21  ;;  %v5098_v21 = vld [vmem:[#allocation2 + $0x778] sm:$0xff] }
  0xc4   :  { %3209 = vmatpush.bf16.msrb.mxu3 %v5045_v24  ;;  %v775_v24 = vld [vmem:[#allocation1] sm:$0xff] }
  0xc5   :  { %3171 = vmatpush.bf16.msrb.mxu0 %v5020_v26  ;;  %v5114_v26 = vld [vmem:[#allocation2 + $0x7f8] sm:$0xff] }
  0xc6   :  { %3184 = vmatpush.bf16.msrb.mxu1 %v5028_v27  ;;  %v776_v27 = vld [vmem:[#allocation1 + $0x9] sm:$0xff] }
  0xc7   :  { %3197 = vmatpush.bf16.msrb.mxu2 %v5036_v28  ;;  %v5089_v28 = vld [vmem:[#allocation2 + $0x730] sm:$0xff] }
  0xc8   :  { %3210 = vmatpush.bf16.msrb.mxu3 %v5044_v34  ;;  %v5096_v34 = vld [vmem:[#allocation2 + $0x768] sm:$0xff] }
  0xc9   :  { %3172 = vmatpush.bf16.msrb.mxu0 %v5019_v36  ;;  %v2966_v56 = vpop.f32.mrf.mxu0  ;;  %v5112_v36 = vld [vmem:[#allocation2 + $0x7e8] sm:$0xff] }
  0xca   :  { %3185 = vmatpush.bf16.msrb.mxu1 %v5027_v37  ;;  %v2979_v57 = vpop.f32.mrf.mxu1  ;;  %v2967_v58 = vadd.f32 %v2966_v56, %v2954_v25  ;;  %v777_v25 = vld [vmem:[#allocation1 + $0x12] sm:$0xff] }
  0xcb   :  { %3198 = vmatpush.bf16.msrb.mxu2 %v5035_v38  ;;  %v5101_v56 = vld [vmem:[#allocation2 + $0x790] sm:$0xff] }
  0xcc   :  { %3211 = vmatpush.bf16.msrb.mxu3 %v5043_v43  ;;  %3173 = vmatmul.bf16.vlgmr.msrb.gmra.mxu0 %v769_v29  ;;  %v2980_v61 = vadd.f32 %v2979_v57, %v2967_v58  ;;  %v778_v29 = vld [vmem:[#allocation1 + $0x1b] sm:$0xff] }
  0xcd   :  { %3217 = vmatpush.bf16.msra.mxu0 %v5058_v39  ;;  %3186 = vmatmul.bf16.vlgmr.msrb.gmra.mxu1 %v770_v31  ;;  %v5105_v31 = vld [vmem:[#allocation2 + $0x7b0] sm:$0xff]  ;;  %v5087_v39 = vld [vmem:[#allocation2 + $0x720] sm:$0xff] }
  0xce   :  { %3230 = vmatpush.bf16.msra.mxu1 %v5066_v40  ;;  %3199 = vmatmul.bf16.vlgmr.msrb.gmra.mxu2 %v771_v30  ;;  %v5097_v30 = vld [vmem:[#allocation2 + $0x770] sm:$0xff]  ;;  %v5095_v40 = vld [vmem:[#allocation2 + $0x760] sm:$0xff] }
  0xcf   :  { %3243 = vmatpush.bf16.msra.mxu2 %v5074_v42  ;;  %3212 = vmatmul.bf16.vlgmr.msrb.gmra.mxu3 %v772_v32  ;;  %v5113_v32 = vld [vmem:[#allocation2 + $0x7f0] sm:$0xff] }
  0xd0   :  { %3256 = vmatpush.bf16.msra.mxu3 %v5082_v44  ;;  %v5111_v44 = vld [vmem:[#allocation2 + $0x7e0] sm:$0xff]  ;;  %v5109_v58 = vld [vmem:[#allocation2 + $0x7d0] sm:$0xff] }
  0xd1   :  { %3218 = vmatpush.bf16.msra.mxu0 %v5057_v45  ;;  %v2992_v0 = vpop.f32.mrf.mxu2  ;;  %v2968_v7 = vpop.f32.mrf.mxu0  ;;  %v5086_v45 = vld [vmem:[#allocation2 + $0x718] sm:$0xff] }
  0xd2   :  { %3231 = vmatpush.bf16.msra.mxu1 %v5065_v46  ;;  %v2993_v2 = vadd.f32 %v2992_v0, %v2980_v61  ;;  %v3005_v6 = vpop.f32.mrf.mxu3  ;;  %v2981_v9 = vpop.f32.mrf.mxu1  ;;  %v5094_v46 = vld [vmem:[#allocation2 + $0x758] sm:$0xff]  ;;  %v5100_v61 = vld [vmem:[#allocation2 + $0x788] sm:$0xff]  ;;  %v5091_v7 = vld [vmem:[#allocation2 + $0x740] sm:$0xff] }
  0xd3   :  { %3244 = vmatpush.bf16.msra.mxu2 %v5073_v47  ;;  %v5102_v47 = vld [vmem:[#allocation2 + $0x798] sm:$0xff]  ;;  %v780_v0 = vld [vmem:[#allocation1 + $0x2d] sm:$0xff] }
  0xd4   :  { %3257 = vmatpush.bf16.msra.mxu3 %v5081_v48  ;;  %v3006_v8 = vadd.f32 %v3005_v6, %v2993_v2  ;;  %v5122_v9 = vld [vmem:[#allocation2 + $0x838] sm:$0xff] }
  0xd5   :  { %3219 = vmatpush.bf16.msra.mxu0 %v5056_v49 }
  0xd6   :  { %3232 = vmatpush.bf16.msra.mxu1 %v5064_v50  ;;  %v5110_v50 = vld [vmem:[#allocation2 + $0x7d8] sm:$0xff] }
  0xd7   :  { %3245 = vmatpush.bf16.msra.mxu2 %v5072_v51 }
  0xd8   :  { %3258 = vmatpush.bf16.msra.mxu3 %v5080_v52 }
  0xd9   :  { %3220 = vmatpush.bf16.msra.mxu0 %v5055_v53  ;;  %v2994_v14 = vpop.f32.mrf.mxu2  ;;  %v5085_v53 = vld [vmem:[#allocation2 + $0x710] sm:$0xff] }
  0xda   :  { %3233 = vmatpush.bf16.msra.mxu1 %v5063_v54  ;;  %v3007_v19 = vpop.f32.mrf.mxu3  ;;  %v5121_v14 = vld [vmem:[#allocation2 + $0x830] sm:$0xff] }
  0xdb   :  { %3246 = vmatpush.bf16.msra.mxu2 %v5071_v55  ;;  %v5093_v55 = vld [vmem:[#allocation2 + $0x750] sm:$0xff]  ;;  %v5128_v19 = vld [vmem:[#allocation2 + $0x868] sm:$0xff] }
  0xdc   :  { %3259 = vmatpush.bf16.msra.mxu3 %v5079_v59  ;;  %v5084_v59 = vld [vmem:[#allocation2 + $0x708] sm:$0xff] }
  0xdd   :  { %3221 = vmatpush.bf16.msra.mxu0 %v5054_v60  ;;  %v5092_v60 = vld [vmem:[#allocation2 + $0x748] sm:$0xff] }
  0xde   :  { %3234 = vmatpush.bf16.msra.mxu1 %v5062_v62  ;;  %v779_v62 = vld [vmem:[#allocation1 + $0x24] sm:$0xff] }
  0xdf   :  { %3247 = vmatpush.bf16.msra.mxu2 %v5070_v63  ;;  %v781_v63 = vld [vmem:[#allocation1 + $0x36] sm:$0xff] }
  0xe0   :  { %3260 = vmatpush.bf16.msra.mxu3 %v5078_v1  ;;  %v782_v1 = vld [vmem:[#allocation1 + $0x3f] sm:$0xff] }
  0xe1   :  { %3222 = vmatpush.bf16.msra.mxu0 %v5053_v3  ;;  %v49_v3 = vld [vmem:[%s5339_s0 + $0x20] sm:$0xff] }
  0xe2   :  { %3235 = vmatpush.bf16.msra.mxu1 %v5061_v4  ;;  %v5108_v4 = vld [vmem:[#allocation2 + $0x7c8] sm:$0xff]  ;;  %784 = vst [vmem:[#allocation1] ss:$9 sm:$0xff] %v49_v3 }
  0xe3   :  { %3248 = vmatpush.bf16.msra.mxu2 %v5069_v5  ;;  %v5083_v5 = vld [vmem:[#allocation2 + $0x700] sm:$0xff]  ;;  %v5160_v3 = vld [vmem:[#allocation2 + $0x968] sm:$0xff] }
  0xe4   :  { %3261 = vmatpush.bf16.msra.mxu3 %v5077_v10  ;;  %v5130_v10 = vld [vmem:[#allocation2 + $0x878] sm:$0xff] }
  0xe5   :  { %3223 = vmatpush.bf16.msra.mxu0 %v5052_v11  ;;  %v5138_v11 = vld [vmem:[#allocation2 + $0x8b8] sm:$0xff] }
  0xe6   :  { %3236 = vmatpush.bf16.msra.mxu1 %v5060_v12  ;;  %v5107_v12 = vld [vmem:[#allocation2 + $0x7c0] sm:$0xff] }
  0xe7   :  { %3249 = vmatpush.bf16.msra.mxu2 %v5068_v13  ;;  %v5146_v13 = vld [vmem:[#allocation2 + $0x8f8] sm:$0xff] }
  0xe8   :  { %3262 = vmatpush.bf16.msra.mxu3 %v5076_v15  ;;  %v5129_v15 = vld [vmem:[#allocation2 + $0x870] sm:$0xff] }
  0xe9   :  { %3224 = vmatpush.bf16.msra.mxu0 %v5051_v16  ;;  %v3018_v37 = vpop.f32.mrf.mxu0  ;;  %v5137_v16 = vld [vmem:[#allocation2 + $0x8b0] sm:$0xff] }
  0xea   :  { %3237 = vmatpush.bf16.msra.mxu1 %v5059_v17  ;;  %v3019_v38 = vadd.f32 %v3018_v37, %v3006_v8  ;;  %v3031_v42 = vpop.f32.mrf.mxu1  ;;  %v5099_v8 = vld [vmem:[#allocation2 + $0x780] sm:$0xff]  ;;  %v5145_v17 = vld [vmem:[#allocation2 + $0x8f0] sm:$0xff] }
  0xeb   :  { %3250 = vmatpush.bf16.msra.mxu2 %v5067_v18  ;;  %v5120_v18 = vld [vmem:[#allocation2 + $0x828] sm:$0xff] }
  0xec   :  { %3263 = vmatpush.bf16.msra.mxu3 %v5075_v23  ;;  %3225 = vmatmul.bf16.vlgmr.msra.gmra.mxu0 %v775_v24  ;;  %v3032_v43 = vadd.f32 %v3031_v42, %v3019_v38  ;;  %v5119_v24 = vld [vmem:[#allocation2 + $0x820] sm:$0xff]  ;;  %v5117_v38 = vld [vmem:[#allocation2 + $0x810] sm:$0xff] }
  0xed   :  { %3269 = vmatpush.bf16.msrb.mxu0 %v5090_v20  ;;  %3238 = vmatmul.bf16.vlgmr.msra.gmra.mxu1 %v776_v27  ;;  %v5136_v20 = vld [vmem:[#allocation2 + $0x8a8] sm:$0xff]  ;;  %v5135_v27 = vld [vmem:[#allocation2 + $0x8a0] sm:$0xff]  ;;  %v5133_v42 = vld [vmem:[#allocation2 + $0x890] sm:$0xff] }
  0xee   :  { %3282 = vmatpush.bf16.msrb.mxu1 %v5098_v21  ;;  %3251 = vmatmul.bf16.vlgmr.msra.gmra.mxu2 %v777_v25  ;;  %v5144_v21 = vld [vmem:[#allocation2 + $0x8e8] sm:$0xff] }
  0xef   :  { %3295 = vmatpush.bf16.msrb.mxu2 %v5106_v22  ;;  %3264 = vmatmul.bf16.vlgmr.msra.gmra.mxu3 %v778_v29  ;;  %v5143_v29 = vld [vmem:[#allocation2 + $0x8e0] sm:$0xff] }
  0xf0   :  { %3308 = vmatpush.bf16.msrb.mxu3 %v5114_v26  ;;  %v5127_v26 = vld [vmem:[#allocation2 + $0x860] sm:$0xff] }
  0xf1   :  { %3270 = vmatpush.bf16.msrb.mxu0 %v5089_v28  ;;  %v3044_v48 = vpop.f32.mrf.mxu2  ;;  %v3020_v51 = vpop.f32.mrf.mxu0 }
  0xf2   :  { %3283 = vmatpush.bf16.msrb.mxu1 %v5097_v30  ;;  %v3045_v49 = vadd.f32 %v3044_v48, %v3032_v43  ;;  %v3057_v52 = vpop.f32.mrf.mxu3  ;;  %v3033_v57 = vpop.f32.mrf.mxu1  ;;  %v5118_v30 = vld [vmem:[#allocation2 + $0x818] sm:$0xff]  ;;  %v5141_v43 = vld [vmem:[#allocation2 + $0x8d0] sm:$0xff]  ;;  %v5140_v48 = vld [vmem:[#allocation2 + $0x8c8] sm:$0xff] }
  0xf3   :  { %3296 = vmatpush.bf16.msrb.mxu2 %v5105_v31  ;;  %v5126_v31 = vld [vmem:[#allocation2 + $0x858] sm:$0xff]  ;;  %v5123_v51 = vld [vmem:[#allocation2 + $0x840] sm:$0xff] }
  0xf4   :  { %3309 = vmatpush.bf16.msrb.mxu3 %v5113_v32  ;;  %v3058_v54 = vadd.f32 %v3057_v52, %v3045_v49  ;;  %v5134_v32 = vld [vmem:[#allocation2 + $0x898] sm:$0xff]  ;;  %v5131_v52 = vld [vmem:[#allocation2 + $0x880] sm:$0xff] }
  0xf5   :  { %3271 = vmatpush.bf16.msrb.mxu0 %v5088_v33  ;;  %v785_v57 = vld [vmem:[#allocation1] sm:$0xff] }
  0xf6   :  { %3284 = vmatpush.bf16.msrb.mxu1 %v5096_v34 }
  0xf7   :  { %3297 = vmatpush.bf16.msrb.mxu2 %v5104_v35  ;;  %v5142_v35 = vld [vmem:[#allocation2 + $0x8d8] sm:$0xff] }
  0xf8   :  { %3310 = vmatpush.bf16.msrb.mxu3 %v5112_v36 }
  0xf9   :  { %3272 = vmatpush.bf16.msrb.mxu0 %v5087_v39  ;;  %v3046_v2 = vpop.f32.mrf.mxu2 }
  0xfa   :  { %3285 = vmatpush.bf16.msrb.mxu1 %v5095_v40  ;;  %v3059_v6 = vpop.f32.mrf.mxu3  ;;  %v5152_v2 = vld [vmem:[#allocation2 + $0x928] sm:$0xff] }
  0xfb   :  { %3298 = vmatpush.bf16.msrb.mxu2 %v5103_v41  ;;  %v5125_v41 = vld [vmem:[#allocation2 + $0x850] sm:$0xff] }
  0xfc   :  { %3311 = vmatpush.bf16.msrb.mxu3 %v5111_v44  ;;  %v5116_v44 = vld [vmem:[#allocation2 + $0x808] sm:$0xff] }
  0xfd   :  { %3273 = vmatpush.bf16.msrb.mxu0 %v5086_v45  ;;  %v5124_v45 = vld [vmem:[#allocation2 + $0x848] sm:$0xff] }
  0xfe   :  { %3286 = vmatpush.bf16.msrb.mxu1 %v5094_v46  ;;  %v5132_v46 = vld [vmem:[#allocation2 + $0x888] sm:$0xff] }
  0xff   :  { %3299 = vmatpush.bf16.msrb.mxu2 %v5102_v47 }
 0x100   :  { %3312 = vmatpush.bf16.msrb.mxu3 %v5110_v50  ;;  %v5115_v50 = vld [vmem:[#allocation2 + $0x800] sm:$0xff] }
 0x101   :  { %3274 = vmatpush.bf16.msrb.mxu0 %v5085_v53  ;;  %v5154_v53 = vld [vmem:[#allocation2 + $0x938] sm:$0xff] }
 0x102   :  { %3287 = vmatpush.bf16.msrb.mxu1 %v5093_v55  ;;  %v5170_v55 = vld [vmem:[#allocation2 + $0x9b8] sm:$0xff] }
 0x103   :  { %3300 = vmatpush.bf16.msrb.mxu2 %v5101_v56  ;;  %v5139_v56 = vld [vmem:[#allocation2 + $0x8c0] sm:$0xff] }
 0x104   :  { %3313 = vmatpush.bf16.msrb.mxu3 %v5109_v58  ;;  %v787_v58 = vld [vmem:[#allocation1 + $0x12] sm:$0xff] }
 0x105   :  { %3275 = vmatpush.bf16.msrb.mxu0 %v5084_v59  ;;  %v5178_v59 = vld [vmem:[#allocation2 + $0x9f8] sm:$0xff] }
 0x106   :  { %3288 = vmatpush.bf16.msrb.mxu1 %v5092_v60  ;;  %v786_v60 = vld [vmem:[#allocation1 + $0x9] sm:$0xff] }
 0x107   :  { %3301 = vmatpush.bf16.msrb.mxu2 %v5100_v61  ;;  %v5153_v61 = vld [vmem:[#allocation2 + $0x930] sm:$0xff] }
 0x108   :  { %3314 = vmatpush.bf16.msrb.mxu3 %v5108_v4  ;;  %v5168_v4 = vld [vmem:[#allocation2 + $0x9a8] sm:$0xff] }
 0x109   :  { %3276 = vmatpush.bf16.msrb.mxu0 %v5083_v5  ;;  %v3070_v22 = vpop.f32.mrf.mxu0  ;;  %v5176_v5 = vld [vmem:[#allocation2 + $0x9e8] sm:$0xff] }
 0x10a   :  { %3289 = vmatpush.bf16.msrb.mxu1 %v5091_v7  ;;  %v3071_v23 = vadd.f32 %v3070_v22, %v3058_v54  ;;  %v3083_v25 = vpop.f32.mrf.mxu1  ;;  %v5162_v54 = vld [vmem:[#allocation2 + $0x978] sm:$0xff] }
 0x10b   :  { %3302 = vmatpush.bf16.msrb.mxu2 %v5099_v8  ;;  %v5151_v8 = vld [vmem:[#allocation2 + $0x920] sm:$0xff] }
 0x10c   :  { %3315 = vmatpush.bf16.msrb.mxu3 %v5107_v12  ;;  %3277 = vmatmul.bf16.vlgmr.msrb.gmra.mxu0 %v779_v62  ;;  %v3084_v28 = vadd.f32 %v3083_v25, %v3071_v23  ;;  %v788_v62 = vld [vmem:[#allocation1 + $0x1b] sm:$0xff] }
 0x10d   :  { %3321 = vmatpush.bf16.msra.mxu0 %v5122_v9  ;;  %3290 = vmatmul.bf16.vlgmr.msrb.gmra.mxu1 %v780_v0  ;;  %v5169_v0 = vld [vmem:[#allocation2 + $0x9b0] sm:$0xff] }
 0x10e   :  { %3334 = vmatpush.bf16.msra.mxu1 %v5130_v10  ;;  %3303 = vmatmul.bf16.vlgmr.msrb.gmra.mxu2 %v781_v63  ;;  %v5161_v63 = vld [vmem:[#allocation2 + $0x970] sm:$0xff]  ;;  %v5159_v10 = vld [vmem:[#allocation2 + $0x960] sm:$0xff] }
 0x10f   :  { %3347 = vmatpush.bf16.msra.mxu2 %v5138_v11  ;;  %3316 = vmatmul.bf16.vlgmr.msrb.gmra.mxu3 %v782_v1  ;;  %v5177_v1 = vld [vmem:[#allocation2 + $0x9f0] sm:$0xff]  ;;  %v5167_v11 = vld [vmem:[#allocation2 + $0x9a0] sm:$0xff] }
 0x110   :  { %3360 = vmatpush.bf16.msra.mxu3 %v5146_v13  ;;  %v5175_v13 = vld [vmem:[#allocation2 + $0x9e0] sm:$0xff]  ;;  %v5149_v23 = vld [vmem:[#allocation2 + $0x910] sm:$0xff] }
 0x111   :  { %3322 = vmatpush.bf16.msra.mxu0 %v5121_v14  ;;  %v3096_v33 = vpop.f32.mrf.mxu2  ;;  %v3072_v37 = vpop.f32.mrf.mxu0  ;;  %v5150_v14 = vld [vmem:[#allocation2 + $0x918] sm:$0xff]  ;;  %v5157_v25 = vld [vmem:[#allocation2 + $0x950] sm:$0xff] }
 0x112   :  { %3335 = vmatpush.bf16.msra.mxu1 %v5129_v15  ;;  %v3097_v34 = vadd.f32 %v3096_v33, %v3084_v28  ;;  %v3109_v36 = vpop.f32.mrf.mxu3  ;;  %v3085_v39 = vpop.f32.mrf.mxu1  ;;  %v5158_v15 = vld [vmem:[#allocation2 + $0x958] sm:$0xff]  ;;  %v5148_v28 = vld [vmem:[#allocation2 + $0x908] sm:$0xff] }
 0x113   :  { %3348 = vmatpush.bf16.msra.mxu2 %v5137_v16  ;;  %v5166_v16 = vld [vmem:[#allocation2 + $0x998] sm:$0xff]  ;;  %v790_v33 = vld [vmem:[#allocation1 + $0x2d] sm:$0xff] }
 0x114   :  { %3361 = vmatpush.bf16.msra.mxu3 %v5145_v17  ;;  %v3110_v40 = vadd.f32 %v3109_v36, %v3097_v34  ;;  %v792_v34 = vld [vmem:[#allocation1 + $0x3f] sm:$0xff]  ;;  %v50_v36 = vld [vmem:[%s5339_s0 + $0x28] sm:$0x7]  ;;  %v5172_v37 = vld [vmem:[#allocation2 + $0x9c8] sm:$0xff]  ;;  %s5291_s0 = smov [#allocation7]  }
 0x115   :  { %3323 = vmatpush.bf16.msra.mxu0 %v5120_v18  ;;  %v5147_v39 = vld [vmem:[#allocation2 + $0x900] sm:$0xff]  ;;  %s3470_s7 = sshll.u32 %s5291_s0, 4  ;;  %s3471_s7 = int_to_ptr.vmem [resolvable:$true] %s3470_s7 }
 0x116   :  { %3336 = vmatpush.bf16.msra.mxu1 %v5128_v19  ;;  %v5174_v19 = vld [vmem:[#allocation2 + $0x9d8] sm:$0xff] }
 0x117   :  { %3349 = vmatpush.bf16.msra.mxu2 %v5136_v20 }
 0x118   :  { %3362 = vmatpush.bf16.msra.mxu3 %v5144_v21 }
 0x119   :  { %3324 = vmatpush.bf16.msra.mxu0 %v5119_v24  ;;  %v3098_v47 = vpop.f32.mrf.mxu2 }
 0x11a   :  { %3337 = vmatpush.bf16.msra.mxu1 %v5127_v26  ;;  %v3111_v49 = vpop.f32.mrf.mxu3  ;;  %v5165_v26 = vld [vmem:[#allocation2 + $0x990] sm:$0xff] }
 0x11b   :  { %3350 = vmatpush.bf16.msra.mxu2 %v5135_v27  ;;  %v5173_v27 = vld [vmem:[#allocation2 + $0x9d0] sm:$0xff]  ;;  %v5184_v49 = vld [vmem:[#allocation2 + $0xa28] sm:$0xff] }
 0x11c   :  { %3363 = vmatpush.bf16.msra.mxu3 %v5143_v29  ;;  %v5156_v29 = vld [vmem:[#allocation2 + $0x948] sm:$0xff]  ;;  %v5193_v47 = vld [vmem:[#allocation2 + $0xa70] sm:$0xff] }
 0x11d   :  { %3325 = vmatpush.bf16.msra.mxu0 %v5118_v30  ;;  %v5164_v30 = vld [vmem:[#allocation2 + $0x988] sm:$0xff] }
 0x11e   :  { %3338 = vmatpush.bf16.msra.mxu1 %v5126_v31  ;;  %v789_v31 = vld [vmem:[#allocation1 + $0x24] sm:$0xff] }
 0x11f   :  { %3351 = vmatpush.bf16.msra.mxu2 %v5134_v32  ;;  %v791_v32 = vld [vmem:[#allocation1 + $0x36] sm:$0xff] }
 0x120   :  { %3364 = vmatpush.bf16.msra.mxu3 %v5142_v35  ;;  %794 = vst [vmem:[#allocation1] ss:$9 sm:$0xff] %v50_v36 }
 0x121   :  { %3326 = vmatpush.bf16.msra.mxu0 %v5117_v38 }
 0x122   :  { %3339 = vmatpush.bf16.msra.mxu1 %v5125_v41  ;;  %v5163_v41 = vld [vmem:[#allocation2 + $0x980] sm:$0xff] }
 0x123   :  { %3352 = vmatpush.bf16.msra.mxu2 %v5133_v42  ;;  %v5186_v42 = vld [vmem:[#allocation2 + $0xa38] sm:$0xff] }
 0x124   :  { %3365 = vmatpush.bf16.msra.mxu3 %v5141_v43  ;;  %v5194_v43 = vld [vmem:[#allocation2 + $0xa78] sm:$0xff] }
 0x125   :  { %3327 = vmatpush.bf16.msra.mxu0 %v5116_v44  ;;  %v5202_v44 = vld [vmem:[#allocation2 + $0xab8] sm:$0xff] }
 0x126   :  { %3340 = vmatpush.bf16.msra.mxu1 %v5124_v45  ;;  %v5171_v45 = vld [vmem:[#allocation2 + $0x9c0] sm:$0xff] }
 0x127   :  { %3353 = vmatpush.bf16.msra.mxu2 %v5132_v46  ;;  %v5185_v46 = vld [vmem:[#allocation2 + $0xa30] sm:$0xff] }
 0x128   :  { %3366 = vmatpush.bf16.msra.mxu3 %v5140_v48  ;;  %v5201_v48 = vld [vmem:[#allocation2 + $0xab0] sm:$0xff] }
 0x129   :  { %3328 = vmatpush.bf16.msra.mxu0 %v5115_v50  ;;  %v3122_v6 = vpop.f32.mrf.mxu0  ;;  %v5192_v50 = vld [vmem:[#allocation2 + $0xa68] sm:$0xff] }
 0x12a   :  { %3341 = vmatpush.bf16.msra.mxu1 %v5123_v51  ;;  %v3123_v7 = vadd.f32 %v3122_v6, %v3110_v40  ;;  %v3135_v9 = vpop.f32.mrf.mxu1  ;;  %v5155_v40 = vld [vmem:[#allocation2 + $0x940] sm:$0xff]  ;;  %v5200_v51 = vld [vmem:[#allocation2 + $0xaa8] sm:$0xff]  ;;  %v5197_v6 = vld [vmem:[#allocation2 + $0xa90] sm:$0xff] }
 0x12b   :  { %3354 = vmatpush.bf16.msra.mxu2 %v5131_v52 }
 0x12c   :  { %3367 = vmatpush.bf16.msra.mxu3 %v5139_v56  ;;  %3329 = vmatmul.bf16.vlgmr.msra.gmra.mxu0 %v785_v57  ;;  %v3136_v12 = vadd.f32 %v3135_v9, %v3123_v7  ;;  %v5191_v56 = vld [vmem:[#allocation2 + $0xa60] sm:$0xff]  ;;  %v5180_v7 = vld [vmem:[#allocation2 + $0xa08] sm:$0xff] }
 0x12d   :  { %3373 = vmatpush.bf16.msrb.mxu0 %v5154_v53  ;;  %3342 = vmatmul.bf16.vlgmr.msra.gmra.mxu1 %v786_v60  ;;  %v5199_v57 = vld [vmem:[#allocation2 + $0xaa0] sm:$0xff]  ;;  %v5190_v60 = vld [vmem:[#allocation2 + $0xa58] sm:$0xff]  ;;  %v5196_v9 = vld [vmem:[#allocation2 + $0xa88] sm:$0xff] }
 0x12e   :  { %3386 = vmatpush.bf16.msrb.mxu1 %v5162_v54  ;;  %3355 = vmatmul.bf16.vlgmr.msra.gmra.mxu2 %v787_v58  ;;  %v5183_v54 = vld [vmem:[#allocation2 + $0xa20] sm:$0xff] }
 0x12f   :  { %3399 = vmatpush.bf16.msrb.mxu2 %v5170_v55  ;;  %3368 = vmatmul.bf16.vlgmr.msra.gmra.mxu3 %v788_v62 }
 0x130   :  { %3412 = vmatpush.bf16.msrb.mxu3 %v5178_v59  ;;  %v5182_v59 = vld [vmem:[#allocation2 + $0xa18] sm:$0xff] }
 0x131   :  { %3374 = vmatpush.bf16.msrb.mxu0 %v5153_v61  ;;  %v3148_v17 = vpop.f32.mrf.mxu2  ;;  %v3124_v21 = vpop.f32.mrf.mxu0  ;;  %v5198_v61 = vld [vmem:[#allocation2 + $0xa98] sm:$0xff] }
 0x132   :  { %3387 = vmatpush.bf16.msrb.mxu1 %v5161_v63  ;;  %v3149_v18 = vadd.f32 %v3148_v17, %v3136_v12  ;;  %v3161_v20 = vpop.f32.mrf.mxu3  ;;  %v3137_v24 = vpop.f32.mrf.mxu1  ;;  %v5179_v12 = vld [vmem:[#allocation2 + $0xa00] sm:$0xff]  ;;  %v797_v17 = vld [vmem:[#allocation1 + $0x12] sm:$0xff] }
 0x133   :  { %3400 = vmatpush.bf16.msrb.mxu2 %v5169_v0 }
 0x134   :  { %3413 = vmatpush.bf16.msrb.mxu3 %v5177_v1  ;;  %v3162_v22 = vadd.f32 %v3161_v20, %v3149_v18 }
 0x135   :  { %3375 = vmatpush.bf16.msrb.mxu0 %v5152_v2 }
 0x136   :  { %3388 = vmatpush.bf16.msrb.mxu1 %v5160_v3  ;;  %v5181_v3 = vld [vmem:[#allocation2 + $0xa10] sm:$0xff] }
 0x137   :  { %3401 = vmatpush.bf16.msrb.mxu2 %v5168_v4 }
 0x138   :  { %3414 = vmatpush.bf16.msrb.mxu3 %v5176_v5  ;;  %v5189_v5 = vld [vmem:[#allocation2 + $0xa50] sm:$0xff] }
 0x139   :  { %3376 = vmatpush.bf16.msrb.mxu0 %v5151_v8  ;;  %v3150_v35 = vpop.f32.mrf.mxu2  ;;  %v5188_v8 = vld [vmem:[#allocation2 + $0xa48] sm:$0xff] }
 0x13a   :  { %3389 = vmatpush.bf16.msrb.mxu1 %v5159_v10  ;;  %v3163_v38 = vpop.f32.mrf.mxu3 }
 0x13b   :  { %3402 = vmatpush.bf16.msrb.mxu2 %v5167_v11 }
 0x13c   :  { %3415 = vmatpush.bf16.msrb.mxu3 %v5175_v13  ;;  %v5187_v13 = vld [vmem:[#allocation2 + $0xa40] sm:$0xff] }
 0x13d   :  { %3377 = vmatpush.bf16.msrb.mxu0 %v5150_v14  ;;  %v5195_v14 = vld [vmem:[#allocation2 + $0xa80] sm:$0xff] }
 0x13e   :  { %3390 = vmatpush.bf16.msrb.mxu1 %v5158_v15  ;;  %v795_v15 = vld [vmem:[#allocation1] sm:$0xff] }
 0x13f   :  { %3403 = vmatpush.bf16.msrb.mxu2 %v5166_v16  ;;  %v796_v16 = vld [vmem:[#allocation1 + $0x9] sm:$0xff] }
 0x140   :  { %3416 = vmatpush.bf16.msrb.mxu3 %v5174_v19 }
 0x141   :  { %3378 = vmatpush.bf16.msrb.mxu0 %v5149_v23 }
 0x142   :  { %3391 = vmatpush.bf16.msrb.mxu1 %v5157_v25 }
 0x143   :  { %3404 = vmatpush.bf16.msrb.mxu2 %v5165_v26 }
 0x144   :  { %3417 = vmatpush.bf16.msrb.mxu3 %v5173_v27 }
 0x145   :  { %3379 = vmatpush.bf16.msrb.mxu0 %v5148_v28 }
 0x146   :  { %3392 = vmatpush.bf16.msrb.mxu1 %v5156_v29 }
 0x147   :  { %3405 = vmatpush.bf16.msrb.mxu2 %v5164_v30 }
 0x148   :  { %3418 = vmatpush.bf16.msrb.mxu3 %v5172_v37 }
 0x149   :  { %3380 = vmatpush.bf16.msrb.mxu0 %v5147_v39  ;;  %v3174_v52 = vpop.f32.mrf.mxu0 }
 0x14a   :  { %3393 = vmatpush.bf16.msrb.mxu1 %v5155_v40  ;;  %v3175_v53 = vadd.f32 %v3174_v52, %v3162_v22  ;;  %v3187_v55 = vpop.f32.mrf.mxu1 }
 0x14b   :  { %3406 = vmatpush.bf16.msrb.mxu2 %v5163_v41 }
 0x14c   :  { %3419 = vmatpush.bf16.msrb.mxu3 %v5171_v45  ;;  %3381 = vmatmul.bf16.vlgmr.msrb.gmra.mxu0 %v789_v31  ;;  %v3188_v58 = vadd.f32 %v3187_v55, %v3175_v53 }
 0x14d   :  { %3425 = vmatpush.bf16.msra.mxu0 %v5186_v42  ;;  %3394 = vmatmul.bf16.vlgmr.msrb.gmra.mxu1 %v790_v33 }
 0x14e   :  { %3438 = vmatpush.bf16.msra.mxu1 %v5194_v43  ;;  %3407 = vmatmul.bf16.vlgmr.msrb.gmra.mxu2 %v791_v32 }
 0x14f   :  { %3451 = vmatpush.bf16.msra.mxu2 %v5202_v44  ;;  %3420 = vmatmul.bf16.vlgmr.msrb.gmra.mxu3 %v792_v34 }
 0x151   :  { %3426 = vmatpush.bf16.msra.mxu0 %v5185_v46  ;;  %v3200_v62 = vpop.f32.mrf.mxu2  ;;  %v3176_v1 = vpop.f32.mrf.mxu0 }
 0x152   :  { %3439 = vmatpush.bf16.msra.mxu1 %v5193_v47  ;;  %v3201_v63 = vadd.f32 %v3200_v62, %v3188_v58  ;;  %v3213_v0 = vpop.f32.mrf.mxu3  ;;  %v3189_v4 = vpop.f32.mrf.mxu1 }
 0x153   :  { %3452 = vmatpush.bf16.msra.mxu2 %v5201_v48 }
 0x154   :  { %v3214_v2 = vadd.f32 %v3213_v0, %v3201_v63 }
 0x155   :  { %3427 = vmatpush.bf16.msra.mxu0 %v5184_v49 }
 0x156   :  { %3440 = vmatpush.bf16.msra.mxu1 %v5192_v50 }
 0x157   :  { %3453 = vmatpush.bf16.msra.mxu2 %v5200_v51 }
 0x159   :  { %3428 = vmatpush.bf16.msra.mxu0 %v5183_v54  ;;  %v3202_v10 = vpop.f32.mrf.mxu2 }
 0x15a   :  { %3441 = vmatpush.bf16.msra.mxu1 %v5191_v56  ;;  %v3215_v11 = vpop.f32.mrf.mxu3 }
 0x15b   :  { %3454 = vmatpush.bf16.msra.mxu2 %v5199_v57 }
 0x15d   :  { %3429 = vmatpush.bf16.msra.mxu0 %v5182_v59 }
 0x15e   :  { %3442 = vmatpush.bf16.msra.mxu1 %v5190_v60 }
 0x15f   :  { %3455 = vmatpush.bf16.msra.mxu2 %v5198_v61 }
 0x161   :  { %3430 = vmatpush.bf16.msra.mxu0 %v5181_v3 }
 0x162   :  { %3443 = vmatpush.bf16.msra.mxu1 %v5189_v5 }
 0x163   :  { %3456 = vmatpush.bf16.msra.mxu2 %v5197_v6 }
 0x165   :  { %3431 = vmatpush.bf16.msra.mxu0 %v5180_v7 }
 0x166   :  { %3444 = vmatpush.bf16.msra.mxu1 %v5188_v8 }
 0x167   :  { %3457 = vmatpush.bf16.msra.mxu2 %v5196_v9 }
 0x169   :  { %3432 = vmatpush.bf16.msra.mxu0 %v5179_v12  ;;  %v3226_v18 = vpop.f32.mrf.mxu0 }
 0x16a   :  { %3445 = vmatpush.bf16.msra.mxu1 %v5187_v13  ;;  %v3227_v19 = vadd.f32 %v3226_v18, %v3214_v2  ;;  %v3239_v20 = vpop.f32.mrf.mxu1 }
 0x16b   :  { %3458 = vmatpush.bf16.msra.mxu2 %v5195_v14 }
 0x16c   :  { %3433 = vmatmul.bf16.vlgmr.msra.gmra.mxu0 %v795_v15  ;;  %v3240_v21 = vadd.f32 %v3239_v20, %v3227_v19 }
 0x16d   :  { %3446 = vmatmul.bf16.vlgmr.msra.gmra.mxu1 %v796_v16 }
 0x16e   :  { %3459 = vmatmul.bf16.vlgmr.msra.gmra.mxu2 %v797_v17 }
 0x171   :  { %v3252_v22 = vpop.f32.mrf.mxu2  ;;  %v3228_v25 = vpop.f32.mrf.mxu0 }
 0x172   :  { %v3253_v23 = vadd.f32 %v3252_v22, %v3240_v21  ;;  %v3265_v24 = vpop.f32.mrf.mxu3  ;;  %v3241_v27 = vpop.f32.mrf.mxu1 }
 0x174   :  { %v3266_v26 = vadd.f32 %v3265_v24, %v3253_v23 }
 0x179   :  { %v3254_v28 = vpop.f32.mrf.mxu2 }
 0x17a   :  { %v3267_v29 = vpop.f32.mrf.mxu3 }
 0x189   :  { %v3278_v30 = vpop.f32.mrf.mxu0 }
 0x18a   :  { %v3279_v31 = vadd.f32 %v3278_v30, %v3266_v26  ;;  %v3291_v32 = vpop.f32.mrf.mxu1 }
 0x18c   :  { %v3292_v33 = vadd.f32 %v3291_v32, %v3279_v31 }
 0x191   :  { %v3304_v34 = vpop.f32.mrf.mxu2  ;;  %v3280_v37 = vpop.f32.mrf.mxu0 }
 0x192   :  { %v3305_v35 = vadd.f32 %v3304_v34, %v3292_v33  ;;  %v3317_v36 = vpop.f32.mrf.mxu3  ;;  %v3293_v39 = vpop.f32.mrf.mxu1 }
 0x194   :  { %v3318_v38 = vadd.f32 %v3317_v36, %v3305_v35 }
 0x199   :  { %v3306_v40 = vpop.f32.mrf.mxu2 }
 0x19a   :  { %v3319_v41 = vpop.f32.mrf.mxu3 }
 0x1a9   :  { %v3330_v42 = vpop.f32.mrf.mxu0 }
 0x1aa   :  { %v3343_v43 = vpop.f32.mrf.mxu1  ;;  %v3331_v53 = vadd.f32 %v3330_v42, %v3318_v38 }
 0x1ac   :  { %v3344_v57 = vadd.f32 %v3343_v43, %v3331_v53 }
 0x1b1   :  { %v3356_v44 = vpop.f32.mrf.mxu2  ;;  %v3332_v46 = vpop.f32.mrf.mxu0 }
 0x1b2   :  { %v3369_v45 = vpop.f32.mrf.mxu3  ;;  %v3345_v47 = vpop.f32.mrf.mxu1  ;;  %v3357_v58 = vadd.f32 %v3356_v44, %v3344_v57 }
 0x1b4   :  { %v3370_v61 = vadd.f32 %v3369_v45, %v3357_v58 }
 0x1b9   :  { %v3358_v48 = vpop.f32.mrf.mxu2 }
 0x1ba   :  { %v3371_v49 = vpop.f32.mrf.mxu3 }
 0x1c9   :  { %v3382_v50 = vpop.f32.mrf.mxu0 }
 0x1ca   :  { %v3395_v51 = vpop.f32.mrf.mxu1  ;;  %v3383_v62 = vadd.f32 %v3382_v50, %v3370_v61 }
 0x1cc   :  { %v3396_v63 = vadd.f32 %v3395_v51, %v3383_v62 }
 0x1d1   :  { %v3408_v52 = vpop.f32.mrf.mxu2  ;;  %v3384_v55 = vpop.f32.mrf.mxu0 }
 0x1d2   :  { %v3421_v54 = vpop.f32.mrf.mxu3  ;;  %v3397_v56 = vpop.f32.mrf.mxu1  ;;  %v3409_v0 = vadd.f32 %v3408_v52, %v3396_v63 }
 0x1d4   :  { %v3422_v1 = vadd.f32 %v3421_v54, %v3409_v0 }
 0x1d9   :  { %v3410_v59 = vpop.f32.mrf.mxu2 }
 0x1da   :  { %v3423_v60 = vpop.f32.mrf.mxu3 }
 0x1e9   :  { %v3434_v2 = vpop.f32.mrf.mxu0 }
 0x1ea   :  { %v3447_v3 = vpop.f32.mrf.mxu1  ;;  %v3435_v4 = vadd.f32 %v3434_v2, %v3422_v1 }
 0x1ec   :  { %v3448_v5 = vadd.f32 %v3447_v3, %v3435_v4 }
 0x1f1   :  { %v3460_v6 = vpop.f32.mrf.mxu2  ;;  %v3436_v8 = vpop.f32.mrf.mxu0 }
 0x1f2   :  { %v3461_v7 = vadd.f32 %v3460_v6, %v3448_v5  ;;  %v3449_v9 = vpop.f32.mrf.mxu1 }
 0x1f4   :  { %3464 = vst [vmem:[#allocation7] sm:$0x3] %v3461_v7 }
 0x1f5   :  { %3475 = dma.vmem_to_hbm [thread:$0]  %s3471_s7, 32, %s3473_s10, [#allocation4]  }
 0x1f9   :  { %v3462_v10 = vpop.f32.mrf.mxu2 }
 0x1fa   :  { %5285 = dma.done.wait [#allocation4], 32  }
 0x1fb   :  { %5286 = vsyncadd [#allocation4], 4294967264 }
 0x1fc   :  { %3480 = vsyncpa [#allocation3], 1 }
 0x1fd   :  { %3481 = vsyncpa [#allocation6], 1 }
 0x1fe   :  { %3482 = vsyncpa [#allocation4], 1 }

// kernel: dqn_forward.2
= control target key start
LH: loop header
LB: loop body
LE: loop exit
PB: predicated region body
PF: predicated region fallthrough
CT: control target
= control target key end

     0   :  { %10 = vsyncpa [#allocation5], 0  ;;  %s13782_s0 = inlined_call_operand.vmem [shape: bf16[512,12], index: 0, kind: input, shape index: {}]   ;;  %s13783_s1 = inlined_call_operand.hbm [shape: bf16[12,16], index: 1, kind: input, shape index: {}]   ;;  %s13784_s2 = inlined_call_operand.hbm [shape: bf16[4,16,32], index: 2, kind: input, shape index: {}]   ;;  %s13785_s3 = inlined_call_operand.hbm [shape: bf16[4,32,32], index: 3, kind: input, shape index: {}]   ;;  %s13786_s4 = inlined_call_operand.hbm [shape: f32[8,32], index: 4, kind: input, shape index: {}]   ;;  %s13787_s5 = inlined_call_operand.vmem [shape: bf16[512,32], index: 5, kind: output, shape index: {}]  }
   0x1   :  { %11 = vsyncpa [#allocation7], 0 }
   0x2   :  { %12 = vsyncpa [#allocation10], 0  ;;  %s32_s20 = sshll.u32 %s13784_s2, 4  ;;  %s8369_s21 = smov [#allocation6]   ;;  %s33_s20 = int_to_ptr.hbm [resolvable:$true] %s32_s20 }
   0x3   :  { %s34_s22 = sshll.u32 %s8369_s21, 4  ;;  %s19_s25 = sshll.u32 %s13783_s1, 4  ;;  %s35_s22 = int_to_ptr.vmem [resolvable:$true] %s34_s22  ;;  %s20_s25 = int_to_ptr.hbm [resolvable:$true] %s19_s25 }
   0x4   :  { %s8370_s26 = smov 64   ;;  %s8371_s27 = smov 4  }
   0x5   :  { %40 = dma.hbm_to_vmem [thread:$0]  %s33_s20, 512, %s35_s22, [#allocation7], %s8370_s26, %s8370_s26, %s8371_s27  }
   0x6   :  { %s8372_s28 = smov [#allocation4]   ;;  %s45_s7 = sshll.u32 %s13785_s3, 4  ;;  %s46_s7 = int_to_ptr.hbm [resolvable:$true] %s45_s7 }
   0x7   :  { %s21_s29 = sshll.u32 %s8372_s28, 4  ;;  %s59_s9 = sshll.u32 %s13786_s4, 4  ;;  %s22_s29 = int_to_ptr.vmem [resolvable:$true] %s21_s29  ;;  %s60_s9 = int_to_ptr.hbm [resolvable:$true] %s59_s9 }
   0x8   :  { %27 = dma.hbm_to_vmem [thread:$0]  %s20_s25, 128, %s22_s29, [#allocation5], %s8370_s26, %s8370_s26, %s8371_s27  }
   0x9   :  { %s8373_s10 = smov [#allocation8]   ;;  %s8374_s1 = smov [#allocation9]  }
   0xa   :  { %s47_s11 = sshll.u32 %s8373_s10, 4  ;;  %s61_s12 = sshll.u32 %s8374_s1, 4  ;;  %s48_s11 = int_to_ptr.vmem [resolvable:$true] %s47_s11  ;;  %s62_s12 = int_to_ptr.vmem [resolvable:$true] %s61_s12 }
   0xb   :  { %53 = dma.hbm_to_vmem [thread:$0]  %s46_s7, 1024, %s48_s11, [#allocation7], %s8370_s26, %s8370_s26, %s8371_s27  }
   0xc   :  { %64 = dma.hbm_to_vmem [thread:$0]  %s60_s9, 128, %s62_s12, [#allocation10]  }
   0xd   :  { %8363 = dma.done.wait [#allocation5], 128  }
   0xe   :  { %8364 = vsyncadd [#allocation5], 4294967168 }
   0xf   :  { %8365 = dma.done.wait [#allocation7], 1536  }
  0x10   :  { %8366 = vsyncadd [#allocation7], 4294965760 }
  0x11   :  { %8367 = dma.done.wait [#allocation10], 128  }
  0x12   :  { %8368 = vsyncadd [#allocation10], 4294967168  ;;  %v7862_v0 = vld [vmem:[#allocation4] sm:$0xf]  ;;  %v8232_v1 = vld [vmem:[#allocation4] sm:$0x30]  ;;  %v90_v57 = vlaneseq }
  0x13   :  { %vm1577_vm0 = vcmask 1045504   ;;  %v7863_v2 = vor.u32 %v8232_v1, %v7862_v0  ;;  %v8200_v3 = vld [vmem:[%s13782_s0] sm:$0xff]  ;;  %vm1480_vm1 = vcmask 97280   ;;  %v8201_v6 = vld [vmem:[%s13782_s0 + $0x8] sm:$0xff]  ;;  %v8202_v9 = vld [vmem:[%s13782_s0 + $0x10] sm:$0xff]  ;;  %vm82_vm2 = vcmask 130048  }
  0x14   :  { %v8208_v5 = vld [vmem:[%s13782_s0 + $0x40] sm:$0xff]  ;;  %v8209_v7 = vld [vmem:[%s13782_s0 + $0x48] sm:$0xff]  ;;  %v8210_v10 = vld [vmem:[%s13782_s0 + $0x50] sm:$0xff]  ;;  %v13788_v28 = vmov 0.0   ;;  %v8594_v59 = vshrl.u32 %v90_v57, 7 }
  0x15   :  { %v1579_v4 = vsel %vm1577_vm0, %v7863_v2, 0  ;;  %v8216_v8 = vld [vmem:[%s13782_s0 + $0x80] sm:$0xff]  ;;  %v8217_v11 = vld [vmem:[%s13782_s0 + $0x88] sm:$0xff]  ;;  %v8203_v12 = vld [vmem:[%s13782_s0 + $0x18] sm:$0xff]  ;;  %83 = vst.msk [vmem:[#allocation2 + $0x200] sm:$0xff] %vm82_vm2, %v13788_v28 }
  0x16   :  { %1588 = vmatpush.bf16.msra.mxu0 %v1579_v4  ;;  %8245 = vmatpush.bf16.msra.mxu1 %v1579_v4  ;;  %v8211_v13 = vld [vmem:[%s13782_s0 + $0x58] sm:$0xff]  ;;  %v8218_v14 = vld [vmem:[%s13782_s0 + $0x90] sm:$0xff]  ;;  %v8224_v15 = vld [vmem:[%s13782_s0 + $0xc0] sm:$0xff]  ;;  %84 = vst.msk [vmem:[#allocation2 + $0x208] sm:$0xff] %vm82_vm2, %v13788_v28  ;;  %v92_v62 = vadd.s32 8, %v8594_v59  ;;  %v94_v0 = vadd.s32 24, %v8594_v59 }
  0x17   :  { %8246 = vmatpush.bf16.msra.mxu2 %v1579_v4  ;;  %8247 = vmatpush.bf16.msra.mxu3 %v1579_v4  ;;  %v8204_v16 = vld [vmem:[%s13782_s0 + $0x20] sm:$0xff]  ;;  %v8219_v18 = vld [vmem:[%s13782_s0 + $0x98] sm:$0xff]  ;;  %v8225_v19 = vld [vmem:[%s13782_s0 + $0xc8] sm:$0xff]  ;;  %85 = vst.msk [vmem:[#allocation2 + $0x210] sm:$0xff] %vm82_vm2, %v13788_v28 }
  0x18   :  { %v8212_v17 = vld [vmem:[%s13782_s0 + $0x60] sm:$0xff]  ;;  %v8205_v20 = vld [vmem:[%s13782_s0 + $0x28] sm:$0xff]  ;;  %v8226_v23 = vld [vmem:[%s13782_s0 + $0xd0] sm:$0xff]  ;;  %v156_v2 = vand.u32 255, %v92_v62 }
  0x19   :  { %7864 = vmatmul.msk.bf16.vlgmr.msra.gmra.mxu0 %vm1480_vm1, %v8200_v3  ;;  %7872 = vmatmul.msk.bf16.vlgmr.msra.gmra.mxu1 %vm1480_vm1, %v8208_v5  ;;  %v8213_v21 = vld [vmem:[%s13782_s0 + $0x68] sm:$0xff]  ;;  %v8220_v22 = vld [vmem:[%s13782_s0 + $0xa0] sm:$0xff]  ;;  %v8206_v24 = vld [vmem:[%s13782_s0 + $0x30] sm:$0xff]  ;;  %v158_v3 = vand.u32 255, %v94_v0 }
  0x1a   :  { %7880 = vmatmul.msk.bf16.vlgmr.msra.gmra.mxu2 %vm1480_vm1, %v8216_v8  ;;  %7888 = vmatmul.msk.bf16.vlgmr.msra.gmra.mxu3 %vm1480_vm1, %v8224_v15  ;;  %v8214_v25 = vld [vmem:[%s13782_s0 + $0x70] sm:$0xff]  ;;  %v8221_v26 = vld [vmem:[%s13782_s0 + $0xa8] sm:$0xff]  ;;  %v8227_v27 = vld [vmem:[%s13782_s0 + $0xd8] sm:$0xff]  ;;  %v8608_v5 = vand.u32 15, %v156_v2 }
  0x1b   :  { %v8207_v29 = vld [vmem:[%s13782_s0 + $0x38] sm:$0xff]  ;;  %v8222_v31 = vld [vmem:[%s13782_s0 + $0xb0] sm:$0xff]  ;;  %v8228_v32 = vld [vmem:[%s13782_s0 + $0xe0] sm:$0xff]  ;;  %v8613_v8 = vand.u32 15, %v158_v3 }
  0x1c   :  { %v8215_v30 = vld [vmem:[%s13782_s0 + $0x78] sm:$0xff]  ;;  %v8229_v36 = vld [vmem:[%s13782_s0 + $0xe8] sm:$0xff]  ;;  %v8230_v41 = vld [vmem:[%s13782_s0 + $0xf0] sm:$0xff]  ;;  %14141 = vst [vmem:[#allocation27_spill] sm:$0xff] %v8608_v5  ;;  %vm348_vm3 = vcmp.lt.s32.totalorder %v8608_v5, 15 }
  0x1d   :  { %v8223_v35 = vld [vmem:[%s13782_s0 + $0xb8] sm:$0xff]  ;;  %14142 = vst [vmem:[#allocation28_spill] sm:$0xff] %v8613_v8  ;;  %vm350_vm4 = vcmp.lt.s32.totalorder %v8613_v8, 15  ;;  %v14155_v8 = vmov 0.0  }
  0x1e   :  { %v8231_v46 = vld [vmem:[%s13782_s0 + $0xf8] sm:$0xff] }
  0x29   :  { %7865 = vmatmul.msk.bf16.gmra.mxu0 %vm1480_vm1, %v8201_v6  ;;  %7873 = vmatmul.msk.bf16.gmra.mxu1 %vm1480_vm1, %v8209_v7  ;;  %v96_v6 = vadd.s32 40, %v8594_v59 }
  0x2a   :  { %7881 = vmatmul.msk.bf16.gmra.mxu2 %vm1480_vm1, %v8217_v11  ;;  %7889 = vmatmul.msk.bf16.gmra.mxu3 %vm1480_vm1, %v8225_v19  ;;  %v8633_v19 = vsel %vm350_vm4, 1.0, %v13788_v28 }
  0x2b   :  { %v160_v11 = vand.u32 255, %v96_v6  ;;  %14146 = vst [vmem:[#allocation32_spill] sm:$0xff] %v8633_v19 }
  0x2d   :  { %v8626_v15 = vand.u32 15, %v160_v11 }
  0x2f   :  { %14145 = vst [vmem:[#allocation31_spill] sm:$0xff] %v8626_v15  ;;  %vm352_vm5 = vcmp.lt.s32.totalorder %v8626_v15, 15 }
  0x39   :  { %7866 = vmatmul.msk.bf16.gmra.mxu0 %vm1480_vm1, %v8202_v9  ;;  %7874 = vmatmul.msk.bf16.gmra.mxu1 %vm1480_vm1, %v8210_v10 }
  0x3a   :  { %7882 = vmatmul.msk.bf16.gmra.mxu2 %vm1480_vm1, %v8218_v14  ;;  %7890 = vmatmul.msk.bf16.gmra.mxu3 %vm1480_vm1, %v8226_v23  ;;  %v100_v14 = vadd.s32 72, %v8594_v59 }
  0x49   :  { %7867 = vmatmul.msk.bf16.gmra.mxu0 %vm1480_vm1, %v8203_v12  ;;  %7875 = vmatmul.msk.bf16.gmra.mxu1 %vm1480_vm1, %v8211_v13  ;;  %v98_v12 = vadd.s32 56, %v8594_v59  ;;  %v8622_v13 = vsel %vm348_vm3, 1.0, %v13788_v28 }
  0x4a   :  { %7883 = vmatmul.msk.bf16.gmra.mxu2 %vm1480_vm1, %v8219_v18  ;;  %7891 = vmatmul.msk.bf16.gmra.mxu3 %vm1480_vm1, %v8227_v27  ;;  %14144 = vst [vmem:[#allocation30_spill] sm:$0xff] %v8622_v13 }
  0x59   :  { %7868 = vmatmul.msk.bf16.gmra.mxu0 %vm1480_vm1, %v8204_v16  ;;  %7876 = vmatmul.msk.bf16.gmra.mxu1 %vm1480_vm1, %v8212_v17  ;;  %v162_v16 = vand.u32 255, %v98_v12 }
  0x5a   :  { %7884 = vmatmul.msk.bf16.gmra.mxu2 %vm1480_vm1, %v8220_v22  ;;  %7892 = vmatmul.msk.bf16.gmra.mxu3 %vm1480_vm1, %v8228_v32 }
  0x5b   :  { %v8640_v23 = vand.u32 15, %v162_v16 }
  0x5d   :  { %14148 = vst [vmem:[#allocation34_spill] sm:$0xff] %v8640_v23  ;;  %vm354_vm6 = vcmp.lt.s32.totalorder %v8640_v23, 15 }
  0x5e   :  { %v8670_v12 = vsel %vm354_vm6, 1.0, %v13788_v28 }
  0x5f   :  { %14151 = vst [vmem:[#allocation37_spill] sm:$0xff] %v8670_v12 }
  0x69   :  { %7869 = vmatmul.msk.bf16.gmra.mxu0 %vm1480_vm1, %v8205_v20  ;;  %7877 = vmatmul.msk.bf16.gmra.mxu1 %vm1480_vm1, %v8213_v21  ;;  %v164_v20 = vand.u32 255, %v100_v14 }
  0x6a   :  { %7885 = vmatmul.msk.bf16.gmra.mxu2 %vm1480_vm1, %v8221_v26  ;;  %7893 = vmatmul.msk.bf16.gmra.mxu3 %vm1480_vm1, %v8229_v36 }
  0x6b   :  { %v8653_v32 = vand.u32 15, %v164_v20 }
  0x6d   :  { %14150 = vst [vmem:[#allocation36_spill] sm:$0xff] %v8653_v32  ;;  %vm356_vm7 = vcmp.lt.s32.totalorder %v8653_v32, 15 }
  0x79   :  { %7870 = vmatmul.msk.bf16.gmra.mxu0 %vm1480_vm1, %v8206_v24  ;;  %7878 = vmatmul.msk.bf16.gmra.mxu1 %vm1480_vm1, %v8214_v25  ;;  %v102_v24 = vadd.s32 88, %v8594_v59 }
  0x7a   :  { %7886 = vmatmul.msk.bf16.gmra.mxu2 %vm1480_vm1, %v8222_v31  ;;  %7894 = vmatmul.msk.bf16.gmra.mxu3 %vm1480_vm1, %v8230_v41  ;;  %v8651_v31 = vsel %vm352_vm5, 1.0, %v13788_v28  ;;  %v104_v41 = vadd.s32 104, %v8594_v59  ;;  %v108_v28 = vadd.s32 136, %v8594_v59 }
  0x7b   :  { %14149 = vst [vmem:[#allocation35_spill] sm:$0xff] %v8651_v31  ;;  %v166_v36 = vand.u32 255, %v102_v24 }
  0x7d   :  { %v8679_v24 = vand.u32 15, %v166_v36 }
  0x7f   :  { %14154 = vst [vmem:[#allocation40_spill] sm:$0xff] %v8679_v24  ;;  %vm358_vm8 = vcmp.lt.s32.totalorder %v8679_v24, 15  ;;  %v110_v24 = vadd.s32 152, %v8594_v59 }
  0x89   :  { %7871 = vmatmul.msk.bf16.gmra.mxu0 %vm1480_vm1, %v8207_v29  ;;  %7879 = vmatmul.msk.bf16.gmra.mxu1 %vm1480_vm1, %v8215_v30 }
  0x8a   :  { %7887 = vmatmul.msk.bf16.gmra.mxu2 %vm1480_vm1, %v8223_v35  ;;  %7895 = vmatmul.msk.bf16.gmra.mxu3 %vm1480_vm1, %v8231_v46 }
  0x96   :  { %v8536_v33 = vpop.f32.mrf.mxu0  ;;  %v8538_v34 = vpop.f32.mrf.mxu1 }
  0x97   :  { %14128 = vst [vmem:[#allocation14_spill] sm:$0xff] %v8538_v34  ;;  %v1948_v27 = vmul.f32 %v8536_v33, %v8536_v33  ;;  %v1814_v46 = vsel %vm82_vm2, %v8536_v33, 0.0 }
  0x99   :  { %v2012_v62 = vsel %vm82_vm2, %v1948_v27, 0.0  ;;  %v168_v27 = vand.u32 255, %v104_v41 }
  0x9d   :  { %v8564_v44 = vpop.f32.mrf.mxu2  ;;  %v8590_v56 = vpop.f32.mrf.mxu3 }
  0x9e   :  { %v8548_v37 = vpop.f32.mrf.mxu0  ;;  %v8550_v38 = vpop.f32.mrf.mxu1  ;;  %14132 = vst [vmem:[#allocation18_spill] sm:$0xff] %v8564_v44 }
  0x9f   :  { %14129 = vst [vmem:[#allocation15_spill] sm:$0xff] %v8550_v38  ;;  %v1751_v18 = vmul.f32 %v8622_v13, %v8548_v37 }
  0xa1   :  { %v1949_v29 = vmul.f32 %v1751_v18, %v1751_v18  ;;  %v1815_v30 = vsel %vm82_vm2, %v1751_v18, 0.0 }
  0xa2   :  { %v1816_v6 = vadd.f32 %v1815_v30, %v1814_v46 }
  0xa3   :  { %v2013_v0 = vsel %vm82_vm2, %v1949_v29, 0.0 }
  0xa4   :  { %v2014_v30 = vadd.f32 %v2013_v0, %v2012_v62 }
  0xa5   :  { %v8573_v48 = vpop.f32.mrf.mxu2  ;;  %v8601_v63 = vpop.f32.mrf.mxu3 }
  0xa6   :  { %v8552_v39 = vpop.f32.mrf.mxu0  ;;  %v8554_v40 = vpop.f32.mrf.mxu1  ;;  %14134 = vst [vmem:[#allocation20_spill] sm:$0xff] %v8573_v48 }
  0xa7   :  { %14130 = vst [vmem:[#allocation16_spill] sm:$0xff] %v8554_v40  ;;  %v1950_v35 = vmul.f32 %v8552_v39, %v8552_v39  ;;  %v1817_v2 = vsel %vm82_vm2, %v8552_v39, 0.0 }
  0xa8   :  { %14138 = vst [vmem:[#allocation24_spill] sm:$0xff] %v8601_v63  ;;  %v1818_v29 = vadd.f32 %v1817_v2, %v1816_v6  ;;  %v8699_v6 = vand.u32 15, %v168_v27  ;;  %v8709_v27 = vsel %vm358_vm8, 1.0, %v14155_v8 }
  0xa9   :  { %v2015_v18 = vsel %vm82_vm2, %v1950_v35, 0.0  ;;  %14158 = vst [vmem:[#allocation43_spill] sm:$0xff] %v8709_v27 }
  0xaa   :  { %v2016_v36 = vadd.f32 %v2015_v18, %v2014_v30  ;;  %14157 = vst [vmem:[#allocation42_spill] sm:$0xff] %v8699_v6  ;;  %vm360_vm9 = vcmp.lt.s32.totalorder %v8699_v6, 15 }
  0xad   :  { %v8582_v52 = vpop.f32.mrf.mxu2  ;;  %v8617_v10 = vpop.f32.mrf.mxu3 }
  0xae   :  { %v8560_v42 = vpop.f32.mrf.mxu0  ;;  %v8562_v43 = vpop.f32.mrf.mxu1 }
  0xaf   :  { %14131 = vst [vmem:[#allocation17_spill] sm:$0xff] %v8562_v43  ;;  %v1753_v25 = vmul.f32 %v8633_v19, %v8560_v42 }
  0xb1   :  { %v1951_v57 = vmul.f32 %v1753_v25, %v1753_v25  ;;  %v1819_v20 = vsel %vm82_vm2, %v1753_v25, 0.0  ;;  %v8690_v25 = vsel %vm356_vm7, 1.0, %v14155_v8 }
  0xb2   :  { %14156 = vst [vmem:[#allocation41_spill] sm:$0xff] %v8690_v25  ;;  %v1820_v41 = vadd.f32 %v1819_v20, %v1818_v29 }
  0xb3   :  { %v2017_v46 = vsel %vm82_vm2, %v1951_v57, 0.0 }
  0xb5   :  { %v8588_v55 = vpop.f32.mrf.mxu2  ;;  %v8645_v26 = vpop.f32.mrf.mxu3 }
  0xb6   :  { %v8566_v45 = vpop.f32.mrf.mxu0  ;;  %v8571_v47 = vpop.f32.mrf.mxu1 }
  0xb7   :  { %14133 = vst [vmem:[#allocation19_spill] sm:$0xff] %v8571_v47  ;;  %v1952_v11 = vmul.f32 %v8566_v45, %v8566_v45  ;;  %v1821_v32 = vsel %vm82_vm2, %v8566_v45, 0.0 }
  0xb8   :  { %v1822_v5 = vadd.f32 %v1821_v32, %v1820_v41 }
  0xb9   :  { %v2019_v62 = vsel %vm82_vm2, %v1952_v11, 0.0 }
  0xbd   :  { %v8598_v61 = vpop.f32.mrf.mxu2  ;;  %v8693_v0 = vpop.f32.mrf.mxu3 }
  0xbe   :  { %v8576_v49 = vpop.f32.mrf.mxu0  ;;  %v8578_v50 = vpop.f32.mrf.mxu1 }
  0xbf   :  { %14135 = vst [vmem:[#allocation21_spill] sm:$0xff] %v8578_v50  ;;  %v1755_v3 = vmul.f32 %v8651_v31, %v8576_v49  ;;  %v172_v31 = vand.u32 255, %v108_v28 }
  0xc1   :  { %v1953_v15 = vmul.f32 %v1755_v3, %v1755_v3  ;;  %v1823_v57 = vsel %vm82_vm2, %v1755_v3, 0.0  ;;  %v106_v3 = vadd.s32 120, %v8594_v59 }
  0xc2   :  { %v1824_v19 = vadd.f32 %v1823_v57, %v1822_v5 }
  0xc3   :  { %v2021_v20 = vsel %vm82_vm2, %v1953_v15, 0.0 }
  0xc5   :  { %v8611_v7 = vpop.f32.mrf.mxu2 }
  0xc6   :  { %v8580_v51 = vpop.f32.mrf.mxu0  ;;  %v8586_v54 = vpop.f32.mrf.mxu1 }
  0xc7   :  { %14137 = vst [vmem:[#allocation23_spill] sm:$0xff] %v8586_v54  ;;  %v1954_v2 = vmul.f32 %v8580_v51, %v8580_v51  ;;  %v1825_v11 = vsel %vm82_vm2, %v8580_v51, 0.0 }
  0xc9   :  { %v2023_v28 = vsel %vm82_vm2, %v1954_v2, 0.0  ;;  %v170_v2 = vand.u32 255, %v106_v3 }
  0xcd   :  { %v8637_v22 = vpop.f32.mrf.mxu2 }
  0xce   :  { %v8584_v53 = vpop.f32.mrf.mxu0  ;;  %v8596_v60 = vpop.f32.mrf.mxu1 }
  0xcf   :  { %14136 = vst [vmem:[#allocation22_spill] sm:$0xff] %v8584_v53  ;;  %v1757_v35 = vmul.f32 %v8670_v12, %v8584_v53  ;;  %v2018_v12 = vadd.f32 %v2017_v46, %v2016_v36  ;;  %v8718_v36 = vand.u32 15, %v172_v31  ;;  %v8728_v31 = vsel %vm360_vm9, 1.0, %v14155_v8 }
  0xd0   :  { %14161 = vst [vmem:[#allocation46_spill] sm:$0xff] %v8728_v31 }
  0xd1   :  { %v1955_v29 = vmul.f32 %v1757_v35, %v1757_v35  ;;  %v2020_v30 = vadd.f32 %v2019_v62, %v2018_v12  ;;  %v1827_v46 = vsel %vm82_vm2, %v1757_v35, 0.0  ;;  %14160 = vst [vmem:[#allocation45_spill] sm:$0xff] %v8718_v36  ;;  %v1826_v12 = vadd.f32 %v1825_v11, %v1824_v19 }
  0xd2   :  { %v112_v11 = vadd.s32 168, %v8594_v59  ;;  %vm364_vm10 = vcmp.lt.s32.totalorder %v8718_v36, 15 }
  0xd3   :  { %v2022_v5 = vadd.f32 %v2021_v20, %v2020_v30  ;;  %v2025_v57 = vsel %vm82_vm2, %v1955_v29, 0.0  ;;  %v1828_v53 = vadd.f32 %v1827_v46, %v1826_v12  ;;  %v8744_v12 = vand.u32 15, %v170_v2 }
  0xd4   :  { %v114_v2 = vadd.s32 184, %v8594_v59 }
  0xd5   :  { %v8683_v23 = vpop.f32.mrf.mxu2  ;;  %v2024_v13 = vadd.f32 %v2023_v28, %v2022_v5  ;;  %14162 = vst [vmem:[#allocation47_spill] sm:$0xff] %v8744_v12  ;;  %vm362_vm11 = vcmp.lt.s32.totalorder %v8744_v12, 15 }
  0xd6   :  { %v8592_v58 = vpop.f32.mrf.mxu0  ;;  %v8606_v4 = vpop.f32.mrf.mxu1  ;;  %v8775_v36 = vsel %vm362_vm11, 1.0, %v14155_v8 }
  0xd7   :  { %14140 = vst [vmem:[#allocation26_spill] sm:$0xff] %v8606_v4  ;;  %v1956_v15 = vmul.f32 %v8592_v58, %v8592_v58 }
  0xd8   :  { %14168 = vst [vmem:[#allocation53_spill] sm:$0xff] %v8775_v36 }
  0xd9   :  { %v2027_v20 = vsel %vm82_vm2, %v1956_v15, 0.0 }
  0xdd   :  { %v8730_v19 = vpop.f32.mrf.mxu2 }
  0xde   :  { %v8604_v1 = vpop.f32.mrf.mxu0  ;;  %v8628_v17 = vpop.f32.mrf.mxu1 }
  0xdf   :  { %14139 = vst [vmem:[#allocation25_spill] sm:$0xff] %v8604_v1  ;;  %v1759_v18 = vmul.f32 %v8690_v25, %v8604_v1  ;;  %v1829_v25 = vsel %vm82_vm2, %v8592_v58, 0.0  ;;  %v174_v1 = vand.u32 255, %v110_v24  ;;  %v8738_v24 = vpop.f32.mrf.mxu3 }
  0xe0   :  { %v1830_v6 = vadd.f32 %v1829_v25, %v1828_v53  ;;  %v176_v25 = vand.u32 255, %v112_v11 }
  0xe1   :  { %v1957_v41 = vmul.f32 %v1759_v18, %v1759_v18  ;;  %v1831_v29 = vsel %vm82_vm2, %v1759_v18, 0.0  ;;  %v8747_v18 = vand.u32 15, %v174_v1 }
  0xe2   :  { %v1832_v53 = vadd.f32 %v1831_v29, %v1830_v6  ;;  %v8768_v29 = vand.u32 15, %v176_v25 }
  0xe3   :  { %v2029_v3 = vsel %vm82_vm2, %v1957_v41, 0.0  ;;  %14163 = vst [vmem:[#allocation48_spill] sm:$0xff] %v8747_v18  ;;  %vm366_vm12 = vcmp.lt.s32.totalorder %v8747_v18, 15  ;;  %v1845_v18 = vsel %vm82_vm2, %v8538_v34, 0.0 }
  0xe4   :  { %14167 = vst [vmem:[#allocation52_spill] sm:$0xff] %v8768_v29  ;;  %vm368_vm13 = vcmp.lt.s32.totalorder %v8768_v29, 15 }
  0xe5   :  { %v8777_v12 = vpop.f32.mrf.mxu2 }
  0xe6   :  { %v8615_v9 = vpop.f32.mrf.mxu0  ;;  %v8675_v16 = vpop.f32.mrf.mxu1 }
  0xe7   :  { %14143 = vst [vmem:[#allocation29_spill] sm:$0xff] %v8615_v9  ;;  %v1958_v30 = vmul.f32 %v8615_v9, %v8615_v9  ;;  %v1833_v28 = vsel %vm82_vm2, %v8615_v9, 0.0 }
  0xe8   :  { %14153 = vst [vmem:[#allocation39_spill] sm:$0xff] %v8675_v16  ;;  %v1834_v9 = vadd.f32 %v1833_v28, %v1832_v53 }
  0xe9   :  { %v2031_v41 = vsel %vm82_vm2, %v1958_v30, 0.0 }
  0xed   :  { %v8826_v29 = vpop.f32.mrf.mxu2 }
  0xee   :  { %v8635_v21 = vpop.f32.mrf.mxu0  ;;  %v8720_v62 = vpop.f32.mrf.mxu1 }
  0xef   :  { %14147 = vst [vmem:[#allocation33_spill] sm:$0xff] %v8635_v21  ;;  %v1761_v35 = vmul.f32 %v8709_v27, %v8635_v21  ;;  %v2026_v27 = vadd.f32 %v2025_v57, %v2024_v13 }
  0xf1   :  { %v1959_v46 = vmul.f32 %v1761_v35, %v1761_v35  ;;  %v2028_v5 = vadd.f32 %v2027_v20, %v2026_v27  ;;  %v1835_v57 = vsel %vm82_vm2, %v1761_v35, 0.0  ;;  %v8763_v27 = vsel %vm364_vm10, 1.0, %v14155_v8 }
  0xf2   :  { %14165 = vst [vmem:[#allocation50_spill] sm:$0xff] %v8763_v27  ;;  %v1836_v20 = vadd.f32 %v1835_v57, %v1834_v9  ;;  %v116_v9 = vadd.s32 200, %v8594_v59 }
  0xf6   :  { %v8673_v14 = vpop.f32.mrf.mxu0  ;;  %v8766_v11 = vpop.f32.mrf.mxu1 }
  0xf7   :  { %14152 = vst [vmem:[#allocation38_spill] sm:$0xff] %v8673_v14  ;;  %v1960_v21 = vmul.f32 %v8673_v14, %v8673_v14  ;;  %v1837_v1 = vsel %vm82_vm2, %v8673_v14, 0.0 }
  0xf8   :  { %14166 = vst [vmem:[#allocation51_spill] sm:$0xff] %v8766_v11 }
  0xf9   :  { %v2035_v30 = vsel %vm82_vm2, %v1960_v21, 0.0 }
  0xfe   :  { %v8711_v32 = vpop.f32.mrf.mxu0 }
  0xff   :  { %14159 = vst [vmem:[#allocation44_spill] sm:$0xff] %v8711_v32  ;;  %v1763_v15 = vmul.f32 %v8728_v31, %v8711_v32  ;;  %v2030_v31 = vadd.f32 %v2029_v3, %v2028_v5  ;;  %v2033_v32 = vsel %vm82_vm2, %v1959_v46, 0.0  ;;  %v178_v46 = vand.u32 255, %v114_v2 }
 0x100   :  { %v1838_v5 = vadd.f32 %v1837_v1, %v1836_v20  ;;  %v1964_v2 = vmul.f32 %v8538_v34, %v8538_v34  ;;  %v8794_v1 = vsel %vm366_vm12, 1.0, %v14155_v8 }
 0x101   :  { %v1961_v6 = vmul.f32 %v1763_v15, %v1763_v15  ;;  %v2032_v35 = vadd.f32 %v2031_v41, %v2030_v31  ;;  %v1839_v3 = vsel %vm82_vm2, %v1763_v15, 0.0  ;;  %v1767_v15 = vmul.f32 %v8763_v27, %v8550_v38  ;;  %14169 = vst [vmem:[#allocation54_spill] sm:$0xff] %v8794_v1 }
 0x102   :  { %v1840_v41 = vadd.f32 %v1839_v3, %v1838_v5  ;;  %v8800_v20 = vand.u32 15, %v178_v46  ;;  %v180_v5 = vand.u32 255, %v116_v9  ;;  %v1966_v46 = vmul.f32 %v8554_v40, %v8554_v40 }
 0x103   :  { %v2034_v53 = vadd.f32 %v2033_v32, %v2032_v35  ;;  %v2037_v31 = vsel %vm82_vm2, %v1961_v6, 0.0  ;;  %v8787_v32 = vpop.f32.mrf.mxu3 }
 0x104   :  { %14170 = vst [vmem:[#allocation55_spill] sm:$0xff] %v8800_v20  ;;  %vm370_vm14 = vcmp.lt.s32.totalorder %v8800_v20, 15 }
 0x105   :  { %v2036_v25 = vadd.f32 %v2035_v30, %v2034_v53  ;;  %v118_v53 = vadd.s32 216, %v8594_v59 }
 0x106   :  { %v8749_v13 = vpop.f32.mrf.mxu0 }
 0x107   :  { %14164 = vst [vmem:[#allocation49_spill] sm:$0xff] %v8749_v13  ;;  %v1962_v28 = vmul.f32 %v8749_v13, %v8749_v13  ;;  %v1841_v21 = vsel %vm82_vm2, %v8749_v13, 0.0  ;;  %v2038_v3 = vadd.f32 %v2037_v31, %v2036_v25  ;;  %v1965_v13 = vmul.f32 %v1767_v15, %v1767_v15 }
 0x108   :  { %v1842_v30 = vadd.f32 %v1841_v21, %v1840_v41  ;;  %v1769_v31 = vmul.f32 %v8794_v1, %v8562_v43  ;;  %v1847_v21 = vsel %vm82_vm2, %v1767_v15, 0.0  ;;  %v8816_v25 = vsel %vm368_vm13, 1.0, %v14155_v8 }
 0x109   :  { %v2039_v6 = vsel %vm82_vm2, %v1962_v28, 0.0  ;;  %14171 = vst [vmem:[#allocation56_spill] sm:$0xff] %v8816_v25  ;;  %v124_v15 = vadd.s32 264, %v8594_v59 }
 0x10a   :  { %v2040_v28 = vadd.f32 %v2039_v6, %v2038_v3 }
 0x10b   :  { %v188_v20 = vand.u32 255, %v124_v15  ;;  %v1970_v15 = vmul.f32 %v8586_v54, %v8586_v54 }
 0x10e   :  { %v8785_v57 = vpop.f32.mrf.mxu0 }
 0x10f   :  { %v1765_v35 = vmul.f32 %v8775_v36, %v8785_v57  ;;  %v2043_v36 = vsel %vm82_vm2, %v1964_v2, 0.0  ;;  %v8821_v2 = vand.u32 15, %v180_v5  ;;  %v1771_v5 = vmul.f32 %v8816_v25, %v8578_v50 }
 0x111   :  { %v1843_v27 = vsel %vm82_vm2, %v1765_v35, 0.0  ;;  %v1963_v38 = vmul.f32 %v1765_v35, %v1765_v35  ;;  %14173 = vst [vmem:[#allocation58_spill] sm:$0xff] %v8821_v2  ;;  %v182_v35 = vand.u32 255, %v118_v53  ;;  %v1968_v53 = vmul.f32 %v8571_v47, %v8571_v47 }
 0x112   :  { %v1844_v14 = vadd.f32 %v1843_v27, %v1842_v30  ;;  %v8818_v27 = vpop.f32.mrf.mxu1  ;;  %v120_v30 = vadd.s32 232, %v8594_v59  ;;  %vm372_vm15 = vcmp.lt.s32.totalorder %v8821_v2, 15  ;;  %v1969_v34 = vmul.f32 %v1771_v5, %v1771_v5 }
 0x113   :  { %v2041_v9 = vsel %vm82_vm2, %v1963_v38, 0.0  ;;  %14172 = vst [vmem:[#allocation57_spill] sm:$0xff] %v8818_v27  ;;  %v2045_v38 = vsel %vm82_vm2, %v1965_v13, 0.0  ;;  %v8836_v13 = vsel %vm370_vm14, 1.0, %v14155_v8 }
 0x114   :  { %v1846_v41 = vadd.f32 %v1845_v18, %v1844_v14  ;;  %v2042_v6 = vadd.f32 %v2041_v9, %v2040_v28  ;;  %v1849_v14 = vsel %vm82_vm2, %v8554_v40, 0.0  ;;  %v2047_v18 = vsel %vm82_vm2, %v1966_v46, 0.0  ;;  %14174 = vst [vmem:[#allocation59_spill] sm:$0xff] %v8836_v13 }
 0x115   :  { %v1967_v28 = vmul.f32 %v1769_v31, %v1769_v31  ;;  %v184_v46 = vand.u32 255, %v120_v30  ;;  %v1853_v40 = vsel %vm82_vm2, %v8571_v47, 0.0  ;;  %v1855_v30 = vsel %vm82_vm2, %v1771_v5, 0.0 }
 0x116   :  { %v1848_v3 = vadd.f32 %v1847_v21, %v1846_v41  ;;  %v2044_v1 = vadd.f32 %v2043_v36, %v2042_v6  ;;  %v8838_v36 = vpop.f32.mrf.mxu3  ;;  %v1851_v41 = vsel %vm82_vm2, %v1769_v31, 0.0  ;;  %v8842_v6 = vand.u32 15, %v182_v35 }
 0x117   :  { %v2049_v50 = vsel %vm82_vm2, %v1967_v28, 0.0  ;;  %v8851_v31 = vsel %vm372_vm15, 1.0, %v14155_v8  ;;  %v126_v28 = vadd.s32 280, %v8594_v59 }
 0x118   :  { %v1850_v9 = vadd.f32 %v1849_v14, %v1848_v3  ;;  %v2046_v21 = vadd.f32 %v2045_v38, %v2044_v1  ;;  %14175 = vst [vmem:[#allocation60_spill] sm:$0xff] %v8842_v6  ;;  %v1773_v1 = vmul.f32 %v8836_v13, %v8596_v60  ;;  %v2051_v38 = vsel %vm82_vm2, %v1968_v53, 0.0 }
 0x119   :  { %14176 = vst [vmem:[#allocation61_spill] sm:$0xff] %v8851_v31  ;;  %vm374_vm0 = vcmp.lt.s32.totalorder %v8842_v6, 15  ;;  %v248_v14 = vand.u32 15, %v184_v46  ;;  %v8870_v46 = vpop.f32.mrf.mxu2 }
 0x11a   :  { %v1852_v43 = vadd.f32 %v1851_v41, %v1850_v9  ;;  %v2048_v25 = vadd.f32 %v2047_v18, %v2046_v21  ;;  %v8857_v18 = vand.u32 15, %v188_v20  ;;  %v8860_v53 = vpop.f32.mrf.mxu1  ;;  %v2053_v41 = vsel %vm82_vm2, %v1969_v34, 0.0 }
 0x11b   :  { %14178 = vst [vmem:[#allocation63_spill] sm:$0xff] %v8860_v53  ;;  %v1972_v34 = vmul.f32 %v8606_v4, %v8606_v4  ;;  %vm376_vm1 = vcmp.lt.s32.totalorder %v248_v14, 15 }
 0x11c   :  { %v1854_v35 = vadd.f32 %v1853_v40, %v1852_v43  ;;  %v2050_v3 = vadd.f32 %v2049_v50, %v2048_v25  ;;  %14177 = vst [vmem:[#allocation62_spill] sm:$0xff] %v8857_v18  ;;  %v1857_v40 = vsel %vm82_vm2, %v8586_v54, 0.0  ;;  %v1971_v43 = vmul.f32 %v1773_v1, %v1773_v1 }
 0x11d   :  { %v1775_v50 = vmul.f32 %v8851_v31, %v8628_v17  ;;  %v8868_v25 = vsel %vm374_vm0, 1.0, %v14155_v8  ;;  %vm380_vm3 = vcmp.lt.s32.totalorder %v8857_v18, 15  ;;  %v8886_v31 = vsel %vm376_vm1, 1.0, %v14155_v8 }
 0x11e   :  { %v2052_v9 = vadd.f32 %v2051_v38, %v2050_v3  ;;  %v1856_v21 = vadd.f32 %v1855_v30, %v1854_v35  ;;  %14179 = vst [vmem:[#allocation64_spill] sm:$0xff] %v8868_v25  ;;  %v2055_v38 = vsel %vm82_vm2, %v1970_v15, 0.0  ;;  %v1859_v35 = vsel %vm82_vm2, %v1773_v1, 0.0  ;;  %v8877_v2 = vpop.f32.mrf.mxu3 }
 0x11f   :  { %v190_v3 = vand.u32 255, %v126_v28  ;;  %v1777_v1 = vmul.f32 %v8868_v25, %v8720_v62  ;;  %v128_v15 = vadd.s32 296, %v8594_v59  ;;  %14180 = vst [vmem:[#allocation65_spill] sm:$0xff] %v8886_v31  ;;  %v2059_v28 = vsel %vm82_vm2, %v1972_v34, 0.0 }
 0x120   :  { %v1858_v20 = vadd.f32 %v1857_v40, %v1856_v21  ;;  %v2054_v5 = vadd.f32 %v2053_v41, %v2052_v9  ;;  %v2057_v21 = vsel %vm82_vm2, %v1971_v43, 0.0  ;;  %v1861_v9 = vsel %vm82_vm2, %v8606_v4, 0.0 }
 0x121   :  { %v1973_v41 = vmul.f32 %v1775_v50, %v1775_v50  ;;  %v1974_v43 = vmul.f32 %v8675_v16, %v8675_v16  ;;  %v1975_v34 = vmul.f32 %v1777_v1, %v1777_v1  ;;  %v130_v25 = vadd.s32 312, %v8594_v59 }
 0x122   :  { %v1860_v30 = vadd.f32 %v1859_v35, %v1858_v20  ;;  %v2056_v6 = vadd.f32 %v2055_v38, %v2054_v5  ;;  %v1863_v20 = vsel %vm82_vm2, %v1775_v50, 0.0  ;;  %v8895_v5 = vsel %vm380_vm3, 1.0, %v14155_v8  ;;  %v8905_v4 = vpop.f32.mrf.mxu1 }
 0x123   :  { %14181 = vst [vmem:[#allocation66_spill] sm:$0xff] %v8895_v5  ;;  %v8897_v38 = vand.u32 15, %v190_v3  ;;  %v1779_v50 = vmul.f32 %v8886_v31, %v8818_v27  ;;  %v2063_v3 = vsel %vm82_vm2, %v1974_v43, 0.0  ;;  %v1869_v43 = vsel %vm82_vm2, %v8766_v11, 0.0 }
 0x124   :  { %v1862_v40 = vadd.f32 %v1861_v9, %v1860_v30  ;;  %v2058_v14 = vadd.f32 %v2057_v21, %v2056_v6  ;;  %v2061_v6 = vsel %vm82_vm2, %v1973_v41, 0.0  ;;  %v1865_v21 = vsel %vm82_vm2, %v8675_v16, 0.0  ;;  %14183 = vst [vmem:[#allocation68_spill] sm:$0xff] %v8905_v4 }
 0x125   :  { %14182 = vst [vmem:[#allocation67_spill] sm:$0xff] %v8897_v38  ;;  %v192_v9 = vand.u32 255, %v128_v15  ;;  %v1976_v41 = vmul.f32 %v8766_v11, %v8766_v11  ;;  %vm382_vm4 = vcmp.lt.s32.totalorder %v8897_v38, 15  ;;  %v194_v31 = vand.u32 255, %v130_v25  ;;  %v8234_v25 = vld [vmem:[#allocation6 + $0x8] sm:$0xff] }
 0x126   :  { %v1864_v35 = vadd.f32 %v1863_v20, %v1862_v40  ;;  %v2060_v30 = vadd.f32 %v2059_v28, %v2058_v14  ;;  %v1867_v40 = vsel %vm82_vm2, %v1777_v1, 0.0  ;;  %v1780_v14 = vmul.f32 0.0, %v8860_v53  ;;  %v8235_v53 = vld [vmem:[#allocation6 + $0x10] sm:$0xff]  ;;  %2916 = vmatpush.bf16.msrb.mxu1 %v8234_v25 }
 0x127   :  { %v1783_v28 = vmul.f32 %v8895_v5, %v8573_v48  ;;  %v1977_v1 = vmul.f32 %v1779_v50, %v1779_v50  ;;  %v8923_v5 = vpop.f32.mrf.mxu3  ;;  %3557 = vmatpush.bf16.msrb.mxu3 %v8235_v53  ;;  %v134_v27 = vadd.s32 344, %v8594_v59 }
 0x128   :  { %v1866_v13 = vadd.f32 %v1865_v21, %v1864_v35  ;;  %v2062_v18 = vadd.f32 %v2061_v6, %v2060_v30  ;;  %v8915_v35 = vpop.f32.mrf.mxu2  ;;  %v2065_v30 = vsel %vm82_vm2, %v1975_v34, 0.0  ;;  %v1781_v6 = vmul.f32 0.0, %v8905_v4 }
 0x129   :  { %v8921_v21 = vand.u32 15, %v192_v9  ;;  %v1978_v34 = vmul.f32 %v1780_v14, %v1780_v14  ;;  %v1981_v11 = vmul.f32 %v1783_v28, %v1783_v28  ;;  %v8233_v9 = vld [vmem:[#allocation6] sm:$0xff]  ;;  %v1879_v53 = vsel %vm82_vm2, %v1783_v28, 0.0 }
 0x12a   :  { %v1868_v15 = vadd.f32 %v1867_v40, %v1866_v13  ;;  %v2064_v20 = vadd.f32 %v2063_v3, %v2062_v18  ;;  %v2067_v13 = vsel %vm82_vm2, %v1976_v41, 0.0  ;;  %v1871_v18 = vsel %vm82_vm2, %v1779_v50, 0.0  ;;  %3187 = vmatpush.bf16.msrb.mxu2 %v8233_v9 }
 0x12b   :  { %14184 = vst [vmem:[#allocation69_spill] sm:$0xff] %v8921_v21  ;;  %v132_v3 = vadd.s32 328, %v8594_v59  ;;  %v1980_v40 = vmul.f32 %v8564_v44, %v8564_v44  ;;  %v2069_v41 = vsel %vm82_vm2, %v1977_v1, 0.0  ;;  %v1873_v50 = vsel %vm82_vm2, %v1780_v14, 0.0  ;;  %v14226_v47 = vld [vmem:[#allocation68_spill] sm:$0xff] }
 0x12c   :  { %v1870_v16 = vadd.f32 %v1869_v43, %v1868_v15  ;;  %v2066_v54 = vadd.f32 %v2065_v30, %v2064_v20  ;;  %v8933_v15 = vsel %vm382_vm4, 1.0, %v14155_v8  ;;  %v1979_v20 = vmul.f32 %v1781_v6, %v1781_v6  ;;  %v8236_v30 = vld [vmem:[#allocation6 + $0x18] sm:$0xff] }
 0x12d   :  { %14185 = vst [vmem:[#allocation70_spill] sm:$0xff] %v8933_v15  ;;  %vm384_vm5 = vcmp.lt.s32.totalorder %v8921_v21, 15  ;;  %v8938_v43 = vand.u32 15, %v194_v31  ;;  %v1875_v38 = vsel %vm82_vm2, %v1781_v6, 0.0  ;;  %3991 = vmatpush.bf16.msrb.mxu0 %v8236_v30  ;;  %v1877_v14 = vsel %vm82_vm2, %v8564_v44, 0.0 }
 0x12e   :  { %v2068_v48 = vadd.f32 %v2067_v13, %v2066_v54  ;;  %v1872_v4 = vadd.f32 %v1871_v18, %v1870_v16  ;;  %v196_v13 = vand.u32 255, %v132_v3  ;;  %v2071_v18 = vsel %vm82_vm2, %v1978_v34, 0.0 }
 0x12f   :  { %14186 = vst [vmem:[#allocation71_spill] sm:$0xff] %v8938_v43  ;;  %v1785_v31 = vmul.f32 %v8933_v15, %v8588_v55  ;;  %v1982_v3 = vmul.f32 %v8582_v52, %v8582_v52  ;;  %v2073_v6 = vsel %vm82_vm2, %v1979_v20, 0.0  ;;  %v2077_v34 = vsel %vm82_vm2, %v1981_v11, 0.0 }
 0x130   :  { %v2070_v54 = vadd.f32 %v2069_v41, %v2068_v48  ;;  %v1874_v16 = vadd.f32 %v1873_v50, %v1872_v4  ;;  %v2075_v4 = vsel %vm82_vm2, %v1980_v40, 0.0  ;;  %v8956_v9 = vsel %vm384_vm5, 1.0, %v14155_v8  ;;  %v8958_v50 = vpop.f32.mrf.mxu2 }
 0x131   :  { %14187 = vst [vmem:[#allocation72_spill] sm:$0xff] %v8956_v9  ;;  %vm386_vm6 = vcmp.lt.s32.totalorder %v8938_v43, 15  ;;  %v198_v28 = vand.u32 255, %v134_v27  ;;  %v136_v40 = vadd.s32 360, %v8594_v59  ;;  %v1983_v30 = vmul.f32 %v1785_v31, %v1785_v31 }
 0x132   :  { %v2072_v1 = vadd.f32 %v2071_v18, %v2070_v54  ;;  %v1876_v48 = vadd.f32 %v1875_v38, %v1874_v16  ;;  %14188 = vst [vmem:[#allocation73_spill] sm:$0xff] %v8958_v50  ;;  %v8961_v38 = vand.u32 15, %v196_v13  ;;  %v140_v20 = vadd.s32 392, %v8594_v59  ;;  %v8965_v16 = vpop.f32.mrf.mxu3 }
 0x133   :  { %v1881_v18 = vsel %vm82_vm2, %v8582_v52, 0.0  ;;  %v1787_v27 = vmul.f32 %v8956_v9, %v8611_v7  ;;  %v1883_v13 = vsel %vm82_vm2, %v1785_v31, 0.0  ;;  %v1885_v31 = vsel %vm82_vm2, %v8598_v61, 0.0 }
 0x134   :  { %v1878_v25 = vadd.f32 %v1877_v14, %v1876_v48  ;;  %v2074_v41 = vadd.f32 %v2073_v6, %v2072_v1  ;;  %14189 = vst [vmem:[#allocation74_spill] sm:$0xff] %v8961_v38  ;;  %v2079_v14 = vsel %vm82_vm2, %v1982_v3, 0.0  ;;  %v1984_v1 = vmul.f32 %v8598_v61, %v8598_v61 }
 0x135   :  { %v8976_v48 = vsel %vm386_vm6, 1.0, %v14155_v8  ;;  %vm388_vm7 = vcmp.lt.s32.totalorder %v8961_v38, 15  ;;  %v8979_v6 = vand.u32 15, %v198_v28  ;;  %v138_v3 = vadd.s32 376, %v8594_v59 }
 0x136   :  { %v1880_v11 = vadd.f32 %v1879_v53, %v1878_v25  ;;  %v2076_v54 = vadd.f32 %v2075_v4, %v2074_v41  ;;  %14190 = vst [vmem:[#allocation75_spill] sm:$0xff] %v8976_v48  ;;  %v200_v25 = vand.u32 255, %v136_v40  ;;  %v2081_v41 = vsel %vm82_vm2, %v1983_v30, 0.0 }
 0x137   :  { %14191 = vst [vmem:[#allocation76_spill] sm:$0xff] %v8979_v6  ;;  %v204_v43 = vand.u32 255, %v140_v20  ;;  %v2083_v9 = vsel %vm82_vm2, %v1984_v1, 0.0  ;;  %v1985_v44 = vmul.f32 %v1787_v27, %v1787_v27  ;;  %v1986_v28 = vmul.f32 %v8637_v22, %v8637_v22 }
 0x138   :  { %v1882_v53 = vadd.f32 %v1881_v18, %v1880_v11  ;;  %v2078_v4 = vadd.f32 %v2077_v34, %v2076_v54  ;;  %v1789_v34 = vmul.f32 %v8976_v48, %v8683_v23  ;;  %v8991_v40 = vsel %vm388_vm7, 1.0, %v14155_v8 }
 0x139   :  { %14192 = vst [vmem:[#allocation77_spill] sm:$0xff] %v8991_v40  ;;  %v1887_v20 = vsel %vm82_vm2, %v1787_v27, 0.0  ;;  %vm390_vm8 = vcmp.lt.s32.totalorder %v8979_v6, 15  ;;  %v8995_v54 = vand.u32 15, %v200_v25  ;;  %v202_v18 = vand.u32 255, %v138_v3 }
 0x13a   :  { %v1884_v21 = vadd.f32 %v1883_v13, %v1882_v53  ;;  %v2080_v15 = vadd.f32 %v2079_v14, %v2078_v4  ;;  %v8997_v14 = vand.u32 15, %v204_v43  ;;  %v142_v1 = vadd.s32 408, %v8594_v59  ;;  %v9000_v4 = vpop.f32.mrf.mxu2 }
 0x13b   :  { %14193 = vst [vmem:[#allocation78_spill] sm:$0xff] %v8995_v54  ;;  %v2085_v38 = vsel %vm82_vm2, %v1985_v44, 0.0  ;;  %v1791_v27 = vmul.f32 %v8991_v40, %v8777_v12  ;;  %v2087_v25 = vsel %vm82_vm2, %v1986_v28, 0.0  ;;  %v9009_v43 = vsel %vm390_vm8, 1.0, %v14155_v8 }
 0x13c   :  { %v1886_v11 = vadd.f32 %v1885_v31, %v1884_v21  ;;  %v2082_v30 = vadd.f32 %v2081_v41, %v2080_v15  ;;  %14194 = vst [vmem:[#allocation79_spill] sm:$0xff] %v8997_v14  ;;  %v1889_v21 = vsel %vm82_vm2, %v8637_v22, 0.0  ;;  %v1987_v15 = vmul.f32 %v1789_v34, %v1789_v34 }
 0x13d   :  { %14195 = vst [vmem:[#allocation80_spill] sm:$0xff] %v9009_v43  ;;  %v1891_v31 = vsel %vm82_vm2, %v1789_v34, 0.0  ;;  %v1988_v44 = vmul.f32 %v8730_v19, %v8730_v19  ;;  %vm392_vm9 = vcmp.lt.s32.totalorder %v8995_v54, 15  ;;  %v1793_v34 = vmul.f32 %v9009_v43, %v8870_v46 }
 0x13e   :  { %v2084_v13 = vadd.f32 %v2083_v9, %v2082_v30  ;;  %v1888_v53 = vadd.f32 %v1887_v20, %v1886_v11  ;;  %v9011_v9 = vpop.f32.mrf.mxu3  ;;  %v9017_v11 = vand.u32 15, %v202_v18  ;;  %v206_v30 = vand.u32 255, %v142_v1 }
 0x13f   :  { %v144_v20 = vadd.s32 424, %v8594_v59  ;;  %v2089_v40 = vsel %vm82_vm2, %v1987_v15, 0.0  ;;  %vm396_vm10 = vcmp.lt.s32.totalorder %v8997_v14, 15  ;;  %v9027_v18 = vsel %vm392_vm9, 1.0, %v14155_v8 }
 0x140   :  { %v1890_v3 = vadd.f32 %v1889_v21, %v1888_v53  ;;  %v2086_v41 = vadd.f32 %v2085_v38, %v2084_v13  ;;  %14196 = vst [vmem:[#allocation81_spill] sm:$0xff] %v9017_v11  ;;  %v1893_v38 = vsel %vm82_vm2, %v8730_v19, 0.0  ;;  %v1989_v13 = vmul.f32 %v1791_v27, %v1791_v27 }
 0x141   :  { %14197 = vst [vmem:[#allocation82_spill] sm:$0xff] %v9027_v18  ;;  %v2091_v1 = vsel %vm82_vm2, %v1988_v44, 0.0  ;;  %v1990_v15 = vmul.f32 %v8826_v29, %v8826_v29  ;;  %vm394_vm11 = vcmp.lt.s32.totalorder %v9017_v11, 15  ;;  %v1795_v44 = vmul.f32 %v9027_v18, %v8958_v50 }
 0x142   :  { %v1892_v28 = vadd.f32 %v1891_v31, %v1890_v3  ;;  %v2088_v6 = vadd.f32 %v2087_v25, %v2086_v41  ;;  %v1895_v25 = vsel %vm82_vm2, %v1791_v27, 0.0  ;;  %v9034_v3 = vand.u32 15, %v206_v30  ;;  %v9045_v30 = vpop.f32.mrf.mxu2 }
 0x143   :  { %v208_v41 = vand.u32 255, %v144_v20  ;;  %v146_v27 = vadd.s32 440, %v8594_v59  ;;  %v9043_v11 = vsel %vm394_vm11, 1.0, %v14155_v8  ;;  %14200 = vst [vmem:[#allocation85_spill] sm:$0xff] %v9045_v30  ;;  %v2095_v20 = vsel %vm82_vm2, %v1990_v15, 0.0 }
 0x144   :  { %v1894_v53 = vadd.f32 %v1893_v38, %v1892_v28  ;;  %v2090_v21 = vadd.f32 %v2089_v40, %v2088_v6  ;;  %14198 = vst [vmem:[#allocation83_spill] sm:$0xff] %v9034_v3  ;;  %v2093_v28 = vsel %vm82_vm2, %v1989_v13, 0.0  ;;  %v1897_v6 = vsel %vm82_vm2, %v8826_v29, 0.0 }
 0x145   :  { %v1991_v40 = vmul.f32 %v1793_v34, %v1793_v34  ;;  %14199 = vst [vmem:[#allocation84_spill] sm:$0xff] %v9043_v11  ;;  %v1899_v13 = vsel %vm82_vm2, %v1793_v34, 0.0  ;;  %vm398_vm12 = vcmp.lt.s32.totalorder %v9034_v3, 15  ;;  %v1901_v15 = vsel %vm82_vm2, %v8915_v35, 0.0 }
 0x146   :  { %v1896_v31 = vadd.f32 %v1895_v25, %v1894_v53  ;;  %v2092_v54 = vadd.f32 %v2091_v1, %v2090_v21  ;;  %v1992_v53 = vmul.f32 %v8915_v35, %v8915_v35  ;;  %v9054_v21 = vsel %vm396_vm10, 1.0, %v14155_v8  ;;  %v9057_v25 = vpop.f32.mrf.mxu3 }
 0x147   :  { %14201 = vst [vmem:[#allocation86_spill] sm:$0xff] %v9054_v21  ;;  %v1993_v34 = vmul.f32 %v1795_v44, %v1795_v44  ;;  %v210_v14 = vand.u32 255, %v146_v27  ;;  %v9078_v27 = vsel %vm398_vm12, 1.0, %v14155_v8  ;;  %vm86_vm6 = vcmask 261120  }
 0x148   :  { %v1898_v38 = vadd.f32 %v1897_v6, %v1896_v31  ;;  %v2094_v43 = vadd.f32 %v2093_v28, %v2092_v54  ;;  %v2097_v31 = vsel %vm82_vm2, %v1991_v40, 0.0  ;;  %v1797_v28 = vmul.f32 %v9043_v11, %v9045_v30  ;;  %14203 = vst [vmem:[#allocation88_spill] sm:$0xff] %v9078_v27 }
 0x149   :  { %v9064_v6 = vand.u32 15, %v208_v41  ;;  %v2099_v50 = vsel %vm82_vm2, %v1992_v53, 0.0  ;;  %v1994_v40 = vmul.f32 %v9000_v4, %v9000_v4  ;;  %v1905_v53 = vsel %vm82_vm2, %v9000_v4, 0.0 }
 0x14a   :  { %v1900_v54 = vadd.f32 %v1899_v13, %v1898_v38  ;;  %v2096_v1 = vadd.f32 %v2095_v20, %v2094_v43  ;;  %v1903_v43 = vsel %vm82_vm2, %v1795_v44, 0.0  ;;  %v148_v38 = vadd.s32 456, %v8594_v59 }
 0x14b   :  { %14202 = vst [vmem:[#allocation87_spill] sm:$0xff] %v9064_v6  ;;  %v1996_v20 = vmul.f32 %v8590_v56, %v8590_v56  ;;  %v1799_v13 = vmul.f32 %v9054_v21, %v8601_v63  ;;  %v2101_v44 = vsel %vm82_vm2, %v1993_v34, 0.0  ;;  %vm400_vm13 = vcmp.lt.s32.totalorder %v9064_v6, 15 }
 0x14c   :  { %v1902_v18 = vadd.f32 %v1901_v15, %v1900_v54  ;;  %v2098_v48 = vadd.f32 %v2097_v31, %v2096_v1  ;;  %v1995_v54 = vmul.f32 %v1797_v28, %v1797_v28  ;;  %v9084_v1 = vand.u32 15, %v210_v14 }
 0x14d   :  { %v212_v21 = vand.u32 255, %v148_v38  ;;  %v1909_v34 = vsel %vm82_vm2, %v8590_v56, 0.0  ;;  %v2107_v30 = vsel %vm82_vm2, %v1996_v20, 0.0  ;;  %v1998_v14 = vmul.f32 %v8617_v10, %v8617_v10 }
 0x14e   :  { %v2100_v41 = vadd.f32 %v2099_v50, %v2098_v48  ;;  %v1904_v11 = vadd.f32 %v1903_v43, %v1902_v18  ;;  %14204 = vst [vmem:[#allocation89_spill] sm:$0xff] %v9084_v1  ;;  %v2103_v50 = vsel %vm82_vm2, %v1994_v40, 0.0  ;;  %v1907_v48 = vsel %vm82_vm2, %v1797_v28, 0.0 }
 0x14f   :  { %v150_v18 = vadd.s32 472, %v8594_v59  ;;  %v1997_v43 = vmul.f32 %v1799_v13, %v1799_v13  ;;  %v2105_v38 = vsel %vm82_vm2, %v1995_v54, 0.0  ;;  %v1911_v28 = vsel %vm82_vm2, %v1799_v13, 0.0 }
 0x150   :  { %v1906_v31 = vadd.f32 %v1905_v53, %v1904_v11  ;;  %v2102_v15 = vadd.f32 %v2101_v44, %v2100_v41  ;;  %v1801_v11 = vmul.f32 %v9078_v27, %v8645_v26  ;;  %v9101_v40 = vsel %vm400_vm13, 1.0, %v14155_v8  ;;  %v9103_v53 = vpop.f32.mrf.mxu3 }
 0x151   :  { %14205 = vst [vmem:[#allocation90_spill] sm:$0xff] %v9101_v40  ;;  %vm402_vm14 = vcmp.lt.s32.totalorder %v9084_v1, 15  ;;  %v9106_v20 = vand.u32 15, %v212_v21  ;;  %v2109_v54 = vsel %vm82_vm2, %v1997_v43, 0.0  ;;  %v2111_v6 = vsel %vm82_vm2, %v1998_v14, 0.0 }
 0x152   :  { %v2104_v3 = vadd.f32 %v2103_v50, %v2102_v15  ;;  %v1908_v63 = vadd.f32 %v1907_v48, %v1906_v31  ;;  %v214_v31 = vand.u32 255, %v150_v18  ;;  %v152_v15 = vadd.s32 488, %v8594_v59 }
 0x153   :  { %14206 = vst [vmem:[#allocation91_spill] sm:$0xff] %v9106_v20  ;;  %v1913_v48 = vsel %vm82_vm2, %v8617_v10, 0.0  ;;  %v2000_v21 = vmul.f32 %v8693_v0, %v8693_v0  ;;  %v9118_v18 = vsel %vm402_vm14, 1.0, %v14155_v8  ;;  %v1915_v43 = vsel %vm82_vm2, %v1801_v11, 0.0 }
 0x154   :  { %v1910_v41 = vadd.f32 %v1909_v34, %v1908_v63  ;;  %v2106_v44 = vadd.f32 %v2105_v38, %v2104_v3  ;;  %v1999_v63 = vmul.f32 %v1801_v11, %v1801_v11  ;;  %v1803_v3 = vmul.f32 %v9101_v40, %v8738_v24  ;;  %14207 = vst [vmem:[#allocation92_spill] sm:$0xff] %v9118_v18 }
 0x155   :  { %vm404_vm15 = vcmp.lt.s32.totalorder %v9106_v20, 15  ;;  %v216_v38 = vand.u32 255, %v152_v15  ;;  %v1805_v40 = vmul.f32 %v9118_v18, %v8838_v36  ;;  %v1933_v20 = vsel %vm82_vm2, %v9057_v25, 0.0 }
 0x156   :  { %v1912_v50 = vadd.f32 %v1911_v28, %v1910_v41  ;;  %v2108_v13 = vadd.f32 %v2107_v30, %v2106_v44  ;;  %v9122_v30 = vand.u32 15, %v214_v31  ;;  %v2113_v41 = vsel %vm82_vm2, %v1999_v63, 0.0 }
 0x157   :  { %v1917_v44 = vsel %vm82_vm2, %v8693_v0, 0.0  ;;  %v2001_v1 = vmul.f32 %v1803_v3, %v1803_v3  ;;  %v9131_v11 = vsel %vm404_vm15, 1.0, %v14155_v8  ;;  %v1919_v15 = vsel %vm82_vm2, %v1803_v3, 0.0 }
 0x158   :  { %v1914_v59 = vadd.f32 %v1913_v48, %v1912_v50  ;;  %v2110_v34 = vadd.f32 %v2109_v54, %v2108_v13  ;;  %14208 = vst [vmem:[#allocation93_spill] sm:$0xff] %v9122_v30  ;;  %v2115_v54 = vsel %vm82_vm2, %v2000_v21, 0.0  ;;  %vm406_vm0 = vcmp.lt.s32.totalorder %v9122_v30, 15 }
 0x159   :  { %14209 = vst [vmem:[#allocation94_spill] sm:$0xff] %v9131_v11  ;;  %v280_v13 = vand.u32 15, %v216_v38  ;;  %v1921_v21 = vsel %vm82_vm2, %v8787_v32, 0.0  ;;  %v9145_v3 = vsel %vm406_vm0, 1.0, %v14155_v8 }
 0x15a   :  { %v1916_v14 = vadd.f32 %v1915_v43, %v1914_v59  ;;  %v2112_v28 = vadd.f32 %v2111_v6, %v2110_v34  ;;  %v2002_v6 = vmul.f32 %v8787_v32, %v8787_v32  ;;  %v9137_v59 = vpop.f32.mrf.mxu3  ;;  %v2117_v34 = vsel %vm82_vm2, %v2001_v1, 0.0  ;;  %14210 = vst [vmem:[#allocation95_spill] sm:$0xff] %v9145_v3 }
 0x15b   :  { %v2003_v43 = vmul.f32 %v1805_v40, %v1805_v40  ;;  %vm408_vm1 = vcmp.lt.s32.totalorder %v280_v13, 15 }
 0x15c   :  { %v1918_v50 = vadd.f32 %v1917_v44, %v1916_v14  ;;  %v2114_v31 = vadd.f32 %v2113_v41, %v2112_v28  ;;  %v1807_v14 = vmul.f32 %v9131_v11, %v8923_v5  ;;  %v2119_v38 = vsel %vm82_vm2, %v2002_v6, 0.0 }
 0x15d   :  { %v1923_v44 = vsel %vm82_vm2, %v1805_v40, 0.0  ;;  %v9157_v6 = vsel %vm408_vm1, 1.0, %v14155_v8 }
 0x15e   :  { %v2116_v48 = vadd.f32 %v2115_v54, %v2114_v31  ;;  %v1920_v63 = vadd.f32 %v1919_v15, %v1918_v50  ;;  %v2004_v54 = vmul.f32 %v8877_v2, %v8877_v2  ;;  %v2121_v31 = vsel %vm82_vm2, %v2003_v43, 0.0  ;;  %14211 = vst [vmem:[#allocation96_spill] sm:$0xff] %v9157_v6 }
 0x15f   :  { %v1925_v15 = vsel %vm82_vm2, %v8877_v2, 0.0  ;;  %v2005_v30 = vmul.f32 %v1807_v14, %v1807_v14  ;;  %v1927_v13 = vsel %vm82_vm2, %v1807_v14, 0.0 }
 0x160   :  { %v1922_v28 = vadd.f32 %v1921_v21, %v1920_v63  ;;  %v2118_v41 = vadd.f32 %v2117_v34, %v2116_v48  ;;  %v1809_v63 = vmul.f32 %v9145_v3, %v9011_v9  ;;  %v2123_v40 = vsel %vm82_vm2, %v2004_v54, 0.0 }
 0x161   :  { %v2006_v21 = vmul.f32 %v8965_v16, %v8965_v16 }
 0x162   :  { %v1924_v1 = vadd.f32 %v1923_v44, %v1922_v28  ;;  %v2120_v50 = vadd.f32 %v2119_v38, %v2118_v41  ;;  %v2125_v41 = vsel %vm82_vm2, %v2005_v30, 0.0  ;;  %v1929_v38 = vsel %vm82_vm2, %v8965_v16, 0.0 }
 0x163   :  { %v2007_v44 = vmul.f32 %v1809_v63, %v1809_v63  ;;  %v2127_v14 = vsel %vm82_vm2, %v2006_v21, 0.0  ;;  %v1931_v54 = vsel %vm82_vm2, %v1809_v63, 0.0  ;;  %v1812_v30 = vmul.f32 0.0, %v9137_v59 }
 0x164   :  { %v1926_v48 = vadd.f32 %v1925_v15, %v1924_v1  ;;  %v2122_v34 = vadd.f32 %v2121_v31, %v2120_v50  ;;  %v1811_v1 = vmul.f32 %v9157_v6, %v9103_v53  ;;  %v9168_v15 = vpop.f32.mrf.mxu3 }
 0x165   :  { %v2010_v8 = vmul.f32 %v1812_v30, %v1812_v30 }
 0x166   :  { %v1928_v43 = vadd.f32 %v1927_v13, %v1926_v48  ;;  %v2124_v28 = vadd.f32 %v2123_v40, %v2122_v34  ;;  %v2008_v48 = vmul.f32 %v9057_v25, %v9057_v25  ;;  %v2129_v13 = vsel %vm82_vm2, %v2007_v44, 0.0 }
 0x167   :  { %v1935_v63 = vsel %vm82_vm2, %v1811_v1, 0.0  ;;  %v2135_v11 = vsel %vm82_vm2, %v2010_v8, 0.0 }
 0x168   :  { %v1930_v50 = vadd.f32 %v1929_v38, %v1928_v43  ;;  %v2126_v31 = vadd.f32 %v2125_v41, %v2124_v28  ;;  %v2009_v43 = vmul.f32 %v1811_v1, %v1811_v1  ;;  %v1813_v28 = vmul.f32 0.0, %v9168_v15 }
 0x169   :  { %v2131_v21 = vsel %vm82_vm2, %v2008_v48, 0.0 }
 0x16a   :  { %v1932_v34 = vadd.f32 %v1931_v54, %v1930_v50  ;;  %v2128_v40 = vadd.f32 %v2127_v14, %v2126_v31  ;;  %v2133_v50 = vsel %vm82_vm2, %v2009_v43, 0.0  ;;  %v1937_v31 = vsel %vm82_vm2, %v1812_v30, 0.0 }
 0x16b   :  { %v2011_v44 = vmul.f32 %v1813_v28, %v1813_v28  ;;  %v1939_v18 = vsel %vm82_vm2, %v1813_v28, 0.0 }
 0x16c   :  { %v1934_v41 = vadd.f32 %v1933_v20, %v1932_v34  ;;  %v2130_v38 = vadd.f32 %v2129_v13, %v2128_v40 }
 0x16d   :  { %v2137_v48 = vsel %vm82_vm2, %v2011_v44, 0.0 }
 0x16e   :  { %v2132_v6 = vadd.f32 %v2131_v21, %v2130_v38  ;;  %v1936_v3 = vadd.f32 %v1935_v63, %v1934_v41 }
 0x170   :  { %v2134_v14 = vadd.f32 %v2133_v50, %v2132_v6  ;;  %v1938_v54 = vadd.f32 %v1937_v31, %v1936_v3 }
 0x172   :  { %v2136_v20 = vadd.f32 %v2135_v11, %v2134_v14  ;;  %v1940_v34 = vadd.f32 %v1939_v18, %v1938_v54 }
 0x174   :  { %v1941_v40 = vrot.slane %v1940_v34, 4  ;;  %v2138_v1 = vadd.f32 %v2137_v48, %v2136_v20 }
 0x176   :  { %v1942_v13 = vadd.f32 %v1941_v40, %v1940_v34  ;;  %v2139_v38 = vrot.slane %v2138_v1, 4 }
 0x178   :  { %v1943_v41 = vrot.slane %v1942_v13, 2  ;;  %v2140_v21 = vadd.f32 %v2139_v38, %v2138_v1  ;;  %v14223_v38 = vld [vmem:[#allocation21_spill] sm:$0xff] }
 0x17a   :  { %v1944_v43 = vadd.f32 %v1943_v41, %v1942_v13  ;;  %v2141_v63 = vrot.slane %v2140_v21, 2  ;;  %v14212_v41 = vld [vmem:[#allocation22_spill] sm:$0xff] }
 0x17c   :  { %v1945_v30 = vrot.slane %v1944_v43, 1  ;;  %v2142_v27 = vadd.f32 %v2141_v63, %v2140_v21  ;;  %v14213_v63 = vld [vmem:[#allocation25_spill] sm:$0xff] }
 0x17d   :  { %v9266_v21 = vld [vmem:[#allocation9 + $0x1] ss:$0 sm:$0xff] }
 0x17e   :  { %v1946_v6 = vadd.f32 %v1945_v30, %v1944_v43  ;;  %v2143_v3 = vrot.slane %v2142_v27, 1  ;;  %14228 = vst [vmem:[#allocation22_spill] sm:$0xff] %v9266_v21 }
 0x180   :  { %v9186_v50 = vmul.f32 0.0022222223, %v1946_v6  ;;  %v2144_v8 = vadd.f32 %v2143_v3, %v2142_v27  ;;  %v14214_v6 = vld [vmem:[#allocation29_spill] sm:$0xff]  ;;  %v14220_v3 = vld [vmem:[#allocation15_spill] sm:$0xff] }
 0x182   :  { %v2145_v28 = vmul.f32 0.0022222223, %v2144_v8  ;;  %v2146_v18 = vmul.f32 %v9186_v50, %v9186_v50  ;;  %v2212_v54 = vsub.f32 %v9168_v15, %v9186_v50  ;;  %v2166_v40 = vsub.f32 %v14220_v3, %v9186_v50 }
 0x183   :  { %v2170_v34 = vsub.f32 %v14223_v38, %v9186_v50  ;;  %v2172_v1 = vsub.f32 %v8596_v60, %v9186_v50  ;;  %v2174_v3 = vsub.f32 %v8628_v17, %v9186_v50  ;;  %v2176_v27 = vsub.f32 %v8720_v62, %v9186_v50  ;;  %v14227_v60 = vld [vmem:[#allocation20_spill] sm:$0xff] }
 0x184   :  { %v2147_v11 = vsub.f32 %v2145_v28, %v2146_v18  ;;  %v14225_v28 = vld [vmem:[#allocation63_spill] sm:$0xff]  ;;  %v2180_v38 = vsub.f32 %v14226_v47, %v9186_v50  ;;  %v2182_v30 = vsub.f32 %v14227_v60, %v9186_v50  ;;  %v2183_v17 = vsub.f32 %v8582_v52, %v9186_v50  ;;  %v14231_v18 = vld [vmem:[#allocation24_spill] sm:$0xff] }
 0x185   :  { %v2179_v13 = vsub.f32 %v14225_v28, %v9186_v50  ;;  %v2184_v62 = vsub.f32 %v8588_v55, %v9186_v50  ;;  %v2186_v47 = vsub.f32 %v8611_v7, %v9186_v50  ;;  %v2187_v28 = vsub.f32 %v8637_v22, %v9186_v50 }
 0x186   :  { %v2148_v31 = vmax.f32 %v2147_v11, 0.0  ;;  %v2188_v60 = vsub.f32 %v8683_v23, %v9186_v50  ;;  %v2189_v55 = vsub.f32 %v8730_v19, %v9186_v50  ;;  %v2192_v7 = vsub.f32 %v8870_v46, %v9186_v50  ;;  %v14229_v23 = vld [vmem:[#allocation73_spill] sm:$0xff] }
 0x187   :  { %v2193_v22 = vsub.f32 %v8915_v35, %v9186_v50  ;;  %v2198_v46 = vsub.f32 %v14231_v18, %v9186_v50  ;;  %v2199_v35 = vsub.f32 %v8617_v10, %v9186_v50  ;;  %v2204_v18 = vsub.f32 %v8838_v36, %v9186_v50 }
 0x188   :  { %v2213_v44 = vadd.f32 1e-05, %v2148_v31  ;;  %v2205_v10 = vsub.f32 %v8877_v2, %v9186_v50 }
 0x18a   :  { %8261 = vrsqrt.f32 %v2213_v44  ;;  %vm2220_vm4 = vweird.f32 %v2213_v44 }
 0x190   :  { %v8262_v14 = vpop.eup %8261 }
 0x191   :  { %v2215_v20 = vmul.f32 %v8262_v14, %v2213_v44  ;;  %vm2221_vm3 = vweird.f32 %v8262_v14  ;;  %v9248_v44 = vld [vmem:[#allocation9] ss:$0 sm:$0xff] }
 0x192   :  { %vm2222_vm5 = vmor %vm2220_vm4, %vm2221_vm3 }
 0x193   :  { %v2216_v15 = vmul.f32 %v8262_v14, %v2215_v20  ;;  %v14230_v20 = vld [vmem:[#allocation85_spill] sm:$0xff] }
 0x195   :  { %v2217_v31 = vmul.f32 0.5, %v2216_v15  ;;  %v14222_v15 = vld [vmem:[#allocation17_spill] sm:$0xff] }
 0x196   :  { %v2168_v11 = vsub.f32 %v14222_v15, %v9186_v50 }
 0x197   :  { %v2218_v48 = vsub.f32 1.5, %v2217_v31  ;;  %v14224_v31 = vld [vmem:[#allocation57_spill] sm:$0xff] }
 0x198   :  { %v2178_v15 = vsub.f32 %v14224_v31, %v9186_v50 }
 0x199   :  { %v2219_v43 = vmul.f32 %v8262_v14, %v2218_v48  ;;  %v2185_v48 = vsub.f32 %v8598_v61, %v9186_v50  ;;  %v2190_v61 = vsub.f32 %v8777_v12, %v9186_v50  ;;  %v2196_v12 = vsub.f32 %v14230_v20, %v9186_v50 }
 0x19b   :  { %v9258_v31 = vsel %vm2222_vm5, %v8262_v14, %v2219_v43  ;;  %v2191_v14 = vsub.f32 %v8826_v29, %v9186_v50  ;;  %v2194_v43 = vsub.f32 %v14229_v23, %v9186_v50  ;;  %v2197_v29 = vsub.f32 %v8590_v56, %v9186_v50 }
 0x19c   :  { %v2287_v52 = vmul.f32 %v9258_v31, %v2212_v54  ;;  %v2195_v54 = vsub.f32 %v9000_v4, %v9186_v50  ;;  %v2200_v23 = vsub.f32 %v8645_v26, %v9186_v50  ;;  %v2201_v4 = vsub.f32 %v8693_v0, %v9186_v50 }
 0x19d   :  { %v2203_v56 = vsub.f32 %v8787_v32, %v9186_v50  ;;  %v2206_v26 = vsub.f32 %v8923_v5, %v9186_v50  ;;  %v2207_v0 = vsub.f32 %v8965_v16, %v9186_v50  ;;  %v9310_v8 = vmul.f32 %v9258_v31, %v2166_v40 }
 0x19e   :  { %v2352_v19 = vmul.f32 %v9248_v44, %v2287_v52  ;;  %v2202_v52 = vsub.f32 %v8738_v24, %v9186_v50  ;;  %v9313_v24 = vmul.f32 %v9258_v31, %v2168_v11  ;;  %v2208_v32 = vsub.f32 %v9011_v9, %v9186_v50 }
 0x19f   :  { %v9318_v36 = vmul.f32 %v9258_v31, %v2170_v34  ;;  %v9321_v2 = vmul.f32 %v9258_v31, %v2172_v1  ;;  %v2209_v5 = vsub.f32 %v9057_v25, %v9186_v50  ;;  %v2210_v16 = vsub.f32 %v9103_v53, %v9186_v50 }
 0x1a0   :  { %v2417_v20 = vadd.f32 %v9266_v21, %v2352_v19  ;;  %v9328_v40 = vmul.f32 %v9258_v31, %v2174_v3  ;;  %v9331_v11 = vmul.f32 %v9258_v31, %v2176_v27  ;;  %v2211_v9 = vsub.f32 %v9137_v59, %v9186_v50 }
 0x1a1   :  { %v9336_v34 = vmul.f32 %v9258_v31, %v2178_v15  ;;  %v9339_v1 = vmul.f32 %v9258_v31, %v2179_v13  ;;  %v14232_v25 = vsub.f32 %v8785_v57, %v9186_v50  ;;  %v9346_v3 = vmul.f32 %v9258_v31, %v2180_v38 }
 0x1a2   :  { %v2481_v19 = vmax.f32 %v2417_v20, 0.0  ;;  %v9349_v27 = vmul.f32 %v9258_v31, %v2182_v30  ;;  %v9356_v59 = vmul.f32 %v9258_v31, %v2184_v62  ;;  %v9359_v13 = vmul.f32 %v9258_v31, %v2185_v48 }
 0x1a3   :  { %v2239_v53 = vmul.f32 %v9258_v31, %v14232_v25  ;;  %v9362_v57 = vmul.f32 %v9258_v31, %v2186_v47  ;;  %v9365_v15 = vmul.f32 %v9258_v31, %v2187_v28  ;;  %v9368_v30 = vmul.f32 %v9258_v31, %v2188_v60 }
 0x1a4   :  { %v2545_v20 = vmul.f32 0.0, %v2481_v19  ;;  %v9352_v19 = vmul.f32 %v9258_v31, %v2183_v17  ;;  %v9371_v38 = vmul.f32 %v9258_v31, %v2189_v55  ;;  %v9374_v17 = vmul.f32 %v9258_v31, %v2190_v61 }
 0x1a5   :  { %v9377_v62 = vmul.f32 %v9258_v31, %v2191_v14  ;;  %v9380_v48 = vmul.f32 %v9258_v31, %v2192_v7  ;;  %v9383_v47 = vmul.f32 %v9258_v31, %v2193_v22  ;;  %v9386_v28 = vmul.f32 %v9258_v31, %v2194_v43 }
 0x1a6   :  { %2609 = vst.msk [vmem:[#allocation2 + $0x1f8] sm:$0xff] %vm82_vm2, %v2545_v20  ;;  %v9389_v60 = vmul.f32 %v9258_v31, %v2195_v54  ;;  %v9392_v55 = vmul.f32 %v9258_v31, %v2196_v12  ;;  %v9395_v61 = vmul.f32 %v9258_v31, %v2197_v29  ;;  %v9398_v14 = vmul.f32 %v9258_v31, %v2198_v46 }
 0x1a7   :  { %v9401_v7 = vmul.f32 %v9258_v31, %v2199_v35  ;;  %v9404_v22 = vmul.f32 %v9258_v31, %v2200_v23  ;;  %v9407_v43 = vmul.f32 %v9258_v31, %v2201_v4  ;;  %v9410_v54 = vmul.f32 %v9258_v31, %v2202_v52 }
 0x1a8   :  { %v9413_v12 = vmul.f32 %v9258_v31, %v2203_v56  ;;  %v9416_v29 = vmul.f32 %v9258_v31, %v2204_v18  ;;  %v9419_v46 = vmul.f32 %v9258_v31, %v2205_v10  ;;  %v9422_v35 = vmul.f32 %v9258_v31, %v2206_v26  ;;  %v14236_v10 = vld [vmem:[#allocation23_spill] sm:$0xff]  ;;  %v14237_v26 = vld [vmem:[#allocation26_spill] sm:$0xff] }
 0x1a9   :  { %v9425_v23 = vmul.f32 %v9258_v31, %v2207_v0  ;;  %v9428_v4 = vmul.f32 %v9258_v31, %v2208_v32  ;;  %v9431_v52 = vmul.f32 %v9258_v31, %v2209_v5  ;;  %v9434_v56 = vmul.f32 %v9258_v31, %v2210_v16  ;;  %v14238_v0 = vld [vmem:[#allocation39_spill] sm:$0xff]  ;;  %v14240_v5 = vld [vmem:[#allocation18_spill] sm:$0xff] }
 0x1aa   :  { %v9437_v18 = vmul.f32 %v9258_v31, %v2211_v9  ;;  %v2171_v20 = vsub.f32 %v14236_v10, %v9186_v50  ;;  %v14239_v32 = vld [vmem:[#allocation51_spill] sm:$0xff]  ;;  %v14241_v16 = vsub.f32 %v8536_v33, %v9186_v50  ;;  %v14242_v10 = vsub.f32 %v8548_v37, %v9186_v50 }
 0x1ab   :  { %14233 = vst [vmem:[#allocation25_spill] sm:$0xff] %v9428_v4  ;;  %v14243_v21 = vsub.f32 %v8552_v39, %v9186_v50  ;;  %v14246_v33 = vsub.f32 %v8566_v45, %v9186_v50  ;;  %v14249_v39 = vsub.f32 %v8580_v51, %v9186_v50  ;;  %v14252_v45 = vsub.f32 %v8592_v58, %v9186_v50 }
 0x1ac   :  { %14234 = vst [vmem:[#allocation29_spill] sm:$0xff] %v9431_v52  ;;  %v2224_v9 = vmul.f32 %v9258_v31, %v14241_v16  ;;  %v14244_v52 = vsub.f32 %v8560_v42, %v9186_v50  ;;  %v14247_v16 = vsub.f32 %v8576_v49, %v9186_v50  ;;  %v14250_v42 = vsub.f32 %v14212_v41, %v9186_v50 }
 0x1ad   :  { %14235 = vst [vmem:[#allocation15_spill] sm:$0xff] %v9437_v18  ;;  %v9457_v18 = vmul.f32 %v9258_v31, %v14242_v10  ;;  %v9463_v25 = vmul.f32 %v9258_v31, %v14243_v21  ;;  %v2228_v37 = vmul.f32 %v9258_v31, %v14246_v33  ;;  %v2230_v21 = vmul.f32 %v9258_v31, %v14249_v39 }
 0x1ae   :  { %v9469_v4 = vmul.f32 %v9258_v31, %v14244_v52  ;;  %v9479_v10 = vmul.f32 %v9258_v31, %v14247_v16  ;;  %v9489_v52 = vmul.f32 %v9258_v31, %v14250_v42  ;;  %v2232_v33 = vmul.f32 %v9258_v31, %v14252_v45  ;;  %v14256_v42 = vld [vmem:[#allocation33_spill] sm:$0xff] }
 0x1af   :  { %v14253_v49 = vsub.f32 %v14213_v63, %v9186_v50  ;;  %v9502_v51 = vmul.f32 %v9248_v44, %v2239_v53  ;;  %v14255_v41 = vsub.f32 %v14214_v6, %v9186_v50  ;;  %v9516_v63 = vmul.f32 %v9248_v44, %v9310_v8  ;;  %v14259_v53 = vld [vmem:[#allocation38_spill] sm:$0xff] }
 0x1b0   :  { %14245 = vst [vmem:[#allocation17_spill] sm:$0xff] %v9469_v4  ;;  %v9520_v45 = vmul.f32 %v9248_v44, %v9313_v24  ;;  %v9538_v8 = vmul.f32 %v9248_v44, %v9321_v2  ;;  %v14264_v24 = vld [vmem:[#allocation49_spill] sm:$0xff]  ;;  %v14268_v2 = vld [vmem:[#allocation16_spill] sm:$0xff] }
 0x1b1   :  { %14248 = vst [vmem:[#allocation21_spill] sm:$0xff] %v9479_v10  ;;  %v9499_v16 = vmul.f32 %v9258_v31, %v14253_v49  ;;  %v2234_v39 = vmul.f32 %v9258_v31, %v14255_v41  ;;  %v14260_v49 = vsub.f32 %v14259_v53, %v9186_v50  ;;  %v14261_v41 = vld [vmem:[#allocation44_spill] sm:$0xff] }
 0x1b2   :  { %14251 = vst [vmem:[#allocation57_spill] sm:$0xff] %v9489_v52  ;;  %v14257_v52 = vsub.f32 %v14256_v42, %v9186_v50 }
 0x1b3   :  { %14254 = vst [vmem:[#allocation63_spill] sm:$0xff] %v9499_v16  ;;  %v2236_v6 = vmul.f32 %v9258_v31, %v14260_v49  ;;  %v14262_v16 = vsub.f32 %v14261_v41, %v9186_v50  ;;  %v14266_v49 = vld [vmem:[#allocation14_spill] sm:$0xff] }
 0x1b4   :  { %v9512_v58 = vmul.f32 %v9258_v31, %v14257_v52  ;;  %v9534_v52 = vmul.f32 %v9248_v44, %v9318_v36  ;;  %v14267_v10 = vsub.f32 %v14266_v49, %v9186_v50  ;;  %v9554_v36 = vmul.f32 %v9248_v44, %v9331_v11  ;;  %v14270_v49 = vld [vmem:[#allocation19_spill] sm:$0xff] }
 0x1b5   :  { %v9530_v42 = vmul.f32 %v9258_v31, %v14262_v16  ;;  %v9550_v16 = vmul.f32 %v9248_v44, %v9328_v40  ;;  %v9570_v40 = vmul.f32 %v9248_v44, %v9346_v3  ;;  %v14271_v11 = vsub.f32 %v14270_v49, %v9186_v50  ;;  %v14274_v49 = vld [vmem:[#allocation25_spill] sm:$0xff] }
 0x1b6   :  { %14258 = vst [vmem:[#allocation68_spill] sm:$0xff] %v9512_v58  ;;  %v14265_v58 = vsub.f32 %v14264_v24, %v9186_v50  ;;  %v2240_v41 = vmul.f32 %v9258_v31, %v14267_v10  ;;  %v9566_v10 = vmul.f32 %v9248_v44, %v9339_v1  ;;  %v9586_v1 = vmul.f32 %v9248_v44, %v9356_v59 }
 0x1b7   :  { %14263 = vst [vmem:[#allocation20_spill] sm:$0xff] %v9530_v42  ;;  %v14269_v42 = vsub.f32 %v14268_v2, %v9186_v50  ;;  %v2244_v4 = vmul.f32 %v9258_v31, %v14271_v11  ;;  %v9590_v3 = vmul.f32 %v9248_v44, %v9359_v13  ;;  %v9594_v2 = vmul.f32 %v9248_v44, %v9362_v57 }
 0x1b8   :  { %v2238_v53 = vmul.f32 %v9258_v31, %v14265_v58  ;;  %v9562_v58 = vmul.f32 %v9248_v44, %v9336_v34  ;;  %v9582_v34 = vmul.f32 %v9248_v44, %v9352_v19  ;;  %v9602_v19 = vmul.f32 %v9248_v44, %v9368_v30 }
 0x1b9   :  { %v2242_v24 = vmul.f32 %v9258_v31, %v14269_v42  ;;  %v9578_v42 = vmul.f32 %v9248_v44, %v9349_v27  ;;  %v9598_v27 = vmul.f32 %v9248_v44, %v9365_v15  ;;  %v9606_v59 = vmul.f32 %v9248_v44, %v9371_v38 }
 0x1ba   :  { %v9610_v13 = vmul.f32 %v9248_v44, %v9374_v17  ;;  %v9614_v57 = vmul.f32 %v9248_v44, %v9377_v62  ;;  %v9618_v15 = vmul.f32 %v9248_v44, %v9380_v48  ;;  %v9622_v30 = vmul.f32 %v9248_v44, %v9383_v47 }
 0x1bb   :  { %v9626_v38 = vmul.f32 %v9248_v44, %v9386_v28  ;;  %v9630_v17 = vmul.f32 %v9248_v44, %v9389_v60  ;;  %v9634_v62 = vmul.f32 %v9248_v44, %v9392_v55  ;;  %v9638_v48 = vmul.f32 %v9248_v44, %v9395_v61 }
 0x1bc   :  { %v9642_v47 = vmul.f32 %v9248_v44, %v9398_v14  ;;  %v9646_v28 = vmul.f32 %v9248_v44, %v9401_v7  ;;  %v9650_v60 = vmul.f32 %v9248_v44, %v9404_v22  ;;  %v9654_v55 = vmul.f32 %v9248_v44, %v9407_v43 }
 0x1bd   :  { %v9658_v61 = vmul.f32 %v9248_v44, %v9410_v54  ;;  %v9662_v14 = vmul.f32 %v9248_v44, %v9413_v12  ;;  %v9666_v7 = vmul.f32 %v9248_v44, %v9416_v29  ;;  %v9670_v22 = vmul.f32 %v9248_v44, %v9419_v46  ;;  %v14276_v29 = vld [vmem:[#allocation29_spill] sm:$0xff] }
 0x1be   :  { %v9674_v43 = vmul.f32 %v9248_v44, %v9422_v35  ;;  %v9678_v54 = vmul.f32 %v9248_v44, %v9425_v23  ;;  %v9682_v12 = vmul.f32 %v9248_v44, %v14274_v49  ;;  %v9685_v11 = vmul.f32 %v9258_v31, %v2171_v20  ;;  %v14277_v35 = vld [vmem:[#allocation15_spill] sm:$0xff] }
 0x1bf   :  { %14272 = vst [vmem:[#allocation73_spill] sm:$0xff] %v9666_v7  ;;  %v2349_v7 = vmul.f32 %v9248_v44, %v14276_v29  ;;  %v9691_v46 = vmul.f32 %v9248_v44, %v9434_v56  ;;  %v14278_v23 = vsub.f32 %v14237_v26, %v9186_v50  ;;  %v14279_v20 = vsub.f32 %v14238_v0, %v9186_v50 }
 0x1c0   :  { %14273 = vst [vmem:[#allocation85_spill] sm:$0xff] %v9674_v43  ;;  %v9695_v43 = vmul.f32 %v9248_v44, %v14277_v35  ;;  %v14280_v56 = vsub.f32 %v14239_v32, %v9186_v50  ;;  %v2289_v35 = vmul.f32 %v9248_v44, %v2224_v9  ;;  %v14282_v26 = vsub.f32 %v14240_v5, %v9186_v50 }
 0x1c1   :  { %14275 = vst [vmem:[#allocation24_spill] sm:$0xff] %v9685_v11  ;;  %v9701_v49 = vmul.f32 %v9258_v31, %v14278_v23  ;;  %v9707_v11 = vmul.f32 %v9258_v31, %v14279_v20  ;;  %v9724_v0 = vmul.f32 %v9248_v44, %v9457_v18  ;;  %v2291_v20 = vmul.f32 %v9248_v44, %v9463_v25 }
 0x1c2   :  { %v9713_v29 = vmul.f32 %v9258_v31, %v14280_v56  ;;  %v9720_v23 = vmul.f32 %v9258_v31, %v14282_v26  ;;  %v2293_v32 = vmul.f32 %v9248_v44, %v2228_v37  ;;  %v2295_v56 = vmul.f32 %v9248_v44, %v2230_v21  ;;  %v14284_v26 = vld [vmem:[#allocation22_spill] sm:$0xff] }
 0x1c3   :  { %14283 = vst [vmem:[#allocation26_spill] sm:$0xff] %v9724_v0  ;;  %v2299_v9 = vmul.f32 %v9248_v44, %v2234_v39  ;;  %v2301_v50 = vmul.f32 %v9248_v44, %v2236_v6  ;;  %v2303_v31 = vmul.f32 %v9248_v44, %v2238_v53  ;;  %v2305_v5 = vmul.f32 %v9248_v44, %v2240_v41 }
 0x1c4   :  { %14281 = vst [vmem:[#allocation23_spill] sm:$0xff] %v9713_v29  ;;  %v2297_v29 = vmul.f32 %v9248_v44, %v2232_v33  ;;  %v2307_v18 = vmul.f32 %v9248_v44, %v2242_v24  ;;  %v9738_v0 = vadd.f32 %v14284_v26, %v9502_v51  ;;  %v9741_v25 = vmul.f32 %v9248_v44, %v2244_v4 }
 0x1c5   :  { %v2354_v37 = vadd.f32 %v14284_v26, %v2289_v35  ;;  %v9746_v21 = vadd.f32 %v14284_v26, %v9516_v63  ;;  %v9750_v33 = vadd.f32 %v14284_v26, %v9520_v45  ;;  %v2356_v39 = vadd.f32 %v14284_v26, %v2291_v20 }
 0x1c6   :  { %v2358_v6 = vadd.f32 %v14284_v26, %v2293_v32  ;;  %v9756_v51 = vadd.f32 %v14284_v26, %v9534_v52  ;;  %v9760_v4 = vadd.f32 %v14284_v26, %v9538_v8  ;;  %v9763_v53 = vadd.f32 %v14284_v26, %v2295_v56  ;;  %v14285_v35 = vld [vmem:[#allocation73_spill] sm:$0xff] }
 0x1c7   :  { %v9766_v63 = vadd.f32 %v14284_v26, %v2297_v29  ;;  %v9770_v45 = vadd.f32 %v14284_v26, %v9550_v16  ;;  %v9774_v41 = vadd.f32 %v14284_v26, %v9554_v36  ;;  %v9777_v52 = vadd.f32 %v14284_v26, %v2299_v9  ;;  %v14287_v20 = vld [vmem:[#allocation85_spill] sm:$0xff] }
 0x1c8   :  { %v9781_v8 = vadd.f32 %v14284_v26, %v9562_v58  ;;  %v9785_v24 = vadd.f32 %v14284_v26, %v9566_v10  ;;  %v9789_v29 = vadd.f32 %v14284_v26, %v9570_v40  ;;  %v9793_v16 = vadd.f32 %v14284_v26, %v9578_v42 }
 0x1c9   :  { %v9797_v36 = vadd.f32 %v14284_v26, %v9582_v34  ;;  %v9801_v58 = vadd.f32 %v14284_v26, %v9586_v1  ;;  %v9805_v10 = vadd.f32 %v14284_v26, %v9590_v3  ;;  %v9809_v40 = vadd.f32 %v14284_v26, %v9594_v2 }
 0x1ca   :  { %v9813_v42 = vadd.f32 %v14284_v26, %v9598_v27  ;;  %v9817_v34 = vadd.f32 %v14284_v26, %v9602_v19  ;;  %v9821_v1 = vadd.f32 %v14284_v26, %v9606_v59  ;;  %v9825_v3 = vadd.f32 %v14284_v26, %v9610_v13 }
 0x1cb   :  { %v9829_v2 = vadd.f32 %v14284_v26, %v9614_v57  ;;  %v9833_v27 = vadd.f32 %v14284_v26, %v9618_v15  ;;  %v9837_v19 = vadd.f32 %v14284_v26, %v9622_v30  ;;  %v9841_v59 = vadd.f32 %v14284_v26, %v9626_v38 }
 0x1cc   :  { %v9845_v13 = vadd.f32 %v14284_v26, %v9630_v17  ;;  %v9849_v57 = vadd.f32 %v14284_v26, %v9634_v62  ;;  %v9853_v15 = vadd.f32 %v14284_v26, %v9638_v48  ;;  %v9857_v30 = vadd.f32 %v14284_v26, %v9642_v47 }
 0x1cd   :  { %v9861_v38 = vadd.f32 %v14284_v26, %v9646_v28  ;;  %v9865_v17 = vadd.f32 %v14284_v26, %v9650_v60  ;;  %v9869_v62 = vadd.f32 %v14284_v26, %v9654_v55  ;;  %v9873_v48 = vadd.f32 %v14284_v26, %v9658_v61 }
 0x1ce   :  { %v9877_v47 = vadd.f32 %v14284_v26, %v9662_v14  ;;  %v9881_v28 = vadd.f32 %v14284_v26, %v14285_v35  ;;  %v9885_v60 = vadd.f32 %v14284_v26, %v9670_v22  ;;  %v9889_v55 = vadd.f32 %v14284_v26, %v14287_v20 }
 0x1cf   :  { %v9893_v61 = vadd.f32 %v14284_v26, %v9678_v54  ;;  %v9897_v14 = vadd.f32 %v14284_v26, %v9682_v12  ;;  %v9900_v32 = vadd.f32 %v14284_v26, %v2349_v7  ;;  %v2366_v56 = vadd.f32 %v14284_v26, %v2301_v50  ;;  %v14292_v54 = vld [vmem:[#allocation24_spill] sm:$0xff] }
 0x1d0   :  { %14286 = vst [vmem:[#allocation39_spill] sm:$0xff] %v9885_v60  ;;  %v9905_v22 = vadd.f32 %v14284_v26, %v9691_v46  ;;  %v9909_v9 = vadd.f32 %v14284_v26, %v9695_v43  ;;  %v2418_v35 = vmax.f32 %v2354_v37, 0.0  ;;  %v2311_v20 = vmul.f32 %v9248_v44, %v14292_v54  ;;  %v14293_v43 = vld [vmem:[#allocation17_spill] sm:$0xff] }
 0x1d1   :  { %14288 = vst [vmem:[#allocation51_spill] sm:$0xff] %v9893_v61  ;;  %v2368_v12 = vadd.f32 %v14284_v26, %v2303_v31  ;;  %v2420_v61 = vmax.f32 %v2356_v39, 0.0  ;;  %v2422_v60 = vmax.f32 %v2358_v6, 0.0  ;;  %v2313_v7 = vmul.f32 %v9248_v44, %v9701_v49  ;;  %v14294_v49 = vld [vmem:[#allocation21_spill] sm:$0xff]  ;;  %v14295_v6 = vld [vmem:[#allocation23_spill] sm:$0xff] }
 0x1d2   :  { %14289 = vst [vmem:[#allocation18_spill] sm:$0xff] %v9900_v32  ;;  %v2370_v50 = vadd.f32 %v14284_v26, %v2305_v5  ;;  %v2424_v46 = vmax.f32 %v9763_v53, 0.0  ;;  %v2426_v32 = vmax.f32 %v9766_v63, 0.0  ;;  %v2292_v37 = vmul.f32 %v9248_v44, %v14293_v43  ;;  %v14296_v43 = vld [vmem:[#allocation57_spill] sm:$0xff] }
 0x1d3   :  { %14290 = vst [vmem:[#allocation33_spill] sm:$0xff] %v9905_v22  ;;  %v2315_v54 = vmul.f32 %v9248_v44, %v9707_v11  ;;  %v2372_v31 = vadd.f32 %v14284_v26, %v2307_v18  ;;  %v2428_v39 = vmax.f32 %v9777_v52, 0.0  ;;  %v2294_v5 = vmul.f32 %v9248_v44, %v14294_v49  ;;  %v14297_v49 = vld [vmem:[#allocation63_spill] sm:$0xff] }
 0x1d4   :  { %14291 = vst [vmem:[#allocation38_spill] sm:$0xff] %v9909_v9  ;;  %v2317_v53 = vmul.f32 %v9248_v44, %v14295_v6  ;;  %v2374_v63 = vadd.f32 %v14284_v26, %v9741_v25  ;;  %v2296_v11 = vmul.f32 %v9248_v44, %v14296_v43  ;;  %v2321_v18 = vmul.f32 %v9248_v44, %v9720_v23  ;;  %v14298_v9 = vld [vmem:[#allocation68_spill] sm:$0xff]  ;;  %v14300_v23 = vld [vmem:[#allocation26_spill] sm:$0xff] }
 0x1d5   :  { %2546 = vst.msk [vmem:[#allocation2] sm:$0xff] %vm82_vm2, %v2418_v35  ;;  %v2430_v35 = vmax.f32 %v2366_v56, 0.0  ;;  %v2376_v52 = vadd.f32 %v14284_v26, %v2311_v20  ;;  %v2298_v6 = vmul.f32 %v9248_v44, %v14297_v49  ;;  %v2300_v25 = vmul.f32 %v9248_v44, %v14298_v9  ;;  %v14299_v43 = vld [vmem:[#allocation20_spill] sm:$0xff] }
 0x1d6   :  { %2548 = vst.msk [vmem:[#allocation2 + $0x10] sm:$0xff] %vm82_vm2, %v2420_v61  ;;  %v2432_v61 = vmax.f32 %v2368_v12, 0.0  ;;  %v2378_v56 = vadd.f32 %v14284_v26, %v2313_v7  ;;  %v2302_v22 = vmul.f32 %v9248_v44, %v14299_v43  ;;  %v2355_v20 = vadd.f32 %v14284_v26, %v14300_v23  ;;  %v14303_v23 = vld [vmem:[#allocation35_spill] sm:$0xff] }
 0x1d7   :  { %2550 = vst.msk [vmem:[#allocation2 + $0x20] sm:$0xff] %vm82_vm2, %v2422_v60  ;;  %v2434_v60 = vmax.f32 %v2370_v50, 0.0  ;;  %v2380_v12 = vadd.f32 %v14284_v26, %v2315_v54  ;;  %v2357_v49 = vadd.f32 %v14284_v26, %v2292_v37  ;;  %v2359_v9 = vadd.f32 %v14284_v26, %v2294_v5 }
 0x1d8   :  { %2552 = vst.msk [vmem:[#allocation2 + $0x30] sm:$0xff] %vm82_vm2, %v2424_v46  ;;  %v2436_v46 = vmax.f32 %v2372_v31, 0.0  ;;  %v2382_v7 = vadd.f32 %v14284_v26, %v2317_v53  ;;  %v2438_v50 = vmax.f32 %v2374_v63, 0.0  ;;  %v2386_v44 = vadd.f32 %v14284_v26, %v2321_v18 }
 0x1d9   :  { %2554 = vst.msk [vmem:[#allocation2 + $0x40] sm:$0xff] %vm82_vm2, %v2426_v32  ;;  %v2361_v32 = vadd.f32 %v14284_v26, %v2296_v11  ;;  %v2440_v43 = vmax.f32 %v2376_v52, 0.0  ;;  %v2363_v54 = vadd.f32 %v14284_v26, %v2298_v6  ;;  %v2442_v31 = vmax.f32 %v2378_v56, 0.0  ;;  %v14302_v56 = vld [vmem:[#allocation32_spill] sm:$0xff] }
 0x1da   :  { %2556 = vst.msk [vmem:[#allocation2 + $0x50] sm:$0xff] %vm82_vm2, %v2428_v39  ;;  %v2365_v37 = vadd.f32 %v14284_v26, %v2300_v25  ;;  %v2367_v39 = vadd.f32 %v14284_v26, %v2302_v22  ;;  %v2444_v5 = vmax.f32 %v2380_v12, 0.0  ;;  %v2419_v53 = vmax.f32 %v2355_v20, 0.0  ;;  %v14301_v22 = vld [vmem:[#allocation30_spill] sm:$0xff] }
 0x1db   :  { %2558 = vst.msk [vmem:[#allocation2 + $0x60] sm:$0xff] %vm82_vm2, %v2430_v35  ;;  %v2421_v63 = vmax.f32 %v2357_v49, 0.0  ;;  %v2423_v35 = vmax.f32 %v2359_v9, 0.0  ;;  %v2446_v11 = vmax.f32 %v2382_v7, 0.0  ;;  %v2425_v18 = vmax.f32 %v2361_v32, 0.0  ;;  %v14305_v7 = vld [vmem:[#allocation41_spill] sm:$0xff] }
 0x1dc   :  { %2560 = vst.msk [vmem:[#allocation2 + $0x70] sm:$0xff] %vm82_vm2, %v2432_v61  ;;  %v2450_v52 = vmax.f32 %v2386_v44, 0.0  ;;  %v2427_v61 = vmax.f32 %v2363_v54, 0.0  ;;  %v2429_v6 = vmax.f32 %v2365_v37, 0.0  ;;  %v2431_v26 = vmax.f32 %v2367_v39, 0.0  ;;  %v14306_v44 = vld [vmem:[#allocation43_spill] sm:$0xff] }
 0x1dd   :  { %2562 = vst.msk [vmem:[#allocation2 + $0x80] sm:$0xff] %vm82_vm2, %v2434_v60  ;;  %v2483_v25 = vmul.f32 %v14301_v22, %v2419_v53  ;;  %v2485_v60 = vmul.f32 %v14302_v56, %v2421_v63  ;;  %v2487_v20 = vmul.f32 %v14303_v23, %v2423_v35  ;;  %v2433_v12 = vmax.f32 %v9738_v0, 0.0  ;;  %v14308_v39 = vld [vmem:[#allocation53_spill] sm:$0xff]  ;;  %v14309_v53 = vld [vmem:[#allocation50_spill] sm:$0xff] }
 0x1de   :  { %2564 = vst.msk [vmem:[#allocation2 + $0x90] sm:$0xff] %vm82_vm2, %v2436_v46  ;;  %v14304_v46 = vld [vmem:[#allocation37_spill] sm:$0xff]  ;;  %v2435_v9 = vmax.f32 %v9746_v21, 0.0  ;;  %v2437_v32 = vmax.f32 %v9750_v33, 0.0  ;;  %v2439_v54 = vmax.f32 %v9756_v51, 0.0  ;;  %v2441_v37 = vmax.f32 %v9760_v4, 0.0 }
 0x1df   :  { %2566 = vst.msk [vmem:[#allocation2 + $0xa0] sm:$0xff] %vm82_vm2, %v2438_v50  ;;  %v2489_v49 = vmul.f32 %v14304_v46, %v2425_v18  ;;  %v2491_v50 = vmul.f32 %v14305_v7, %v2427_v61  ;;  %v2497_v21 = vmul.f32 %v14308_v39, %v2433_v12  ;;  %v2445_v63 = vmax.f32 %v9774_v41, 0.0  ;;  %v14310_v35 = vld [vmem:[#allocation54_spill] sm:$0xff]  ;;  %v14311_v18 = vld [vmem:[#allocation56_spill] sm:$0xff]  ;;  %v14312_v61 = vld [vmem:[#allocation59_spill] sm:$0xff] }
 0x1e0   :  { %2568 = vst.msk [vmem:[#allocation2 + $0xb0] sm:$0xff] %vm82_vm2, %v2440_v43  ;;  %v2493_v43 = vmul.f32 %v14306_v44, %v2429_v6  ;;  %v2499_v33 = vmul.f32 %v14309_v53, %v2435_v9  ;;  %v2501_v51 = vmul.f32 %v14310_v35, %v2437_v32  ;;  %v2503_v4 = vmul.f32 %v14311_v18, %v2439_v54  ;;  %v14315_v56 = vld [vmem:[#allocation65_spill] sm:$0xff]  ;;  %v14316_v12 = vld [vmem:[#allocation66_spill] sm:$0xff] }
 0x1e1   :  { %2570 = vst.msk [vmem:[#allocation2 + $0xc0] sm:$0xff] %vm82_vm2, %v2442_v31  ;;  %v14307_v31 = vld [vmem:[#allocation46_spill] sm:$0xff]  ;;  %v2449_v6 = vmax.f32 %v9789_v29, 0.0  ;;  %v2451_v22 = vmax.f32 %v9793_v16, 0.0  ;;  %v2452_v46 = vmax.f32 %v9797_v36, 0.0  ;;  %v2460_v18 = vmax.f32 %v9829_v2, 0.0 }
 0x1e2   :  { %2572 = vst.msk [vmem:[#allocation2 + $0xd0] sm:$0xff] %vm82_vm2, %v2444_v5  ;;  %v2495_v0 = vmul.f32 %v14307_v31, %v2431_v26  ;;  %v2443_v5 = vmax.f32 %v9770_v45, 0.0  ;;  %v2505_v45 = vmul.f32 %v14312_v61, %v2441_v37  ;;  %v14313_v26 = vld [vmem:[#allocation61_spill] sm:$0xff]  ;;  %v2610_v7 = vld [vmem:[#allocation2] sm:$0xff]  ;;  %v2454_v31 = vmax.f32 %v9805_v10, 0.0 }
 0x1e3   :  { %2574 = vst.msk [vmem:[#allocation2 + $0xe0] sm:$0xff] %vm82_vm2, %v2446_v11  ;;  %v2447_v11 = vmax.f32 %v9781_v8, 0.0  ;;  %v2513_v29 = vmul.f32 0.0, %v2449_v6  ;;  %v2515_v16 = vmul.f32 %v14316_v12, %v2451_v22  ;;  %v2461_v10 = vmax.f32 %v9833_v27, 0.0  ;;  %v14322_v61 = vld [vmem:[#allocation82_spill] sm:$0xff]  ;;  %v14323_v6 = vld [vmem:[#allocation84_spill] sm:$0xff] }
 0x1e4   :  { %2578 = vst.msk [vmem:[#allocation2 + $0x100] sm:$0xff] %vm82_vm2, %v2450_v52  ;;  %v2448_v52 = vmax.f32 %v9785_v24, 0.0  ;;  %v2507_v41 = vmul.f32 %v14313_v26, %v2443_v5  ;;  %v2453_v24 = vmax.f32 %v9801_v58, 0.0  ;;  %v2457_v58 = vmax.f32 %v9817_v34, 0.0  ;;  %v14318_v5 = vld [vmem:[#allocation72_spill] sm:$0xff] }
 0x1e5   :  { %2547 = vst.msk [vmem:[#allocation2 + $0x8] sm:$0xff] %vm82_vm2, %v2483_v25  ;;  %v14314_v25 = vld [vmem:[#allocation64_spill] sm:$0xff]  ;;  %v2465_v27 = vmax.f32 %v9849_v57, 0.0  ;;  %v2464_v2 = vmax.f32 %v9845_v13, 0.0  ;;  %v2469_v57 = vmax.f32 %v9865_v17, 0.0  ;;  %v2468_v13 = vmax.f32 %v9861_v38, 0.0 }
 0x1e6   :  { %2549 = vst.msk [vmem:[#allocation2 + $0x18] sm:$0xff] %vm82_vm2, %v2485_v60  ;;  %v2509_v8 = vmul.f32 %v14314_v25, %v2445_v63  ;;  %v2511_v60 = vmul.f32 %v14315_v56, %v2447_v11  ;;  %v2512_v23 = vmul.f32 0.0, %v2448_v52  ;;  %v14319_v63 = vld [vmem:[#allocation75_spill] sm:$0xff]  ;;  %v2473_v56 = vmax.f32 %v9881_v28, 0.0 }
 0x1e7   :  { %2551 = vst.msk [vmem:[#allocation2 + $0x28] sm:$0xff] %vm82_vm2, %v2487_v20  ;;  %v2455_v20 = vmax.f32 %v9809_v40, 0.0  ;;  %v3349_v40 = vld [vmem:[#allocation2 + $0x10] sm:$0xff]  ;;  %v2521_v35 = vmul.f32 %v14319_v63, %v2457_v58  ;;  %v2529_v26 = vmul.f32 %v14323_v6, %v2465_v27  ;;  %v2472_v28 = vmax.f32 %v9877_v47, 0.0 }
 0x1e8   :  { %2553 = vst.msk [vmem:[#allocation2 + $0x38] sm:$0xff] %vm82_vm2, %v2489_v49 }
 0x1e9   :  { %2555 = vst.msk [vmem:[#allocation2 + $0x48] sm:$0xff] %vm82_vm2, %v2491_v50  ;;  %v14317_v50 = vld [vmem:[#allocation70_spill] sm:$0xff]  ;;  %v2519_v34 = vmul.f32 %v14318_v5, %v2455_v20 }
 0x1ea   :  { %2557 = vst.msk [vmem:[#allocation2 + $0x58] sm:$0xff] %vm82_vm2, %v2493_v43  ;;  %v2517_v32 = vmul.f32 %v14317_v50, %v2453_v24  ;;  %v14326_v20 = vld [vmem:[#allocation90_spill] sm:$0xff]  ;;  %v14331_v50 = vld [vmem:[#allocation51_spill] sm:$0xff] }
 0x1eb   :  { %2559 = vst.msk [vmem:[#allocation2 + $0x68] sm:$0xff] %vm82_vm2, %v2495_v0 }
 0x1ec   :  { %2561 = vst.msk [vmem:[#allocation2 + $0x78] sm:$0xff] %vm82_vm2, %v2497_v21  ;;  %v2708_v49 = vld [vmem:[#allocation2 + $0x1] sm:$0xff]  ;;  %v2709_v9 = vld [vmem:[#allocation2 + $0x9] sm:$0xff]  ;;  %v2459_v21 = vmax.f32 %v9825_v3, 0.0  ;;  %v2458_v3 = vmax.f32 %v9821_v1, 0.0  ;;  %v2462_v1 = vmax.f32 %v9837_v19, 0.0 }
 0x1ed   :  { %2563 = vst.msk [vmem:[#allocation2 + $0x88] sm:$0xff] %vm82_vm2, %v2499_v33  ;;  %v2772_v44 = vpack.c.bf16 %v2709_v9, %v2708_v49  ;;  %v2611_v43 = vld [vmem:[#allocation2 + $0x8] sm:$0xff]  ;;  %v3350_v54 = vld [vmem:[#allocation2 + $0x18] sm:$0xff]  ;;  %v2456_v33 = vmax.f32 %v9813_v42, 0.0  ;;  %v2463_v42 = vmax.f32 %v9841_v59, 0.0  ;;  %v2467_v59 = vmax.f32 %v9857_v30, 0.0 }
 0x1ee   :  { %2565 = vst.msk [vmem:[#allocation2 + $0x98] sm:$0xff] %vm82_vm2, %v2501_v51  ;;  %v2674_v36 = vpack.c.bf16 %v2611_v43, %v2610_v7  ;;  %v3413_v0 = vpack.c.bf16 %v3350_v54, %v3349_v40  ;;  %v3783_v37 = vld [vmem:[#allocation2 + $0x11] sm:$0xff]  ;;  %v3784_v39 = vld [vmem:[#allocation2 + $0x19] sm:$0xff]  ;;  %v2466_v19 = vmax.f32 %v9853_v15, 0.0  ;;  %v2471_v30 = vmax.f32 %v9873_v48, 0.0  ;;  %v3352_v25 = vld [vmem:[#allocation2 + $0x28] sm:$0xff] }
 0x1ef   :  { %2567 = vst.msk [vmem:[#allocation2 + $0xa8] sm:$0xff] %vm82_vm2, %v2503_v4  ;;  %7900 = vmatmul.msk.bf16.vlgmr.msrb.gmra.mxu1 %vm82_vm2, %v2772_v44  ;;  %v3847_v53 = vpack.c.bf16 %v3784_v39, %v3783_v37  ;;  %v14320_v51 = vld [vmem:[#allocation77_spill] sm:$0xff]  ;;  %v14321_v4 = vld [vmem:[#allocation80_spill] sm:$0xff]  ;;  %v3785_v17 = vld [vmem:[#allocation2 + $0x21] sm:$0xff]  ;;  %v2470_v48 = vmax.f32 %v9869_v62, 0.0  ;;  %v2477_v62 = vmax.f32 %v9897_v14, 0.0 }
 0x1f0   :  { %2569 = vst.msk [vmem:[#allocation2 + $0xb8] sm:$0xff] %vm82_vm2, %v2505_v45  ;;  %7936 = vmatmul.msk.bf16.vlgmr.msrb.gmra.mxu2 %vm82_vm2, %v2674_v36  ;;  %7972 = vmatmul.msk.bf16.vlgmr.msrb.gmra.mxu3 %vm82_vm2, %v3413_v0  ;;  %v2523_v11 = vmul.f32 %v14320_v51, %v2459_v21  ;;  %v2525_v52 = vmul.f32 %v14321_v4, %v2461_v10  ;;  %v3351_v15 = vld [vmem:[#allocation2 + $0x20] sm:$0xff]  ;;  %v14329_v9 = vld [vmem:[#allocation33_spill] sm:$0xff]  ;;  %v14333_v43 = vld [vmem:[#allocation95_spill] sm:$0xff] }
 0x1f1   :  { %2571 = vst.msk [vmem:[#allocation2 + $0xc8] sm:$0xff] %vm82_vm2, %v2507_v41  ;;  %8008 = vmatmul.msk.bf16.vlgmr.msrb.gmra.mxu0 %vm82_vm2, %v3847_v53  ;;  %v2527_v45 = vmul.f32 %v14322_v61, %v2463_v42  ;;  %v14324_v41 = vld [vmem:[#allocation86_spill] sm:$0xff]  ;;  %v2535_v38 = vmul.f32 %v14326_v20, %v2471_v30  ;;  %v2479_v47 = vmax.f32 %v14329_v9, 0.0  ;;  %v2541_v40 = vmul.f32 %v14333_v43, %v2477_v62  ;;  %v14335_v36 = vld [vmem:[#allocation96_spill] sm:$0xff]  ;;  %v3354_v39 = vld [vmem:[#allocation2 + $0x38] sm:$0xff] }
 0x1f2   :  { %2573 = vst.msk [vmem:[#allocation2 + $0xd8] sm:$0xff] %vm82_vm2, %v2509_v8  ;;  %v2531_v22 = vmul.f32 %v14324_v41, %v2467_v59  ;;  %v3786_v8 = vld [vmem:[#allocation2 + $0x29] sm:$0xff]  ;;  %v14330_v7 = vld [vmem:[#allocation94_spill] sm:$0xff]  ;;  %v3787_v21 = vld [vmem:[#allocation2 + $0x31] sm:$0xff] }
 0x1f3   :  { %2575 = vst.msk [vmem:[#allocation2 + $0xe8] sm:$0xff] %vm82_vm2, %v2511_v60  ;;  %v14325_v60 = vld [vmem:[#allocation88_spill] sm:$0xff]  ;;  %v3848_v12 = vpack.c.bf16 %v3786_v8, %v3785_v17  ;;  %v14332_v44 = vld [vmem:[#allocation38_spill] sm:$0xff]  ;;  %v3356_v10 = vld [vmem:[#allocation2 + $0x48] sm:$0xff] }
 0x1f4   :  { %2576 = vst.msk [vmem:[#allocation2 + $0xf0] sm:$0xff] %vm82_vm2, %v2512_v23  ;;  %v2533_v24 = vmul.f32 %v14325_v60, %v2469_v57  ;;  %v3414_v23 = vpack.c.bf16 %v3352_v25, %v3351_v15  ;;  %v2480_v14 = vmax.f32 %v14332_v44, 0.0  ;;  %v14334_v54 = vld [vmem:[#allocation18_spill] sm:$0xff]  ;;  %v3357_v4 = vld [vmem:[#allocation2 + $0x50] sm:$0xff]  ;;  %v3360_v59 = vld [vmem:[#allocation2 + $0x68] sm:$0xff] }
 0x1f5   :  { %2577 = vst.msk [vmem:[#allocation2 + $0xf8] sm:$0xff] %vm82_vm2, %v2513_v29  ;;  %v2475_v29 = vmax.f32 %v9889_v55, 0.0  ;;  %v14328_v55 = vld [vmem:[#allocation39_spill] sm:$0xff]  ;;  %v3788_v5 = vld [vmem:[#allocation2 + $0x39] sm:$0xff]  ;;  %v3361_v41 = vld [vmem:[#allocation2 + $0x70] sm:$0xff] }
 0x1f6   :  { %2579 = vst.msk [vmem:[#allocation2 + $0x108] sm:$0xff] %vm82_vm2, %v2515_v16  ;;  %v14327_v16 = vld [vmem:[#allocation92_spill] sm:$0xff]  ;;  %v2474_v49 = vmax.f32 %v14328_v55, 0.0  ;;  %v2544_v37 = vmul.f32 0.0, %v2480_v14  ;;  %v3789_v63 = vld [vmem:[#allocation2 + $0x41] sm:$0xff]  ;;  %v3792_v27 = vld [vmem:[#allocation2 + $0x59] sm:$0xff] }
 0x1f7   :  { %2580 = vst.msk [vmem:[#allocation2 + $0x110] sm:$0xff] %vm82_vm2, %v2452_v46  ;;  %v2537_v46 = vmul.f32 %v14327_v16, %v2473_v56  ;;  %v2539_v58 = vmul.f32 %v14330_v7, %v2475_v29  ;;  %v3793_v61 = vld [vmem:[#allocation2 + $0x61] sm:$0xff]  ;;  %v3796_v30 = vld [vmem:[#allocation2 + $0x79] sm:$0xff]  ;;  %v3798_v56 = vld [vmem:[#allocation2 + $0x89] sm:$0xff] }
 0x1f8   :  { %2581 = vst.msk [vmem:[#allocation2 + $0x118] sm:$0xff] %vm82_vm2, %v2517_v32  ;;  %v2476_v32 = vmax.f32 %v14331_v50, 0.0  ;;  %v3364_v17 = vld [vmem:[#allocation2 + $0x88] sm:$0xff]  ;;  %v3363_v60 = vld [vmem:[#allocation2 + $0x80] sm:$0xff]  ;;  %v3799_v29 = vld [vmem:[#allocation2 + $0x91] sm:$0xff] }
 0x1f9   :  { %2582 = vst.msk [vmem:[#allocation2 + $0x120] sm:$0xff] %vm82_vm2, %v2454_v31  ;;  %v2478_v31 = vmax.f32 %v14334_v54, 0.0  ;;  %v3797_v8 = vld [vmem:[#allocation2 + $0x81] sm:$0xff]  ;;  %v3800_v20 = vld [vmem:[#allocation2 + $0x99] sm:$0xff] }
 0x1fa   :  { %2583 = vst.msk [vmem:[#allocation2 + $0x128] sm:$0xff] %vm82_vm2, %v2519_v34  ;;  %v3353_v34 = vld [vmem:[#allocation2 + $0x30] sm:$0xff]  ;;  %v3854_v15 = vpack.c.bf16 %v3798_v56, %v3797_v8  ;;  %v3855_v62 = vpack.c.bf16 %v3800_v20, %v3799_v29  ;;  %v3801_v43 = vld [vmem:[#allocation2 + $0xa1] sm:$0xff] }
 0x1fb   :  { %2584 = vst.msk [vmem:[#allocation2 + $0x130] sm:$0xff] %vm82_vm2, %v2456_v33  ;;  %v3849_v33 = vpack.c.bf16 %v3788_v5, %v3787_v21  ;;  %v3367_v54 = vld [vmem:[#allocation2 + $0xa0] sm:$0xff] }
 0x1fc   :  { %2585 = vst.msk [vmem:[#allocation2 + $0x138] sm:$0xff] %vm82_vm2, %v2521_v35  ;;  %v3790_v35 = vld [vmem:[#allocation2 + $0x49] sm:$0xff] }
 0x1fd   :  { %2586 = vst.msk [vmem:[#allocation2 + $0x140] sm:$0xff] %vm82_vm2, %v2458_v3  ;;  %v3355_v3 = vld [vmem:[#allocation2 + $0x40] sm:$0xff]  ;;  %v3850_v51 = vpack.c.bf16 %v3790_v35, %v3789_v63 }
 0x1fe   :  { %2587 = vst.msk [vmem:[#allocation2 + $0x148] sm:$0xff] %vm82_vm2, %v2523_v11  ;;  %v3416_v42 = vpack.c.bf16 %v3356_v10, %v3355_v3  ;;  %v3358_v11 = vld [vmem:[#allocation2 + $0x58] sm:$0xff] }
 0x1ff   :  { %2588 = vst.msk [vmem:[#allocation2 + $0x150] sm:$0xff] %vm82_vm2, %v2460_v18  ;;  %7901 = vmatmul.msk.bf16.gmra.mxu1 %vm82_vm2, %v3847_v53  ;;  %v3415_v53 = vpack.c.bf16 %v3354_v39, %v3353_v34  ;;  %v3791_v18 = vld [vmem:[#allocation2 + $0x51] sm:$0xff] }
 0x200   :  { %2589 = vst.msk [vmem:[#allocation2 + $0x158] sm:$0xff] %vm82_vm2, %v2525_v52  ;;  %7937 = vmatmul.msk.bf16.gmra.mxu2 %vm82_vm2, %v3413_v0  ;;  %7973 = vmatmul.msk.bf16.gmra.mxu3 %vm82_vm2, %v3414_v23  ;;  %v2543_v0 = vmul.f32 %v14335_v36, %v2479_v47  ;;  %v3417_v52 = vpack.c.bf16 %v3358_v11, %v3357_v4  ;;  %v3369_v4 = vld [vmem:[#allocation2 + $0xb0] sm:$0xff] }
 0x201   :  { %2590 = vst.msk [vmem:[#allocation2 + $0x160] sm:$0xff] %vm82_vm2, %v2462_v1  ;;  %8009 = vmatmul.msk.bf16.gmra.mxu0 %vm82_vm2, %v3848_v12  ;;  %v3851_v1 = vpack.c.bf16 %v3792_v27, %v3791_v18  ;;  %v3803_v18 = vld [vmem:[#allocation2 + $0xb1] sm:$0xff]  ;;  %v3804_v27 = vld [vmem:[#allocation2 + $0xb9] sm:$0xff] }
 0x202   :  { %2591 = vst.msk [vmem:[#allocation2 + $0x168] sm:$0xff] %vm82_vm2, %v2527_v45  ;;  %v3794_v45 = vld [vmem:[#allocation2 + $0x69] sm:$0xff] }
 0x203   :  { %2592 = vst.msk [vmem:[#allocation2 + $0x170] sm:$0xff] %vm82_vm2, %v2464_v2  ;;  %v3359_v2 = vld [vmem:[#allocation2 + $0x60] sm:$0xff]  ;;  %v3852_v6 = vpack.c.bf16 %v3794_v45, %v3793_v61  ;;  %v3857_v61 = vpack.c.bf16 %v3804_v27, %v3803_v18  ;;  %v3376_v27 = vld [vmem:[#allocation2 + $0xe8] sm:$0xff] }
 0x204   :  { %2593 = vst.msk [vmem:[#allocation2 + $0x178] sm:$0xff] %vm82_vm2, %v2529_v26  ;;  %v3418_v57 = vpack.c.bf16 %v3360_v59, %v3359_v2  ;;  %v3362_v26 = vld [vmem:[#allocation2 + $0x78] sm:$0xff] }
 0x205   :  { %2594 = vst.msk [vmem:[#allocation2 + $0x180] sm:$0xff] %vm82_vm2, %v2466_v19  ;;  %v3795_v19 = vld [vmem:[#allocation2 + $0x71] sm:$0xff] }
 0x206   :  { %2595 = vst.msk [vmem:[#allocation2 + $0x188] sm:$0xff] %vm82_vm2, %v2531_v22  ;;  %v3419_v22 = vpack.c.bf16 %v3362_v26, %v3361_v41  ;;  %v3853_v25 = vpack.c.bf16 %v3796_v30, %v3795_v19 }
 0x207   :  { %2596 = vst.msk [vmem:[#allocation2 + $0x190] sm:$0xff] %vm82_vm2, %v2468_v13  ;;  %v14336_v13 = vmov 0.0  }
 0x208   :  { %2597 = vst.msk [vmem:[#allocation2 + $0x198] sm:$0xff] %vm82_vm2, %v2533_v24  ;;  %v3420_v24 = vpack.c.bf16 %v3364_v17, %v3363_v60  ;;  %v3372_v17 = vld [vmem:[#allocation2 + $0xc8] sm:$0xff] }
 0x209   :  { %2598 = vst.msk [vmem:[#allocation2 + $0x1a0] sm:$0xff] %vm82_vm2, %v2470_v48  ;;  %v3366_v48 = vld [vmem:[#allocation2 + $0x98] sm:$0xff]  ;;  %v3805_v60 = vld [vmem:[#allocation2 + $0xc1] sm:$0xff] }
 0x20a   :  { %2599 = vst.msk [vmem:[#allocation2 + $0x1a8] sm:$0xff] %vm82_vm2, %v2535_v38  ;;  %v3365_v38 = vld [vmem:[#allocation2 + $0x90] sm:$0xff] }
 0x20b   :  { %2600 = vst.msk [vmem:[#allocation2 + $0x1b0] sm:$0xff] %vm82_vm2, %v2472_v28  ;;  %v3421_v28 = vpack.c.bf16 %v3366_v48, %v3365_v38  ;;  %v8238_v48 = vld [vmem:[#allocation8 + $0x8] sm:$0xff] }
 0x20c   :  { %2601 = vst.msk [vmem:[#allocation2 + $0x1b8] sm:$0xff] %vm82_vm2, %v2537_v46  ;;  %5669 = vmatpush.bf16.msra.mxu2 %v8238_v48  ;;  %v3377_v48 = vld [vmem:[#allocation2 + $0xf0] sm:$0xff] }
 0x20d   :  { %2602 = vst.msk [vmem:[#allocation2 + $0x1c0] sm:$0xff] %vm82_vm2, %v2474_v49 }
 0x20e   :  { %2603 = vst.msk [vmem:[#allocation2 + $0x1c8] sm:$0xff] %vm82_vm2, %v2539_v58 }
 0x20f   :  { %2604 = vst.msk [vmem:[#allocation2 + $0x1d0] sm:$0xff] %vm82_vm2, %v2476_v32  ;;  %7902 = vmatmul.msk.bf16.gmra.mxu1 %vm82_vm2, %v3848_v12  ;;  %v3368_v32 = vld [vmem:[#allocation2 + $0xa8] sm:$0xff] }
 0x210   :  { %2605 = vst.msk [vmem:[#allocation2 + $0x1d8] sm:$0xff] %vm82_vm2, %v2541_v40  ;;  %7938 = vmatmul.msk.bf16.gmra.mxu2 %vm82_vm2, %v3414_v23  ;;  %7974 = vmatmul.msk.bf16.gmra.mxu3 %vm82_vm2, %v3415_v53  ;;  %v3802_v40 = vld [vmem:[#allocation2 + $0xa9] sm:$0xff] }
 0x211   :  { %2606 = vst.msk [vmem:[#allocation2 + $0x1e0] sm:$0xff] %vm82_vm2, %v2478_v31  ;;  %8010 = vmatmul.msk.bf16.gmra.mxu0 %vm82_vm2, %v3849_v33 }
 0x212   :  { %2607 = vst.msk [vmem:[#allocation2 + $0x1e8] sm:$0xff] %vm82_vm2, %v2543_v0  ;;  %v3422_v0 = vpack.c.bf16 %v3368_v32, %v3367_v54  ;;  %v3807_v54 = vld [vmem:[#allocation2 + $0xd1] sm:$0xff] }
 0x213   :  { %2608 = vst.msk [vmem:[#allocation2 + $0x1f0] sm:$0xff] %vm82_vm2, %v2544_v37  ;;  %v3856_v37 = vpack.c.bf16 %v3802_v40, %v3801_v43 }
 0x214   :  { %87 = vst.msk [vmem:[#allocation3 + $0x200] sm:$0xff] %vm86_vm6, %v14336_v13 }
 0x215   :  { %88 = vst.msk [vmem:[#allocation3 + $0x208] sm:$0xff] %vm86_vm6, %v14336_v13 }
 0x216   :  { %89 = vst.msk [vmem:[#allocation3 + $0x210] sm:$0xff] %vm86_vm6, %v14336_v13 }
 0x21f   :  { %7903 = vmatmul.msk.bf16.gmra.mxu1 %vm82_vm2, %v3849_v33 }
 0x220   :  { %7939 = vmatmul.msk.bf16.gmra.mxu2 %vm82_vm2, %v3415_v53  ;;  %7975 = vmatmul.msk.bf16.gmra.mxu3 %vm82_vm2, %v3416_v42 }
 0x221   :  { %8011 = vmatmul.msk.bf16.gmra.mxu0 %vm82_vm2, %v3850_v51 }
 0x22f   :  { %7904 = vmatmul.msk.bf16.gmra.mxu1 %vm82_vm2, %v3850_v51 }
 0x230   :  { %7940 = vmatmul.msk.bf16.gmra.mxu2 %vm82_vm2, %v3416_v42  ;;  %7976 = vmatmul.msk.bf16.gmra.mxu3 %vm82_vm2, %v3417_v52  ;;  %v3370_v42 = vld [vmem:[#allocation2 + $0xb8] sm:$0xff] }
 0x231   :  { %8012 = vmatmul.msk.bf16.gmra.mxu0 %vm82_vm2, %v3851_v1  ;;  %v3423_v59 = vpack.c.bf16 %v3370_v42, %v3369_v4 }
 0x23f   :  { %7905 = vmatmul.msk.bf16.gmra.mxu1 %vm82_vm2, %v3851_v1 }
 0x240   :  { %7941 = vmatmul.msk.bf16.gmra.mxu2 %vm82_vm2, %v3417_v52  ;;  %7977 = vmatmul.msk.bf16.gmra.mxu3 %vm82_vm2, %v3418_v57 }
 0x241   :  { %8013 = vmatmul.msk.bf16.gmra.mxu0 %vm82_vm2, %v3852_v6 }
 0x24f   :  { %7906 = vmatmul.msk.bf16.gmra.mxu1 %vm82_vm2, %v3852_v6 }
 0x250   :  { %7942 = vmatmul.msk.bf16.gmra.mxu2 %vm82_vm2, %v3418_v57  ;;  %7978 = vmatmul.msk.bf16.gmra.mxu3 %vm82_vm2, %v3419_v22 }
 0x251   :  { %8014 = vmatmul.msk.bf16.gmra.mxu0 %vm82_vm2, %v3853_v25 }
 0x25f   :  { %7907 = vmatmul.msk.bf16.gmra.mxu1 %vm82_vm2, %v3853_v25 }
 0x260   :  { %7943 = vmatmul.msk.bf16.gmra.mxu2 %vm82_vm2, %v3419_v22  ;;  %7979 = vmatmul.msk.bf16.gmra.mxu3 %vm82_vm2, %v3420_v24 }
 0x261   :  { %8015 = vmatmul.msk.bf16.gmra.mxu0 %vm82_vm2, %v3854_v15 }
 0x26c   :  { %v2918_v23 = vpop.f32.mrf.mxu1 }
 0x26e   :  { %v3993_v12 = vpop.f32.mrf.mxu0 }
 0x26f   :  { %7908 = vmatmul.msk.bf16.gmra.mxu1 %vm82_vm2, %v3854_v15  ;;  %v3371_v15 = vld [vmem:[#allocation2 + $0xc0] sm:$0xff] }
 0x270   :  { %7944 = vmatmul.msk.bf16.gmra.mxu2 %vm82_vm2, %v3420_v24  ;;  %7980 = vmatmul.msk.bf16.gmra.mxu3 %vm82_vm2, %v3421_v28  ;;  %v3806_v24 = vld [vmem:[#allocation2 + $0xc9] sm:$0xff]  ;;  %v3424_v38 = vpack.c.bf16 %v3372_v17, %v3371_v15 }
 0x271   :  { %8016 = vmatmul.msk.bf16.gmra.mxu0 %vm82_vm2, %v3855_v62 }
 0x273   :  { %v3189_v16 = vpop.f32.mrf.mxu2  ;;  %v3559_v46 = vpop.f32.mrf.mxu3 }
 0x274   :  { %v3190_v55 = vadd.f32 %v3189_v16, %v2918_v23  ;;  %v2920_v49 = vpop.f32.mrf.mxu1  ;;  %v8242_v23 = vld [vmem:[#allocation8 + $0x28] sm:$0xff] }
 0x275   :  { %6047 = vmatpush.bf16.msra.mxu3 %v8242_v23  ;;  %v3378_v23 = vld [vmem:[#allocation2 + $0xf8] sm:$0xff] }
 0x276   :  { %v3719_v9 = vadd.f32 %v3559_v46, %v3190_v55  ;;  %v3995_v47 = vpop.f32.mrf.mxu0 }
 0x278   :  { %v10129_v7 = vadd.f32 %v3993_v12, %v3719_v9  ;;  %v8240_v12 = vld [vmem:[#allocation8 + $0x18] sm:$0xff] }
 0x279   :  { %5392 = vmatpush.bf16.msra.mxu1 %v8240_v12  ;;  %v3812_v12 = vld [vmem:[#allocation2 + $0xf9] sm:$0xff] }
 0x27a   :  { %14337 = vst [vmem:[#allocation44_spill] sm:$0xff] %v10129_v7 }
 0x27b   :  { %v3191_v58 = vpop.f32.mrf.mxu2  ;;  %v3561_v50 = vpop.f32.mrf.mxu3 }
 0x27c   :  { %v3192_v44 = vadd.f32 %v3191_v58, %v2920_v49  ;;  %v2923_v14 = vpop.f32.mrf.mxu1  ;;  %v8244_v58 = vld [vmem:[#allocation8 + $0x38] sm:$0xff] }
 0x27d   :  { %6489 = vmatpush.bf16.msra.mxu0 %v8244_v58 }
 0x27e   :  { %v3720_v31 = vadd.f32 %v3561_v50, %v3192_v44  ;;  %v3998_v36 = vpop.f32.mrf.mxu0 }
 0x27f   :  { %7909 = vmatmul.msk.bf16.gmra.mxu1 %vm82_vm2, %v3855_v62 }
 0x280   :  { %v10132_v39 = vadd.f32 %v3995_v47, %v3720_v31  ;;  %7945 = vmatmul.msk.bf16.gmra.mxu2 %vm82_vm2, %v3421_v28  ;;  %7981 = vmatmul.msk.bf16.gmra.mxu3 %vm82_vm2, %v3422_v0  ;;  %v3858_v28 = vpack.c.bf16 %v3806_v24, %v3805_v60  ;;  %v3808_v31 = vld [vmem:[#allocation2 + $0xd9] sm:$0xff] }
 0x281   :  { %8017 = vmatmul.msk.bf16.gmra.mxu0 %vm82_vm2, %v3856_v37 }
 0x282   :  { %14338 = vst [vmem:[#allocation49_spill] sm:$0xff] %v10132_v39 }
 0x283   :  { %v3194_v21 = vpop.f32.mrf.mxu2  ;;  %v3564_v5 = vpop.f32.mrf.mxu3 }
 0x284   :  { %v3195_v34 = vadd.f32 %v3194_v21, %v2923_v14  ;;  %v2925_v53 = vpop.f32.mrf.mxu1  ;;  %v3374_v14 = vld [vmem:[#allocation2 + $0xd8] sm:$0xff] }
 0x286   :  { %v3721_v33 = vadd.f32 %v3564_v5, %v3195_v34  ;;  %v4000_v10 = vpop.f32.mrf.mxu0  ;;  %v3859_v5 = vpack.c.bf16 %v3808_v31, %v3807_v54  ;;  %v3380_v31 = vld [vmem:[#allocation2 + $0x108] sm:$0xff] }
 0x288   :  { %v10137_v63 = vadd.f32 %v3998_v36, %v3721_v33  ;;  %v3373_v36 = vld [vmem:[#allocation2 + $0xd0] sm:$0xff] }
 0x289   :  { %v3425_v21 = vpack.c.bf16 %v3374_v14, %v3373_v36 }
 0x28a   :  { %14339 = vst [vmem:[#allocation14_spill] sm:$0xff] %v10137_v63 }
 0x28b   :  { %v3196_v35 = vpop.f32.mrf.mxu2  ;;  %v3566_v3 = vpop.f32.mrf.mxu3 }
 0x28c   :  { %v3197_v51 = vadd.f32 %v3196_v35, %v2925_v53  ;;  %v2928_v11 = vpop.f32.mrf.mxu1 }
 0x28e   :  { %v3722_v52 = vadd.f32 %v3566_v3, %v3197_v51  ;;  %v4003_v1 = vpop.f32.mrf.mxu0 }
 0x28f   :  { %7910 = vmatmul.msk.bf16.gmra.mxu1 %vm82_vm2, %v3856_v37 }
 0x290   :  { %v10140_v45 = vadd.f32 %v4000_v10, %v3722_v52  ;;  %7946 = vmatmul.msk.bf16.gmra.mxu2 %vm82_vm2, %v3422_v0  ;;  %7982 = vmatmul.msk.bf16.gmra.mxu3 %vm82_vm2, %v3423_v59 }
 0x291   :  { %8018 = vmatmul.msk.bf16.gmra.mxu0 %vm82_vm2, %v3857_v61 }
 0x292   :  { %14340 = vst [vmem:[#allocation16_spill] sm:$0xff] %v10140_v45 }
 0x293   :  { %v3199_v2 = vpop.f32.mrf.mxu2  ;;  %v3569_v57 = vpop.f32.mrf.mxu3 }
 0x294   :  { %v3200_v6 = vadd.f32 %v3199_v2, %v2928_v11  ;;  %v2930_v26 = vpop.f32.mrf.mxu1 }
 0x296   :  { %v3723_v19 = vadd.f32 %v3569_v57, %v3200_v6  ;;  %v4005_v30 = vpop.f32.mrf.mxu0 }
 0x298   :  { %v10145_v41 = vadd.f32 %v4003_v1, %v3723_v19  ;;  %v3809_v1 = vld [vmem:[#allocation2 + $0xe1] sm:$0xff] }
 0x29b   :  { %v3201_v22 = vpop.f32.mrf.mxu2  ;;  %v3571_v25 = vpop.f32.mrf.mxu3 }
 0x29c   :  { %v3202_v8 = vadd.f32 %v3201_v22, %v2930_v26  ;;  %v2933_v56 = vpop.f32.mrf.mxu1 }
 0x29e   :  { %v3724_v29 = vadd.f32 %v3571_v25, %v3202_v8  ;;  %v4008_v20 = vpop.f32.mrf.mxu0 }
 0x29f   :  { %7911 = vmatmul.msk.bf16.gmra.mxu1 %vm82_vm2, %v3857_v61  ;;  %v3375_v61 = vld [vmem:[#allocation2 + $0xe0] sm:$0xff] }
 0x2a0   :  { %v10148_v62 = vadd.f32 %v4005_v30, %v3724_v29  ;;  %7947 = vmatmul.msk.bf16.gmra.mxu2 %vm82_vm2, %v3423_v59  ;;  %7983 = vmatmul.msk.bf16.gmra.mxu3 %vm82_vm2, %v3424_v38  ;;  %v3810_v59 = vld [vmem:[#allocation2 + $0xe9] sm:$0xff]  ;;  %v3426_v6 = vpack.c.bf16 %v3376_v27, %v3375_v61 }
 0x2a1   :  { %8019 = vmatmul.msk.bf16.gmra.mxu0 %vm82_vm2, %v3858_v28  ;;  %v3860_v26 = vpack.c.bf16 %v3810_v59, %v3809_v1 }
 0x2a2   :  { %14341 = vst [vmem:[#allocation19_spill] sm:$0xff] %v10148_v62 }
 0x2a3   :  { %v3204_v16 = vpop.f32.mrf.mxu2  ;;  %v3574_v46 = vpop.f32.mrf.mxu3 }
 0x2a4   :  { %v3205_v55 = vadd.f32 %v3204_v16, %v2933_v56  ;;  %v2935_v49 = vpop.f32.mrf.mxu1 }
 0x2a6   :  { %v3725_v9 = vadd.f32 %v3574_v46, %v3205_v55  ;;  %v4010_v47 = vpop.f32.mrf.mxu0  ;;  %v3427_v46 = vpack.c.bf16 %v3378_v23, %v3377_v48 }
 0x2a8   :  { %v10153_v50 = vadd.f32 %v4008_v20, %v3725_v9 }
 0x2ab   :  { %v3206_v32 = vpop.f32.mrf.mxu2  ;;  %v3576_v44 = vpop.f32.mrf.mxu3 }
 0x2ac   :  { %v3207_v43 = vadd.f32 %v3206_v32, %v2935_v49  ;;  %v2938_v40 = vpop.f32.mrf.mxu1 }
 0x2ae   :  { %v3726_v0 = vadd.f32 %v3576_v44, %v3207_v43  ;;  %v4013_v37 = vpop.f32.mrf.mxu0 }
 0x2af   :  { %7912 = vmatmul.msk.bf16.gmra.mxu1 %vm82_vm2, %v3858_v28 }
 0x2b0   :  { %v10156_v34 = vadd.f32 %v4010_v47, %v3726_v0  ;;  %7948 = vmatmul.msk.bf16.gmra.mxu2 %vm82_vm2, %v3424_v38  ;;  %7984 = vmatmul.msk.bf16.gmra.mxu3 %vm82_vm2, %v3425_v21  ;;  %v3811_v38 = vld [vmem:[#allocation2 + $0xf1] sm:$0xff] }
 0x2b1   :  { %8020 = vmatmul.msk.bf16.gmra.mxu0 %vm82_vm2, %v3859_v5  ;;  %v3861_v55 = vpack.c.bf16 %v3812_v12, %v3811_v38 }
 0x2b3   :  { %v3209_v53 = vpop.f32.mrf.mxu2  ;;  %v3579_v33 = vpop.f32.mrf.mxu3 }
 0x2b4   :  { %v3210_v10 = vadd.f32 %v3209_v53, %v2938_v40  ;;  %v2940_v35 = vpop.f32.mrf.mxu1 }
 0x2b6   :  { %v3727_v3 = vadd.f32 %v3579_v33, %v3210_v10  ;;  %v4015_v42 = vpop.f32.mrf.mxu0 }
 0x2b8   :  { %v10161_v51 = vadd.f32 %v4013_v37, %v3727_v3  ;;  %v3813_v37 = vld [vmem:[#allocation2 + $0x101] sm:$0xff] }
 0x2ba   :  { %14342 = vst [vmem:[#allocation25_spill] sm:$0xff] %v10161_v51 }
 0x2bb   :  { %v3211_v11 = vpop.f32.mrf.mxu2  ;;  %v3581_v18 = vpop.f32.mrf.mxu3 }
 0x2bc   :  { %v3212_v4 = vadd.f32 %v3211_v11, %v2940_v35  ;;  %v2943_v52 = vpop.f32.mrf.mxu1 }
 0x2be   :  { %v3728_v2 = vadd.f32 %v3581_v18, %v3212_v4  ;;  %v4018_v57 = vpop.f32.mrf.mxu0 }
 0x2bf   :  { %7913 = vmatmul.msk.bf16.gmra.mxu1 %vm82_vm2, %v3859_v5  ;;  %v3379_v5 = vld [vmem:[#allocation2 + $0x100] sm:$0xff] }
 0x2c0   :  { %v10164_v19 = vadd.f32 %v4015_v42, %v3728_v2  ;;  %7949 = vmatmul.msk.bf16.gmra.mxu2 %vm82_vm2, %v3425_v21  ;;  %7985 = vmatmul.msk.bf16.gmra.mxu3 %vm82_vm2, %v3426_v6  ;;  %v3814_v21 = vld [vmem:[#allocation2 + $0x109] sm:$0xff]  ;;  %v3428_v10 = vpack.c.bf16 %v3380_v31, %v3379_v5  ;;  %v3382_v2 = vld [vmem:[#allocation2 + $0x118] sm:$0xff] }
 0x2c1   :  { %8021 = vmatmul.msk.bf16.gmra.mxu0 %vm82_vm2, %v3860_v26  ;;  %v3862_v35 = vpack.c.bf16 %v3814_v21, %v3813_v37 }
 0x2c2   :  { %14343 = vst [vmem:[#allocation29_spill] sm:$0xff] %v10164_v19 }
 0x2c3   :  { %v3214_v30 = vpop.f32.mrf.mxu2  ;;  %v3584_v22 = vpop.f32.mrf.mxu3 }
 0x2c4   :  { %v3215_v25 = vadd.f32 %v3214_v30, %v2943_v52  ;;  %v2945_v17 = vpop.f32.mrf.mxu1  ;;  %v3816_v30 = vld [vmem:[#allocation2 + $0x119] sm:$0xff] }
 0x2c6   :  { %v3729_v8 = vadd.f32 %v3584_v22, %v3215_v25  ;;  %v4020_v56 = vpop.f32.mrf.mxu0  ;;  %v3381_v22 = vld [vmem:[#allocation2 + $0x110] sm:$0xff] }
 0x2c8   :  { %v10169_v60 = vadd.f32 %v4018_v57, %v3729_v8  ;;  %v3429_v8 = vpack.c.bf16 %v3382_v2, %v3381_v22 }
 0x2ca   :  { %14344 = vst [vmem:[#allocation15_spill] sm:$0xff] %v10169_v60 }
 0x2cb   :  { %v3216_v24 = vpop.f32.mrf.mxu2  ;;  %v3586_v15 = vpop.f32.mrf.mxu3 }
 0x2cc   :  { %v3217_v29 = vadd.f32 %v3216_v24, %v2945_v17  ;;  %v2948_v20 = vpop.f32.mrf.mxu1 }
 0x2ce   :  { %v3730_v28 = vadd.f32 %v3586_v15, %v3217_v29  ;;  %v4023_v16 = vpop.f32.mrf.mxu0 }
 0x2cf   :  { %7914 = vmatmul.msk.bf16.gmra.mxu1 %vm82_vm2, %v3860_v26  ;;  %v3815_v26 = vld [vmem:[#allocation2 + $0x111] sm:$0xff] }
 0x2d0   :  { %v10172_v49 = vadd.f32 %v4020_v56, %v3730_v28  ;;  %7950 = vmatmul.msk.bf16.gmra.mxu2 %vm82_vm2, %v3426_v6  ;;  %7986 = vmatmul.msk.bf16.gmra.mxu3 %vm82_vm2, %v3427_v46  ;;  %v3863_v56 = vpack.c.bf16 %v3816_v30, %v3815_v26 }
 0x2d1   :  { %8022 = vmatmul.msk.bf16.gmra.mxu0 %vm82_vm2, %v3861_v55 }
 0x2d2   :  { %14345 = vst [vmem:[#allocation22_spill] sm:$0xff] %v10172_v49 }
 0x2d3   :  { %v3219_v9 = vpop.f32.mrf.mxu2  ;;  %v3589_v47 = vpop.f32.mrf.mxu3 }
 0x2d4   :  { %v3220_v58 = vadd.f32 %v3219_v9, %v2948_v20  ;;  %v2950_v32 = vpop.f32.mrf.mxu1 }
 0x2d6   :  { %v3731_v44 = vadd.f32 %v3589_v47, %v3220_v58  ;;  %v4025_v14 = vpop.f32.mrf.mxu0  ;;  %v3817_v47 = vld [vmem:[#allocation2 + $0x121] sm:$0xff]  ;;  %v3818_v58 = vld [vmem:[#allocation2 + $0x129] sm:$0xff] }
 0x2d8   :  { %v10177_v43 = vadd.f32 %v4023_v16, %v3731_v44 }
 0x2da   :  { %14346 = vst [vmem:[#allocation73_spill] sm:$0xff] %v10177_v43 }
 0x2db   :  { %v3221_v40 = vpop.f32.mrf.mxu2  ;;  %v3591_v54 = vpop.f32.mrf.mxu3 }
 0x2dc   :  { %v3222_v36 = vadd.f32 %v3221_v40, %v2950_v32  ;;  %v2953_v0 = vpop.f32.mrf.mxu1  ;;  %v3383_v32 = vld [vmem:[#allocation2 + $0x120] sm:$0xff] }
 0x2de   :  { %v3732_v53 = vadd.f32 %v3591_v54, %v3222_v36  ;;  %v4028_v33 = vpop.f32.mrf.mxu0  ;;  %v3864_v54 = vpack.c.bf16 %v3818_v58, %v3817_v47 }
 0x2df   :  { %7915 = vmatmul.msk.bf16.gmra.mxu1 %vm82_vm2, %v3861_v55 }
 0x2e0   :  { %v10180_v3 = vadd.f32 %v4025_v14, %v3732_v53  ;;  %7951 = vmatmul.msk.bf16.gmra.mxu2 %vm82_vm2, %v3427_v46  ;;  %7987 = vmatmul.msk.bf16.gmra.mxu3 %vm82_vm2, %v3428_v10  ;;  %v3384_v46 = vld [vmem:[#allocation2 + $0x128] sm:$0xff] }
 0x2e1   :  { %8023 = vmatmul.msk.bf16.gmra.mxu0 %vm82_vm2, %v3862_v35  ;;  %v3430_v40 = vpack.c.bf16 %v3384_v46, %v3383_v32 }
 0x2e2   :  { %14347 = vst [vmem:[#allocation85_spill] sm:$0xff] %v10180_v3 }
 0x2e3   :  { %v3224_v42 = vpop.f32.mrf.mxu2  ;;  %v3594_v11 = vpop.f32.mrf.mxu3 }
 0x2e4   :  { %v3225_v18 = vadd.f32 %v3224_v42, %v2953_v0  ;;  %v2955_v27 = vpop.f32.mrf.mxu1  ;;  %v3386_v42 = vld [vmem:[#allocation2 + $0x138] sm:$0xff] }
 0x2e6   :  { %v3733_v4 = vadd.f32 %v3594_v11, %v3225_v18  ;;  %v4030_v52 = vpop.f32.mrf.mxu0 }
 0x2e8   :  { %v10185_v1 = vadd.f32 %v4028_v33, %v3733_v4  ;;  %v3820_v4 = vld [vmem:[#allocation2 + $0x139] sm:$0xff] }
 0x2ea   :  { %14348 = vst [vmem:[#allocation24_spill] sm:$0xff] %v10185_v1 }
 0x2eb   :  { %v3226_v59 = vpop.f32.mrf.mxu2  ;;  %v3596_v61 = vpop.f32.mrf.mxu3 }
 0x2ec   :  { %v3227_v57 = vadd.f32 %v3226_v59, %v2955_v27  ;;  %v2958_v6 = vpop.f32.mrf.mxu1  ;;  %v3819_v27 = vld [vmem:[#allocation2 + $0x131] sm:$0xff] }
 0x2ee   :  { %v3734_v25 = vadd.f32 %v3596_v61, %v3227_v57  ;;  %v4033_v17 = vpop.f32.mrf.mxu0  ;;  %v3865_v57 = vpack.c.bf16 %v3820_v4, %v3819_v27 }
 0x2ef   :  { %7916 = vmatmul.msk.bf16.gmra.mxu1 %vm82_vm2, %v3862_v35 }
 0x2f0   :  { %v10188_v24 = vadd.f32 %v4030_v52, %v3734_v25  ;;  %7952 = vmatmul.msk.bf16.gmra.mxu2 %vm82_vm2, %v3428_v10  ;;  %7988 = vmatmul.msk.bf16.gmra.mxu3 %vm82_vm2, %v3429_v8  ;;  %v3385_v52 = vld [vmem:[#allocation2 + $0x130] sm:$0xff] }
 0x2f1   :  { %8024 = vmatmul.msk.bf16.gmra.mxu0 %vm82_vm2, %v3863_v56  ;;  %v3431_v2 = vpack.c.bf16 %v3386_v42, %v3385_v52  ;;  %v3824_v42 = vld [vmem:[#allocation2 + $0x159] sm:$0xff] }
 0x2f2   :  { %14349 = vst [vmem:[#allocation17_spill] sm:$0xff] %v10188_v24 }
 0x2f3   :  { %v3229_v15 = vpop.f32.mrf.mxu2  ;;  %v3599_v48 = vpop.f32.mrf.mxu3 }
 0x2f4   :  { %v3230_v23 = vadd.f32 %v3229_v15, %v2958_v6  ;;  %v2960_v29 = vpop.f32.mrf.mxu1 }
 0x2f6   :  { %v3735_v20 = vadd.f32 %v3599_v48, %v3230_v23  ;;  %v4035_v38 = vpop.f32.mrf.mxu0  ;;  %v3388_v23 = vld [vmem:[#allocation2 + $0x148] sm:$0xff] }
 0x2f8   :  { %v10193_v12 = vadd.f32 %v4033_v17, %v3735_v20 }
 0x2fa   :  { %14350 = vst [vmem:[#allocation21_spill] sm:$0xff] %v10193_v12 }
 0x2fb   :  { %v3231_v28 = vpop.f32.mrf.mxu2  ;;  %v3601_v16 = vpop.f32.mrf.mxu3 }
 0x2fc   :  { %v3232_v55 = vadd.f32 %v3231_v28, %v2960_v29  ;;  %v2963_v9 = vpop.f32.mrf.mxu1  ;;  %v3822_v28 = vld [vmem:[#allocation2 + $0x149] sm:$0xff] }
 0x2fe   :  { %v3736_v44 = vadd.f32 %v3601_v16, %v3232_v55  ;;  %v4038_v14 = vpop.f32.mrf.mxu0  ;;  %v3387_v16 = vld [vmem:[#allocation2 + $0x140] sm:$0xff] }
 0x2ff   :  { %7917 = vmatmul.msk.bf16.gmra.mxu1 %vm82_vm2, %v3863_v56 }
 0x300   :  { %v10196_v31 = vadd.f32 %v4035_v38, %v3736_v44  ;;  %7953 = vmatmul.msk.bf16.gmra.mxu2 %vm82_vm2, %v3429_v8  ;;  %7989 = vmatmul.msk.bf16.gmra.mxu3 %vm82_vm2, %v3430_v40  ;;  %v3821_v38 = vld [vmem:[#allocation2 + $0x141] sm:$0xff] }
 0x301   :  { %8025 = vmatmul.msk.bf16.gmra.mxu0 %vm82_vm2, %v3864_v54  ;;  %v3866_v47 = vpack.c.bf16 %v3822_v28, %v3821_v38  ;;  %v3391_v38 = vld [vmem:[#allocation2 + $0x160] sm:$0xff] }
 0x302   :  { %14351 = vst [vmem:[#allocation23_spill] sm:$0xff] %v10196_v31 }
 0x303   :  { %v3234_v36 = vpop.f32.mrf.mxu2  ;;  %v3604_v0 = vpop.f32.mrf.mxu3 }
 0x304   :  { %v3235_v37 = vadd.f32 %v3234_v36, %v2963_v9  ;;  %v2965_v21 = vpop.f32.mrf.mxu1  ;;  %v3432_v9 = vpack.c.bf16 %v3388_v23, %v3387_v16 }
 0x306   :  { %v3737_v5 = vadd.f32 %v3604_v0, %v3235_v37  ;;  %v4040_v53 = vpop.f32.mrf.mxu0 }
 0x308   :  { %v10201_v33 = vadd.f32 %v4038_v14, %v3737_v5  ;;  %v3390_v5 = vld [vmem:[#allocation2 + $0x158] sm:$0xff] }
 0x30a   :  { %14352 = vst [vmem:[#allocation57_spill] sm:$0xff] %v10201_v33 }
 0x30b   :  { %v3236_v10 = vpop.f32.mrf.mxu2  ;;  %v3606_v35 = vpop.f32.mrf.mxu3 }
 0x30c   :  { %v3237_v11 = vadd.f32 %v3236_v10, %v2965_v21  ;;  %v2968_v18 = vpop.f32.mrf.mxu1 }
 0x30e   :  { %v3738_v59 = vadd.f32 %v3606_v35, %v3237_v11  ;;  %v4043_v61 = vpop.f32.mrf.mxu0  ;;  %v3823_v35 = vld [vmem:[#allocation2 + $0x151] sm:$0xff] }
 0x30f   :  { %7918 = vmatmul.msk.bf16.gmra.mxu1 %vm82_vm2, %v3864_v54  ;;  %v3389_v11 = vld [vmem:[#allocation2 + $0x150] sm:$0xff]  ;;  %v3867_v52 = vpack.c.bf16 %v3824_v42, %v3823_v35  ;;  %v3828_v42 = vld [vmem:[#allocation2 + $0x179] sm:$0xff] }
 0x310   :  { %v10204_v6 = vadd.f32 %v4040_v53, %v3738_v59  ;;  %7954 = vmatmul.msk.bf16.gmra.mxu2 %vm82_vm2, %v3430_v40  ;;  %7990 = vmatmul.msk.bf16.gmra.mxu3 %vm82_vm2, %v3431_v2  ;;  %v3433_v4 = vpack.c.bf16 %v3390_v5, %v3389_v11  ;;  %v3394_v5 = vld [vmem:[#allocation2 + $0x178] sm:$0xff]  ;;  %v3393_v11 = vld [vmem:[#allocation2 + $0x170] sm:$0xff] }
 0x311   :  { %8026 = vmatmul.msk.bf16.gmra.mxu0 %vm82_vm2, %v3865_v57  ;;  %v3827_v35 = vld [vmem:[#allocation2 + $0x171] sm:$0xff] }
 0x312   :  { %14353 = vst [vmem:[#allocation63_spill] sm:$0xff] %v10204_v6 }
 0x313   :  { %v3239_v26 = vpop.f32.mrf.mxu2  ;;  %v3609_v30 = vpop.f32.mrf.mxu3 }
 0x314   :  { %v3240_v22 = vadd.f32 %v3239_v26, %v2968_v18  ;;  %v2970_v25 = vpop.f32.mrf.mxu1 }
 0x316   :  { %v3739_v17 = vadd.f32 %v3609_v30, %v3240_v22  ;;  %v4045_v8 = vpop.f32.mrf.mxu0 }
 0x318   :  { %v10209_v56 = vadd.f32 %v4043_v61, %v3739_v17 }
 0x31a   :  { %14354 = vst [vmem:[#allocation68_spill] sm:$0xff] %v10209_v56 }
 0x31b   :  { %v3241_v15 = vpop.f32.mrf.mxu2  ;;  %v3611_v48 = vpop.f32.mrf.mxu3 }
 0x31c   :  { %v3242_v29 = vadd.f32 %v3241_v15, %v2970_v25  ;;  %v2973_v20 = vpop.f32.mrf.mxu1  ;;  %v3392_v15 = vld [vmem:[#allocation2 + $0x168] sm:$0xff] }
 0x31e   :  { %v3740_v46 = vadd.f32 %v3611_v48, %v3242_v29  ;;  %v4048_v55 = vpop.f32.mrf.mxu0  ;;  %v3825_v29 = vld [vmem:[#allocation2 + $0x161] sm:$0xff] }
 0x31f   :  { %7919 = vmatmul.msk.bf16.gmra.mxu1 %vm82_vm2, %v3865_v57 }
 0x320   :  { %v10212_v58 = vadd.f32 %v4045_v8, %v3740_v46  ;;  %7955 = vmatmul.msk.bf16.gmra.mxu2 %vm82_vm2, %v3431_v2  ;;  %7991 = vmatmul.msk.bf16.gmra.mxu3 %vm82_vm2, %v3432_v9  ;;  %v3434_v46 = vpack.c.bf16 %v3392_v15, %v3391_v38  ;;  %v3829_v38 = vld [vmem:[#allocation2 + $0x181] sm:$0xff] }
 0x321   :  { %8027 = vmatmul.msk.bf16.gmra.mxu0 %vm82_vm2, %v3866_v47 }
 0x322   :  { %14355 = vst [vmem:[#allocation20_spill] sm:$0xff] %v10212_v58 }
 0x323   :  { %v3244_v32 = vpop.f32.mrf.mxu2  ;;  %v3614_v44 = vpop.f32.mrf.mxu3 }
 0x324   :  { %v3245_v14 = vadd.f32 %v3244_v32, %v2973_v20  ;;  %v2975_v40 = vpop.f32.mrf.mxu1  ;;  %v3826_v20 = vld [vmem:[#allocation2 + $0x169] sm:$0xff] }
 0x326   :  { %v3741_v54 = vadd.f32 %v3614_v44, %v3245_v14  ;;  %v4050_v36 = vpop.f32.mrf.mxu0 }
 0x328   :  { %v10217_v0 = vadd.f32 %v4048_v55, %v3741_v54  ;;  %v3868_v55 = vpack.c.bf16 %v3826_v20, %v3825_v29 }
 0x32a   :  { %14356 = vst [vmem:[#allocation26_spill] sm:$0xff] %v10217_v0 }
 0x32b   :  { %v3246_v37 = vpop.f32.mrf.mxu2  ;;  %v3616_v21 = vpop.f32.mrf.mxu3 }
 0x32c   :  { %v3247_v53 = vadd.f32 %v3246_v37, %v2975_v40  ;;  %v2978_v10 = vpop.f32.mrf.mxu1 }
 0x32e   :  { %v3742_v18 = vadd.f32 %v3616_v21, %v3247_v53  ;;  %v4053_v27 = vpop.f32.mrf.mxu0 }
 0x32f   :  { %7920 = vmatmul.msk.bf16.gmra.mxu1 %vm82_vm2, %v3866_v47 }
 0x330   :  { %v10220_v59 = vadd.f32 %v4050_v36, %v3742_v18  ;;  %7956 = vmatmul.msk.bf16.gmra.mxu2 %vm82_vm2, %v3432_v9  ;;  %7992 = vmatmul.msk.bf16.gmra.mxu3 %vm82_vm2, %v3433_v4 }
 0x331   :  { %8028 = vmatmul.msk.bf16.gmra.mxu0 %vm82_vm2, %v3867_v52 }
 0x332   :  { %14357 = vst [vmem:[#allocation30_spill] sm:$0xff] %v10220_v59 }
 0x333   :  { %v3249_v61 = vpop.f32.mrf.mxu2  ;;  %v3619_v2 = vpop.f32.mrf.mxu3 }
 0x334   :  { %v3250_v57 = vadd.f32 %v3249_v61, %v2978_v10  ;;  %v2980_v26 = vpop.f32.mrf.mxu1 }
 0x336   :  { %v3743_v30 = vadd.f32 %v3619_v2, %v3250_v57  ;;  %v4055_v22 = vpop.f32.mrf.mxu0 }
 0x338   :  { %v10225_v25 = vadd.f32 %v4053_v27, %v3743_v30 }
 0x33a   :  { %14358 = vst [vmem:[#allocation32_spill] sm:$0xff] %v10225_v25 }
 0x33b   :  { %v3251_v17 = vpop.f32.mrf.mxu2  ;;  %v3621_v8 = vpop.f32.mrf.mxu3 }
 0x33c   :  { %v3252_v48 = vadd.f32 %v3251_v17, %v2980_v26  ;;  %v2983_v23 = vpop.f32.mrf.mxu1 }
 0x33e   :  { %v3744_v28 = vadd.f32 %v3621_v8, %v3252_v48  ;;  %v4058_v16 = vpop.f32.mrf.mxu0 }
 0x33f   :  { %7921 = vmatmul.msk.bf16.gmra.mxu1 %vm82_vm2, %v3867_v52  ;;  %v3869_v52 = vpack.c.bf16 %v3828_v42, %v3827_v35  ;;  %v3398_v42 = vld [vmem:[#allocation2 + $0x198] sm:$0xff] }
 0x340   :  { %v10228_v9 = vadd.f32 %v4055_v22, %v3744_v28  ;;  %7957 = vmatmul.msk.bf16.gmra.mxu2 %vm82_vm2, %v3433_v4  ;;  %7993 = vmatmul.msk.bf16.gmra.mxu3 %vm82_vm2, %v3434_v46  ;;  %v3435_v4 = vpack.c.bf16 %v3394_v5, %v3393_v11  ;;  %v3830_v28 = vld [vmem:[#allocation2 + $0x189] sm:$0xff] }
 0x341   :  { %8029 = vmatmul.msk.bf16.gmra.mxu0 %vm82_vm2, %v3868_v55 }
 0x342   :  { %14359 = vst [vmem:[#allocation35_spill] sm:$0xff] %v10228_v9 }
 0x343   :  { %v3254_v47 = vpop.f32.mrf.mxu2  ;;  %v3624_v32 = vpop.f32.mrf.mxu3 }
 0x344   :  { %v3255_v44 = vadd.f32 %v3254_v47, %v2983_v23  ;;  %v2985_v14 = vpop.f32.mrf.mxu1  ;;  %v3396_v23 = vld [vmem:[#allocation2 + $0x188] sm:$0xff] }
 0x346   :  { %v3745_v40 = vadd.f32 %v3624_v32, %v3255_v44  ;;  %v4060_v54 = vpop.f32.mrf.mxu0  ;;  %v3870_v32 = vpack.c.bf16 %v3830_v28, %v3829_v38 }
 0x348   :  { %v10233_v36 = vadd.f32 %v4058_v16, %v3745_v40  ;;  %v3395_v16 = vld [vmem:[#allocation2 + $0x180] sm:$0xff] }
 0x349   :  { %v3436_v47 = vpack.c.bf16 %v3396_v23, %v3395_v16 }
 0x34a   :  { %14360 = vst [vmem:[#allocation37_spill] sm:$0xff] %v10233_v36 }
 0x34b   :  { %v3256_v37 = vpop.f32.mrf.mxu2  ;;  %v3626_v21 = vpop.f32.mrf.mxu3 }
 0x34c   :  { %v3257_v53 = vadd.f32 %v3256_v37, %v2985_v14  ;;  %v2988_v10 = vpop.f32.mrf.mxu1 }
 0x34e   :  { %v3746_v18 = vadd.f32 %v3626_v21, %v3257_v53  ;;  %v4063_v27 = vpop.f32.mrf.mxu0 }
 0x34f   :  { %7922 = vmatmul.msk.bf16.gmra.mxu1 %vm82_vm2, %v3868_v55 }
 0x350   :  { %v10236_v61 = vadd.f32 %v4060_v54, %v3746_v18  ;;  %7958 = vmatmul.msk.bf16.gmra.mxu2 %vm82_vm2, %v3434_v46  ;;  %7994 = vmatmul.msk.bf16.gmra.mxu3 %vm82_vm2, %v3435_v4 }
 0x351   :  { %8030 = vmatmul.msk.bf16.gmra.mxu0 %vm82_vm2, %v3869_v52 }
 0x352   :  { %14361 = vst [vmem:[#allocation41_spill] sm:$0xff] %v10236_v61 }
 0x353   :  { %v3259_v2 = vpop.f32.mrf.mxu2  ;;  %v3629_v57 = vpop.f32.mrf.mxu3 }
 0x354   :  { %v3260_v26 = vadd.f32 %v3259_v2, %v2988_v10  ;;  %v2990_v30 = vpop.f32.mrf.mxu1 }
 0x356   :  { %v3747_v22 = vadd.f32 %v3629_v57, %v3260_v26  ;;  %v4065_v17 = vpop.f32.mrf.mxu0 }
 0x358   :  { %v10241_v8 = vadd.f32 %v4063_v27, %v3747_v22  ;;  %v3831_v27 = vld [vmem:[#allocation2 + $0x191] sm:$0xff] }
 0x35a   :  { %14362 = vst [vmem:[#allocation43_spill] sm:$0xff] %v10241_v8 }
 0x35b   :  { %v3261_v15 = vpop.f32.mrf.mxu2  ;;  %v3631_v48 = vpop.f32.mrf.mxu3 }
 0x35c   :  { %v3262_v29 = vadd.f32 %v3261_v15, %v2990_v30  ;;  %v2993_v20 = vpop.f32.mrf.mxu1 }
 0x35e   :  { %v3748_v46 = vadd.f32 %v3631_v48, %v3262_v29  ;;  %v4068_v55 = vpop.f32.mrf.mxu0 }
 0x35f   :  { %7923 = vmatmul.msk.bf16.gmra.mxu1 %vm82_vm2, %v3869_v52  ;;  %v3832_v52 = vld [vmem:[#allocation2 + $0x199] sm:$0xff] }
 0x360   :  { %v10244_v44 = vadd.f32 %v4065_v17, %v3748_v46  ;;  %7959 = vmatmul.msk.bf16.gmra.mxu2 %vm82_vm2, %v3435_v4  ;;  %7995 = vmatmul.msk.bf16.gmra.mxu3 %vm82_vm2, %v3436_v47  ;;  %v3397_v4 = vld [vmem:[#allocation2 + $0x190] sm:$0xff]  ;;  %v3871_v30 = vpack.c.bf16 %v3832_v52, %v3831_v27  ;;  %v3400_v46 = vld [vmem:[#allocation2 + $0x1a8] sm:$0xff] }
 0x361   :  { %8031 = vmatmul.msk.bf16.gmra.mxu0 %vm82_vm2, %v3870_v32  ;;  %v3437_v26 = vpack.c.bf16 %v3398_v42, %v3397_v4 }
 0x362   :  { %14363 = vst [vmem:[#allocation46_spill] sm:$0xff] %v10244_v44 }
 0x363   :  { %v3264_v14 = vpop.f32.mrf.mxu2  ;;  %v3634_v40 = vpop.f32.mrf.mxu3 }
 0x364   :  { %v3265_v54 = vadd.f32 %v3264_v14, %v2993_v20  ;;  %v2995_v37 = vpop.f32.mrf.mxu1  ;;  %v3833_v14 = vld [vmem:[#allocation2 + $0x1a1] sm:$0xff] }
 0x366   :  { %v3749_v21 = vadd.f32 %v3634_v40, %v3265_v54  ;;  %v4070_v5 = vpop.f32.mrf.mxu0  ;;  %v3834_v40 = vld [vmem:[#allocation2 + $0x1a9] sm:$0xff] }
 0x368   :  { %v10249_v53 = vadd.f32 %v4068_v55, %v3749_v21 }
 0x36a   :  { %14364 = vst [vmem:[#allocation53_spill] sm:$0xff] %v10249_v53 }
 0x36b   :  { %v3266_v10 = vpop.f32.mrf.mxu2  ;;  %v3636_v35 = vpop.f32.mrf.mxu3 }
 0x36c   :  { %v3267_v11 = vadd.f32 %v3266_v10, %v2995_v37  ;;  %v2998_v18 = vpop.f32.mrf.mxu1 }
 0x36e   :  { %v3750_v2 = vadd.f32 %v3636_v35, %v3267_v11  ;;  %v4073_v57 = vpop.f32.mrf.mxu0 }
 0x36f   :  { %7924 = vmatmul.msk.bf16.gmra.mxu1 %vm82_vm2, %v3870_v32 }
 0x370   :  { %v10252_v22 = vadd.f32 %v4070_v5, %v3750_v2  ;;  %7960 = vmatmul.msk.bf16.gmra.mxu2 %vm82_vm2, %v3436_v47  ;;  %7996 = vmatmul.msk.bf16.gmra.mxu3 %vm82_vm2, %v3437_v26  ;;  %v3399_v47 = vld [vmem:[#allocation2 + $0x1a0] sm:$0xff]  ;;  %v3872_v5 = vpack.c.bf16 %v3834_v40, %v3833_v14 }
 0x371   :  { %8032 = vmatmul.msk.bf16.gmra.mxu0 %vm82_vm2, %v3871_v30  ;;  %v3438_v21 = vpack.c.bf16 %v3400_v46, %v3399_v47 }
 0x372   :  { %14365 = vst [vmem:[#allocation50_spill] sm:$0xff] %v10252_v22 }
 0x373   :  { %v3269_v17 = vpop.f32.mrf.mxu2  ;;  %v3639_v15 = vpop.f32.mrf.mxu3 }
 0x374   :  { %v3270_v48 = vadd.f32 %v3269_v17, %v2998_v18  ;;  %v3000_v23 = vpop.f32.mrf.mxu1 }
 0x376   :  { %v3751_v29 = vadd.f32 %v3639_v15, %v3270_v48  ;;  %v4075_v20 = vpop.f32.mrf.mxu0  ;;  %v3835_v48 = vld [vmem:[#allocation2 + $0x1b1] sm:$0xff] }
 0x378   :  { %v10257_v38 = vadd.f32 %v4073_v57, %v3751_v29 }
 0x37a   :  { %14366 = vst [vmem:[#allocation54_spill] sm:$0xff] %v10257_v38 }
 0x37b   :  { %v3271_v28 = vpop.f32.mrf.mxu2  ;;  %v3641_v16 = vpop.f32.mrf.mxu3 }
 0x37c   :  { %v3272_v55 = vadd.f32 %v3271_v28, %v3000_v23  ;;  %v3003_v32 = vpop.f32.mrf.mxu1  ;;  %v3836_v23 = vld [vmem:[#allocation2 + $0x1b9] sm:$0xff] }
 0x37e   :  { %v3752_v54 = vadd.f32 %v3641_v16, %v3272_v55  ;;  %v4078_v37 = vpop.f32.mrf.mxu0  ;;  %v3873_v16 = vpack.c.bf16 %v3836_v23, %v3835_v48  ;;  %v8239_v23 = vld [vmem:[#allocation8 + $0x10] sm:$0xff] }
 0x37f   :  { %7925 = vmatmul.msk.bf16.gmra.mxu1 %vm82_vm2, %v3871_v30  ;;  %v3402_v30 = vld [vmem:[#allocation2 + $0x1b8] sm:$0xff] }
 0x380   :  { %v10260_v10 = vadd.f32 %v4075_v20, %v3752_v54  ;;  %7961 = vmatmul.msk.bf16.gmra.mxu2 %vm82_vm2, %v3437_v26  ;;  %7997 = vmatmul.msk.bf16.gmra.mxu3 %vm82_vm2, %v3438_v21  ;;  %v3401_v26 = vld [vmem:[#allocation2 + $0x1b0] sm:$0xff] }
 0x381   :  { %8033 = vmatmul.msk.bf16.gmra.mxu0 %vm82_vm2, %v3872_v5  ;;  %v3439_v28 = vpack.c.bf16 %v3402_v30, %v3401_v26  ;;  %5393 = vmatpush.bf16.msra.mxu1 %v8239_v23 }
 0x382   :  { %14367 = vst [vmem:[#allocation56_spill] sm:$0xff] %v10260_v10 }
 0x383   :  { %v3274_v35 = vpop.f32.mrf.mxu2  ;;  %v3644_v42 = vpop.f32.mrf.mxu3 }
 0x384   :  { %v3275_v11 = vadd.f32 %v3274_v35, %v3003_v32  ;;  %v3005_v18 = vpop.f32.mrf.mxu1 }
 0x386   :  { %v3753_v27 = vadd.f32 %v3644_v42, %v3275_v11  ;;  %v4080_v52 = vpop.f32.mrf.mxu0 }
 0x388   :  { %v10265_v4 = vadd.f32 %v4078_v37, %v3753_v27  ;;  %v3837_v27 = vld [vmem:[#allocation2 + $0x1c1] sm:$0xff] }
 0x38a   :  { %14368 = vst [vmem:[#allocation59_spill] sm:$0xff] %v10265_v4 }
 0x38b   :  { %v3276_v2 = vpop.f32.mrf.mxu2  ;;  %v3646_v57 = vpop.f32.mrf.mxu3 }
 0x38c   :  { %v3277_v17 = vadd.f32 %v3276_v2, %v3005_v18  ;;  %v3008_v15 = vpop.f32.mrf.mxu1  ;;  %v8237_v2 = vld [vmem:[#allocation8] sm:$0xff] }
 0x38d   :  { %5670 = vmatpush.bf16.msra.mxu2 %v8237_v2 }
 0x38e   :  { %v3754_v29 = vadd.f32 %v3646_v57, %v3277_v17  ;;  %v4083_v20 = vpop.f32.mrf.mxu0  ;;  %v8241_v57 = vld [vmem:[#allocation8 + $0x20] sm:$0xff] }
 0x38f   :  { %7926 = vmatmul.msk.bf16.gmra.mxu1 %vm82_vm2, %v3872_v5  ;;  %v3404_v5 = vld [vmem:[#allocation2 + $0x1c8] sm:$0xff]  ;;  %6048 = vmatpush.bf16.msra.mxu3 %v8241_v57 }
 0x390   :  { %v10268_v46 = vadd.f32 %v4080_v52, %v3754_v29  ;;  %7962 = vmatmul.msk.bf16.gmra.mxu2 %vm82_vm2, %v3438_v21  ;;  %7998 = vmatmul.msk.bf16.gmra.mxu3 %vm82_vm2, %v3439_v28  ;;  %v3838_v52 = vld [vmem:[#allocation2 + $0x1c9] sm:$0xff]  ;;  %v3403_v21 = vld [vmem:[#allocation2 + $0x1c0] sm:$0xff] }
 0x391   :  { %8034 = vmatmul.msk.bf16.gmra.mxu0 %vm82_vm2, %v3873_v16  ;;  %v3440_v48 = vpack.c.bf16 %v3404_v5, %v3403_v21 }
 0x392   :  { %14369 = vst [vmem:[#allocation61_spill] sm:$0xff] %v10268_v46 }
 0x393   :  { %v3279_v55 = vpop.f32.mrf.mxu2  ;;  %v3649_v32 = vpop.f32.mrf.mxu3 }
 0x394   :  { %v3280_v14 = vadd.f32 %v3279_v55, %v3008_v15  ;;  %v3010_v40 = vpop.f32.mrf.mxu1  ;;  %v3874_v15 = vpack.c.bf16 %v3838_v52, %v3837_v27  ;;  %v3840_v27 = vld [vmem:[#allocation2 + $0x1d9] sm:$0xff]  ;;  %v3405_v52 = vld [vmem:[#allocation2 + $0x1d0] sm:$0xff] }
 0x396   :  { %v3755_v47 = vadd.f32 %v3649_v32, %v3280_v14  ;;  %v4085_v54 = vpop.f32.mrf.mxu0 }
 0x398   :  { %v10273_v37 = vadd.f32 %v4083_v20, %v3755_v47  ;;  %v8243_v47 = vld [vmem:[#allocation8 + $0x30] sm:$0xff] }
 0x399   :  { %6490 = vmatpush.bf16.msra.mxu0 %v8243_v47  ;;  %v3408_v47 = vld [vmem:[#allocation2 + $0x1e8] sm:$0xff] }
 0x39a   :  { %14370 = vst [vmem:[#allocation64_spill] sm:$0xff] %v10273_v37 }
 0x39b   :  { %v3281_v35 = vpop.f32.mrf.mxu2  ;;  %v3651_v42 = vpop.f32.mrf.mxu3 }
 0x39c   :  { %v3282_v11 = vadd.f32 %v3281_v35, %v3010_v40  ;;  %v3013_v18 = vpop.f32.mrf.mxu1 }
 0x39e   :  { %v3756_v30 = vadd.f32 %v3651_v42, %v3282_v11  ;;  %v4088_v17 = vpop.f32.mrf.mxu0  ;;  %v3406_v42 = vld [vmem:[#allocation2 + $0x1d8] sm:$0xff] }
 0x39f   :  { %7927 = vmatmul.msk.bf16.gmra.mxu1 %vm82_vm2, %v3873_v16  ;;  %v3839_v11 = vld [vmem:[#allocation2 + $0x1d1] sm:$0xff]  ;;  %v3441_v57 = vpack.c.bf16 %v3406_v42, %v3405_v52  ;;  %v3407_v42 = vld [vmem:[#allocation2 + $0x1e0] sm:$0xff] }
 0x3a0   :  { %v10276_v26 = vadd.f32 %v4085_v54, %v3756_v30  ;;  %7963 = vmatmul.msk.bf16.gmra.mxu2 %vm82_vm2, %v3439_v28  ;;  %7999 = vmatmul.msk.bf16.gmra.mxu3 %vm82_vm2, %v3440_v48 }
 0x3a1   :  { %8035 = vmatmul.msk.bf16.gmra.mxu0 %vm82_vm2, %v3874_v15 }
 0x3a2   :  { %14371 = vst [vmem:[#allocation65_spill] sm:$0xff] %v10276_v26 }
 0x3a3   :  { %v3284_v29 = vpop.f32.mrf.mxu2  ;;  %v3654_v20 = vpop.f32.mrf.mxu3 }
 0x3a4   :  { %v3285_v55 = vadd.f32 %v3284_v29, %v3013_v18  ;;  %v3015_v32 = vpop.f32.mrf.mxu1  ;;  %v3875_v18 = vpack.c.bf16 %v3840_v27, %v3839_v11  ;;  %v3442_v11 = vpack.c.bf16 %v3408_v47, %v3407_v42  ;;  %v3409_v47 = vld [vmem:[#allocation2 + $0x1f0] sm:$0xff]  ;;  %v3844_v42 = vld [vmem:[#allocation2 + $0x1f9] sm:$0xff] }
 0x3a6   :  { %v3757_v14 = vadd.f32 %v3654_v20, %v3285_v55  ;;  %v4090_v40 = vpop.f32.mrf.mxu0 }
 0x3a8   :  { %v10281_v16 = vadd.f32 %v4088_v17, %v3757_v14 }
 0x3aa   :  { %14372 = vst [vmem:[#allocation66_spill] sm:$0xff] %v10281_v16 }
 0x3ab   :  { %v3286_v54 = vpop.f32.mrf.mxu2  ;;  %v3656_v35 = vpop.f32.mrf.mxu3 }
 0x3ac   :  { %v3287_v28 = vadd.f32 %v3286_v54, %v3015_v32  ;;  %v3018_v5 = vpop.f32.mrf.mxu1  ;;  %v3841_v54 = vld [vmem:[#allocation2 + $0x1e1] sm:$0xff] }
 0x3ae   :  { %v3758_v21 = vadd.f32 %v3656_v35, %v3287_v28  ;;  %v4093_v2 = vpop.f32.mrf.mxu0  ;;  %v3842_v35 = vld [vmem:[#allocation2 + $0x1e9] sm:$0xff] }
 0x3af   :  { %7928 = vmatmul.msk.bf16.gmra.mxu1 %vm82_vm2, %v3874_v15 }
 0x3b0   :  { %v10284_v30 = vadd.f32 %v4090_v40, %v3758_v21  ;;  %7964 = vmatmul.msk.bf16.gmra.mxu2 %vm82_vm2, %v3440_v48  ;;  %8000 = vmatmul.msk.bf16.gmra.mxu3 %vm82_vm2, %v3441_v57 }
 0x3b1   :  { %8036 = vmatmul.msk.bf16.gmra.mxu0 %vm82_vm2, %v3875_v18 }
 0x3b2   :  { %14373 = vst [vmem:[#allocation70_spill] sm:$0xff] %v10284_v30 }
 0x3b3   :  { %v3289_v17 = vpop.f32.mrf.mxu2  ;;  %v3659_v23 = vpop.f32.mrf.mxu3 }
 0x3b4   :  { %v3290_v29 = vadd.f32 %v3289_v17, %v3018_v5  ;;  %v10289_v20 = vpop.f32.mrf.mxu1  ;;  %v3876_v5 = vpack.c.bf16 %v3842_v35, %v3841_v54  ;;  %v3843_v35 = vld [vmem:[#allocation2 + $0x1f1] sm:$0xff] }
 0x3b6   :  { %v3759_v55 = vadd.f32 %v3659_v23, %v3290_v29  ;;  %v10291_v32 = vpop.f32.mrf.mxu0 }
 0x3b7   :  { %14374 = vst [vmem:[#allocation72_spill] sm:$0xff] %v10291_v32 }
 0x3b8   :  { %v10293_v14 = vadd.f32 %v4093_v2, %v3759_v55 }
 0x3ba   :  { %14375 = vst [vmem:[#allocation75_spill] sm:$0xff] %v10293_v14 }
 0x3bb   :  { %v10295_v15 = vpop.f32.mrf.mxu2  ;;  %v10297_v40 = vpop.f32.mrf.mxu3 }
 0x3bc   :  { %v3023_v48 = vpop.f32.mrf.mxu1 }
 0x3be   :  { %v4098_v28 = vpop.f32.mrf.mxu0 }
 0x3bf   :  { %7929 = vmatmul.msk.bf16.gmra.mxu1 %vm82_vm2, %v3875_v18 }
 0x3c0   :  { %7965 = vmatmul.msk.bf16.gmra.mxu2 %vm82_vm2, %v3441_v57  ;;  %8001 = vmatmul.msk.bf16.gmra.mxu3 %vm82_vm2, %v3442_v11  ;;  %v3410_v57 = vld [vmem:[#allocation2 + $0x1f8] sm:$0xff] }
 0x3c1   :  { %8037 = vmatmul.msk.bf16.gmra.mxu0 %vm82_vm2, %v3876_v5  ;;  %v3443_v16 = vpack.c.bf16 %v3410_v57, %v3409_v47  ;;  %v3411_v47 = vld [vmem:[#allocation2 + $0x200] sm:$0xff]  ;;  %v3412_v57 = vld [vmem:[#allocation2 + $0x208] sm:$0xff] }
 0x3c2   :  { %v3444_v32 = vpack.c.bf16 %v3412_v57, %v3411_v47 }
 0x3c3   :  { %v3294_v27 = vpop.f32.mrf.mxu2  ;;  %v3664_v52 = vpop.f32.mrf.mxu3 }
 0x3c4   :  { %v3295_v21 = vadd.f32 %v3294_v27, %v3023_v48  ;;  %v10303_v2 = vpop.f32.mrf.mxu1  ;;  %v3877_v48 = vpack.c.bf16 %v3844_v42, %v3843_v35  ;;  %v3846_v35 = vld [vmem:[#allocation2 + $0x209] sm:$0xff] }
 0x3c6   :  { %v3761_v17 = vadd.f32 %v3664_v52, %v3295_v21  ;;  %v10305_v23 = vpop.f32.mrf.mxu0 }
 0x3c7   :  { %14376 = vst [vmem:[#allocation77_spill] sm:$0xff] %v10305_v23 }
 0x3c8   :  { %v10307_v29 = vadd.f32 %v4098_v28, %v3761_v17 }
 0x3ca   :  { %14377 = vst [vmem:[#allocation80_spill] sm:$0xff] %v10307_v29 }
 0x3cb   :  { %v10309_v55 = vpop.f32.mrf.mxu2  ;;  %v10311_v18 = vpop.f32.mrf.mxu3 }
 0x3cc   :  { %14378 = vst [vmem:[#allocation82_spill] sm:$0xff] %v10311_v18  ;;  %v3028_v54 = vpop.f32.mrf.mxu1 }
 0x3ce   :  { %v4103_v14 = vpop.f32.mrf.mxu0 }
 0x3cf   :  { %7930 = vmatmul.msk.bf16.gmra.mxu1 %vm82_vm2, %v3876_v5  ;;  %v3845_v5 = vld [vmem:[#allocation2 + $0x201] sm:$0xff] }
 0x3d0   :  { %7966 = vmatmul.msk.bf16.gmra.mxu2 %vm82_vm2, %v3442_v11  ;;  %8002 = vmatmul.msk.bf16.gmra.mxu3 %vm82_vm2, %v3443_v16  ;;  %v3878_v30 = vpack.c.bf16 %v3846_v35, %v3845_v5  ;;  %v14391_v5 = vld [vmem:[#allocation31_spill] sm:$0xff] }
 0x3d1   :  { %8038 = vmatmul.msk.bf16.gmra.mxu0 %vm82_vm2, %v3877_v48 }
 0x3d3   :  { %v3299_v28 = vpop.f32.mrf.mxu2  ;;  %v3669_v27 = vpop.f32.mrf.mxu3 }
 0x3d4   :  { %v3300_v52 = vadd.f32 %v3299_v28, %v3028_v54  ;;  %v10317_v21 = vpop.f32.mrf.mxu1 }
 0x3d5   :  { %14379 = vst [vmem:[#allocation84_spill] sm:$0xff] %v10317_v21 }
 0x3d6   :  { %v3763_v17 = vadd.f32 %v3669_v27, %v3300_v52  ;;  %v10319_v29 = vpop.f32.mrf.mxu0 }
 0x3d7   :  { %14380 = vst [vmem:[#allocation86_spill] sm:$0xff] %v10319_v29 }
 0x3d8   :  { %v10321_v23 = vadd.f32 %v4103_v14, %v3763_v17  ;;  %v14384_v14 = vld [vmem:[#allocation27_spill] sm:$0xff] }
 0x3d9   :  { %vm668_vm7 = vcmp.lt.s32.totalorder %v14384_v14, 14 }
 0x3da   :  { %14381 = vst [vmem:[#allocation88_spill] sm:$0xff] %v10321_v23  ;;  %v10335_v17 = vsel %vm668_vm7, 1.0, %v14336_v13 }
 0x3db   :  { %v10323_v42 = vpop.f32.mrf.mxu2  ;;  %v10325_v11 = vpop.f32.mrf.mxu3  ;;  %14386 = vst [vmem:[#allocation33_spill] sm:$0xff] %v10335_v17 }
 0x3dc   :  { %14382 = vst [vmem:[#allocation90_spill] sm:$0xff] %v10323_v42  ;;  %v3033_v18 = vpop.f32.mrf.mxu1 }
 0x3dd   :  { %14383 = vst [vmem:[#allocation92_spill] sm:$0xff] %v10325_v11 }
 0x3de   :  { %v4108_v37 = vpop.f32.mrf.mxu0 }
 0x3df   :  { %7931 = vmatmul.msk.bf16.gmra.mxu1 %vm82_vm2, %v3877_v48  ;;  %v14388_v48 = vld [vmem:[#allocation28_spill] sm:$0xff] }
 0x3e0   :  { %7967 = vmatmul.msk.bf16.gmra.mxu2 %vm82_vm2, %v3443_v16  ;;  %8003 = vmatmul.msk.bf16.gmra.mxu3 %vm82_vm2, %v3444_v32  ;;  %vm670_vm8 = vcmp.lt.s32.totalorder %v14388_v48, 14 }
 0x3e1   :  { %8039 = vmatmul.msk.bf16.gmra.mxu0 %vm82_vm2, %v3878_v30  ;;  %v4218_v30 = vmul.f32 %v10335_v17, %v10132_v39  ;;  %v10345_v32 = vsel %vm670_vm8, 1.0, %v14336_v13  ;;  %vm672_vm2 = vcmp.lt.s32.totalorder %v14391_v5, 14  ;;  %v4417_v5 = vmul.f32 %v10137_v63, %v10137_v63  ;;  %v14395_v17 = vld [vmem:[#allocation34_spill] sm:$0xff] }
 0x3e2   :  { %14390 = vst [vmem:[#allocation38_spill] sm:$0xff] %v10345_v32  ;;  %vm674_vm9 = vcmp.lt.s32.totalorder %v14395_v17, 14  ;;  %v4281_v39 = vsel %vm86_vm6, %v10129_v7, 0.0 }
 0x3e3   :  { %v3304_v54 = vpop.f32.mrf.mxu2  ;;  %v3674_v28 = vpop.f32.mrf.mxu3  ;;  %v4282_v14 = vsel %vm86_vm6, %v4218_v30, 0.0  ;;  %v4482_v17 = vsel %vm86_vm6, %v4417_v5, 0.0 }
 0x3e4   :  { %v3305_v27 = vadd.f32 %v3304_v54, %v3033_v18  ;;  %v10332_v52 = vpop.f32.mrf.mxu1 }
 0x3e5   :  { %14385 = vst [vmem:[#allocation39_spill] sm:$0xff] %v10332_v52 }
 0x3e6   :  { %v3765_v47 = vadd.f32 %v3674_v28, %v3305_v27  ;;  %v10337_v57 = vpop.f32.mrf.mxu0  ;;  %v4416_v28 = vmul.f32 %v4218_v30, %v4218_v30  ;;  %v4220_v27 = vmul.f32 %v10345_v32, %v10140_v45  ;;  %v4284_v32 = vsel %vm86_vm6, %v10137_v63, 0.0 }
 0x3e7   :  { %14387 = vst [vmem:[#allocation94_spill] sm:$0xff] %v10337_v57  ;;  %v4283_v30 = vadd.f32 %v4282_v14, %v4281_v39  ;;  %v4288_v14 = vsel %vm86_vm6, %v10145_v41, 0.0 }
 0x3e8   :  { %v10340_v16 = vadd.f32 %v4108_v37, %v3765_v47  ;;  %v4415_v37 = vmul.f32 %v10129_v7, %v10129_v7  ;;  %v10357_v47 = vsel %vm672_vm2, 1.0, %v14336_v13  ;;  %v4418_v45 = vmul.f32 %v4220_v27, %v4220_v27  ;;  %v14397_v7 = vld [vmem:[#allocation36_spill] sm:$0xff] }
 0x3e9   :  { %14394 = vst [vmem:[#allocation96_spill] sm:$0xff] %v10357_v47  ;;  %v4222_v23 = vmul.f32 %v10357_v47, %v10148_v62  ;;  %v4286_v29 = vsel %vm86_vm6, %v4220_v27, 0.0  ;;  %vm676_vm10 = vcmp.lt.s32.totalorder %v14397_v7, 14  ;;  %v4285_v11 = vadd.f32 %v4284_v32, %v4283_v30  ;;  %v14399_v32 = vld [vmem:[#allocation40_spill] sm:$0xff] }
 0x3ea   :  { %14389 = vst [vmem:[#allocation51_spill] sm:$0xff] %v10340_v16  ;;  %v4480_v16 = vsel %vm86_vm6, %v4416_v28, 0.0  ;;  %v4479_v57 = vsel %vm86_vm6, %v4415_v37, 0.0  ;;  %v4419_v28 = vmul.f32 %v10145_v41, %v10145_v41  ;;  %v4484_v39 = vsel %vm86_vm6, %v4418_v45, 0.0 }
 0x3eb   :  { %v10348_v18 = vpop.f32.mrf.mxu2  ;;  %v10350_v35 = vpop.f32.mrf.mxu3  ;;  %v4481_v52 = vadd.f32 %v4480_v16, %v4479_v57  ;;  %v4420_v5 = vmul.f32 %v4222_v23, %v4222_v23  ;;  %v4287_v42 = vadd.f32 %v4286_v29, %v4285_v11  ;;  %v10387_v7 = vsel %vm676_vm10, 1.0, %v14336_v13 }
 0x3ec   :  { %14392 = vst [vmem:[#allocation95_spill] sm:$0xff] %v10348_v18  ;;  %v3038_v54 = vpop.f32.mrf.mxu1  ;;  %v4290_v16 = vsel %vm86_vm6, %v4222_v23, 0.0  ;;  %v4421_v45 = vmul.f32 %v10153_v50, %v10153_v50  ;;  %vm678_vm11 = vcmp.lt.s32.totalorder %v14399_v32, 14  ;;  %v4292_v11 = vsel %vm86_vm6, %v10153_v50, 0.0 }
 0x3ed   :  { %14393 = vst [vmem:[#allocation18_spill] sm:$0xff] %v10350_v35  ;;  %v10372_v35 = vsel %vm674_vm9, 1.0, %v14336_v13  ;;  %v4483_v37 = vadd.f32 %v4482_v17, %v4481_v52  ;;  %v4289_v30 = vadd.f32 %v4288_v14, %v4287_v42  ;;  %v4488_v29 = vsel %vm86_vm6, %v4420_v5, 0.0 }
 0x3ee   :  { %v4113_v48 = vpop.f32.mrf.mxu0  ;;  %14396 = vst [vmem:[#allocation97_spill] sm:$0xff] %v10372_v35  ;;  %v4224_v27 = vmul.f32 %v10372_v35, %v10156_v34  ;;  %v4226_v17 = vmul.f32 %v10387_v7, %v10164_v19 }
 0x3ef   :  { %14398 = vst [vmem:[#allocation98_spill] sm:$0xff] %v10387_v7  ;;  %v4291_v23 = vadd.f32 %v4290_v16, %v4289_v30 }
 0x3f0   :  { %v4422_v52 = vmul.f32 %v4224_v27, %v4224_v27  ;;  %v4294_v42 = vsel %vm86_vm6, %v4224_v27, 0.0 }
 0x3f2   :  { %v4492_v16 = vsel %vm86_vm6, %v4422_v52, 0.0  ;;  %v14403_v52 = vld [vmem:[#allocation47_spill] sm:$0xff] }
 0x3f3   :  { %v3309_v63 = vpop.f32.mrf.mxu2  ;;  %v3679_v18 = vpop.f32.mrf.mxu3  ;;  %vm682_vm13 = vcmp.lt.s32.totalorder %v14403_v52, 14 }
 0x3f4   :  { %v3310_v47 = vadd.f32 %v3309_v63, %v3038_v54  ;;  %v10379_v62 = vpop.f32.mrf.mxu1  ;;  %v4486_v63 = vsel %vm86_vm6, %v4419_v28, 0.0  ;;  %v4485_v54 = vadd.f32 %v4484_v39, %v4483_v37  ;;  %v4490_v28 = vsel %vm86_vm6, %v4421_v45, 0.0 }
 0x3f5   :  { %v4293_v37 = vadd.f32 %v4292_v11, %v4291_v23  ;;  %v4424_v45 = vmul.f32 %v4226_v17, %v4226_v17  ;;  %v4425_v11 = vmul.f32 %v10169_v60, %v10169_v60 }
 0x3f6   :  { %v3767_v21 = vadd.f32 %v3679_v18, %v3310_v47  ;;  %v10389_v57 = vpop.f32.mrf.mxu0  ;;  %v4487_v18 = vadd.f32 %v4486_v63, %v4485_v54  ;;  %v10404_v47 = vsel %vm678_vm11, 1.0, %v14336_v13  ;;  %v4296_v54 = vsel %vm86_vm6, %v10161_v51, 0.0 }
 0x3f7   :  { %14400 = vst [vmem:[#allocation99_spill] sm:$0xff] %v10404_v47  ;;  %v4228_v27 = vmul.f32 %v10404_v47, %v10172_v49  ;;  %v4295_v32 = vadd.f32 %v4294_v42, %v4293_v37  ;;  %v4498_v47 = vsel %vm86_vm6, %v4425_v11, 0.0 }
 0x3f8   :  { %v10396_v35 = vadd.f32 %v4113_v48, %v3767_v21  ;;  %v4423_v21 = vmul.f32 %v10161_v51, %v10161_v51  ;;  %v14401_v48 = vld [vmem:[#allocation42_spill] sm:$0xff]  ;;  %v4489_v5 = vadd.f32 %v4488_v29, %v4487_v18  ;;  %v4298_v29 = vsel %vm86_vm6, %v4226_v17, 0.0 }
 0x3f9   :  { %vm680_vm12 = vcmp.lt.s32.totalorder %v14401_v48, 14  ;;  %v4297_v23 = vadd.f32 %v4296_v54, %v4295_v32  ;;  %v4496_v51 = vsel %vm86_vm6, %v4424_v45, 0.0  ;;  %v4426_v42 = vmul.f32 %v4228_v27, %v4228_v27 }
 0x3fa   :  { %v4491_v30 = vadd.f32 %v4490_v28, %v4489_v5  ;;  %v10421_v48 = vsel %vm680_vm12, 1.0, %v14336_v13  ;;  %v4494_v19 = vsel %vm86_vm6, %v4423_v21, 0.0  ;;  %v4300_v28 = vsel %vm86_vm6, %v10169_v60, 0.0 }
 0x3fb   :  { %v10411_v39 = vpop.f32.mrf.mxu2  ;;  %v10413_v14 = vpop.f32.mrf.mxu3  ;;  %14402 = vst [vmem:[#allocation100_spill] sm:$0xff] %v10421_v48  ;;  %v4230_v5 = vmul.f32 %v10421_v48, %v10180_v3  ;;  %v4299_v21 = vadd.f32 %v4298_v29, %v4297_v23  ;;  %v10434_v17 = vsel %vm682_vm13, 1.0, %v14336_v13  ;;  %v4302_v52 = vsel %vm86_vm6, %v4228_v27, 0.0 }
 0x3fc   :  { %v3043_v63 = vpop.f32.mrf.mxu1  ;;  %v4493_v18 = vadd.f32 %v4492_v16, %v4491_v30  ;;  %14404 = vst [vmem:[#allocation101_spill] sm:$0xff] %v10434_v17  ;;  %v4427_v32 = vmul.f32 %v10177_v43, %v10177_v43  ;;  %v14405_v16 = vld [vmem:[#allocation45_spill] sm:$0xff]  ;;  %v4304_v29 = vsel %vm86_vm6, %v10177_v43, 0.0  ;;  %v4232_v27 = vmul.f32 %v10434_v17, %v10188_v24 }
 0x3fd   :  { %vm684_vm14 = vcmp.lt.s32.totalorder %v14405_v16, 14  ;;  %v4301_v49 = vadd.f32 %v4300_v28, %v4299_v21  ;;  %v4428_v11 = vmul.f32 %v4230_v5, %v4230_v5  ;;  %v4306_v28 = vsel %vm86_vm6, %v4230_v5, 0.0 }
 0x3fe   :  { %v4118_v7 = vpop.f32.mrf.mxu0  ;;  %v4495_v37 = vadd.f32 %v4494_v19, %v4493_v18  ;;  %v4500_v19 = vsel %vm86_vm6, %v4426_v42, 0.0  ;;  %v10449_v16 = vsel %vm684_vm14, 1.0, %v14336_v13  ;;  %v4429_v42 = vmul.f32 %v10185_v1, %v10185_v1 }
 0x3ff   :  { %v4303_v23 = vadd.f32 %v4302_v52, %v4301_v49  ;;  %14406 = vst [vmem:[#allocation102_spill] sm:$0xff] %v10449_v16  ;;  %v4504_v49 = vsel %vm86_vm6, %v4428_v11, 0.0  ;;  %v4234_v52 = vmul.f32 %v10449_v16, %v10196_v31 }
 0x400   :  { %v4497_v30 = vadd.f32 %v4496_v51, %v4495_v37  ;;  %v14407_v37 = vld [vmem:[#allocation48_spill] sm:$0xff] }
 0x401   :  { %vm686_vm15 = vcmp.lt.s32.totalorder %v14407_v37, 14 }
 0x402   :  { %v4499_v18 = vadd.f32 %v4498_v47, %v4497_v30  ;;  %v4430_v47 = vmul.f32 %v4232_v27, %v4232_v27  ;;  %v4506_v30 = vsel %vm86_vm6, %v4429_v42, 0.0  ;;  %v4432_v42 = vmul.f32 %v4234_v52, %v4234_v52 }
 0x403   :  { %v3314_v54 = vpop.f32.mrf.mxu2  ;;  %v3684_v45 = vpop.f32.mrf.mxu3 }
 0x404   :  { %v3315_v60 = vadd.f32 %v3314_v54, %v3043_v63  ;;  %v10441_v48 = vpop.f32.mrf.mxu1  ;;  %v4502_v63 = vsel %vm86_vm6, %v4427_v32, 0.0  ;;  %v4501_v21 = vadd.f32 %v4500_v19, %v4499_v18  ;;  %v4305_v54 = vadd.f32 %v4304_v29, %v4303_v23 }
 0x405   :  { %v4310_v19 = vsel %vm86_vm6, %v4232_v27, 0.0 }
 0x406   :  { %v3769_v3 = vadd.f32 %v3684_v45, %v3315_v60  ;;  %v10451_v51 = vpop.f32.mrf.mxu0  ;;  %v4308_v60 = vsel %vm86_vm6, %v10185_v1, 0.0  ;;  %v4503_v32 = vadd.f32 %v4502_v63, %v4501_v21  ;;  %v4307_v5 = vadd.f32 %v4306_v28, %v4305_v54 }
 0x407   :  { %v10466_v45 = vsel %vm686_vm15, 1.0, %v14336_v13  ;;  %v4508_v28 = vsel %vm86_vm6, %v4430_v47, 0.0  ;;  %v4312_v21 = vsel %vm86_vm6, %v10193_v12, 0.0  ;;  %v14411_v47 = vld [vmem:[#allocation55_spill] sm:$0xff] }
 0x408   :  { %v10458_v17 = vadd.f32 %v4118_v7, %v3769_v3  ;;  %14408 = vst [vmem:[#allocation103_spill] sm:$0xff] %v10466_v45  ;;  %v4431_v7 = vmul.f32 %v10193_v12, %v10193_v12  ;;  %v14409_v3 = vld [vmem:[#allocation52_spill] sm:$0xff]  ;;  %v4505_v18 = vadd.f32 %v4504_v49, %v4503_v32  ;;  %v4309_v23 = vadd.f32 %v4308_v60, %v4307_v5 }
 0x409   :  { %vm688_vm0 = vcmp.lt.s32.totalorder %v14409_v3, 14  ;;  %v4236_v27 = vmul.f32 %v10466_v45, %v10204_v6  ;;  %v4314_v49 = vsel %vm86_vm6, %v4234_v52, 0.0  ;;  %v4433_v60 = vmul.f32 %v10201_v33, %v10201_v33 }
 0x40a   :  { %v4507_v54 = vadd.f32 %v4506_v30, %v4505_v18  ;;  %v4311_v37 = vadd.f32 %v4310_v19, %v4309_v23  ;;  %v10483_v3 = vsel %vm688_vm0, 1.0, %v14336_v13  ;;  %v4510_v31 = vsel %vm86_vm6, %v4431_v7, 0.0 }
 0x40b   :  { %v10473_v29 = vpop.f32.mrf.mxu2  ;;  %v10475_v11 = vpop.f32.mrf.mxu3  ;;  %14410 = vst [vmem:[#allocation104_spill] sm:$0xff] %v10483_v3  ;;  %vm690_vm1 = vcmp.lt.s32.totalorder %v14411_v47, 14  ;;  %v4512_v12 = vsel %vm86_vm6, %v4432_v42, 0.0  ;;  %v4316_v30 = vsel %vm86_vm6, %v10201_v33, 0.0  ;;  %v4434_v19 = vmul.f32 %v4236_v27, %v4236_v27 }
 0x40c   :  { %v3048_v63 = vpop.f32.mrf.mxu1  ;;  %v4509_v32 = vadd.f32 %v4508_v28, %v4507_v54  ;;  %v4313_v5 = vadd.f32 %v4312_v21, %v4311_v37  ;;  %v4238_v18 = vmul.f32 %v10483_v3, %v10212_v58  ;;  %v10496_v52 = vsel %vm690_vm1, 1.0, %v14336_v13  ;;  %v14413_v28 = vld [vmem:[#allocation58_spill] sm:$0xff] }
 0x40d   :  { %14412 = vst [vmem:[#allocation105_spill] sm:$0xff] %v10496_v52  ;;  %v4514_v45 = vsel %vm86_vm6, %v4433_v60, 0.0  ;;  %v4318_v47 = vsel %vm86_vm6, %v4236_v27, 0.0  ;;  %v4435_v37 = vmul.f32 %v10209_v56, %v10209_v56  ;;  %vm692_vm3 = vcmp.lt.s32.totalorder %v14413_v28, 14 }
 0x40e   :  { %v4123_v16 = vpop.f32.mrf.mxu0  ;;  %v4511_v23 = vadd.f32 %v4510_v31, %v4509_v32  ;;  %v4315_v7 = vadd.f32 %v4314_v49, %v4313_v5  ;;  %v4516_v31 = vsel %vm86_vm6, %v4434_v19, 0.0  ;;  %v4320_v49 = vsel %vm86_vm6, %v10209_v56, 0.0  ;;  %v14446_v56 = vld [vmem:[#allocation18_spill] sm:$0xff] }
 0x40f   :  { %v4436_v60 = vmul.f32 %v4238_v18, %v4238_v18  ;;  %v4240_v27 = vmul.f32 %v10496_v52, %v10220_v59  ;;  %v10511_v28 = vsel %vm692_vm3, 1.0, %v14336_v13  ;;  %v4437_v19 = vmul.f32 %v10217_v0, %v10217_v0 }
 0x410   :  { %v4513_v54 = vadd.f32 %v4512_v12, %v4511_v23  ;;  %v4317_v6 = vadd.f32 %v4316_v30, %v4315_v7  ;;  %14414 = vst [vmem:[#allocation106_spill] sm:$0xff] %v10511_v28  ;;  %v4322_v30 = vsel %vm86_vm6, %v4238_v18, 0.0  ;;  %v14415_v23 = vld [vmem:[#allocation60_spill] sm:$0xff] }
 0x411   :  { %vm694_vm4 = vcmp.lt.s32.totalorder %v14415_v23, 14 }
 0x412   :  { %v4515_v32 = vadd.f32 %v4514_v45, %v4513_v54  ;;  %v4319_v5 = vadd.f32 %v4318_v47, %v4317_v6  ;;  %v4520_v6 = vsel %vm86_vm6, %v4436_v60, 0.0  ;;  %v4438_v45 = vmul.f32 %v4240_v27, %v4240_v27 }
 0x413   :  { %v3319_v21 = vpop.f32.mrf.mxu2  ;;  %v3689_v42 = vpop.f32.mrf.mxu3  ;;  %v4242_v47 = vmul.f32 %v10511_v28, %v10228_v9  ;;  %v4522_v54 = vsel %vm86_vm6, %v4437_v19, 0.0 }
 0x414   :  { %v3320_v33 = vadd.f32 %v3319_v21, %v3048_v63  ;;  %v10503_v3 = vpop.f32.mrf.mxu1  ;;  %v4518_v63 = vsel %vm86_vm6, %v4435_v37, 0.0  ;;  %v4517_v7 = vadd.f32 %v4516_v31, %v4515_v32  ;;  %v4321_v21 = vadd.f32 %v4320_v49, %v4319_v5 }
 0x415   :  { %v4326_v31 = vsel %vm86_vm6, %v4240_v27, 0.0  ;;  %v4440_v23 = vmul.f32 %v4242_v47, %v4242_v47 }
 0x416   :  { %v3771_v58 = vadd.f32 %v3689_v42, %v3320_v33  ;;  %v10513_v12 = vpop.f32.mrf.mxu0  ;;  %v4324_v33 = vsel %vm86_vm6, %v10217_v0, 0.0  ;;  %v4519_v37 = vadd.f32 %v4518_v63, %v4517_v7  ;;  %v4323_v18 = vadd.f32 %v4322_v30, %v4321_v21 }
 0x417   :  { %v10528_v42 = vsel %vm694_vm4, 1.0, %v14336_v13  ;;  %v4524_v63 = vsel %vm86_vm6, %v4438_v45, 0.0  ;;  %v4328_v30 = vsel %vm86_vm6, %v10225_v25, 0.0  ;;  %v4245_v45 = vmul.f32 0.0, %v10241_v8 }
 0x418   :  { %v10520_v52 = vadd.f32 %v4123_v16, %v3771_v58  ;;  %14416 = vst [vmem:[#allocation60_spill] sm:$0xff] %v10528_v42  ;;  %v4439_v58 = vmul.f32 %v10225_v25, %v10225_v25  ;;  %v4521_v60 = vadd.f32 %v4520_v6, %v4519_v37  ;;  %v4325_v32 = vadd.f32 %v4324_v33, %v4323_v18 }
 0x419   :  { %v4244_v27 = vmul.f32 %v10528_v42, %v10236_v61  ;;  %v4330_v6 = vsel %vm86_vm6, %v4242_v47, 0.0  ;;  %v4441_v33 = vmul.f32 %v10233_v36, %v10233_v36  ;;  %v4528_v25 = vsel %vm86_vm6, %v4440_v23, 0.0  ;;  %v14417_v61 = vld [vmem:[#allocation62_spill] sm:$0xff] }
 0x41a   :  { %v4523_v19 = vadd.f32 %v4522_v54, %v4521_v60  ;;  %v4327_v7 = vadd.f32 %v4326_v31, %v4325_v32  ;;  %v4526_v28 = vsel %vm86_vm6, %v4439_v58, 0.0  ;;  %v4246_v42 = vmul.f32 0.0, %v10244_v44 }
 0x41b   :  { %v10534_v16 = vpop.f32.mrf.mxu2  ;;  %v10536_v49 = vpop.f32.mrf.mxu3  ;;  %v4442_v0 = vmul.f32 %v4244_v27, %v4244_v27  ;;  %v4332_v60 = vsel %vm86_vm6, %v10233_v36, 0.0  ;;  %v4530_v58 = vsel %vm86_vm6, %v4441_v33, 0.0  ;;  %v4443_v47 = vmul.f32 %v4245_v45, %v4245_v45 }
 0x41c   :  { %v10538_v5 = vpop.f32.mrf.mxu1  ;;  %v4525_v37 = vadd.f32 %v4524_v63, %v4523_v19  ;;  %v4329_v18 = vadd.f32 %v4328_v30, %v4327_v7  ;;  %v4247_v32 = vmul.f32 0.0, %v10249_v53  ;;  %vm700_vm5 = vcmp.lt.s32.totalorder %v14417_v61, 14 }
 0x41d   :  { %v4334_v23 = vsel %vm86_vm6, %v4244_v27, 0.0  ;;  %v4532_v7 = vsel %vm86_vm6, %v4442_v0, 0.0  ;;  %v4248_v33 = vmul.f32 0.0, %v10252_v22  ;;  %v10570_v61 = vsel %vm700_vm5, 1.0, %v14336_v13 }
 0x41e   :  { %v10545_v21 = vpop.f32.mrf.mxu0  ;;  %v4527_v54 = vadd.f32 %v4526_v28, %v4525_v37  ;;  %v4331_v31 = vadd.f32 %v4330_v6, %v4329_v18  ;;  %v4444_v6 = vmul.f32 %v4246_v42, %v4246_v42  ;;  %v4336_v18 = vsel %vm86_vm6, %v4245_v45, 0.0  ;;  %14418 = vst [vmem:[#allocation107_spill] sm:$0xff] %v10570_v61 }
 0x41f   :  { %v4445_v27 = vmul.f32 %v4247_v32, %v4247_v32  ;;  %v4338_v0 = vsel %vm86_vm6, %v4246_v42, 0.0  ;;  %v4250_v45 = vmul.f32 %v10570_v61, %v10260_v10  ;;  %v4340_v44 = vsel %vm86_vm6, %v4247_v32, 0.0  ;;  %v14435_v10 = vld [vmem:[#allocation76_spill] sm:$0xff] }
 0x420   :  { %v4529_v30 = vadd.f32 %v4528_v25, %v4527_v54  ;;  %v4333_v28 = vadd.f32 %v4332_v60, %v4331_v31  ;;  %v4534_v25 = vsel %vm86_vm6, %v4443_v47, 0.0  ;;  %v14419_v54 = vld [vmem:[#allocation67_spill] sm:$0xff]  ;;  %v4536_v22 = vsel %vm86_vm6, %v4444_v6, 0.0 }
 0x421   :  { %vm702_vm7 = vcmp.lt.s32.totalorder %v14419_v54, 14  ;;  %v4344_v54 = vsel %vm86_vm6, %v10257_v38, 0.0  ;;  %vm710_vm10 = vcmp.lt.s32.totalorder %v14435_v10, 14 }
 0x422   :  { %v4531_v37 = vadd.f32 %v4530_v58, %v4529_v30  ;;  %v4335_v53 = vadd.f32 %v4334_v23, %v4333_v28  ;;  %v4446_v58 = vmul.f32 %v4248_v33, %v4248_v33  ;;  %v10582_v23 = vsel %vm702_vm7, 1.0, %v14336_v13 }
 0x423   :  { %v10559_v8 = vpop.f32.mrf.mxu2  ;;  %v10561_v63 = vpop.f32.mrf.mxu3  ;;  %14420 = vst [vmem:[#allocation108_spill] sm:$0xff] %v10582_v23  ;;  %v4538_v28 = vsel %vm86_vm6, %v4445_v27, 0.0  ;;  %v4252_v27 = vmul.f32 %v10582_v23, %v10268_v46  ;;  %v10671_v10 = vsel %vm710_vm10, 1.0, %v14336_v13 }
 0x424   :  { %v10564_v19 = vpop.f32.mrf.mxu1  ;;  %v4533_v31 = vadd.f32 %v4532_v7, %v4531_v37  ;;  %v4337_v60 = vadd.f32 %v4336_v18, %v4335_v53  ;;  %v4447_v7 = vmul.f32 %v10257_v38, %v10257_v38  ;;  %v4342_v37 = vsel %vm86_vm6, %v4248_v33, 0.0  ;;  %v14421_v18 = vld [vmem:[#allocation69_spill] sm:$0xff] }
 0x425   :  { %vm704_vm8 = vcmp.lt.s32.totalorder %v14421_v18, 14 }
 0x426   :  { %v10572_v36 = vpop.f32.mrf.mxu0  ;;  %v4535_v30 = vadd.f32 %v4534_v25, %v4533_v31  ;;  %v4339_v47 = vadd.f32 %v4338_v0, %v4337_v60  ;;  %v4540_v31 = vsel %vm86_vm6, %v4446_v58, 0.0  ;;  %v4448_v0 = vmul.f32 %v4250_v45, %v4250_v45 }
 0x427   :  { %v4542_v18 = vsel %vm86_vm6, %v4447_v7, 0.0  ;;  %v10608_v58 = vsel %vm704_vm8, 1.0, %v14336_v13 }
 0x428   :  { %v4537_v6 = vadd.f32 %v4536_v22, %v4535_v30  ;;  %v4341_v32 = vadd.f32 %v4340_v44, %v4339_v47  ;;  %v3292_v22 = vadd.f32 %v10295_v15, %v10289_v20  ;;  %v4449_v44 = vmul.f32 %v10265_v4, %v10265_v4  ;;  %14422 = vst [vmem:[#allocation109_spill] sm:$0xff] %v10608_v58 }
 0x429   :  { %v4544_v61 = vsel %vm86_vm6, %v4448_v0, 0.0  ;;  %v4450_v20 = vmul.f32 %v4252_v27, %v4252_v27  ;;  %v4254_v7 = vmul.f32 %v10608_v58, %v10276_v26 }
 0x42a   :  { %v4539_v60 = vadd.f32 %v4538_v28, %v4537_v6  ;;  %v4343_v33 = vadd.f32 %v4342_v37, %v4341_v32  ;;  %v4346_v28 = vsel %vm86_vm6, %v4250_v45, 0.0  ;;  %v14423_v6 = vld [vmem:[#allocation71_spill] sm:$0xff]  ;;  %v4348_v37 = vsel %vm86_vm6, %v10265_v4, 0.0  ;;  %v14428_v4 = vld [vmem:[#allocation72_spill] sm:$0xff] }
 0x42b   :  { %v10587_v42 = vpop.f32.mrf.mxu2  ;;  %v10589_v53 = vpop.f32.mrf.mxu3  ;;  %vm706_vm2 = vcmp.lt.s32.totalorder %v14423_v6, 14  ;;  %v3760_v32 = vadd.f32 %v10297_v40, %v3292_v22  ;;  %v4350_v40 = vsel %vm86_vm6, %v4252_v27, 0.0  ;;  %v14426_v22 = vld [vmem:[#allocation64_spill] sm:$0xff]  ;;  %v4452_v58 = vmul.f32 %v4254_v7, %v4254_v7 }
 0x42c   :  { %v10593_v25 = vpop.f32.mrf.mxu1  ;;  %v4541_v47 = vadd.f32 %v4540_v31, %v4539_v60  ;;  %v4345_v23 = vadd.f32 %v4344_v54, %v4343_v33  ;;  %v4546_v31 = vsel %vm86_vm6, %v4449_v44, 0.0  ;;  %v10620_v45 = vsel %vm706_vm2, 1.0, %v14336_v13  ;;  %v14425_v33 = vld [vmem:[#allocation74_spill] sm:$0xff] }
 0x42d   :  { %14424 = vst [vmem:[#allocation110_spill] sm:$0xff] %v10620_v45  ;;  %v3297_v54 = vadd.f32 %v10309_v55, %v10303_v2  ;;  %vm708_vm9 = vcmp.lt.s32.totalorder %v14425_v33, 14  ;;  %v4451_v44 = vmul.f32 %v14426_v22, %v14426_v22  ;;  %v14427_v2 = vld [vmem:[#allocation70_spill] sm:$0xff]  ;;  %v10638_v26 = vadd.f32 %v14428_v4, %v3760_v32 }
 0x42e   :  { %v10602_v30 = vpop.f32.mrf.mxu0  ;;  %v4543_v15 = vadd.f32 %v4542_v18, %v4541_v47  ;;  %v4347_v38 = vadd.f32 %v4346_v28, %v4345_v23  ;;  %v4548_v23 = vsel %vm86_vm6, %v4450_v20, 0.0  ;;  %v4256_v55 = vmul.f32 %v10620_v45, %v14427_v2  ;;  %v14431_v20 = vld [vmem:[#allocation82_spill] sm:$0xff] }
 0x42f   :  { %14429 = vst [vmem:[#allocation72_spill] sm:$0xff] %v10638_v26  ;;  %v10645_v27 = vsel %vm708_vm9, 1.0, %v14336_v13  ;;  %v14433_v33 = vld [vmem:[#allocation90_spill] sm:$0xff]  ;;  %v4550_v45 = vsel %vm86_vm6, %v4451_v44, 0.0  ;;  %v4354_v4 = vsel %vm86_vm6, %v4254_v7, 0.0  ;;  %v4552_v9 = vsel %vm86_vm6, %v4452_v58, 0.0 }
 0x430   :  { %v4545_v60 = vadd.f32 %v4544_v61, %v4543_v15  ;;  %v4349_v6 = vadd.f32 %v4348_v37, %v4347_v38  ;;  %v4352_v38 = vsel %vm86_vm6, %v14426_v22, 0.0  ;;  %14430 = vst [vmem:[#allocation111_spill] sm:$0xff] %v10645_v27  ;;  %v3762_v15 = vadd.f32 %v14431_v20, %v3297_v54  ;;  %v14432_v37 = vld [vmem:[#allocation84_spill] sm:$0xff]  ;;  %v14434_v32 = vld [vmem:[#allocation66_spill] sm:$0xff]  ;;  %v14439_v44 = vld [vmem:[#allocation39_spill] sm:$0xff] }
 0x431   :  { %v4453_v2 = vmul.f32 %v14434_v32, %v14434_v32  ;;  %v4454_v59 = vmul.f32 %v4256_v55, %v4256_v55  ;;  %v4258_v54 = vmul.f32 %v10645_v27, %v10638_v26  ;;  %14441 = vst [vmem:[#allocation84_spill] sm:$0xff] %v10671_v10 }
 0x432   :  { %v4547_v28 = vadd.f32 %v4546_v31, %v4545_v60  ;;  %v3302_v31 = vadd.f32 %v14433_v33, %v14432_v37  ;;  %v4351_v60 = vadd.f32 %v4350_v40, %v4349_v6  ;;  %v4356_v6 = vsel %vm86_vm6, %v14434_v32, 0.0  ;;  %v14436_v33 = vld [vmem:[#allocation77_spill] sm:$0xff] }
 0x433   :  { %v10624_v0 = vpop.f32.mrf.mxu2  ;;  %v10626_v18 = vpop.f32.mrf.mxu3  ;;  %v10661_v40 = vadd.f32 %v14436_v33, %v3762_v15  ;;  %v4554_v26 = vsel %vm86_vm6, %v4453_v2, 0.0  ;;  %v4358_v15 = vsel %vm86_vm6, %v4256_v55, 0.0  ;;  %v14442_v33 = vld [vmem:[#allocation75_spill] sm:$0xff]  ;;  %v4556_v32 = vsel %vm86_vm6, %v4454_v59, 0.0 }
 0x434   :  { %v10629_v47 = vpop.f32.mrf.mxu1  ;;  %v4549_v46 = vadd.f32 %v4548_v23, %v4547_v28  ;;  %v4353_v22 = vadd.f32 %v4352_v38, %v4351_v60  ;;  %v14438_v23 = vld [vmem:[#allocation92_spill] sm:$0xff]  ;;  %v14440_v28 = vld [vmem:[#allocation95_spill] sm:$0xff]  ;;  %v3312_v59 = vadd.f32 %v10411_v39, %v10379_v62  ;;  %v14450_v39 = vld [vmem:[#allocation94_spill] sm:$0xff] }
 0x435   :  { %14437 = vst [vmem:[#allocation82_spill] sm:$0xff] %v10661_v40  ;;  %v3764_v7 = vadd.f32 %v14438_v23, %v3302_v31  ;;  %v3307_v20 = vadd.f32 %v14440_v28, %v14439_v44  ;;  %v4455_v31 = vmul.f32 %v14442_v33, %v14442_v33  ;;  %v14443_v23 = vld [vmem:[#allocation78_spill] sm:$0xff]  ;;  %v4260_v2 = vmul.f32 %v10671_v10, %v10661_v40  ;;  %v14449_v40 = vld [vmem:[#allocation81_spill] sm:$0xff] }
 0x436   :  { %v10640_v61 = vpop.f32.mrf.mxu0  ;;  %v4551_v58 = vadd.f32 %v4550_v45, %v4549_v46  ;;  %v4355_v60 = vadd.f32 %v4354_v4, %v4353_v22  ;;  %vm712_vm11 = vcmp.lt.s32.totalorder %v14443_v23, 14  ;;  %v4456_v46 = vmul.f32 %v4258_v54, %v4258_v54  ;;  %v14444_v4 = vld [vmem:[#allocation86_spill] sm:$0xff] }
 0x437   :  { %v4360_v22 = vsel %vm86_vm6, %v14442_v33, 0.0  ;;  %v10688_v55 = vadd.f32 %v14444_v4, %v3764_v7  ;;  %v3766_v24 = vadd.f32 %v14446_v56, %v3307_v20  ;;  %vm714_vm12 = vcmp.lt.s32.totalorder %v14449_v40, 14 }
 0x438   :  { %v4553_v44 = vadd.f32 %v4552_v9, %v4551_v58  ;;  %v4357_v28 = vadd.f32 %v4356_v6, %v4355_v60  ;;  %v10692_v9 = vsel %vm712_vm11, 1.0, %v14336_v13  ;;  %v4558_v6 = vsel %vm86_vm6, %v4455_v31, 0.0  ;;  %v14448_v60 = vld [vmem:[#allocation80_spill] sm:$0xff] }
 0x439   :  { %14445 = vst [vmem:[#allocation90_spill] sm:$0xff] %v10688_v55  ;;  %v4362_v58 = vsel %vm86_vm6, %v4258_v54, 0.0  ;;  %v4457_v10 = vmul.f32 %v14448_v60, %v14448_v60  ;;  %v4560_v56 = vsel %vm86_vm6, %v4456_v46, 0.0  ;;  %v4458_v20 = vmul.f32 %v4260_v2, %v4260_v2 }
 0x43a   :  { %v4555_v1 = vadd.f32 %v4554_v26, %v4553_v44  ;;  %v4359_v23 = vadd.f32 %v4358_v15, %v4357_v28  ;;  %14447 = vst [vmem:[#allocation77_spill] sm:$0xff] %v10692_v9  ;;  %v4364_v26 = vsel %vm86_vm6, %v14448_v60, 0.0  ;;  %v4262_v62 = vmul.f32 %v10692_v9, %v10688_v55  ;;  %v14453_v55 = vld [vmem:[#allocation79_spill] sm:$0xff] }
 0x43b   :  { %v10666_v37 = vpop.f32.mrf.mxu2  ;;  %v10668_v38 = vpop.f32.mrf.mxu3  ;;  %v10707_v15 = vadd.f32 %v14450_v39, %v3766_v24  ;;  %v4562_v46 = vsel %vm86_vm6, %v4457_v10, 0.0  ;;  %v4366_v9 = vsel %vm86_vm6, %v4260_v2, 0.0  ;;  %vm716_vm13 = vcmp.lt.s32.totalorder %v14453_v55, 14 }
 0x43c   :  { %v10673_v27 = vpop.f32.mrf.mxu1  ;;  %v4557_v7 = vadd.f32 %v4556_v32, %v4555_v1  ;;  %v4361_v4 = vadd.f32 %v4360_v22, %v4359_v23  ;;  %v10714_v1 = vsel %vm714_vm12, 1.0, %v14336_v13  ;;  %v3768_v32 = vadd.f32 %v10413_v14, %v3312_v59  ;;  %v14452_v22 = vld [vmem:[#allocation88_spill] sm:$0xff] }
 0x43d   :  { %14451 = vst [vmem:[#allocation92_spill] sm:$0xff] %v10714_v1  ;;  %v4459_v40 = vmul.f32 %v14452_v22, %v14452_v22  ;;  %v3317_v14 = vadd.f32 %v10473_v29, %v10441_v48  ;;  %v4368_v10 = vsel %vm86_vm6, %v14452_v22, 0.0  ;;  %v4370_v48 = vsel %vm86_vm6, %v4262_v62, 0.0 }
 0x43e   :  { %v10681_v45 = vpop.f32.mrf.mxu0  ;;  %v4559_v44 = vadd.f32 %v4558_v6, %v4557_v7  ;;  %v4363_v28 = vadd.f32 %v4362_v58, %v4361_v4  ;;  %v4564_v6 = vsel %vm86_vm6, %v4458_v20, 0.0  ;;  %v4460_v58 = vmul.f32 %v4262_v62, %v4262_v62  ;;  %v14454_v20 = vld [vmem:[#allocation51_spill] sm:$0xff] }
 0x43f   :  { %v4264_v7 = vmul.f32 %v10714_v1, %v10707_v15  ;;  %v10732_v4 = vadd.f32 %v10389_v57, %v3768_v32  ;;  %v3770_v57 = vadd.f32 %v10475_v11, %v3317_v14  ;;  %v14456_v11 = vld [vmem:[#allocation83_spill] sm:$0xff] }
 0x440   :  { %v4561_v24 = vadd.f32 %v4560_v56, %v4559_v44  ;;  %v4365_v39 = vadd.f32 %v4364_v26, %v4363_v28  ;;  %v4566_v26 = vsel %vm86_vm6, %v4459_v40, 0.0  ;;  %v4461_v44 = vmul.f32 %v14454_v20, %v14454_v20  ;;  %v14500_v43 = vld [vmem:[#allocation90_spill] sm:$0xff] }
 0x441   :  { %v10740_v28 = vsel %vm716_vm13, 1.0, %v14336_v13  ;;  %v4372_v40 = vsel %vm86_vm6, %v14454_v20, 0.0  ;;  %vm718_vm14 = vcmp.lt.s32.totalorder %v14456_v11, 14 }
 0x442   :  { %v4563_v59 = vadd.f32 %v4562_v46, %v4561_v24  ;;  %v4367_v2 = vadd.f32 %v4366_v9, %v4365_v39  ;;  %14455 = vst [vmem:[#allocation39_spill] sm:$0xff] %v10740_v28  ;;  %v4568_v46 = vsel %vm86_vm6, %v4460_v58, 0.0  ;;  %v4462_v24 = vmul.f32 %v4264_v7, %v4264_v7 }
 0x443   :  { %v10709_v54 = vpop.f32.mrf.mxu2  ;;  %v10711_v31 = vpop.f32.mrf.mxu3  ;;  %v4266_v39 = vmul.f32 %v10740_v28, %v10732_v4  ;;  %v4463_v58 = vmul.f32 %v10396_v35, %v10396_v35  ;;  %v10760_v28 = vadd.f32 %v10451_v51, %v3770_v57  ;;  %v4465_v51 = vmul.f32 %v10458_v17, %v10458_v17  ;;  %v14458_v57 = vld [vmem:[#allocation87_spill] sm:$0xff] }
 0x444   :  { %v10717_v23 = vpop.f32.mrf.mxu1  ;;  %v4565_v55 = vadd.f32 %v4564_v6, %v4563_v59  ;;  %v4369_v29 = vadd.f32 %v4368_v10, %v4367_v2  ;;  %v3322_v6 = vadd.f32 %v10534_v16, %v10503_v3  ;;  %v4570_v59 = vsel %vm86_vm6, %v4461_v44, 0.0 }
 0x445   :  { %v3327_v3 = vadd.f32 %v10587_v42, %v10564_v19  ;;  %v4464_v44 = vmul.f32 %v4266_v39, %v4266_v39  ;;  %vm720_vm15 = vcmp.lt.s32.totalorder %v14458_v57, 14  ;;  %v3325_v19 = vadd.f32 %v10559_v8, %v10538_v5 }
 0x446   :  { %v10734_v56 = vpop.f32.mrf.mxu0  ;;  %v4567_v9 = vadd.f32 %v4566_v26, %v4565_v55  ;;  %v4371_v62 = vadd.f32 %v4370_v48, %v4369_v29  ;;  %v4374_v55 = vsel %vm86_vm6, %v4264_v7, 0.0  ;;  %v4572_v26 = vsel %vm86_vm6, %v4462_v24, 0.0 }
 0x447   :  { %v10765_v48 = vsel %vm718_vm14, 1.0, %v14336_v13  ;;  %v3772_v29 = vadd.f32 %v10536_v49, %v3322_v6  ;;  %v4376_v7 = vsel %vm86_vm6, %v10396_v35, 0.0  ;;  %v3332_v6 = vadd.f32 %v10666_v37, %v10629_v47 }
 0x448   :  { %v4569_v10 = vadd.f32 %v4568_v46, %v4567_v9  ;;  %v4373_v2 = vadd.f32 %v4372_v40, %v4371_v62  ;;  %14457 = vst [vmem:[#allocation95_spill] sm:$0xff] %v10765_v48  ;;  %v4574_v46 = vsel %vm86_vm6, %v4463_v58, 0.0  ;;  %v4378_v9 = vsel %vm86_vm6, %v4266_v39, 0.0 }
 0x449   :  { %v4268_v49 = vmul.f32 %v10765_v48, %v10760_v28  ;;  %v3774_v40 = vadd.f32 %v10589_v53, %v3327_v3  ;;  %v10786_v8 = vadd.f32 %v10513_v12, %v3772_v29  ;;  %v4380_v5 = vsel %vm86_vm6, %v10458_v17, 0.0  ;;  %v14493_v48 = vld [vmem:[#allocation64_spill] sm:$0xff] }
 0x44a   :  { %v4571_v16 = vadd.f32 %v4570_v59, %v4569_v10  ;;  %v4375_v11 = vadd.f32 %v4374_v55, %v4373_v2  ;;  %v4576_v55 = vsel %vm86_vm6, %v4464_v44, 0.0  ;;  %v10791_v39 = vsel %vm720_vm15, 1.0, %v14336_v13  ;;  %v14460_v2 = vld [vmem:[#allocation89_spill] sm:$0xff] }
 0x44b   :  { %v3336_v32 = vpop.f32.mrf.mxu2  ;;  %v10745_v1 = vpop.f32.mrf.mxu3  ;;  %14459 = vst [vmem:[#allocation75_spill] sm:$0xff] %v10791_v39  ;;  %vm722_vm0 = vcmp.lt.s32.totalorder %v14460_v2, 14  ;;  %v3330_v53 = vadd.f32 %v10624_v0, %v10593_v25  ;;  %v4578_v37 = vsel %vm86_vm6, %v4465_v51, 0.0  ;;  %v4466_v3 = vmul.f32 %v4268_v49, %v4268_v49 }
 0x44c   :  { %v3068_v14 = vpop.f32.mrf.mxu1  ;;  %v4573_v24 = vadd.f32 %v4572_v26, %v4571_v16  ;;  %v4377_v58 = vadd.f32 %v4376_v7, %v4375_v11  ;;  %v3773_v11 = vadd.f32 %v10561_v63, %v3325_v19  ;;  %v10799_v12 = vadd.f32 %v10572_v36, %v3774_v40  ;;  %v14462_v36 = vld [vmem:[#allocation91_spill] sm:$0xff] }
 0x44d   :  { %v3776_v16 = vadd.f32 %v10668_v38, %v3332_v6  ;;  %v4270_v7 = vmul.f32 %v10791_v39, %v10786_v8  ;;  %v3337_v25 = vadd.f32 %v3336_v32, %v10717_v23  ;;  %v4467_v63 = vmul.f32 %v10520_v52, %v10520_v52 }
 0x44e   :  { %v10776_v42 = vpop.f32.mrf.mxu0  ;;  %v4575_v10 = vadd.f32 %v4574_v46, %v4573_v24  ;;  %v4379_v47 = vadd.f32 %v4378_v9, %v4377_v58  ;;  %v10805_v46 = vsel %vm722_vm0, 1.0, %v14336_v13  ;;  %v3775_v24 = vadd.f32 %v10626_v18, %v3330_v53 }
 0x44f   :  { %14461 = vst [vmem:[#allocation86_spill] sm:$0xff] %v10805_v46  ;;  %vm724_vm1 = vcmp.lt.s32.totalorder %v14462_v36, 14  ;;  %v4382_v38 = vsel %vm86_vm6, %v4268_v49, 0.0  ;;  %v10814_v51 = vadd.f32 %v10545_v21, %v3773_v11  ;;  %v3335_v19 = vadd.f32 %v10709_v54, %v10673_v27 }
 0x450   :  { %v4577_v26 = vadd.f32 %v4576_v55, %v4575_v10  ;;  %v4381_v29 = vadd.f32 %v4380_v5, %v4379_v47  ;;  %v4580_v40 = vsel %vm86_vm6, %v4466_v3, 0.0  ;;  %v4384_v23 = vsel %vm86_vm6, %v10520_v52, 0.0  ;;  %v14464_v47 = vld [vmem:[#allocation93_spill] sm:$0xff] }
 0x451   :  { %v4272_v32 = vmul.f32 %v10805_v46, %v10799_v12  ;;  %v10824_v18 = vadd.f32 %v10640_v61, %v3776_v16  ;;  %v4468_v58 = vmul.f32 %v4270_v7, %v4270_v7  ;;  %v10827_v21 = vsel %vm724_vm1, 1.0, %v14336_v13 }
 0x452   :  { %v4579_v0 = vadd.f32 %v4578_v37, %v4577_v26  ;;  %14463 = vst [vmem:[#allocation18_spill] sm:$0xff] %v10827_v21  ;;  %v3778_v27 = vadd.f32 %v10745_v1, %v3337_v25  ;;  %v4386_v10 = vsel %vm86_vm6, %v4270_v7, 0.0  ;;  %v10833_v55 = vadd.f32 %v10602_v30, %v3775_v24 }
 0x453   :  { %v3339_v62 = vpop.f32.mrf.mxu2  ;;  %v3709_v59 = vpop.f32.mrf.mxu3  ;;  %v4469_v61 = vmul.f32 %v10814_v51, %v10814_v51  ;;  %v3777_v53 = vadd.f32 %v10711_v31, %v3335_v19  ;;  %vm726_vm3 = vcmp.lt.s32.totalorder %v14464_v47, 14  ;;  %v4470_v26 = vmul.f32 %v4272_v32, %v4272_v32 }
 0x454   :  { %v3070_v44 = vpop.f32.mrf.mxu1  ;;  %v3340_v9 = vadd.f32 %v3339_v62, %v3068_v14  ;;  %v4383_v14 = vadd.f32 %v4382_v38, %v4381_v29  ;;  %v4582_v62 = vsel %vm86_vm6, %v4467_v63, 0.0  ;;  %v4581_v11 = vadd.f32 %v4580_v40, %v4579_v0 }
 0x455   :  { %v4274_v3 = vmul.f32 %v10827_v21, %v10824_v18  ;;  %v4584_v16 = vsel %vm86_vm6, %v4468_v58, 0.0  ;;  %v4388_v30 = vsel %vm86_vm6, %v10814_v51, 0.0  ;;  %v10850_v25 = vsel %vm726_vm3, 1.0, %v14336_v13  ;;  %v14489_v13 = vld [vmem:[#allocation53_spill] sm:$0xff] }
 0x456   :  { %v4145_v5 = vpop.f32.mrf.mxu0  ;;  %v3779_v37 = vadd.f32 %v3709_v59, %v3340_v9  ;;  %v4385_v1 = vadd.f32 %v4384_v23, %v4383_v14  ;;  %v4583_v7 = vadd.f32 %v4582_v62, %v4581_v11  ;;  %v4471_v59 = vmul.f32 %v10833_v55, %v10833_v55  ;;  %14465 = vst [vmem:[#allocation80_spill] sm:$0xff] %v10850_v25 }
 0x457   :  { %v4586_v63 = vsel %vm86_vm6, %v4469_v61, 0.0  ;;  %v4390_v24 = vsel %vm86_vm6, %v4272_v32, 0.0  ;;  %v10855_v38 = vadd.f32 %v10681_v45, %v3777_v53  ;;  %v4588_v40 = vsel %vm86_vm6, %v4470_v26, 0.0 }
 0x458   :  { %v4387_v31 = vadd.f32 %v4386_v10, %v4385_v1  ;;  %v4585_v19 = vadd.f32 %v4584_v16, %v4583_v7  ;;  %v4472_v23 = vmul.f32 %v4274_v3, %v4274_v3  ;;  %v4392_v58 = vsel %vm86_vm6, %v10833_v55, 0.0 }
 0x459   :  { %v4394_v10 = vsel %vm86_vm6, %v4274_v3, 0.0  ;;  %v4473_v61 = vmul.f32 %v10855_v38, %v10855_v38 }
 0x45a   :  { %v4389_v9 = vadd.f32 %v4388_v30, %v4387_v31  ;;  %v4592_v1 = vsel %vm86_vm6, %v4472_v23, 0.0 }
 0x45b   :  { %v3341_v6 = vpop.f32.mrf.mxu2  ;;  %v3711_v49 = vpop.f32.mrf.mxu3  ;;  %v4594_v7 = vsel %vm86_vm6, %v4473_v61, 0.0 }
 0x45c   :  { %v3342_v54 = vadd.f32 %v3341_v6, %v3070_v44  ;;  %v10845_v44 = vadd.f32 %v10734_v56, %v3778_v27  ;;  %v3073_v0 = vpop.f32.mrf.mxu1  ;;  %v10858_v56 = vadd.f32 %v10776_v42, %v3779_v37  ;;  %v4391_v14 = vadd.f32 %v4390_v24, %v4389_v9 }
 0x45d   :  { %v4590_v42 = vsel %vm86_vm6, %v4471_v59, 0.0 }
 0x45e   :  { %v3780_v29 = vadd.f32 %v3711_v49, %v3342_v54  ;;  %v4276_v27 = vmul.f32 %v10850_v25, %v10845_v44  ;;  %v4587_v54 = vadd.f32 %v4586_v63, %v4585_v19  ;;  %v4148_v62 = vpop.f32.mrf.mxu0  ;;  %v4277_v53 = vmul.f32 0.0, %v10858_v56  ;;  %v14490_v25 = vld [vmem:[#allocation50_spill] sm:$0xff] }
 0x45f   :  { %v4393_v11 = vadd.f32 %v4392_v58, %v4391_v14 }
 0x460   :  { %v10865_v32 = vadd.f32 %v4145_v5, %v3780_v29  ;;  %v4589_v37 = vadd.f32 %v4588_v40, %v4587_v54  ;;  %v4396_v5 = vsel %vm86_vm6, %v10855_v38, 0.0  ;;  %v4474_v26 = vmul.f32 %v4276_v27, %v4276_v27 }
 0x461   :  { %v4395_v3 = vadd.f32 %v4394_v10, %v4393_v11  ;;  %v4398_v31 = vsel %vm86_vm6, %v4276_v27, 0.0  ;;  %v4475_v59 = vmul.f32 %v4277_v53, %v4277_v53  ;;  %v4400_v23 = vsel %vm86_vm6, %v4277_v53, 0.0 }
 0x462   :  { %v4278_v16 = vmul.f32 0.0, %v10865_v32  ;;  %v4591_v29 = vadd.f32 %v4590_v42, %v4589_v37  ;;  %v4596_v40 = vsel %vm86_vm6, %v4474_v26, 0.0 }
 0x463   :  { %v3344_v6 = vpop.f32.mrf.mxu2  ;;  %v3714_v49 = vpop.f32.mrf.mxu3  ;;  %v4397_v24 = vadd.f32 %v4396_v5, %v4395_v3  ;;  %v4598_v14 = vsel %vm86_vm6, %v4475_v59, 0.0 }
 0x464   :  { %v3345_v45 = vadd.f32 %v3344_v6, %v3073_v0  ;;  %v4593_v63 = vadd.f32 %v4592_v1, %v4591_v29  ;;  %v3075_v19 = vpop.f32.mrf.mxu1  ;;  %v4476_v6 = vmul.f32 %v4278_v16, %v4278_v16  ;;  %v4402_v27 = vsel %vm86_vm6, %v4278_v16, 0.0 }
 0x466   :  { %v3781_v47 = vadd.f32 %v3714_v49, %v3345_v45  ;;  %v4595_v58 = vadd.f32 %v4594_v7, %v4593_v63  ;;  %v4399_v45 = vadd.f32 %v4398_v31, %v4397_v24  ;;  %v4600_v37 = vsel %vm86_vm6, %v4476_v6, 0.0 }
 0x468   :  { %v10876_v30 = vadd.f32 %v4148_v62, %v3781_v47  ;;  %v4597_v10 = vadd.f32 %v4596_v40, %v4595_v58  ;;  %v4401_v61 = vadd.f32 %v4400_v23, %v4399_v45  ;;  %v4150_v47 = vpop.f32.mrf.mxu0 }
 0x46a   :  { %v4279_v0 = vmul.f32 0.0, %v10876_v30  ;;  %v4599_v53 = vadd.f32 %v4598_v14, %v4597_v10  ;;  %v4403_v5 = vadd.f32 %v4402_v27, %v4401_v61 }
 0x46b   :  { %v3346_v9 = vpop.f32.mrf.mxu2  ;;  %v3716_v54 = vpop.f32.mrf.mxu3 }
 0x46c   :  { %v3347_v49 = vadd.f32 %v3346_v9, %v3075_v19  ;;  %v4477_v42 = vmul.f32 %v4279_v0, %v4279_v0  ;;  %v4404_v11 = vsel %vm86_vm6, %v4279_v0, 0.0  ;;  %v4601_v3 = vadd.f32 %v4600_v37, %v4599_v53 }
 0x46d   :  { %v4405_v7 = vadd.f32 %v4404_v11, %v4403_v5 }
 0x46e   :  { %v3782_v62 = vadd.f32 %v3716_v54, %v3347_v49  ;;  %v4602_v26 = vsel %vm86_vm6, %v4477_v42, 0.0 }
 0x46f   :  { %v4603_v59 = vadd.f32 %v4602_v26, %v4601_v3 }
 0x470   :  { %v10887_v1 = vadd.f32 %v4150_v47, %v3782_v62 }
 0x472   :  { %v4280_v29 = vmul.f32 0.0, %v10887_v1 }
 0x474   :  { %v4406_v16 = vsel %vm86_vm6, %v4280_v29, 0.0  ;;  %v4478_v31 = vmul.f32 %v4280_v29, %v4280_v29  ;;  %v14466_v29 = vld [vmem:[#allocation44_spill] sm:$0xff] }
 0x475   :  { %v4407_v63 = vadd.f32 %v4406_v16, %v4405_v7  ;;  %v14467_v7 = vld [vmem:[#allocation49_spill] sm:$0xff] }
 0x476   :  { %v4604_v24 = vsel %vm86_vm6, %v4478_v31, 0.0  ;;  %v14468_v31 = vld [vmem:[#allocation14_spill] sm:$0xff] }
 0x477   :  { %v4408_v19 = vrot.slane %v4407_v63, 4  ;;  %v4605_v9 = vadd.f32 %v4604_v24, %v4603_v59  ;;  %v14481_v59 = vld [vmem:[#allocation63_spill] sm:$0xff]  ;;  %v10955_v24 = vld [vmem:[#allocation9 + $0x2] ss:$0 sm:$0xff] }
 0x479   :  { %v4409_v0 = vadd.f32 %v4408_v19, %v4407_v63  ;;  %v4606_v40 = vrot.slane %v4605_v9, 4  ;;  %v14469_v63 = vld [vmem:[#allocation16_spill] sm:$0xff] }
 0x47b   :  { %v4410_v23 = vrot.slane %v4409_v0, 2  ;;  %v4607_v6 = vadd.f32 %v4606_v40, %v4605_v9  ;;  %v14470_v9 = vld [vmem:[#allocation19_spill] sm:$0xff]  ;;  %v10975_v40 = vld [vmem:[#allocation9 + $0x3] ss:$0 sm:$0xff] }
 0x47c   :  { %14494 = vst [vmem:[#allocation94_spill] sm:$0xff] %v10975_v40 }
 0x47d   :  { %v4411_v49 = vadd.f32 %v4410_v23, %v4409_v0  ;;  %v4608_v58 = vrot.slane %v4607_v6, 2 }
 0x47f   :  { %v4412_v45 = vrot.slane %v4411_v49, 1  ;;  %v4609_v54 = vadd.f32 %v4608_v58, %v4607_v6  ;;  %v14471_v6 = vld [vmem:[#allocation25_spill] sm:$0xff] }
 0x480   :  { %v14472_v58 = vld [vmem:[#allocation29_spill] sm:$0xff] }
 0x481   :  { %v4413_v14 = vadd.f32 %v4412_v45, %v4411_v49  ;;  %v4610_v27 = vrot.slane %v4609_v54, 1  ;;  %v14477_v45 = vld [vmem:[#allocation17_spill] sm:$0xff] }
 0x482   :  { %v14486_v49 = vld [vmem:[#allocation41_spill] sm:$0xff] }
 0x483   :  { %v10893_v42 = vmul.f32 0.0025510204, %v4413_v14  ;;  %v4611_v62 = vadd.f32 %v4610_v27, %v4609_v54  ;;  %v14473_v54 = vld [vmem:[#allocation15_spill] sm:$0xff] }
 0x485   :  { %v4612_v10 = vmul.f32 0.0025510204, %v4611_v62  ;;  %v4613_v61 = vmul.f32 %v10893_v42, %v10893_v42  ;;  %v4679_v5 = vsub.f32 %v10887_v1, %v10893_v42  ;;  %v14479_v62 = vld [vmem:[#allocation23_spill] sm:$0xff]  ;;  %v4635_v16 = vsub.f32 %v14481_v59, %v10893_v42 }
 0x486   :  { %v4633_v0 = vsub.f32 %v14479_v62, %v10893_v42  ;;  %v14483_v62 = vld [vmem:[#allocation20_spill] sm:$0xff]  ;;  %v4643_v57 = vsub.f32 %v14486_v49, %v10893_v42  ;;  %v14487_v59 = vld [vmem:[#allocation43_spill] sm:$0xff] }
 0x487   :  { %v4614_v47 = vsub.f32 %v4612_v10, %v4613_v61  ;;  %v4644_v3 = vsub.f32 %v14487_v59, %v10893_v42  ;;  %v14491_v49 = vld [vmem:[#allocation56_spill] sm:$0xff]  ;;  %v4652_v59 = vsub.f32 %v14493_v48, %v10893_v42  ;;  %v4658_v48 = vsub.f32 %v14448_v60, %v10893_v42 }
 0x488   :  { %v4649_v46 = vsub.f32 %v14491_v49, %v10893_v42  ;;  %v4656_v49 = vsub.f32 %v14442_v33, %v10893_v42  ;;  %v4662_v33 = vsub.f32 %v14454_v20, %v10893_v42  ;;  %v4664_v60 = vsub.f32 %v10396_v35, %v10893_v42 }
 0x489   :  { %v4615_v37 = vmax.f32 %v4614_v47, 0.0  ;;  %v4668_v20 = vsub.f32 %v10520_v52, %v10893_v42  ;;  %v4670_v35 = vsub.f32 %v10814_v51, %v10893_v42  ;;  %v4673_v51 = vsub.f32 %v10824_v18, %v10893_v42 }
 0x48a   :  { %v4675_v18 = vsub.f32 %v10845_v44, %v10893_v42 }
 0x48b   :  { %v4680_v11 = vadd.f32 1e-05, %v4615_v37  ;;  %v14485_v37 = vld [vmem:[#allocation35_spill] sm:$0xff] }
 0x48c   :  { %v4641_v2 = vsub.f32 %v14485_v37, %v10893_v42  ;;  %v4647_v37 = vsub.f32 %v14490_v25, %v10893_v42  ;;  %v14496_v25 = vld [vmem:[#allocation66_spill] sm:$0xff] }
 0x48d   :  { %8263 = vrsqrt.f32 %v4680_v11  ;;  %vm4687_vm4 = vweird.f32 %v4680_v11 }
 0x493   :  { %v8264_v53 = vpop.eup %8263 }
 0x494   :  { %v4682_v26 = vmul.f32 %v8264_v53, %v4680_v11  ;;  %vm4688_vm5 = vweird.f32 %v8264_v53  ;;  %v14492_v11 = vld [vmem:[#allocation61_spill] sm:$0xff] }
 0x495   :  { %vm4689_vm7 = vmor %vm4687_vm4, %vm4688_vm5  ;;  %v4651_v39 = vsub.f32 %v14492_v11, %v10893_v42  ;;  %v14498_v11 = vld [vmem:[#allocation72_spill] sm:$0xff] }
 0x496   :  { %v4683_v1 = vmul.f32 %v8264_v53, %v4682_v26  ;;  %v4657_v26 = vsub.f32 %v14498_v11, %v10893_v42  ;;  %v4663_v11 = vsub.f32 %v10707_v15, %v10893_v42  ;;  %v4669_v15 = vsub.f32 %v10786_v8, %v10893_v42 }
 0x498   :  { %v4684_v61 = vmul.f32 0.5, %v4683_v1  ;;  %v14484_v1 = vld [vmem:[#allocation30_spill] sm:$0xff] }
 0x499   :  { %v4639_v36 = vsub.f32 %v14484_v1, %v10893_v42  ;;  %v4646_v1 = vsub.f32 %v14489_v13, %v10893_v42  ;;  %v14495_v13 = vld [vmem:[#allocation65_spill] sm:$0xff] }
 0x49a   :  { %v4685_v19 = vsub.f32 1.5, %v4684_v61  ;;  %v4637_v61 = vsub.f32 %v14483_v62, %v10893_v42  ;;  %v14488_v62 = vld [vmem:[#allocation46_spill] sm:$0xff]  ;;  %v4653_v10 = vsub.f32 %v14495_v13, %v10893_v42 }
 0x49c   :  { %v4686_v23 = vmul.f32 %v8264_v53, %v4685_v19  ;;  %v4645_v19 = vsub.f32 %v14488_v62, %v10893_v42 }
 0x49e   :  { %v10967_v21 = vsel %vm4689_vm7, %v8264_v53, %v4686_v23  ;;  %v4654_v53 = vsub.f32 %v14496_v25, %v10893_v42  ;;  %v14497_v23 = vld [vmem:[#allocation70_spill] sm:$0xff]  ;;  %v4660_v25 = vsub.f32 %v14452_v22, %v10893_v42 }
 0x49f   :  { %v4754_v62 = vmul.f32 %v10967_v21, %v4679_v5  ;;  %v4655_v14 = vsub.f32 %v14497_v23, %v10893_v42  ;;  %v14499_v5 = vld [vmem:[#allocation82_spill] sm:$0xff]  ;;  %v4661_v23 = vsub.f32 %v14500_v43, %v10893_v42  ;;  %v4667_v43 = vsub.f32 %v10760_v28, %v10893_v42 }
 0x4a0   :  { %v4659_v47 = vsub.f32 %v14499_v5, %v10893_v42  ;;  %v4665_v5 = vsub.f32 %v10732_v4, %v10893_v42  ;;  %v4671_v4 = vsub.f32 %v10799_v12, %v10893_v42  ;;  %v11019_v27 = vmul.f32 %v10967_v21, %v4633_v0 }
 0x4a1   :  { %v4819_v13 = vmul.f32 %v10955_v24, %v4754_v62  ;;  %v4666_v62 = vsub.f32 %v10458_v17, %v10893_v42  ;;  %v11022_v17 = vmul.f32 %v10967_v21, %v4635_v16  ;;  %v4672_v28 = vsub.f32 %v10833_v55, %v10893_v42 }
 0x4a2   :  { %v11027_v52 = vmul.f32 %v10967_v21, %v4637_v61  ;;  %v11030_v8 = vmul.f32 %v10967_v21, %v4639_v36  ;;  %v4674_v12 = vsub.f32 %v10855_v38, %v10893_v42  ;;  %v11037_v0 = vmul.f32 %v10967_v21, %v4641_v2 }
 0x4a3   :  { %v4884_v22 = vadd.f32 %v10975_v40, %v4819_v13  ;;  %v11040_v16 = vmul.f32 %v10967_v21, %v4643_v57  ;;  %v11043_v55 = vmul.f32 %v10967_v21, %v4644_v3  ;;  %v11046_v61 = vmul.f32 %v10967_v21, %v4645_v19 }
 0x4a4   :  { %v11049_v36 = vmul.f32 %v10967_v21, %v4646_v1  ;;  %v14501_v2 = vsub.f32 %v14477_v45, %v10893_v42  ;;  %v4722_v57 = vmul.f32 %v10967_v21, %v4647_v37  ;;  %v11063_v3 = vmul.f32 %v10967_v21, %v4651_v39 }
 0x4a5   :  { %v4948_v13 = vmax.f32 %v4884_v22, 0.0  ;;  %v11066_v19 = vmul.f32 %v10967_v21, %v4652_v59  ;;  %v11069_v44 = vmul.f32 %v10967_v21, %v4653_v10  ;;  %v11072_v45 = vmul.f32 %v10967_v21, %v4654_v53 }
 0x4a6   :  { %v4706_v38 = vmul.f32 %v10967_v21, %v14501_v2  ;;  %v11075_v1 = vmul.f32 %v10967_v21, %v4655_v14  ;;  %v11081_v37 = vmul.f32 %v10967_v21, %v4657_v26  ;;  %v11084_v39 = vmul.f32 %v10967_v21, %v4658_v48 }
 0x4a7   :  { %v5012_v22 = vmul.f32 0.0, %v4948_v13  ;;  %v11059_v13 = vmul.f32 %v10967_v21, %v4649_v46  ;;  %v11078_v46 = vmul.f32 %v10967_v21, %v4656_v49  ;;  %v11087_v59 = vmul.f32 %v10967_v21, %v4659_v47 }
 0x4a8   :  { %v11090_v10 = vmul.f32 %v10967_v21, %v4660_v25  ;;  %v11093_v53 = vmul.f32 %v10967_v21, %v4661_v23  ;;  %v11096_v14 = vmul.f32 %v10967_v21, %v4662_v33  ;;  %v11099_v49 = vmul.f32 %v10967_v21, %v4663_v11 }
 0x4a9   :  { %5076 = vst.msk [vmem:[#allocation3 + $0x1f8] sm:$0xff] %vm86_vm6, %v5012_v22  ;;  %v11102_v26 = vmul.f32 %v10967_v21, %v4664_v60  ;;  %v11105_v48 = vmul.f32 %v10967_v21, %v4665_v5  ;;  %v11108_v47 = vmul.f32 %v10967_v21, %v4666_v62  ;;  %v11111_v25 = vmul.f32 %v10967_v21, %v4667_v43  ;;  %v14508_v22 = vld [vmem:[#allocation26_spill] sm:$0xff] }
 0x4aa   :  { %v11114_v23 = vmul.f32 %v10967_v21, %v4668_v20  ;;  %v11117_v33 = vmul.f32 %v10967_v21, %v4669_v15  ;;  %v11120_v11 = vmul.f32 %v10967_v21, %v4670_v35  ;;  %v11123_v60 = vmul.f32 %v10967_v21, %v4671_v4 }
 0x4ab   :  { %v11126_v5 = vmul.f32 %v10967_v21, %v4672_v28  ;;  %v11129_v62 = vmul.f32 %v10967_v21, %v4673_v51  ;;  %v11132_v43 = vmul.f32 %v10967_v21, %v4674_v12  ;;  %v11135_v20 = vmul.f32 %v10967_v21, %v4675_v18 }
 0x4ac   :  { %v14502_v15 = vsub.f32 %v10858_v56, %v10893_v42  ;;  %v14504_v4 = vsub.f32 %v10865_v32, %v10893_v42  ;;  %v14506_v51 = vsub.f32 %v10876_v30, %v10893_v42  ;;  %v4638_v18 = vsub.f32 %v14508_v22, %v10893_v42  ;;  %v14509_v56 = vld [vmem:[#allocation32_spill] sm:$0xff]  ;;  %v14511_v32 = vld [vmem:[#allocation54_spill] sm:$0xff] }
 0x4ad   :  { %v14513_v30 = vsub.f32 %v14466_v29, %v10893_v42  ;;  %v14514_v22 = vsub.f32 %v14467_v7, %v10893_v42  ;;  %v14515_v40 = vsub.f32 %v14468_v31, %v10893_v42  ;;  %v14518_v29 = vsub.f32 %v10145_v41, %v10893_v42 }
 0x4ae   :  { %v11141_v35 = vmul.f32 %v10967_v21, %v14502_v15  ;;  %v11147_v28 = vmul.f32 %v10967_v21, %v14504_v4  ;;  %v11153_v12 = vmul.f32 %v10967_v21, %v14506_v51  ;;  %v14510_v15 = vld [vmem:[#allocation37_spill] sm:$0xff]  ;;  %v14512_v4 = vld [vmem:[#allocation59_spill] sm:$0xff]  ;;  %v14521_v31 = vsub.f32 %v10153_v50, %v10893_v42 }
 0x4af   :  { %v4691_v51 = vmul.f32 %v10967_v21, %v14513_v30  ;;  %v11179_v2 = vmul.f32 %v10967_v21, %v14515_v40  ;;  %v4695_v7 = vmul.f32 %v10967_v21, %v14518_v29  ;;  %v14519_v30 = vsub.f32 %v14470_v9, %v10893_v42 }
 0x4b0   :  { %14503 = vst [vmem:[#allocation88_spill] sm:$0xff] %v11141_v35  ;;  %v4697_v40 = vmul.f32 %v10967_v21, %v14521_v31  ;;  %v14524_v41 = vsub.f32 %v14471_v6, %v10893_v42  ;;  %v14525_v9 = vsub.f32 %v14472_v58, %v10893_v42  ;;  %v11218_v50 = vmul.f32 %v10955_v24, %v4706_v38  ;;  %v14531_v38 = vld [vmem:[#allocation73_spill] sm:$0xff] }
 0x4b1   :  { %14505 = vst [vmem:[#allocation51_spill] sm:$0xff] %v11147_v28  ;;  %v14516_v28 = vsub.f32 %v14469_v63, %v10893_v42  ;;  %v14522_v63 = vsub.f32 %v10156_v34, %v10893_v42  ;;  %v14527_v34 = vsub.f32 %v14473_v54, %v10893_v42  ;;  %v11232_v58 = vmul.f32 %v10955_v24, %v11019_v27 }
 0x4b2   :  { %14507 = vst [vmem:[#allocation93_spill] sm:$0xff] %v11153_v12  ;;  %v11173_v12 = vmul.f32 %v10967_v21, %v14514_v22  ;;  %v11195_v22 = vmul.f32 %v10967_v21, %v14519_v30  ;;  %v4699_v29 = vmul.f32 %v10967_v21, %v14524_v41  ;;  %v11215_v30 = vmul.f32 %v10967_v21, %v14525_v9 }
 0x4b3   :  { %v11185_v35 = vmul.f32 %v10967_v21, %v14516_v28  ;;  %v11205_v28 = vmul.f32 %v10967_v21, %v14522_v63  ;;  %v4701_v31 = vmul.f32 %v10967_v21, %v14527_v34  ;;  %v14528_v63 = vld [vmem:[#allocation22_spill] sm:$0xff]  ;;  %v11236_v41 = vmul.f32 %v10955_v24, %v11022_v17  ;;  %v14533_v34 = vld [vmem:[#allocation85_spill] sm:$0xff]  ;;  %v14536_v17 = vld [vmem:[#allocation24_spill] sm:$0xff] }
 0x4b4   :  { %14520 = vst [vmem:[#allocation49_spill] sm:$0xff] %v11195_v22  ;;  %v14532_v9 = vsub.f32 %v14531_v38, %v10893_v42  ;;  %v11254_v27 = vmul.f32 %v10955_v24, %v11030_v8  ;;  %v11274_v8 = vmul.f32 %v10955_v24, %v11043_v55 }
 0x4b5   :  { %14517 = vst [vmem:[#allocation44_spill] sm:$0xff] %v11185_v35 }
 0x4b6   :  { %14523 = vst [vmem:[#allocation14_spill] sm:$0xff] %v11205_v28  ;;  %v14529_v28 = vsub.f32 %v14528_v63, %v10893_v42  ;;  %v4703_v54 = vmul.f32 %v10967_v21, %v14532_v9  ;;  %v14538_v9 = vld [vmem:[#allocation21_spill] sm:$0xff] }
 0x4b7   :  { %14526 = vst [vmem:[#allocation16_spill] sm:$0xff] %v11215_v30  ;;  %v14534_v30 = vsub.f32 %v14533_v34, %v10893_v42  ;;  %v14539_v22 = vsub.f32 %v14538_v9, %v10893_v42 }
 0x4b8   :  { %v11228_v6 = vmul.f32 %v10967_v21, %v14529_v28  ;;  %v11250_v28 = vmul.f32 %v10955_v24, %v11027_v52  ;;  %v11270_v52 = vmul.f32 %v10955_v24, %v11040_v16 }
 0x4b9   :  { %v11246_v63 = vmul.f32 %v10967_v21, %v14534_v30  ;;  %v4707_v34 = vmul.f32 %v10967_v21, %v14539_v22  ;;  %v11266_v30 = vmul.f32 %v10955_v24, %v11037_v0  ;;  %v11285_v22 = vmul.f32 %v10955_v24, %v4722_v57  ;;  %v14540_v0 = vld [vmem:[#allocation57_spill] sm:$0xff] }
 0x4ba   :  { %14530 = vst [vmem:[#allocation19_spill] sm:$0xff] %v11228_v6  ;;  %v14537_v6 = vsub.f32 %v14536_v17, %v10893_v42  ;;  %v11282_v17 = vmul.f32 %v10955_v24, %v11049_v36  ;;  %v14541_v9 = vsub.f32 %v14540_v0, %v10893_v42  ;;  %v11301_v36 = vmul.f32 %v10955_v24, %v11063_v3 }
 0x4bb   :  { %14535 = vst [vmem:[#allocation25_spill] sm:$0xff] %v11246_v63  ;;  %v14542_v63 = vld [vmem:[#allocation68_spill] sm:$0xff]  ;;  %v11305_v57 = vmul.f32 %v10955_v24, %v11066_v19  ;;  %v11309_v0 = vmul.f32 %v10955_v24, %v11069_v44  ;;  %v11321_v3 = vmul.f32 %v10955_v24, %v11078_v46  ;;  %v11325_v19 = vmul.f32 %v10955_v24, %v11081_v37 }
 0x4bc   :  { %v4705_v38 = vmul.f32 %v10967_v21, %v14537_v6  ;;  %v11278_v6 = vmul.f32 %v10955_v24, %v11046_v61  ;;  %v4709_v16 = vmul.f32 %v10967_v21, %v14541_v9  ;;  %v14543_v55 = vsub.f32 %v14542_v63, %v10893_v42 }
 0x4bd   :  { %v11297_v61 = vmul.f32 %v10955_v24, %v11059_v13  ;;  %v11313_v63 = vmul.f32 %v10955_v24, %v11072_v45  ;;  %v11317_v13 = vmul.f32 %v10955_v24, %v11075_v1  ;;  %v11329_v44 = vmul.f32 %v10955_v24, %v11084_v39 }
 0x4be   :  { %v4711_v35 = vmul.f32 %v10967_v21, %v14543_v55  ;;  %v11333_v45 = vmul.f32 %v10955_v24, %v11087_v59  ;;  %v11337_v1 = vmul.f32 %v10955_v24, %v11090_v10  ;;  %v11341_v46 = vmul.f32 %v10955_v24, %v11093_v53 }
 0x4bf   :  { %v11345_v37 = vmul.f32 %v10955_v24, %v11096_v14  ;;  %v11349_v39 = vmul.f32 %v10955_v24, %v11099_v49  ;;  %v11353_v59 = vmul.f32 %v10955_v24, %v11102_v26  ;;  %v11357_v10 = vmul.f32 %v10955_v24, %v11105_v48 }
 0x4c0   :  { %v11361_v53 = vmul.f32 %v10955_v24, %v11108_v47  ;;  %v11365_v14 = vmul.f32 %v10955_v24, %v11111_v25  ;;  %v11369_v49 = vmul.f32 %v10955_v24, %v11114_v23  ;;  %v11373_v26 = vmul.f32 %v10955_v24, %v11117_v33 }
 0x4c1   :  { %v11377_v48 = vmul.f32 %v10955_v24, %v11120_v11  ;;  %v11381_v47 = vmul.f32 %v10955_v24, %v11123_v60  ;;  %v11385_v25 = vmul.f32 %v10955_v24, %v11126_v5  ;;  %v11389_v23 = vmul.f32 %v10955_v24, %v11129_v62  ;;  %v14547_v60 = vld [vmem:[#allocation88_spill] sm:$0xff]  ;;  %v14548_v5 = vld [vmem:[#allocation51_spill] sm:$0xff]  ;;  %v14549_v62 = vld [vmem:[#allocation93_spill] sm:$0xff] }
 0x4c2   :  { %v11393_v33 = vmul.f32 %v10955_v24, %v11132_v43  ;;  %v11397_v11 = vmul.f32 %v10955_v24, %v11135_v20  ;;  %v11400_v9 = vmul.f32 %v10967_v21, %v4638_v18  ;;  %v4816_v55 = vmul.f32 %v10955_v24, %v14547_v60 }
 0x4c3   :  { %14544 = vst [vmem:[#allocation29_spill] sm:$0xff] %v11385_v25  ;;  %v11406_v25 = vmul.f32 %v10955_v24, %v14548_v5  ;;  %v14550_v43 = vsub.f32 %v14509_v56, %v10893_v42  ;;  %v14551_v18 = vsub.f32 %v14510_v15, %v10893_v42  ;;  %v14552_v60 = vsub.f32 %v14511_v32, %v10893_v42 }
 0x4c4   :  { %14545 = vst [vmem:[#allocation15_spill] sm:$0xff] %v11389_v23  ;;  %v11410_v23 = vmul.f32 %v10955_v24, %v14549_v62  ;;  %v4756_v62 = vmul.f32 %v10955_v24, %v4691_v51  ;;  %v14554_v56 = vsub.f32 %v14512_v4, %v10893_v42  ;;  %v11439_v15 = vmul.f32 %v10955_v24, %v11173_v12 }
 0x4c5   :  { %14546 = vst [vmem:[#allocation17_spill] sm:$0xff] %v11400_v9  ;;  %v11416_v20 = vmul.f32 %v10967_v21, %v14550_v43  ;;  %v11422_v9 = vmul.f32 %v10967_v21, %v14551_v18  ;;  %v11428_v5 = vmul.f32 %v10967_v21, %v14552_v60  ;;  %v4758_v18 = vmul.f32 %v10955_v24, %v11179_v2 }
 0x4c6   :  { %v11435_v43 = vmul.f32 %v10967_v21, %v14554_v56  ;;  %14555 = vst [vmem:[#allocation63_spill] sm:$0xff] %v11439_v15  ;;  %v4760_v32 = vmul.f32 %v10955_v24, %v4695_v7  ;;  %v4762_v60 = vmul.f32 %v10955_v24, %v4697_v40  ;;  %v4766_v51 = vmul.f32 %v10955_v24, %v4701_v31  ;;  %v14556_v56 = vld [vmem:[#allocation94_spill] sm:$0xff] }
 0x4c7   :  { %14553 = vst [vmem:[#allocation23_spill] sm:$0xff] %v11428_v5  ;;  %v4764_v5 = vmul.f32 %v10955_v24, %v4699_v29  ;;  %v4768_v42 = vmul.f32 %v10955_v24, %v4703_v54  ;;  %v4770_v21 = vmul.f32 %v10955_v24, %v4705_v38  ;;  %v4772_v4 = vmul.f32 %v10955_v24, %v4707_v34 }
 0x4c8   :  { %v4774_v12 = vmul.f32 %v10955_v24, %v4709_v16  ;;  %v11453_v15 = vadd.f32 %v14556_v56, %v11218_v50  ;;  %v11456_v2 = vmul.f32 %v10955_v24, %v4711_v35  ;;  %v4821_v7 = vadd.f32 %v14556_v56, %v4756_v62 }
 0x4c9   :  { %v11461_v40 = vadd.f32 %v14556_v56, %v11232_v58  ;;  %v11465_v29 = vadd.f32 %v14556_v56, %v11236_v41  ;;  %v4823_v31 = vadd.f32 %v14556_v56, %v4758_v18  ;;  %v4825_v54 = vadd.f32 %v14556_v56, %v4760_v32 }
 0x4ca   :  { %v11471_v50 = vadd.f32 %v14556_v56, %v11250_v28  ;;  %v11475_v35 = vadd.f32 %v14556_v56, %v11254_v27  ;;  %v11478_v38 = vadd.f32 %v14556_v56, %v4762_v60  ;;  %v11482_v58 = vadd.f32 %v14556_v56, %v11266_v30  ;;  %v14557_v62 = vld [vmem:[#allocation29_spill] sm:$0xff] }
 0x4cb   :  { %v11486_v41 = vadd.f32 %v14556_v56, %v11270_v52  ;;  %v11490_v34 = vadd.f32 %v14556_v56, %v11274_v8  ;;  %v11493_v28 = vadd.f32 %v14556_v56, %v4764_v5  ;;  %v11497_v27 = vadd.f32 %v14556_v56, %v11278_v6  ;;  %v14559_v18 = vld [vmem:[#allocation15_spill] sm:$0xff] }
 0x4cc   :  { %v11501_v16 = vadd.f32 %v14556_v56, %v11282_v17  ;;  %v11505_v30 = vadd.f32 %v14556_v56, %v11285_v22  ;;  %v11508_v52 = vadd.f32 %v14556_v56, %v4766_v51  ;;  %v11512_v8 = vadd.f32 %v14556_v56, %v11297_v61 }
 0x4cd   :  { %v11516_v5 = vadd.f32 %v14556_v56, %v11301_v36  ;;  %v11520_v6 = vadd.f32 %v14556_v56, %v11305_v57  ;;  %v11524_v17 = vadd.f32 %v14556_v56, %v11309_v0  ;;  %v11528_v22 = vadd.f32 %v14556_v56, %v11313_v63 }
 0x4ce   :  { %v11532_v61 = vadd.f32 %v14556_v56, %v11317_v13  ;;  %v11536_v36 = vadd.f32 %v14556_v56, %v11321_v3  ;;  %v11540_v57 = vadd.f32 %v14556_v56, %v11325_v19  ;;  %v11544_v0 = vadd.f32 %v14556_v56, %v11329_v44 }
 0x4cf   :  { %v11548_v63 = vadd.f32 %v14556_v56, %v11333_v45  ;;  %v11552_v13 = vadd.f32 %v14556_v56, %v11337_v1  ;;  %v11556_v3 = vadd.f32 %v14556_v56, %v11341_v46  ;;  %v11560_v19 = vadd.f32 %v14556_v56, %v11345_v37 }
 0x4d0   :  { %v11564_v44 = vadd.f32 %v14556_v56, %v11349_v39  ;;  %v11568_v45 = vadd.f32 %v14556_v56, %v11353_v59  ;;  %v11572_v1 = vadd.f32 %v14556_v56, %v11357_v10  ;;  %v11576_v46 = vadd.f32 %v14556_v56, %v11361_v53 }
 0x4d1   :  { %v11580_v37 = vadd.f32 %v14556_v56, %v11365_v14  ;;  %v11584_v39 = vadd.f32 %v14556_v56, %v11369_v49  ;;  %v11588_v59 = vadd.f32 %v14556_v56, %v11373_v26  ;;  %v11592_v10 = vadd.f32 %v14556_v56, %v11377_v48 }
 0x4d2   :  { %v11596_v53 = vadd.f32 %v14556_v56, %v11381_v47  ;;  %v11600_v14 = vadd.f32 %v14556_v56, %v14557_v62  ;;  %v11604_v49 = vadd.f32 %v14556_v56, %v14559_v18  ;;  %v11608_v26 = vadd.f32 %v14556_v56, %v11393_v33  ;;  %v14564_v33 = vld [vmem:[#allocation17_spill] sm:$0xff] }
 0x4d3   :  { %v11612_v48 = vadd.f32 %v14556_v56, %v11397_v11  ;;  %v11615_v32 = vadd.f32 %v14556_v56, %v4816_v55  ;;  %v4833_v47 = vadd.f32 %v14556_v56, %v4768_v42  ;;  %v11620_v60 = vadd.f32 %v14556_v56, %v11406_v25 }
 0x4d4   :  { %14558 = vst [vmem:[#allocation20_spill] sm:$0xff] %v11600_v14  ;;  %v11624_v51 = vadd.f32 %v14556_v56, %v11410_v23  ;;  %v4885_v62 = vmax.f32 %v4821_v7, 0.0  ;;  %v4778_v18 = vmul.f32 %v10955_v24, %v14564_v33  ;;  %v4835_v11 = vadd.f32 %v14556_v56, %v4770_v21  ;;  %v14565_v23 = vld [vmem:[#allocation44_spill] sm:$0xff] }
 0x4d5   :  { %14560 = vst [vmem:[#allocation30_spill] sm:$0xff] %v11608_v26  ;;  %v4887_v26 = vmax.f32 %v4823_v31, 0.0  ;;  %v4889_v14 = vmax.f32 %v4825_v54, 0.0  ;;  %v4780_v55 = vmul.f32 %v10955_v24, %v11416_v20  ;;  %v4837_v42 = vadd.f32 %v14556_v56, %v4772_v4  ;;  %v14566_v20 = vld [vmem:[#allocation49_spill] sm:$0xff]  ;;  %v14567_v54 = vld [vmem:[#allocation23_spill] sm:$0xff] }
 0x4d6   :  { %14561 = vst [vmem:[#allocation35_spill] sm:$0xff] %v11615_v32  ;;  %v4891_v25 = vmax.f32 %v11478_v38, 0.0  ;;  %v4759_v7 = vmul.f32 %v10955_v24, %v14565_v23  ;;  %v4782_v33 = vmul.f32 %v10955_v24, %v11422_v9  ;;  %v4839_v21 = vadd.f32 %v14556_v56, %v4774_v12  ;;  %v14568_v23 = vld [vmem:[#allocation14_spill] sm:$0xff] }
 0x4d7   :  { %14562 = vst [vmem:[#allocation41_spill] sm:$0xff] %v11620_v60  ;;  %v4893_v60 = vmax.f32 %v11493_v28, 0.0  ;;  %v4895_v31 = vmax.f32 %v11508_v52, 0.0  ;;  %v4761_v4 = vmul.f32 %v10955_v24, %v14566_v20  ;;  %v4788_v38 = vmul.f32 %v10955_v24, %v14567_v54  ;;  %v14569_v20 = vld [vmem:[#allocation16_spill] sm:$0xff] }
 0x4d8   :  { %14563 = vst [vmem:[#allocation43_spill] sm:$0xff] %v11624_v51  ;;  %v4841_v28 = vadd.f32 %v14556_v56, %v11456_v2  ;;  %v4763_v9 = vmul.f32 %v10955_v24, %v14568_v23  ;;  %v4790_v12 = vmul.f32 %v10955_v24, %v11435_v43  ;;  %v4843_v52 = vadd.f32 %v14556_v56, %v4778_v18  ;;  %v14570_v51 = vld [vmem:[#allocation19_spill] sm:$0xff]  ;;  %v14571_v23 = vld [vmem:[#allocation25_spill] sm:$0xff] }
 0x4d9   :  { %5013 = vst.msk [vmem:[#allocation3] sm:$0xff] %vm86_vm6, %v4885_v62  ;;  %v4897_v62 = vmax.f32 %v4833_v47, 0.0  ;;  %v4765_v54 = vmul.f32 %v10955_v24, %v14569_v20  ;;  %v4767_v2 = vmul.f32 %v10955_v24, %v14570_v51  ;;  %v4845_v47 = vadd.f32 %v14556_v56, %v4780_v55  ;;  %v14572_v43 = vld [vmem:[#allocation63_spill] sm:$0xff] }
 0x4da   :  { %5015 = vst.msk [vmem:[#allocation3 + $0x10] sm:$0xff] %vm86_vm6, %v4887_v26  ;;  %v4899_v26 = vmax.f32 %v4835_v11, 0.0  ;;  %v4769_v32 = vmul.f32 %v10955_v24, %v14571_v23  ;;  %v4822_v18 = vadd.f32 %v14556_v56, %v14572_v43  ;;  %v4847_v11 = vadd.f32 %v14556_v56, %v4782_v33  ;;  %v14575_v43 = vld [vmem:[#allocation96_spill] sm:$0xff] }
 0x4db   :  { %5017 = vst.msk [vmem:[#allocation3 + $0x20] sm:$0xff] %vm86_vm6, %v4889_v14  ;;  %v4901_v14 = vmax.f32 %v4837_v42, 0.0  ;;  %v4824_v20 = vadd.f32 %v14556_v56, %v4759_v7  ;;  %v4826_v51 = vadd.f32 %v14556_v56, %v4761_v4  ;;  %v4853_v55 = vadd.f32 %v14556_v56, %v4788_v38 }
 0x4dc   :  { %5019 = vst.msk [vmem:[#allocation3 + $0x30] sm:$0xff] %vm86_vm6, %v4891_v25  ;;  %v4903_v25 = vmax.f32 %v4839_v21, 0.0  ;;  %v4905_v42 = vmax.f32 %v4841_v28, 0.0  ;;  %v4855_v24 = vadd.f32 %v14556_v56, %v4790_v12  ;;  %v4907_v23 = vmax.f32 %v4843_v52, 0.0 }
 0x4dd   :  { %5021 = vst.msk [vmem:[#allocation3 + $0x40] sm:$0xff] %vm86_vm6, %v4893_v60  ;;  %v4828_v60 = vadd.f32 %v14556_v56, %v4763_v9  ;;  %v4830_v33 = vadd.f32 %v14556_v56, %v4765_v54  ;;  %v4909_v21 = vmax.f32 %v4845_v47, 0.0  ;;  %v4832_v7 = vadd.f32 %v14556_v56, %v4767_v2  ;;  %v14574_v47 = vld [vmem:[#allocation38_spill] sm:$0xff] }
 0x4de   :  { %5023 = vst.msk [vmem:[#allocation3 + $0x50] sm:$0xff] %vm86_vm6, %v4895_v31  ;;  %v4834_v31 = vadd.f32 %v14556_v56, %v4769_v32  ;;  %v4911_v4 = vmax.f32 %v4847_v11, 0.0  ;;  %v4886_v38 = vmax.f32 %v4822_v18, 0.0  ;;  %v4888_v28 = vmax.f32 %v4824_v20, 0.0  ;;  %v14573_v32 = vld [vmem:[#allocation33_spill] sm:$0xff] }
 0x4df   :  { %5025 = vst.msk [vmem:[#allocation3 + $0x60] sm:$0xff] %vm86_vm6, %v4897_v62  ;;  %v4890_v62 = vmax.f32 %v4826_v51, 0.0  ;;  %v4917_v9 = vmax.f32 %v4853_v55, 0.0  ;;  %v4892_v12 = vmax.f32 %v4828_v60, 0.0  ;;  %v4919_v52 = vmax.f32 %v4855_v24, 0.0  ;;  %v14577_v55 = vld [vmem:[#allocation98_spill] sm:$0xff] }
 0x4e0   :  { %5027 = vst.msk [vmem:[#allocation3 + $0x70] sm:$0xff] %vm86_vm6, %v4899_v26  ;;  %v4894_v26 = vmax.f32 %v4830_v33, 0.0  ;;  %v4896_v54 = vmax.f32 %v4832_v7, 0.0  ;;  %v4898_v56 = vmax.f32 %v4834_v31, 0.0  ;;  %v4950_v2 = vmul.f32 %v14573_v32, %v4886_v38  ;;  %v14578_v24 = vld [vmem:[#allocation99_spill] sm:$0xff]  ;;  %v14580_v31 = vld [vmem:[#allocation101_spill] sm:$0xff] }
 0x4e1   :  { %5029 = vst.msk [vmem:[#allocation3 + $0x80] sm:$0xff] %vm86_vm6, %v4901_v14  ;;  %v4952_v14 = vmul.f32 %v14574_v47, %v4888_v28  ;;  %v4954_v18 = vmul.f32 %v14575_v43, %v4890_v62  ;;  %v4900_v11 = vmax.f32 %v11453_v15, 0.0  ;;  %v4902_v51 = vmax.f32 %v11461_v40, 0.0  ;;  %v14581_v38 = vld [vmem:[#allocation102_spill] sm:$0xff]  ;;  %v14582_v62 = vld [vmem:[#allocation103_spill] sm:$0xff] }
 0x4e2   :  { %5031 = vst.msk [vmem:[#allocation3 + $0x90] sm:$0xff] %vm86_vm6, %v4903_v25  ;;  %v14576_v25 = vld [vmem:[#allocation97_spill] sm:$0xff]  ;;  %v4904_v60 = vmax.f32 %v11465_v29, 0.0  ;;  %v4906_v33 = vmax.f32 %v11471_v50, 0.0  ;;  %v4908_v7 = vmax.f32 %v11475_v35, 0.0  ;;  %v4912_v28 = vmax.f32 %v11486_v41, 0.0 }
 0x4e3   :  { %5033 = vst.msk [vmem:[#allocation3 + $0xa0] sm:$0xff] %vm86_vm6, %v4905_v42  ;;  %v4956_v20 = vmul.f32 %v14576_v25, %v4892_v12  ;;  %v4958_v42 = vmul.f32 %v14577_v55, %v4894_v26  ;;  %v4964_v40 = vmul.f32 %v14580_v31, %v4900_v11  ;;  %v4966_v29 = vmul.f32 %v14581_v38, %v4902_v51  ;;  %v14583_v12 = vld [vmem:[#allocation104_spill] sm:$0xff]  ;;  %v14584_v26 = vld [vmem:[#allocation105_spill] sm:$0xff]  ;;  %v14587_v11 = vld [vmem:[#allocation107_spill] sm:$0xff] }
 0x4e4   :  { %5035 = vst.msk [vmem:[#allocation3 + $0xb0] sm:$0xff] %vm86_vm6, %v4907_v23  ;;  %v4960_v23 = vmul.f32 %v14578_v24, %v4896_v54  ;;  %v4968_v50 = vmul.f32 %v14582_v62, %v4904_v60  ;;  %v4970_v35 = vmul.f32 %v14583_v12, %v4906_v33  ;;  %v4915_v54 = vmax.f32 %v11501_v16, 0.0  ;;  %v5077_v51 = vld [vmem:[#allocation3] sm:$0xff]  ;;  %v14588_v55 = vld [vmem:[#allocation108_spill] sm:$0xff] }
 0x4e5   :  { %5037 = vst.msk [vmem:[#allocation3 + $0xc0] sm:$0xff] %vm86_vm6, %v4909_v21  ;;  %v14579_v21 = vld [vmem:[#allocation100_spill] sm:$0xff]  ;;  %v4916_v32 = vmax.f32 %v11505_v30, 0.0  ;;  %v4918_v47 = vmax.f32 %v11512_v8, 0.0  ;;  %v4921_v33 = vmax.f32 %v11520_v6, 0.0  ;;  %v4928_v6 = vmax.f32 %v11548_v63, 0.0 }
 0x4e6   :  { %5039 = vst.msk [vmem:[#allocation3 + $0xd0] sm:$0xff] %vm86_vm6, %v4911_v4  ;;  %v4962_v15 = vmul.f32 %v14579_v21, %v4898_v56  ;;  %v4910_v4 = vmax.f32 %v11482_v58, 0.0  ;;  %v4972_v58 = vmul.f32 %v14584_v26, %v4908_v7  ;;  %v14585_v56 = vld [vmem:[#allocation106_spill] sm:$0xff]  ;;  %v4979_v16 = vmul.f32 0.0, %v4915_v54  ;;  %v14593_v26 = vld [vmem:[#allocation77_spill] sm:$0xff]  ;;  %v14594_v54 = vld [vmem:[#allocation92_spill] sm:$0xff] }
 0x4e7   :  { %5045 = vst.msk [vmem:[#allocation3 + $0x100] sm:$0xff] %vm86_vm6, %v4917_v9  ;;  %v4913_v9 = vmax.f32 %v11490_v34, 0.0  ;;  %v4980_v30 = vmul.f32 0.0, %v4916_v32  ;;  %v4982_v25 = vmul.f32 %v14587_v11, %v4918_v47  ;;  %v4927_v12 = vmax.f32 %v11544_v0, 0.0  ;;  %v14598_v11 = vld [vmem:[#allocation86_spill] sm:$0xff] }
 0x4e8   :  { %5047 = vst.msk [vmem:[#allocation3 + $0x110] sm:$0xff] %vm86_vm6, %v4919_v52  ;;  %v4914_v52 = vmax.f32 %v11497_v27, 0.0  ;;  %v4974_v41 = vmul.f32 %v14585_v56, %v4910_v4  ;;  %v4920_v27 = vmax.f32 %v11516_v5, 0.0  ;;  %v4924_v5 = vmax.f32 %v11532_v61, 0.0  ;;  %v14589_v4 = vld [vmem:[#allocation109_spill] sm:$0xff] }
 0x4e9   :  { %5014 = vst.msk [vmem:[#allocation3 + $0x8] sm:$0xff] %vm86_vm6, %v4950_v2  ;;  %v14586_v2 = vld [vmem:[#allocation60_spill] sm:$0xff]  ;;  %v4932_v63 = vmax.f32 %v11564_v44, 0.0  ;;  %v4931_v0 = vmax.f32 %v11560_v19, 0.0  ;;  %v4936_v44 = vmax.f32 %v11580_v37, 0.0  ;;  %v4935_v19 = vmax.f32 %v11576_v46, 0.0 }
 0x4ea   :  { %5016 = vst.msk [vmem:[#allocation3 + $0x18] sm:$0xff] %vm86_vm6, %v4952_v14  ;;  %v4976_v34 = vmul.f32 %v14586_v2, %v4912_v28  ;;  %v4977_v14 = vmul.f32 0.0, %v4913_v9  ;;  %v4978_v43 = vmul.f32 0.0, %v4914_v52  ;;  %v14590_v28 = vld [vmem:[#allocation110_spill] sm:$0xff]  ;;  %v4940_v47 = vmax.f32 %v11596_v53, 0.0 }
 0x4eb   :  { %5018 = vst.msk [vmem:[#allocation3 + $0x28] sm:$0xff] %vm86_vm6, %v4954_v18  ;;  %v4922_v18 = vmax.f32 %v11524_v17, 0.0  ;;  %v4988_v62 = vmul.f32 %v14590_v28, %v4924_v5  ;;  %v4996_v56 = vmul.f32 %v14594_v54, %v4932_v63  ;;  %v4939_v53 = vmax.f32 %v11592_v10, 0.0  ;;  %v14601_v10 = vld [vmem:[#allocation41_spill] sm:$0xff] }
 0x4ec   :  { %5020 = vst.msk [vmem:[#allocation3 + $0x38] sm:$0xff] %vm86_vm6, %v4956_v20  ;;  %v4946_v5 = vmax.f32 %v14601_v10, 0.0 }
 0x4ed   :  { %5022 = vst.msk [vmem:[#allocation3 + $0x48] sm:$0xff] %vm86_vm6, %v4958_v42  ;;  %v4984_v42 = vmul.f32 %v14588_v55, %v4920_v27  ;;  %v4986_v61 = vmul.f32 %v14589_v4, %v4922_v18  ;;  %v14597_v18 = vld [vmem:[#allocation75_spill] sm:$0xff]  ;;  %v14602_v55 = vld [vmem:[#allocation18_spill] sm:$0xff] }
 0x4ee   :  { %5024 = vst.msk [vmem:[#allocation3 + $0x58] sm:$0xff] %vm86_vm6, %v4960_v23  ;;  %v5832_v23 = vld [vmem:[#allocation3 + $0x10] sm:$0xff] }
 0x4ef   :  { %5026 = vst.msk [vmem:[#allocation3 + $0x68] sm:$0xff] %vm86_vm6, %v4962_v15 }
 0x4f0   :  { %5028 = vst.msk [vmem:[#allocation3 + $0x78] sm:$0xff] %vm86_vm6, %v4964_v40  ;;  %v5177_v8 = vld [vmem:[#allocation3 + $0x1] sm:$0xff]  ;;  %v5178_v20 = vld [vmem:[#allocation3 + $0x9] sm:$0xff]  ;;  %v4926_v40 = vmax.f32 %v11540_v57, 0.0  ;;  %v4925_v57 = vmax.f32 %v11536_v36, 0.0  ;;  %v4929_v36 = vmax.f32 %v11552_v13, 0.0 }
 0x4f1   :  { %5030 = vst.msk [vmem:[#allocation3 + $0x88] sm:$0xff] %vm86_vm6, %v4966_v29  ;;  %v5241_v60 = vpack.c.bf16 %v5178_v20, %v5177_v8  ;;  %v5078_v24 = vld [vmem:[#allocation3 + $0x8] sm:$0xff]  ;;  %v5833_v17 = vld [vmem:[#allocation3 + $0x18] sm:$0xff]  ;;  %v4923_v29 = vmax.f32 %v11528_v22, 0.0  ;;  %v4930_v22 = vmax.f32 %v11556_v3, 0.0  ;;  %v4934_v3 = vmax.f32 %v11572_v1, 0.0 }
 0x4f2   :  { %5032 = vst.msk [vmem:[#allocation3 + $0x98] sm:$0xff] %vm86_vm6, %v4968_v50  ;;  %v5141_v21 = vpack.c.bf16 %v5078_v24, %v5077_v51  ;;  %v5896_v15 = vpack.c.bf16 %v5833_v17, %v5832_v23  ;;  %v6274_v7 = vld [vmem:[#allocation3 + $0x11] sm:$0xff]  ;;  %v6275_v31 = vld [vmem:[#allocation3 + $0x19] sm:$0xff]  ;;  %v4933_v13 = vmax.f32 %v11568_v45, 0.0  ;;  %v4938_v1 = vmax.f32 %v11588_v59, 0.0  ;;  %v5835_v2 = vld [vmem:[#allocation3 + $0x28] sm:$0xff] }
 0x4f3   :  { %5034 = vst.msk [vmem:[#allocation3 + $0xa8] sm:$0xff] %vm86_vm6, %v4970_v35  ;;  %8048 = vmatmul.msk.bf16.vlgmr.msra.gmra.mxu1 %vm86_vm6, %v5241_v60  ;;  %v6338_v38 = vpack.c.bf16 %v6275_v31, %v6274_v7  ;;  %v14591_v50 = vld [vmem:[#allocation111_spill] sm:$0xff]  ;;  %v14592_v35 = vld [vmem:[#allocation84_spill] sm:$0xff]  ;;  %v6276_v37 = vld [vmem:[#allocation3 + $0x21] sm:$0xff]  ;;  %v4937_v59 = vmax.f32 %v11584_v39, 0.0  ;;  %v4944_v39 = vmax.f32 %v11612_v48, 0.0 }
 0x4f4   :  { %5036 = vst.msk [vmem:[#allocation3 + $0xb8] sm:$0xff] %vm86_vm6, %v4972_v58  ;;  %8088 = vmatmul.msk.bf16.vlgmr.msra.gmra.mxu2 %vm86_vm6, %v5141_v21  ;;  %8128 = vmatmul.msk.bf16.vlgmr.msra.gmra.mxu3 %vm86_vm6, %v5896_v15  ;;  %v4990_v9 = vmul.f32 %v14591_v50, %v4926_v40  ;;  %v4992_v52 = vmul.f32 %v14592_v35, %v4928_v6  ;;  %v5834_v45 = vld [vmem:[#allocation3 + $0x20] sm:$0xff]  ;;  %v14600_v20 = vld [vmem:[#allocation35_spill] sm:$0xff]  ;;  %v14603_v60 = vld [vmem:[#allocation30_spill] sm:$0xff] }
 0x4f5   :  { %5038 = vst.msk [vmem:[#allocation3 + $0xc8] sm:$0xff] %vm86_vm6, %v4974_v41  ;;  %8168 = vmatmul.msk.bf16.vlgmr.msra.gmra.mxu0 %vm86_vm6, %v6338_v38  ;;  %v4994_v58 = vmul.f32 %v14593_v26, %v4930_v22  ;;  %v14595_v41 = vld [vmem:[#allocation39_spill] sm:$0xff]  ;;  %v5002_v46 = vmul.f32 %v14597_v18, %v4938_v1  ;;  %v4945_v51 = vmax.f32 %v14600_v20, 0.0  ;;  %v4943_v48 = vmax.f32 %v14603_v60, 0.0  ;;  %v14605_v17 = vld [vmem:[#allocation80_spill] sm:$0xff]  ;;  %v5839_v6 = vld [vmem:[#allocation3 + $0x48] sm:$0xff] }
 0x4f6   :  { %5040 = vst.msk [vmem:[#allocation3 + $0xd8] sm:$0xff] %vm86_vm6, %v4976_v34  ;;  %v4998_v32 = vmul.f32 %v14595_v41, %v4934_v3  ;;  %v6277_v34 = vld [vmem:[#allocation3 + $0x29] sm:$0xff]  ;;  %v5837_v31 = vld [vmem:[#allocation3 + $0x38] sm:$0xff]  ;;  %v6280_v28 = vld [vmem:[#allocation3 + $0x41] sm:$0xff] }
 0x4f7   :  { %5041 = vst.msk [vmem:[#allocation3 + $0xe0] sm:$0xff] %vm86_vm6, %v4977_v14  ;;  %v14596_v14 = vld [vmem:[#allocation95_spill] sm:$0xff]  ;;  %v5009_v21 = vmul.f32 0.0, %v4945_v51  ;;  %v6279_v4 = vld [vmem:[#allocation3 + $0x39] sm:$0xff]  ;;  %v5843_v3 = vld [vmem:[#allocation3 + $0x68] sm:$0xff] }
 0x4f8   :  { %5042 = vst.msk [vmem:[#allocation3 + $0xe8] sm:$0xff] %vm86_vm6, %v4978_v43  ;;  %v5000_v27 = vmul.f32 %v14596_v14, %v4936_v44  ;;  %v5897_v43 = vpack.c.bf16 %v5835_v2, %v5834_v45  ;;  %v14604_v24 = vld [vmem:[#allocation43_spill] sm:$0xff]  ;;  %v6283_v63 = vld [vmem:[#allocation3 + $0x59] sm:$0xff]  ;;  %v6284_v26 = vld [vmem:[#allocation3 + $0x61] sm:$0xff] }
 0x4f9   :  { %5043 = vst.msk [vmem:[#allocation3 + $0xf0] sm:$0xff] %vm86_vm6, %v4979_v16  ;;  %v4942_v16 = vmax.f32 %v11604_v49, 0.0  ;;  %v14599_v49 = vld [vmem:[#allocation20_spill] sm:$0xff]  ;;  %v4947_v23 = vmax.f32 %v14604_v24, 0.0  ;;  %v5840_v35 = vld [vmem:[#allocation3 + $0x50] sm:$0xff] }
 0x4fa   :  { %5044 = vst.msk [vmem:[#allocation3 + $0xf8] sm:$0xff] %vm86_vm6, %v4980_v30  ;;  %v6339_v30 = vpack.c.bf16 %v6277_v34, %v6276_v37  ;;  %v4941_v8 = vmax.f32 %v14599_v49, 0.0  ;;  %v6278_v40 = vld [vmem:[#allocation3 + $0x31] sm:$0xff]  ;;  %v6287_v1 = vld [vmem:[#allocation3 + $0x79] sm:$0xff]  ;;  %v6288_v37 = vld [vmem:[#allocation3 + $0x81] sm:$0xff] }
 0x4fb   :  { %5046 = vst.msk [vmem:[#allocation3 + $0x108] sm:$0xff] %vm86_vm6, %v4982_v25  ;;  %v5004_v25 = vmul.f32 %v14598_v11, %v4940_v47  ;;  %v5011_v7 = vmul.f32 0.0, %v4947_v23  ;;  %v5844_v41 = vld [vmem:[#allocation3 + $0x70] sm:$0xff]  ;;  %v5846_v47 = vld [vmem:[#allocation3 + $0x80] sm:$0xff]  ;;  %v5849_v45 = vld [vmem:[#allocation3 + $0x98] sm:$0xff] }
 0x4fc   :  { %5048 = vst.msk [vmem:[#allocation3 + $0x118] sm:$0xff] %vm86_vm6, %v4984_v42  ;;  %v5006_v42 = vmul.f32 %v14602_v55, %v4942_v16  ;;  %v6289_v34 = vld [vmem:[#allocation3 + $0x89] sm:$0xff]  ;;  %v6291_v16 = vld [vmem:[#allocation3 + $0x99] sm:$0xff] }
 0x4fd   :  { %5049 = vst.msk [vmem:[#allocation3 + $0x120] sm:$0xff] %vm86_vm6, %v4921_v33  ;;  %v5008_v33 = vmul.f32 %v14605_v17, %v4944_v39  ;;  %v5848_v18 = vld [vmem:[#allocation3 + $0x90] sm:$0xff]  ;;  %v5851_v55 = vld [vmem:[#allocation3 + $0xa8] sm:$0xff]  ;;  %v5850_v23 = vld [vmem:[#allocation3 + $0xa0] sm:$0xff] }
 0x4fe   :  { %5050 = vst.msk [vmem:[#allocation3 + $0x128] sm:$0xff] %vm86_vm6, %v4986_v61  ;;  %v5836_v61 = vld [vmem:[#allocation3 + $0x30] sm:$0xff] }
 0x4ff   :  { %5051 = vst.msk [vmem:[#allocation3 + $0x130] sm:$0xff] %vm86_vm6, %v4923_v29  ;;  %v6340_v29 = vpack.c.bf16 %v6279_v4, %v6278_v40  ;;  %v6293_v24 = vld [vmem:[#allocation3 + $0xa9] sm:$0xff] }
 0x500   :  { %5052 = vst.msk [vmem:[#allocation3 + $0x138] sm:$0xff] %vm86_vm6, %v4988_v62  ;;  %v6281_v62 = vld [vmem:[#allocation3 + $0x49] sm:$0xff] }
 0x501   :  { %5053 = vst.msk [vmem:[#allocation3 + $0x140] sm:$0xff] %vm86_vm6, %v4925_v57  ;;  %v5838_v57 = vld [vmem:[#allocation3 + $0x40] sm:$0xff]  ;;  %v6341_v50 = vpack.c.bf16 %v6281_v62, %v6280_v28 }
 0x502   :  { %5054 = vst.msk [vmem:[#allocation3 + $0x148] sm:$0xff] %vm86_vm6, %v4990_v9  ;;  %v5899_v22 = vpack.c.bf16 %v5839_v6, %v5838_v57  ;;  %v5841_v9 = vld [vmem:[#allocation3 + $0x58] sm:$0xff] }
 0x503   :  { %5055 = vst.msk [vmem:[#allocation3 + $0x150] sm:$0xff] %vm86_vm6, %v4927_v12  ;;  %8049 = vmatmul.msk.bf16.gmra.mxu1 %vm86_vm6, %v6338_v38  ;;  %v5898_v38 = vpack.c.bf16 %v5837_v31, %v5836_v61  ;;  %v6282_v12 = vld [vmem:[#allocation3 + $0x51] sm:$0xff] }
 0x504   :  { %5056 = vst.msk [vmem:[#allocation3 + $0x158] sm:$0xff] %vm86_vm6, %v4992_v52  ;;  %8089 = vmatmul.msk.bf16.gmra.mxu2 %vm86_vm6, %v5896_v15  ;;  %8129 = vmatmul.msk.bf16.gmra.mxu3 %vm86_vm6, %v5897_v43  ;;  %v5010_v15 = vmul.f32 0.0, %v4946_v5  ;;  %v5900_v52 = vpack.c.bf16 %v5841_v9, %v5840_v35  ;;  %v5853_v57 = vld [vmem:[#allocation3 + $0xb8] sm:$0xff] }
 0x505   :  { %5057 = vst.msk [vmem:[#allocation3 + $0x160] sm:$0xff] %vm86_vm6, %v4929_v36  ;;  %8169 = vmatmul.msk.bf16.gmra.mxu0 %vm86_vm6, %v6339_v30  ;;  %v6342_v36 = vpack.c.bf16 %v6283_v63, %v6282_v12  ;;  %v6294_v9 = vld [vmem:[#allocation3 + $0xb1] sm:$0xff]  ;;  %v6295_v12 = vld [vmem:[#allocation3 + $0xb9] sm:$0xff] }
 0x506   :  { %5058 = vst.msk [vmem:[#allocation3 + $0x168] sm:$0xff] %vm86_vm6, %v4994_v58  ;;  %v6285_v58 = vld [vmem:[#allocation3 + $0x69] sm:$0xff] }
 0x507   :  { %5059 = vst.msk [vmem:[#allocation3 + $0x170] sm:$0xff] %vm86_vm6, %v4931_v0  ;;  %v5842_v0 = vld [vmem:[#allocation3 + $0x60] sm:$0xff]  ;;  %v6343_v54 = vpack.c.bf16 %v6285_v58, %v6284_v26  ;;  %v5852_v63 = vld [vmem:[#allocation3 + $0xb0] sm:$0xff] }
 0x508   :  { %5060 = vst.msk [vmem:[#allocation3 + $0x178] sm:$0xff] %vm86_vm6, %v4996_v56  ;;  %v5901_v44 = vpack.c.bf16 %v5843_v3, %v5842_v0  ;;  %v5845_v56 = vld [vmem:[#allocation3 + $0x78] sm:$0xff]  ;;  %v6348_v3 = vpack.c.bf16 %v6295_v12, %v6294_v9  ;;  %v6300_v9 = vld [vmem:[#allocation3 + $0xe1] sm:$0xff]  ;;  %v6301_v12 = vld [vmem:[#allocation3 + $0xe9] sm:$0xff] }
 0x509   :  { %5061 = vst.msk [vmem:[#allocation3 + $0x180] sm:$0xff] %vm86_vm6, %v4933_v13  ;;  %v6286_v13 = vld [vmem:[#allocation3 + $0x71] sm:$0xff] }
 0x50a   :  { %5062 = vst.msk [vmem:[#allocation3 + $0x188] sm:$0xff] %vm86_vm6, %v4998_v32  ;;  %v5902_v32 = vpack.c.bf16 %v5845_v56, %v5844_v41  ;;  %v6344_v2 = vpack.c.bf16 %v6287_v1, %v6286_v13 }
 0x50b   :  { %5063 = vst.msk [vmem:[#allocation3 + $0x190] sm:$0xff] %vm86_vm6, %v4935_v19  ;;  %v5847_v19 = vld [vmem:[#allocation3 + $0x88] sm:$0xff] }
 0x50c   :  { %5064 = vst.msk [vmem:[#allocation3 + $0x198] sm:$0xff] %vm86_vm6, %v5000_v27  ;;  %v5903_v14 = vpack.c.bf16 %v5847_v19, %v5846_v47  ;;  %v6345_v27 = vpack.c.bf16 %v6289_v34, %v6288_v37  ;;  %v6296_v34 = vld [vmem:[#allocation3 + $0xc1] sm:$0xff]  ;;  %v6297_v47 = vld [vmem:[#allocation3 + $0xc9] sm:$0xff] }
 0x50d   :  { %5065 = vst.msk [vmem:[#allocation3 + $0x1a0] sm:$0xff] %vm86_vm6, %v4937_v59 }
 0x50e   :  { %5066 = vst.msk [vmem:[#allocation3 + $0x1a8] sm:$0xff] %vm86_vm6, %v5002_v46 }
 0x50f   :  { %5067 = vst.msk [vmem:[#allocation3 + $0x1b0] sm:$0xff] %vm86_vm6, %v4939_v53 }
 0x510   :  { %5068 = vst.msk [vmem:[#allocation3 + $0x1b8] sm:$0xff] %vm86_vm6, %v5004_v25 }
 0x511   :  { %5069 = vst.msk [vmem:[#allocation3 + $0x1c0] sm:$0xff] %vm86_vm6, %v4941_v8 }
 0x512   :  { %5070 = vst.msk [vmem:[#allocation3 + $0x1c8] sm:$0xff] %vm86_vm6, %v5006_v42 }
 0x513   :  { %5071 = vst.msk [vmem:[#allocation3 + $0x1d0] sm:$0xff] %vm86_vm6, %v4943_v48  ;;  %8050 = vmatmul.msk.bf16.gmra.mxu1 %vm86_vm6, %v6339_v30  ;;  %v5904_v30 = vpack.c.bf16 %v5849_v45, %v5848_v18  ;;  %v6292_v48 = vld [vmem:[#allocation3 + $0xa1] sm:$0xff] }
 0x514   :  { %5072 = vst.msk [vmem:[#allocation3 + $0x1d8] sm:$0xff] %vm86_vm6, %v5008_v33  ;;  %8090 = vmatmul.msk.bf16.gmra.mxu2 %vm86_vm6, %v5897_v43  ;;  %8130 = vmatmul.msk.bf16.gmra.mxu3 %vm86_vm6, %v5898_v38  ;;  %v6290_v43 = vld [vmem:[#allocation3 + $0x91] sm:$0xff] }
 0x515   :  { %5073 = vst.msk [vmem:[#allocation3 + $0x1e0] sm:$0xff] %vm86_vm6, %v5009_v21  ;;  %8170 = vmatmul.msk.bf16.gmra.mxu0 %vm86_vm6, %v6340_v29  ;;  %v6346_v53 = vpack.c.bf16 %v6291_v16, %v6290_v43  ;;  %v5905_v21 = vpack.c.bf16 %v5851_v55, %v5850_v23  ;;  %v6349_v43 = vpack.c.bf16 %v6297_v47, %v6296_v34  ;;  %v6298_v55 = vld [vmem:[#allocation3 + $0xd1] sm:$0xff] }
 0x516   :  { %5074 = vst.msk [vmem:[#allocation3 + $0x1e8] sm:$0xff] %vm86_vm6, %v5010_v15  ;;  %v6347_v15 = vpack.c.bf16 %v6293_v24, %v6292_v48 }
 0x517   :  { %5075 = vst.msk [vmem:[#allocation3 + $0x1f0] sm:$0xff] %vm86_vm6, %v5011_v7 }
 0x523   :  { %8051 = vmatmul.msk.bf16.gmra.mxu1 %vm86_vm6, %v6340_v29 }
 0x524   :  { %8091 = vmatmul.msk.bf16.gmra.mxu2 %vm86_vm6, %v5898_v38  ;;  %8131 = vmatmul.msk.bf16.gmra.mxu3 %vm86_vm6, %v5899_v22 }
 0x525   :  { %8171 = vmatmul.msk.bf16.gmra.mxu0 %vm86_vm6, %v6341_v50 }
 0x533   :  { %8052 = vmatmul.msk.bf16.gmra.mxu1 %vm86_vm6, %v6341_v50 }
 0x534   :  { %8092 = vmatmul.msk.bf16.gmra.mxu2 %vm86_vm6, %v5899_v22  ;;  %8132 = vmatmul.msk.bf16.gmra.mxu3 %vm86_vm6, %v5900_v52 }
 0x535   :  { %8172 = vmatmul.msk.bf16.gmra.mxu0 %vm86_vm6, %v6342_v36 }
 0x543   :  { %8053 = vmatmul.msk.bf16.gmra.mxu1 %vm86_vm6, %v6342_v36  ;;  %v5906_v36 = vpack.c.bf16 %v5853_v57, %v5852_v63  ;;  %v5859_v57 = vld [vmem:[#allocation3 + $0xe8] sm:$0xff] }
 0x544   :  { %8093 = vmatmul.msk.bf16.gmra.mxu2 %vm86_vm6, %v5900_v52  ;;  %8133 = vmatmul.msk.bf16.gmra.mxu3 %vm86_vm6, %v5901_v44 }
 0x545   :  { %8173 = vmatmul.msk.bf16.gmra.mxu0 %vm86_vm6, %v6343_v54 }
 0x553   :  { %8054 = vmatmul.msk.bf16.gmra.mxu1 %vm86_vm6, %v6343_v54 }
 0x554   :  { %8094 = vmatmul.msk.bf16.gmra.mxu2 %vm86_vm6, %v5901_v44  ;;  %8134 = vmatmul.msk.bf16.gmra.mxu3 %vm86_vm6, %v5902_v32 }
 0x555   :  { %8174 = vmatmul.msk.bf16.gmra.mxu0 %vm86_vm6, %v6344_v2 }
 0x563   :  { %8055 = vmatmul.msk.bf16.gmra.mxu1 %vm86_vm6, %v6344_v2  ;;  %v5855_v2 = vld [vmem:[#allocation3 + $0xc8] sm:$0xff] }
 0x564   :  { %8095 = vmatmul.msk.bf16.gmra.mxu2 %vm86_vm6, %v5902_v32  ;;  %8135 = vmatmul.msk.bf16.gmra.mxu3 %vm86_vm6, %v5903_v14 }
 0x565   :  { %8175 = vmatmul.msk.bf16.gmra.mxu0 %vm86_vm6, %v6345_v27 }
 0x570   :  { %v5395_v59 = vpop.f32.mrf.mxu1 }
 0x572   :  { %v6492_v46 = vpop.f32.mrf.mxu0 }
 0x573   :  { %8056 = vmatmul.msk.bf16.gmra.mxu1 %vm86_vm6, %v6345_v27 }
 0x574   :  { %8096 = vmatmul.msk.bf16.gmra.mxu2 %vm86_vm6, %v5903_v14  ;;  %8136 = vmatmul.msk.bf16.gmra.mxu3 %vm86_vm6, %v5904_v30  ;;  %v5854_v14 = vld [vmem:[#allocation3 + $0xc0] sm:$0xff] }
 0x575   :  { %8176 = vmatmul.msk.bf16.gmra.mxu0 %vm86_vm6, %v6346_v53 }
 0x577   :  { %v5672_v39 = vpop.f32.mrf.mxu2  ;;  %v6050_v11 = vpop.f32.mrf.mxu3 }
 0x578   :  { %v5673_v25 = vadd.f32 %v5672_v39, %v5395_v59  ;;  %v5397_v49 = vpop.f32.mrf.mxu1  ;;  %v5907_v59 = vpack.c.bf16 %v5855_v2, %v5854_v14  ;;  %v6302_v14 = vld [vmem:[#allocation3 + $0xf1] sm:$0xff] }
 0x57a   :  { %v6210_v8 = vadd.f32 %v6050_v11, %v5673_v25  ;;  %v6494_v20 = vpop.f32.mrf.mxu0 }
 0x57c   :  { %v11836_v51 = vadd.f32 %v6492_v46, %v6210_v8 }
 0x57e   :  { %14606 = vst [vmem:[#allocation46_spill] sm:$0xff] %v11836_v51 }
 0x57f   :  { %v5674_v10 = vpop.f32.mrf.mxu2  ;;  %v6052_v5 = vpop.f32.mrf.mxu3 }
 0x580   :  { %v5675_v42 = vadd.f32 %v5674_v10, %v5397_v49  ;;  %v5400_v60 = vpop.f32.mrf.mxu1 }
 0x582   :  { %v6211_v17 = vadd.f32 %v6052_v5, %v5675_v42  ;;  %v6497_v33 = vpop.f32.mrf.mxu0  ;;  %v6299_v42 = vld [vmem:[#allocation3 + $0xd9] sm:$0xff] }
 0x583   :  { %8057 = vmatmul.msk.bf16.gmra.mxu1 %vm86_vm6, %v6346_v53 }
 0x584   :  { %v11839_v7 = vadd.f32 %v6494_v20, %v6211_v17  ;;  %8097 = vmatmul.msk.bf16.gmra.mxu2 %vm86_vm6, %v5904_v30  ;;  %8137 = vmatmul.msk.bf16.gmra.mxu3 %vm86_vm6, %v5905_v21  ;;  %v5857_v20 = vld [vmem:[#allocation3 + $0xd8] sm:$0xff]  ;;  %v6350_v17 = vpack.c.bf16 %v6299_v42, %v6298_v55  ;;  %v5863_v55 = vld [vmem:[#allocation3 + $0x108] sm:$0xff] }
 0x585   :  { %8177 = vmatmul.msk.bf16.gmra.mxu0 %vm86_vm6, %v6347_v15 }
 0x586   :  { %14607 = vst [vmem:[#allocation53_spill] sm:$0xff] %v11839_v7 }
 0x587   :  { %v5677_v31 = vpop.f32.mrf.mxu2  ;;  %v6055_v40 = vpop.f32.mrf.mxu3 }
 0x588   :  { %v5678_v4 = vadd.f32 %v5677_v31, %v5400_v60  ;;  %v5402_v61 = vpop.f32.mrf.mxu1  ;;  %v5856_v60 = vld [vmem:[#allocation3 + $0xd0] sm:$0xff] }
 0x589   :  { %v5908_v23 = vpack.c.bf16 %v5857_v20, %v5856_v60 }
 0x58a   :  { %v6212_v38 = vadd.f32 %v6055_v40, %v5678_v4  ;;  %v6499_v29 = vpop.f32.mrf.mxu0 }
 0x58c   :  { %v11844_v6 = vadd.f32 %v6497_v33, %v6212_v38 }
 0x58e   :  { %14608 = vst [vmem:[#allocation50_spill] sm:$0xff] %v11844_v6 }
 0x58f   :  { %v5679_v28 = vpop.f32.mrf.mxu2  ;;  %v6057_v62 = vpop.f32.mrf.mxu3 }
 0x590   :  { %v5680_v22 = vadd.f32 %v5679_v28, %v5402_v61  ;;  %v5405_v50 = vpop.f32.mrf.mxu1 }
 0x592   :  { %v6213_v35 = vadd.f32 %v6057_v62, %v5680_v22  ;;  %v6502_v52 = vpop.f32.mrf.mxu0  ;;  %v5858_v62 = vld [vmem:[#allocation3 + $0xe0] sm:$0xff] }
 0x593   :  { %8058 = vmatmul.msk.bf16.gmra.mxu1 %vm86_vm6, %v6347_v15 }
 0x594   :  { %v11847_v26 = vadd.f32 %v6499_v29, %v6213_v35  ;;  %8098 = vmatmul.msk.bf16.gmra.mxu2 %vm86_vm6, %v5905_v21  ;;  %8138 = vmatmul.msk.bf16.gmra.mxu3 %vm86_vm6, %v5906_v36 }
 0x595   :  { %8178 = vmatmul.msk.bf16.gmra.mxu0 %vm86_vm6, %v6348_v3 }
 0x596   :  { %14609 = vst [vmem:[#allocation56_spill] sm:$0xff] %v11847_v26 }
 0x597   :  { %v5682_v58 = vpop.f32.mrf.mxu2  ;;  %v6060_v0 = vpop.f32.mrf.mxu3 }
 0x598   :  { %v5683_v44 = vadd.f32 %v5682_v58, %v5405_v50  ;;  %v5407_v54 = vpop.f32.mrf.mxu1 }
 0x59a   :  { %v6214_v56 = vadd.f32 %v6060_v0, %v5683_v44  ;;  %v6504_v13 = vpop.f32.mrf.mxu0 }
 0x59c   :  { %v11852_v1 = vadd.f32 %v6502_v52, %v6214_v56  ;;  %v5909_v52 = vpack.c.bf16 %v5859_v57, %v5858_v62 }
 0x59f   :  { %v5684_v41 = vpop.f32.mrf.mxu2  ;;  %v6062_v32 = vpop.f32.mrf.mxu3 }
 0x5a0   :  { %v5685_v19 = vadd.f32 %v5684_v41, %v5407_v54  ;;  %v5410_v37 = vpop.f32.mrf.mxu1 }
 0x5a2   :  { %v6215_v27 = vadd.f32 %v6062_v32, %v5685_v19  ;;  %v6507_v45 = vpop.f32.mrf.mxu0  ;;  %v5860_v19 = vld [vmem:[#allocation3 + $0xf0] sm:$0xff] }
 0x5a3   :  { %8059 = vmatmul.msk.bf16.gmra.mxu1 %vm86_vm6, %v6348_v3 }
 0x5a4   :  { %v11855_v16 = vadd.f32 %v6504_v13, %v6215_v27  ;;  %8099 = vmatmul.msk.bf16.gmra.mxu2 %vm86_vm6, %v5906_v36  ;;  %8139 = vmatmul.msk.bf16.gmra.mxu3 %vm86_vm6, %v5907_v59  ;;  %v6351_v36 = vpack.c.bf16 %v6301_v12, %v6300_v9  ;;  %v6303_v27 = vld [vmem:[#allocation3 + $0xf9] sm:$0xff] }
 0x5a5   :  { %8179 = vmatmul.msk.bf16.gmra.mxu0 %vm86_vm6, %v6349_v43  ;;  %v5865_v12 = vld [vmem:[#allocation3 + $0x118] sm:$0xff] }
 0x5a6   :  { %14610 = vst [vmem:[#allocation61_spill] sm:$0xff] %v11855_v16 }
 0x5a7   :  { %v5687_v18 = vpop.f32.mrf.mxu2  ;;  %v6065_v46 = vpop.f32.mrf.mxu3 }
 0x5a8   :  { %v5688_v30 = vadd.f32 %v5687_v18, %v5410_v37  ;;  %v5412_v53 = vpop.f32.mrf.mxu1  ;;  %v5861_v37 = vld [vmem:[#allocation3 + $0xf8] sm:$0xff]  ;;  %v6352_v18 = vpack.c.bf16 %v6303_v27, %v6302_v14 }
 0x5aa   :  { %v6216_v39 = vadd.f32 %v6065_v46, %v5688_v30  ;;  %v6509_v11 = vpop.f32.mrf.mxu0 }
 0x5ac   :  { %v11860_v25 = vadd.f32 %v6507_v45, %v6216_v39 }
 0x5ae   :  { %14611 = vst [vmem:[#allocation64_spill] sm:$0xff] %v11860_v25 }
 0x5af   :  { %v5689_v49 = vpop.f32.mrf.mxu2  ;;  %v6067_v8 = vpop.f32.mrf.mxu3 }
 0x5b0   :  { %v5690_v10 = vadd.f32 %v5689_v49, %v5412_v53  ;;  %v5415_v5 = vpop.f32.mrf.mxu1 }
 0x5b2   :  { %v6217_v48 = vadd.f32 %v6067_v8, %v5690_v10  ;;  %v6512_v24 = vpop.f32.mrf.mxu0 }
 0x5b3   :  { %8060 = vmatmul.msk.bf16.gmra.mxu1 %vm86_vm6, %v6349_v43  ;;  %v5910_v43 = vpack.c.bf16 %v5861_v37, %v5860_v19 }
 0x5b4   :  { %v11863_v33 = vadd.f32 %v6509_v11, %v6217_v48  ;;  %8100 = vmatmul.msk.bf16.gmra.mxu2 %vm86_vm6, %v5907_v59  ;;  %8140 = vmatmul.msk.bf16.gmra.mxu3 %vm86_vm6, %v5908_v23  ;;  %v6304_v48 = vld [vmem:[#allocation3 + $0x101] sm:$0xff] }
 0x5b5   :  { %8180 = vmatmul.msk.bf16.gmra.mxu0 %vm86_vm6, %v6350_v17 }
 0x5b6   :  { %14612 = vst [vmem:[#allocation65_spill] sm:$0xff] %v11863_v33 }
 0x5b7   :  { %v5692_v21 = vpop.f32.mrf.mxu2  ;;  %v6070_v15 = vpop.f32.mrf.mxu3 }
 0x5b8   :  { %v5693_v31 = vadd.f32 %v5692_v21, %v5415_v5  ;;  %v5417_v40 = vpop.f32.mrf.mxu1 }
 0x5ba   :  { %v6218_v4 = vadd.f32 %v6070_v15, %v5693_v31  ;;  %v6514_v61 = vpop.f32.mrf.mxu0 }
 0x5bc   :  { %v11868_v38 = vadd.f32 %v6512_v24, %v6218_v4  ;;  %v6305_v24 = vld [vmem:[#allocation3 + $0x109] sm:$0xff] }
 0x5bd   :  { %v6353_v31 = vpack.c.bf16 %v6305_v24, %v6304_v48 }
 0x5bf   :  { %v5694_v29 = vpop.f32.mrf.mxu2  ;;  %v6072_v28 = vpop.f32.mrf.mxu3 }
 0x5c0   :  { %v5695_v22 = vadd.f32 %v5694_v29, %v5417_v40  ;;  %v5420_v50 = vpop.f32.mrf.mxu1 }
 0x5c2   :  { %v6219_v63 = vadd.f32 %v6072_v28, %v5695_v22  ;;  %v6517_v35 = vpop.f32.mrf.mxu0 }
 0x5c3   :  { %8061 = vmatmul.msk.bf16.gmra.mxu1 %vm86_vm6, %v6350_v17 }
 0x5c4   :  { %v11871_v3 = vadd.f32 %v6514_v61, %v6219_v63  ;;  %8101 = vmatmul.msk.bf16.gmra.mxu2 %vm86_vm6, %v5908_v23  ;;  %8141 = vmatmul.msk.bf16.gmra.mxu3 %vm86_vm6, %v5909_v52  ;;  %v5862_v23 = vld [vmem:[#allocation3 + $0x100] sm:$0xff] }
 0x5c5   :  { %8181 = vmatmul.msk.bf16.gmra.mxu0 %vm86_vm6, %v6351_v36  ;;  %v5911_v15 = vpack.c.bf16 %v5863_v55, %v5862_v23 }
 0x5c6   :  { %14613 = vst [vmem:[#allocation66_spill] sm:$0xff] %v11871_v3 }
 0x5c7   :  { %v5697_v58 = vpop.f32.mrf.mxu2  ;;  %v6075_v0 = vpop.f32.mrf.mxu3 }
 0x5c8   :  { %v5698_v44 = vadd.f32 %v5697_v58, %v5420_v50  ;;  %v5422_v54 = vpop.f32.mrf.mxu1  ;;  %v5864_v58 = vld [vmem:[#allocation3 + $0x110] sm:$0xff] }
 0x5ca   :  { %v6220_v56 = vadd.f32 %v6075_v0, %v5698_v44  ;;  %v6519_v13 = vpop.f32.mrf.mxu0 }
 0x5cc   :  { %v11876_v41 = vadd.f32 %v6517_v35, %v6220_v56 }
 0x5ce   :  { %14614 = vst [vmem:[#allocation70_spill] sm:$0xff] %v11876_v41 }
 0x5cf   :  { %v5699_v32 = vpop.f32.mrf.mxu2  ;;  %v6077_v2 = vpop.f32.mrf.mxu3 }
 0x5d0   :  { %v5700_v34 = vadd.f32 %v5699_v32, %v5422_v54  ;;  %v5425_v47 = vpop.f32.mrf.mxu1  ;;  %v5912_v54 = vpack.c.bf16 %v5865_v12, %v5864_v58 }
 0x5d2   :  { %v6221_v45 = vadd.f32 %v6077_v2, %v5700_v34  ;;  %v6522_v59 = vpop.f32.mrf.mxu0 }
 0x5d3   :  { %8062 = vmatmul.msk.bf16.gmra.mxu1 %vm86_vm6, %v6351_v36  ;;  %v6307_v36 = vld [vmem:[#allocation3 + $0x119] sm:$0xff] }
 0x5d4   :  { %v11879_v46 = vadd.f32 %v6519_v13, %v6221_v45  ;;  %8102 = vmatmul.msk.bf16.gmra.mxu2 %vm86_vm6, %v5909_v52  ;;  %8142 = vmatmul.msk.bf16.gmra.mxu3 %vm86_vm6, %v5910_v43  ;;  %v6306_v52 = vld [vmem:[#allocation3 + $0x111] sm:$0xff] }
 0x5d5   :  { %8182 = vmatmul.msk.bf16.gmra.mxu0 %vm86_vm6, %v6352_v18  ;;  %v6354_v56 = vpack.c.bf16 %v6307_v36, %v6306_v52 }
 0x5d6   :  { %14615 = vst [vmem:[#allocation72_spill] sm:$0xff] %v11879_v46 }
 0x5d7   :  { %v5702_v30 = vpop.f32.mrf.mxu2  ;;  %v6080_v53 = vpop.f32.mrf.mxu3 }
 0x5d8   :  { %v5703_v39 = vadd.f32 %v5702_v30, %v5425_v47  ;;  %v5427_v11 = vpop.f32.mrf.mxu1  ;;  %v6308_v30 = vld [vmem:[#allocation3 + $0x121] sm:$0xff] }
 0x5da   :  { %v6222_v49 = vadd.f32 %v6080_v53, %v5703_v39  ;;  %v6524_v8 = vpop.f32.mrf.mxu0  ;;  %v6309_v53 = vld [vmem:[#allocation3 + $0x129] sm:$0xff]  ;;  %v5866_v39 = vld [vmem:[#allocation3 + $0x120] sm:$0xff] }
 0x5dc   :  { %v11884_v20 = vadd.f32 %v6522_v59, %v6222_v49  ;;  %v5867_v59 = vld [vmem:[#allocation3 + $0x128] sm:$0xff] }
 0x5de   :  { %14616 = vst [vmem:[#allocation82_spill] sm:$0xff] %v11884_v20 }
 0x5df   :  { %v5704_v10 = vpop.f32.mrf.mxu2  ;;  %v6082_v5 = vpop.f32.mrf.mxu3 }
 0x5e0   :  { %v5705_v42 = vadd.f32 %v5704_v10, %v5427_v11  ;;  %v5430_v60 = vpop.f32.mrf.mxu1  ;;  %v6355_v10 = vpack.c.bf16 %v6309_v53, %v6308_v30 }
 0x5e2   :  { %v6223_v17 = vadd.f32 %v6082_v5, %v5705_v42  ;;  %v6527_v21 = vpop.f32.mrf.mxu0 }
 0x5e3   :  { %8063 = vmatmul.msk.bf16.gmra.mxu1 %vm86_vm6, %v6352_v18 }
 0x5e4   :  { %v11887_v40 = vadd.f32 %v6524_v8, %v6223_v17  ;;  %8103 = vmatmul.msk.bf16.gmra.mxu2 %vm86_vm6, %v5910_v43  ;;  %8143 = vmatmul.msk.bf16.gmra.mxu3 %vm86_vm6, %v5911_v15  ;;  %v5913_v8 = vpack.c.bf16 %v5867_v59, %v5866_v39 }
 0x5e5   :  { %8183 = vmatmul.msk.bf16.gmra.mxu0 %vm86_vm6, %v6353_v31 }
 0x5e6   :  { %14617 = vst [vmem:[#allocation90_spill] sm:$0xff] %v11887_v40 }
 0x5e7   :  { %v5707_v4 = vpop.f32.mrf.mxu2  ;;  %v6085_v61 = vpop.f32.mrf.mxu3 }
 0x5e8   :  { %v5708_v29 = vadd.f32 %v5707_v4, %v5430_v60  ;;  %v5432_v28 = vpop.f32.mrf.mxu1 }
 0x5ea   :  { %v6224_v62 = vadd.f32 %v6085_v61, %v5708_v29  ;;  %v6529_v57 = vpop.f32.mrf.mxu0  ;;  %v6310_v29 = vld [vmem:[#allocation3 + $0x131] sm:$0xff] }
 0x5ec   :  { %v11892_v22 = vadd.f32 %v6527_v21, %v6224_v62  ;;  %v5868_v62 = vld [vmem:[#allocation3 + $0x130] sm:$0xff] }
 0x5ee   :  { %14618 = vst [vmem:[#allocation26_spill] sm:$0xff] %v11892_v22 }
 0x5ef   :  { %v5709_v50 = vpop.f32.mrf.mxu2  ;;  %v6087_v9 = vpop.f32.mrf.mxu3 }
 0x5f0   :  { %v5710_v63 = vadd.f32 %v5709_v50, %v5432_v28  ;;  %v5435_v35 = vpop.f32.mrf.mxu1  ;;  %v6311_v28 = vld [vmem:[#allocation3 + $0x139] sm:$0xff] }
 0x5f1   :  { %v6356_v12 = vpack.c.bf16 %v6311_v28, %v6310_v29 }
 0x5f2   :  { %v6225_v0 = vadd.f32 %v6087_v9, %v5710_v63  ;;  %v6532_v44 = vpop.f32.mrf.mxu0 }
 0x5f3   :  { %8064 = vmatmul.msk.bf16.gmra.mxu1 %vm86_vm6, %v6353_v31  ;;  %v5869_v31 = vld [vmem:[#allocation3 + $0x138] sm:$0xff] }
 0x5f4   :  { %v11895_v13 = vadd.f32 %v6529_v57, %v6225_v0  ;;  %8104 = vmatmul.msk.bf16.gmra.mxu2 %vm86_vm6, %v5911_v15  ;;  %8144 = vmatmul.msk.bf16.gmra.mxu3 %vm86_vm6, %v5912_v54  ;;  %v5914_v9 = vpack.c.bf16 %v5869_v31, %v5868_v62  ;;  %v5872_v31 = vld [vmem:[#allocation3 + $0x150] sm:$0xff] }
 0x5f5   :  { %8184 = vmatmul.msk.bf16.gmra.mxu0 %vm86_vm6, %v6354_v56 }
 0x5f6   :  { %14619 = vst [vmem:[#allocation32_spill] sm:$0xff] %v11895_v13 }
 0x5f7   :  { %v5712_v32 = vpop.f32.mrf.mxu2  ;;  %v6090_v2 = vpop.f32.mrf.mxu3 }
 0x5f8   :  { %v5713_v19 = vadd.f32 %v5712_v32, %v5435_v35  ;;  %v5437_v37 = vpop.f32.mrf.mxu1 }
 0x5fa   :  { %v6226_v34 = vadd.f32 %v6090_v2, %v5713_v19  ;;  %v6534_v47 = vpop.f32.mrf.mxu0  ;;  %v5871_v2 = vld [vmem:[#allocation3 + $0x148] sm:$0xff] }
 0x5fc   :  { %v11900_v14 = vadd.f32 %v6532_v44, %v6226_v34  ;;  %v6312_v34 = vld [vmem:[#allocation3 + $0x141] sm:$0xff] }
 0x5fe   :  { %14620 = vst [vmem:[#allocation37_spill] sm:$0xff] %v11900_v14 }
 0x5ff   :  { %v5714_v27 = vpop.f32.mrf.mxu2  ;;  %v6092_v45 = vpop.f32.mrf.mxu3 }
 0x600   :  { %v5715_v43 = vadd.f32 %v5714_v27, %v5437_v37  ;;  %v5440_v18 = vpop.f32.mrf.mxu1  ;;  %v5870_v27 = vld [vmem:[#allocation3 + $0x140] sm:$0xff] }
 0x602   :  { %v6227_v11 = vadd.f32 %v6092_v45, %v5715_v43  ;;  %v6537_v49 = vpop.f32.mrf.mxu0  ;;  %v5915_v43 = vpack.c.bf16 %v5871_v2, %v5870_v27  ;;  %v6316_v2 = vld [vmem:[#allocation3 + $0x161] sm:$0xff] }
 0x603   :  { %8065 = vmatmul.msk.bf16.gmra.mxu1 %vm86_vm6, %v6354_v56 }
 0x604   :  { %v11903_v5 = vadd.f32 %v6534_v47, %v6227_v11  ;;  %8105 = vmatmul.msk.bf16.gmra.mxu2 %vm86_vm6, %v5912_v54  ;;  %8145 = vmatmul.msk.bf16.gmra.mxu3 %vm86_vm6, %v5913_v8  ;;  %v6313_v47 = vld [vmem:[#allocation3 + $0x149] sm:$0xff] }
 0x605   :  { %8185 = vmatmul.msk.bf16.gmra.mxu0 %vm86_vm6, %v6355_v10 }
 0x606   :  { %14621 = vst [vmem:[#allocation54_spill] sm:$0xff] %v11903_v5 }
 0x607   :  { %v5717_v55 = vpop.f32.mrf.mxu2  ;;  %v6095_v42 = vpop.f32.mrf.mxu3 }
 0x608   :  { %v5718_v60 = vadd.f32 %v5717_v55, %v5440_v18  ;;  %v5442_v48 = vpop.f32.mrf.mxu1  ;;  %v6357_v18 = vpack.c.bf16 %v6313_v47, %v6312_v34 }
 0x60a   :  { %v6228_v24 = vadd.f32 %v6095_v42, %v5718_v60  ;;  %v6539_v23 = vpop.f32.mrf.mxu0 }
 0x60c   :  { %v11908_v17 = vadd.f32 %v6537_v49, %v6228_v24 }
 0x60e   :  { %14622 = vst [vmem:[#allocation59_spill] sm:$0xff] %v11908_v17 }
 0x60f   :  { %v5719_v21 = vpop.f32.mrf.mxu2  ;;  %v6097_v15 = vpop.f32.mrf.mxu3 }
 0x610   :  { %v5720_v4 = vadd.f32 %v5719_v21, %v5442_v48  ;;  %v5445_v61 = vpop.f32.mrf.mxu1  ;;  %v5873_v48 = vld [vmem:[#allocation3 + $0x158] sm:$0xff] }
 0x611   :  { %v6314_v21 = vld [vmem:[#allocation3 + $0x151] sm:$0xff]  ;;  %v5916_v29 = vpack.c.bf16 %v5873_v48, %v5872_v31 }
 0x612   :  { %v6229_v57 = vadd.f32 %v6097_v15, %v5720_v4  ;;  %v6542_v50 = vpop.f32.mrf.mxu0  ;;  %v6315_v15 = vld [vmem:[#allocation3 + $0x159] sm:$0xff] }
 0x613   :  { %8066 = vmatmul.msk.bf16.gmra.mxu1 %vm86_vm6, %v6355_v10  ;;  %v6358_v28 = vpack.c.bf16 %v6315_v15, %v6314_v21  ;;  %v6319_v21 = vld [vmem:[#allocation3 + $0x179] sm:$0xff]  ;;  %v5876_v15 = vld [vmem:[#allocation3 + $0x170] sm:$0xff] }
 0x614   :  { %v11911_v63 = vadd.f32 %v6539_v23, %v6229_v57  ;;  %8106 = vmatmul.msk.bf16.gmra.mxu2 %vm86_vm6, %v5913_v8  ;;  %8146 = vmatmul.msk.bf16.gmra.mxu3 %vm86_vm6, %v5914_v9 }
 0x615   :  { %8186 = vmatmul.msk.bf16.gmra.mxu0 %vm86_vm6, %v6356_v12 }
 0x616   :  { %14623 = vst [vmem:[#allocation22_spill] sm:$0xff] %v11911_v63 }
 0x617   :  { %v5722_v35 = vpop.f32.mrf.mxu2  ;;  %v6100_v52 = vpop.f32.mrf.mxu3 }
 0x618   :  { %v5723_v36 = vadd.f32 %v5722_v35, %v5445_v61  ;;  %v5447_v58 = vpop.f32.mrf.mxu1 }
 0x61a   :  { %v6230_v0 = vadd.f32 %v6100_v52, %v5723_v36  ;;  %v6544_v44 = vpop.f32.mrf.mxu0 }
 0x61c   :  { %v11916_v54 = vadd.f32 %v6542_v50, %v6230_v0 }
 0x61e   :  { %14624 = vst [vmem:[#allocation73_spill] sm:$0xff] %v11916_v54 }
 0x61f   :  { %v5724_v56 = vpop.f32.mrf.mxu2  ;;  %v6102_v32 = vpop.f32.mrf.mxu3 }
 0x620   :  { %v5725_v19 = vadd.f32 %v5724_v56, %v5447_v58  ;;  %v5450_v37 = vpop.f32.mrf.mxu1 }
 0x622   :  { %v6231_v45 = vadd.f32 %v6102_v32, %v5725_v19  ;;  %v6547_v59 = vpop.f32.mrf.mxu0  ;;  %v6317_v19 = vld [vmem:[#allocation3 + $0x169] sm:$0xff] }
 0x623   :  { %8067 = vmatmul.msk.bf16.gmra.mxu1 %vm86_vm6, %v6356_v12 }
 0x624   :  { %v11919_v30 = vadd.f32 %v6544_v44, %v6231_v45  ;;  %8107 = vmatmul.msk.bf16.gmra.mxu2 %vm86_vm6, %v5914_v9  ;;  %8147 = vmatmul.msk.bf16.gmra.mxu3 %vm86_vm6, %v5915_v43  ;;  %v5875_v44 = vld [vmem:[#allocation3 + $0x168] sm:$0xff]  ;;  %v6359_v45 = vpack.c.bf16 %v6317_v19, %v6316_v2 }
 0x625   :  { %8187 = vmatmul.msk.bf16.gmra.mxu0 %vm86_vm6, %v6357_v18  ;;  %v6320_v19 = vld [vmem:[#allocation3 + $0x181] sm:$0xff] }
 0x626   :  { %14625 = vst [vmem:[#allocation85_spill] sm:$0xff] %v11919_v30 }
 0x627   :  { %v5727_v53 = vpop.f32.mrf.mxu2  ;;  %v6105_v39 = vpop.f32.mrf.mxu3 }
 0x628   :  { %v5728_v11 = vadd.f32 %v5727_v53, %v5450_v37  ;;  %v5452_v49 = vpop.f32.mrf.mxu1  ;;  %v5874_v37 = vld [vmem:[#allocation3 + $0x160] sm:$0xff] }
 0x629   :  { %v5917_v27 = vpack.c.bf16 %v5875_v44, %v5874_v37  ;;  %v6321_v37 = vld [vmem:[#allocation3 + $0x189] sm:$0xff] }
 0x62a   :  { %v6232_v8 = vadd.f32 %v6105_v39, %v5728_v11  ;;  %v6549_v10 = vpop.f32.mrf.mxu0 }
 0x62c   :  { %v11924_v55 = vadd.f32 %v6547_v59, %v6232_v8 }
 0x62e   :  { %14626 = vst [vmem:[#allocation24_spill] sm:$0xff] %v11924_v55 }
 0x62f   :  { %v5729_v42 = vpop.f32.mrf.mxu2  ;;  %v6107_v60 = vpop.f32.mrf.mxu3 }
 0x630   :  { %v5730_v24 = vadd.f32 %v5729_v42, %v5452_v49  ;;  %v5455_v23 = vpop.f32.mrf.mxu1 }
 0x632   :  { %v6233_v4 = vadd.f32 %v6107_v60, %v5730_v24  ;;  %v6552_v61 = vpop.f32.mrf.mxu0  ;;  %v5877_v60 = vld [vmem:[#allocation3 + $0x178] sm:$0xff] }
 0x633   :  { %8068 = vmatmul.msk.bf16.gmra.mxu1 %vm86_vm6, %v6357_v18 }
 0x634   :  { %v11927_v62 = vadd.f32 %v6549_v10, %v6233_v4  ;;  %8108 = vmatmul.msk.bf16.gmra.mxu2 %vm86_vm6, %v5915_v43  ;;  %8148 = vmatmul.msk.bf16.gmra.mxu3 %vm86_vm6, %v5916_v29 }
 0x635   :  { %8188 = vmatmul.msk.bf16.gmra.mxu0 %vm86_vm6, %v6358_v28 }
 0x636   :  { %14627 = vst [vmem:[#allocation21_spill] sm:$0xff] %v11927_v62 }
 0x637   :  { %v5732_v57 = vpop.f32.mrf.mxu2  ;;  %v6110_v50 = vpop.f32.mrf.mxu3 }
 0x638   :  { %v5733_v9 = vadd.f32 %v5732_v57, %v5455_v23  ;;  %v5457_v12 = vpop.f32.mrf.mxu1  ;;  %v6318_v23 = vld [vmem:[#allocation3 + $0x171] sm:$0xff] }
 0x63a   :  { %v6234_v35 = vadd.f32 %v6110_v50, %v5733_v9  ;;  %v6554_v52 = vpop.f32.mrf.mxu0 }
 0x63c   :  { %v11932_v36 = vadd.f32 %v6552_v61, %v6234_v35  ;;  %v5918_v61 = vpack.c.bf16 %v5877_v60, %v5876_v15 }
 0x63e   :  { %14628 = vst [vmem:[#allocation57_spill] sm:$0xff] %v11932_v36 }
 0x63f   :  { %v5734_v58 = vpop.f32.mrf.mxu2  ;;  %v6112_v0 = vpop.f32.mrf.mxu3 }
 0x640   :  { %v5735_v56 = vadd.f32 %v5734_v58, %v5457_v12  ;;  %v5460_v32 = vpop.f32.mrf.mxu1 }
 0x642   :  { %v6235_v34 = vadd.f32 %v6112_v0, %v5735_v56  ;;  %v6557_v47 = vpop.f32.mrf.mxu0  ;;  %v5879_v56 = vld [vmem:[#allocation3 + $0x188] sm:$0xff] }
 0x643   :  { %8069 = vmatmul.msk.bf16.gmra.mxu1 %vm86_vm6, %v6358_v28 }
 0x644   :  { %v11935_v59 = vadd.f32 %v6554_v52, %v6235_v34  ;;  %8109 = vmatmul.msk.bf16.gmra.mxu2 %vm86_vm6, %v5916_v29  ;;  %8149 = vmatmul.msk.bf16.gmra.mxu3 %vm86_vm6, %v5917_v27  ;;  %v6360_v29 = vpack.c.bf16 %v6319_v21, %v6318_v23  ;;  %v5878_v34 = vld [vmem:[#allocation3 + $0x180] sm:$0xff]  ;;  %v5881_v23 = vld [vmem:[#allocation3 + $0x198] sm:$0xff] }
 0x645   :  { %8189 = vmatmul.msk.bf16.gmra.mxu0 %vm86_vm6, %v6359_v45 }
 0x646   :  { %14629 = vst [vmem:[#allocation68_spill] sm:$0xff] %v11935_v59 }
 0x647   :  { %v5737_v43 = vpop.f32.mrf.mxu2  ;;  %v6115_v18 = vpop.f32.mrf.mxu3 }
 0x648   :  { %v5738_v53 = vadd.f32 %v5737_v43, %v5460_v32  ;;  %v5462_v39 = vpop.f32.mrf.mxu1  ;;  %v6361_v43 = vpack.c.bf16 %v6321_v37, %v6320_v19 }
 0x64a   :  { %v6236_v11 = vadd.f32 %v6115_v18, %v5738_v53  ;;  %v6559_v49 = vpop.f32.mrf.mxu0 }
 0x64c   :  { %v11940_v8 = vadd.f32 %v6557_v47, %v6236_v11 }
 0x64e   :  { %14630 = vst [vmem:[#allocation88_spill] sm:$0xff] %v11940_v8 }
 0x64f   :  { %v5739_v10 = vpop.f32.mrf.mxu2  ;;  %v6117_v42 = vpop.f32.mrf.mxu3 }
 0x650   :  { %v5740_v48 = vadd.f32 %v5739_v10, %v5462_v39  ;;  %v5465_v24 = vpop.f32.mrf.mxu1 }
 0x652   :  { %v6237_v31 = vadd.f32 %v6117_v42, %v5740_v48  ;;  %v6562_v4 = vpop.f32.mrf.mxu0 }
 0x653   :  { %8070 = vmatmul.msk.bf16.gmra.mxu1 %vm86_vm6, %v6359_v45  ;;  %v5919_v45 = vpack.c.bf16 %v5879_v56, %v5878_v34  ;;  %v5883_v34 = vld [vmem:[#allocation3 + $0x1a8] sm:$0xff] }
 0x654   :  { %v11943_v28 = vadd.f32 %v6559_v49, %v6237_v31  ;;  %8110 = vmatmul.msk.bf16.gmra.mxu2 %vm86_vm6, %v5917_v27  ;;  %8150 = vmatmul.msk.bf16.gmra.mxu3 %vm86_vm6, %v5918_v61  ;;  %v6322_v31 = vld [vmem:[#allocation3 + $0x191] sm:$0xff] }
 0x655   :  { %8190 = vmatmul.msk.bf16.gmra.mxu0 %vm86_vm6, %v6360_v29 }
 0x656   :  { %14631 = vst [vmem:[#allocation51_spill] sm:$0xff] %v11943_v28 }
 0x657   :  { %v5742_v57 = vpop.f32.mrf.mxu2  ;;  %v6120_v50 = vpop.f32.mrf.mxu3 }
 0x658   :  { %v5743_v9 = vadd.f32 %v5742_v57, %v5465_v24  ;;  %v5467_v12 = vpop.f32.mrf.mxu1 }
 0x65a   :  { %v6238_v35 = vadd.f32 %v6120_v50, %v5743_v9  ;;  %v6564_v52 = vpop.f32.mrf.mxu0 }
 0x65c   :  { %v11948_v58 = vadd.f32 %v6562_v4, %v6238_v35  ;;  %v6323_v4 = vld [vmem:[#allocation3 + $0x199] sm:$0xff] }
 0x65d   :  { %v6362_v9 = vpack.c.bf16 %v6323_v4, %v6322_v31 }
 0x65e   :  { %14632 = vst [vmem:[#allocation93_spill] sm:$0xff] %v11948_v58 }
 0x65f   :  { %v5744_v0 = vpop.f32.mrf.mxu2  ;;  %v6122_v44 = vpop.f32.mrf.mxu3 }
 0x660   :  { %v5745_v32 = vadd.f32 %v5744_v0, %v5467_v12  ;;  %v5470_v2 = vpop.f32.mrf.mxu1 }
 0x662   :  { %v6239_v47 = vadd.f32 %v6122_v44, %v5745_v32  ;;  %v6567_v27 = vpop.f32.mrf.mxu0 }
 0x663   :  { %8071 = vmatmul.msk.bf16.gmra.mxu1 %vm86_vm6, %v6360_v29 }
 0x664   :  { %v11951_v18 = vadd.f32 %v6564_v52, %v6239_v47  ;;  %8111 = vmatmul.msk.bf16.gmra.mxu2 %vm86_vm6, %v5918_v61  ;;  %8151 = vmatmul.msk.bf16.gmra.mxu3 %vm86_vm6, %v5919_v45  ;;  %v5880_v61 = vld [vmem:[#allocation3 + $0x190] sm:$0xff] }
 0x665   :  { %8191 = vmatmul.msk.bf16.gmra.mxu0 %vm86_vm6, %v6361_v43  ;;  %v5920_v50 = vpack.c.bf16 %v5881_v23, %v5880_v61 }
 0x666   :  { %14633 = vst [vmem:[#allocation94_spill] sm:$0xff] %v11951_v18 }
 0x667   :  { %v5747_v53 = vpop.f32.mrf.mxu2  ;;  %v6125_v39 = vpop.f32.mrf.mxu3 }
 0x668   :  { %v5748_v11 = vadd.f32 %v5747_v53, %v5470_v2  ;;  %v5472_v49 = vpop.f32.mrf.mxu1  ;;  %v6325_v53 = vld [vmem:[#allocation3 + $0x1a9] sm:$0xff] }
 0x66a   :  { %v6240_v10 = vadd.f32 %v6125_v39, %v5748_v11  ;;  %v6569_v42 = vpop.f32.mrf.mxu0 }
 0x66c   :  { %v11956_v60 = vadd.f32 %v6567_v27, %v6240_v10 }
 0x66e   :  { %14634 = vst [vmem:[#allocation29_spill] sm:$0xff] %v11956_v60 }
 0x66f   :  { %v5749_v48 = vpop.f32.mrf.mxu2  ;;  %v6127_v24 = vpop.f32.mrf.mxu3 }
 0x670   :  { %v5750_v21 = vadd.f32 %v5749_v48, %v5472_v49  ;;  %v5475_v15 = vpop.f32.mrf.mxu1 }
 0x672   :  { %v6241_v29 = vadd.f32 %v6127_v24, %v5750_v21  ;;  %v6572_v57 = vpop.f32.mrf.mxu0 }
 0x673   :  { %8072 = vmatmul.msk.bf16.gmra.mxu1 %vm86_vm6, %v6361_v43  ;;  %v6324_v43 = vld [vmem:[#allocation3 + $0x1a1] sm:$0xff] }
 0x674   :  { %v11959_v12 = vadd.f32 %v6569_v42, %v6241_v29  ;;  %8112 = vmatmul.msk.bf16.gmra.mxu2 %vm86_vm6, %v5919_v45  ;;  %8152 = vmatmul.msk.bf16.gmra.mxu3 %vm86_vm6, %v5920_v50  ;;  %v5882_v45 = vld [vmem:[#allocation3 + $0x1a0] sm:$0xff]  ;;  %v6363_v10 = vpack.c.bf16 %v6325_v53, %v6324_v43 }
 0x675   :  { %8192 = vmatmul.msk.bf16.gmra.mxu0 %vm86_vm6, %v6362_v9  ;;  %v5921_v49 = vpack.c.bf16 %v5883_v34, %v5882_v45 }
 0x676   :  { %14635 = vst [vmem:[#allocation15_spill] sm:$0xff] %v11959_v12 }
 0x677   :  { %v5752_v35 = vpop.f32.mrf.mxu2  ;;  %v6130_v52 = vpop.f32.mrf.mxu3 }
 0x678   :  { %v5753_v0 = vadd.f32 %v5752_v35, %v5475_v15  ;;  %v5477_v44 = vpop.f32.mrf.mxu1 }
 0x67a   :  { %v6242_v56 = vadd.f32 %v6130_v52, %v5753_v0  ;;  %v6574_v32 = vpop.f32.mrf.mxu0  ;;  %v6326_v52 = vld [vmem:[#allocation3 + $0x1b1] sm:$0xff]  ;;  %v6327_v0 = vld [vmem:[#allocation3 + $0x1b9] sm:$0xff] }
 0x67c   :  { %v11964_v2 = vadd.f32 %v6572_v57, %v6242_v56  ;;  %v5885_v57 = vld [vmem:[#allocation3 + $0x1b8] sm:$0xff] }
 0x67e   :  { %14636 = vst [vmem:[#allocation17_spill] sm:$0xff] %v11964_v2 }
 0x67f   :  { %v5754_v19 = vpop.f32.mrf.mxu2  ;;  %v6132_v37 = vpop.f32.mrf.mxu3 }
 0x680   :  { %v5755_v47 = vadd.f32 %v5754_v19, %v5477_v44  ;;  %v5480_v27 = vpop.f32.mrf.mxu1  ;;  %v6364_v19 = vpack.c.bf16 %v6327_v0, %v6326_v52 }
 0x682   :  { %v6243_v39 = vadd.f32 %v6132_v37, %v5755_v47  ;;  %v6577_v11 = vpop.f32.mrf.mxu0 }
 0x683   :  { %8073 = vmatmul.msk.bf16.gmra.mxu1 %vm86_vm6, %v6362_v9 }
 0x684   :  { %v11967_v42 = vadd.f32 %v6574_v32, %v6243_v39  ;;  %8113 = vmatmul.msk.bf16.gmra.mxu2 %vm86_vm6, %v5920_v50  ;;  %8153 = vmatmul.msk.bf16.gmra.mxu3 %vm86_vm6, %v5921_v49  ;;  %v5884_v50 = vld [vmem:[#allocation3 + $0x1b0] sm:$0xff] }
 0x685   :  { %8193 = vmatmul.msk.bf16.gmra.mxu0 %vm86_vm6, %v6363_v10  ;;  %v5922_v32 = vpack.c.bf16 %v5885_v57, %v5884_v50 }
 0x686   :  { %14637 = vst [vmem:[#allocation44_spill] sm:$0xff] %v11967_v42 }
 0x687   :  { %v5757_v48 = vpop.f32.mrf.mxu2  ;;  %v6135_v24 = vpop.f32.mrf.mxu3 }
 0x688   :  { %v5758_v23 = vadd.f32 %v5757_v48, %v5480_v27  ;;  %v5482_v21 = vpop.f32.mrf.mxu1 }
 0x68a   :  { %v6244_v15 = vadd.f32 %v6135_v24, %v5758_v23  ;;  %v6579_v31 = vpop.f32.mrf.mxu0 }
 0x68c   :  { %v11972_v4 = vadd.f32 %v6577_v11, %v6244_v15  ;;  %v6329_v15 = vld [vmem:[#allocation3 + $0x1c9] sm:$0xff] }
 0x68e   :  { %14638 = vst [vmem:[#allocation49_spill] sm:$0xff] %v11972_v4 }
 0x68f   :  { %v5759_v61 = vpop.f32.mrf.mxu2  ;;  %v6137_v29 = vpop.f32.mrf.mxu3 }
 0x690   :  { %v5760_v9 = vadd.f32 %v5759_v61, %v5482_v21  ;;  %v5485_v35 = vpop.f32.mrf.mxu1  ;;  %v6328_v21 = vld [vmem:[#allocation3 + $0x1c1] sm:$0xff] }
 0x691   :  { %v6365_v57 = vpack.c.bf16 %v6329_v15, %v6328_v21 }
 0x692   :  { %v6245_v44 = vadd.f32 %v6137_v29, %v5760_v9  ;;  %v6582_v56 = vpop.f32.mrf.mxu0 }
 0x693   :  { %8074 = vmatmul.msk.bf16.gmra.mxu1 %vm86_vm6, %v6363_v10  ;;  %v5887_v10 = vld [vmem:[#allocation3 + $0x1c8] sm:$0xff] }
 0x694   :  { %v11975_v37 = vadd.f32 %v6579_v31, %v6245_v44  ;;  %8114 = vmatmul.msk.bf16.gmra.mxu2 %vm86_vm6, %v5921_v49  ;;  %8154 = vmatmul.msk.bf16.gmra.mxu3 %vm86_vm6, %v5922_v32  ;;  %v5886_v49 = vld [vmem:[#allocation3 + $0x1c0] sm:$0xff] }
 0x695   :  { %8194 = vmatmul.msk.bf16.gmra.mxu0 %vm86_vm6, %v6364_v19  ;;  %v5923_v29 = vpack.c.bf16 %v5887_v10, %v5886_v49 }
 0x696   :  { %14639 = vst [vmem:[#allocation23_spill] sm:$0xff] %v11975_v37 }
 0x697   :  { %v5762_v34 = vpop.f32.mrf.mxu2  ;;  %v6140_v47 = vpop.f32.mrf.mxu3 }
 0x698   :  { %v5763_v27 = vadd.f32 %v5762_v34, %v5485_v35  ;;  %v5487_v43 = vpop.f32.mrf.mxu1 }
 0x69a   :  { %v6246_v53 = vadd.f32 %v6140_v47, %v5763_v27  ;;  %v6584_v45 = vpop.f32.mrf.mxu0 }
 0x69c   :  { %v11980_v39 = vadd.f32 %v6582_v56, %v6246_v53 }
 0x69e   :  { %14640 = vst [vmem:[#allocation14_spill] sm:$0xff] %v11980_v39 }
 0x69f   :  { %v5764_v11 = vpop.f32.mrf.mxu2  ;;  %v6142_v48 = vpop.f32.mrf.mxu3 }
 0x6a0   :  { %v5765_v24 = vadd.f32 %v5764_v11, %v5487_v43  ;;  %v5490_v23 = vpop.f32.mrf.mxu1  ;;  %v6331_v11 = vld [vmem:[#allocation3 + $0x1d9] sm:$0xff] }
 0x6a2   :  { %v6247_v31 = vadd.f32 %v6142_v48, %v5765_v24  ;;  %v6587_v61 = vpop.f32.mrf.mxu0 }
 0x6a3   :  { %8075 = vmatmul.msk.bf16.gmra.mxu1 %vm86_vm6, %v6364_v19  ;;  %v5889_v19 = vld [vmem:[#allocation3 + $0x1d8] sm:$0xff] }
 0x6a4   :  { %v11983_v9 = vadd.f32 %v6584_v45, %v6247_v31  ;;  %8115 = vmatmul.msk.bf16.gmra.mxu2 %vm86_vm6, %v5922_v32  ;;  %8155 = vmatmul.msk.bf16.gmra.mxu3 %vm86_vm6, %v5923_v29  ;;  %v6330_v45 = vld [vmem:[#allocation3 + $0x1d1] sm:$0xff] }
 0x6a5   :  { %8195 = vmatmul.msk.bf16.gmra.mxu0 %vm86_vm6, %v6365_v57  ;;  %v5888_v32 = vld [vmem:[#allocation3 + $0x1d0] sm:$0xff]  ;;  %v6366_v21 = vpack.c.bf16 %v6331_v11, %v6330_v45 }
 0x6a6   :  { %14641 = vst [vmem:[#allocation16_spill] sm:$0xff] %v11983_v9  ;;  %v5924_v24 = vpack.c.bf16 %v5889_v19, %v5888_v32  ;;  %v6332_v19 = vld [vmem:[#allocation3 + $0x1e1] sm:$0xff] }
 0x6a7   :  { %v5767_v35 = vpop.f32.mrf.mxu2  ;;  %v6145_v52 = vpop.f32.mrf.mxu3 }
 0x6a8   :  { %v5768_v0 = vadd.f32 %v5767_v35, %v5490_v23  ;;  %v5492_v50 = vpop.f32.mrf.mxu1 }
 0x6aa   :  { %v6248_v44 = vadd.f32 %v6145_v52, %v5768_v0  ;;  %v6589_v56 = vpop.f32.mrf.mxu0 }
 0x6ac   :  { %v11988_v34 = vadd.f32 %v6587_v61, %v6248_v44 }
 0x6ae   :  { %14642 = vst [vmem:[#allocation19_spill] sm:$0xff] %v11988_v34 }
 0x6af   :  { %v5769_v47 = vpop.f32.mrf.mxu2  ;;  %v6147_v27 = vpop.f32.mrf.mxu3 }
 0x6b0   :  { %v5770_v43 = vadd.f32 %v5769_v47, %v5492_v50  ;;  %v5495_v53 = vpop.f32.mrf.mxu1  ;;  %v5891_v47 = vld [vmem:[#allocation3 + $0x1e8] sm:$0xff] }
 0x6b2   :  { %v6249_v48 = vadd.f32 %v6147_v27, %v5770_v43  ;;  %v6592_v10 = vpop.f32.mrf.mxu0 }
 0x6b3   :  { %8076 = vmatmul.msk.bf16.gmra.mxu1 %vm86_vm6, %v6365_v57  ;;  %v5890_v57 = vld [vmem:[#allocation3 + $0x1e0] sm:$0xff] }
 0x6b4   :  { %v11991_v23 = vadd.f32 %v6589_v56, %v6249_v48  ;;  %8116 = vmatmul.msk.bf16.gmra.mxu2 %vm86_vm6, %v5923_v29  ;;  %8156 = vmatmul.msk.bf16.gmra.mxu3 %vm86_vm6, %v5924_v24  ;;  %v6333_v29 = vld [vmem:[#allocation3 + $0x1e9] sm:$0xff]  ;;  %v5925_v11 = vpack.c.bf16 %v5891_v47, %v5890_v57  ;;  %v5893_v57 = vld [vmem:[#allocation3 + $0x1f8] sm:$0xff] }
 0x6b5   :  { %8196 = vmatmul.msk.bf16.gmra.mxu0 %vm86_vm6, %v6366_v21  ;;  %v6367_v32 = vpack.c.bf16 %v6333_v29, %v6332_v19 }
 0x6b6   :  { %14643 = vst [vmem:[#allocation25_spill] sm:$0xff] %v11991_v23 }
 0x6b7   :  { %v5772_v15 = vpop.f32.mrf.mxu2  ;;  %v6150_v49 = vpop.f32.mrf.mxu3 }
 0x6b8   :  { %v5773_v31 = vadd.f32 %v5772_v15, %v5495_v53  ;;  %v5497_v61 = vpop.f32.mrf.mxu1 }
 0x6ba   :  { %v6250_v35 = vadd.f32 %v6150_v49, %v5773_v31  ;;  %v6594_v52 = vpop.f32.mrf.mxu0 }
 0x6bc   :  { %v11996_v0 = vadd.f32 %v6592_v10, %v6250_v35 }
 0x6be   :  { %14644 = vst [vmem:[#allocation63_spill] sm:$0xff] %v11996_v0 }
 0x6bf   :  { %v5774_v50 = vpop.f32.mrf.mxu2  ;;  %v6152_v44 = vpop.f32.mrf.mxu3 }
 0x6c0   :  { %v5775_v56 = vadd.f32 %v5774_v50, %v5497_v61  ;;  %v5500_v27 = vpop.f32.mrf.mxu1 }
 0x6c2   :  { %v6251_v43 = vadd.f32 %v6152_v44, %v5775_v56  ;;  %v6597_v45 = vpop.f32.mrf.mxu0  ;;  %v6334_v56 = vld [vmem:[#allocation3 + $0x1f1] sm:$0xff] }
 0x6c3   :  { %8077 = vmatmul.msk.bf16.gmra.mxu1 %vm86_vm6, %v6366_v21  ;;  %v5892_v21 = vld [vmem:[#allocation3 + $0x1f0] sm:$0xff] }
 0x6c4   :  { %v11999_v53 = vadd.f32 %v6594_v52, %v6251_v43  ;;  %8117 = vmatmul.msk.bf16.gmra.mxu2 %vm86_vm6, %v5924_v24  ;;  %8157 = vmatmul.msk.bf16.gmra.mxu3 %vm86_vm6, %v5925_v11  ;;  %v6335_v24 = vld [vmem:[#allocation3 + $0x1f9] sm:$0xff]  ;;  %v5926_v43 = vpack.c.bf16 %v5893_v57, %v5892_v21  ;;  %v5895_v21 = vld [vmem:[#allocation3 + $0x208] sm:$0xff] }
 0x6c5   :  { %8197 = vmatmul.msk.bf16.gmra.mxu0 %vm86_vm6, %v6367_v32  ;;  %v6368_v0 = vpack.c.bf16 %v6335_v24, %v6334_v56  ;;  %v6337_v57 = vld [vmem:[#allocation3 + $0x209] sm:$0xff] }
 0x6c6   :  { %14645 = vst [vmem:[#allocation33_spill] sm:$0xff] %v11999_v53 }
 0x6c7   :  { %v5777_v48 = vpop.f32.mrf.mxu2  ;;  %v6155_v10 = vpop.f32.mrf.mxu3 }
 0x6c8   :  { %v5778_v15 = vadd.f32 %v5777_v48, %v5500_v27  ;;  %v5502_v49 = vpop.f32.mrf.mxu1 }
 0x6ca   :  { %v6252_v31 = vadd.f32 %v6155_v10, %v5778_v15  ;;  %v6599_v61 = vpop.f32.mrf.mxu0 }
 0x6cc   :  { %v12004_v35 = vadd.f32 %v6597_v45, %v6252_v31 }
 0x6ce   :  { %14646 = vst [vmem:[#allocation38_spill] sm:$0xff] %v12004_v35 }
 0x6cf   :  { %v5779_v50 = vpop.f32.mrf.mxu2  ;;  %v6157_v44 = vpop.f32.mrf.mxu3 }
 0x6d0   :  { %v5780_v52 = vadd.f32 %v5779_v50, %v5502_v49  ;;  %v5505_v47 = vpop.f32.mrf.mxu1 }
 0x6d2   :  { %v6253_v19 = vadd.f32 %v6157_v44, %v5780_v52  ;;  %v6602_v29 = vpop.f32.mrf.mxu0  ;;  %v5894_v44 = vld [vmem:[#allocation3 + $0x200] sm:$0xff] }
 0x6d3   :  { %8078 = vmatmul.msk.bf16.gmra.mxu1 %vm86_vm6, %v6367_v32  ;;  %v6336_v32 = vld [vmem:[#allocation3 + $0x201] sm:$0xff]  ;;  %v5927_v24 = vpack.c.bf16 %v5895_v21, %v5894_v44 }
 0x6d4   :  { %v12007_v27 = vadd.f32 %v6599_v61, %v6253_v19  ;;  %8118 = vmatmul.msk.bf16.gmra.mxu2 %vm86_vm6, %v5925_v11  ;;  %8158 = vmatmul.msk.bf16.gmra.mxu3 %vm86_vm6, %v5926_v43  ;;  %v6369_v19 = vpack.c.bf16 %v6337_v57, %v6336_v32  ;;  %v14650_v57 = vld [vmem:[#allocation27_spill] sm:$0xff] }
 0x6d5   :  { %8198 = vmatmul.msk.bf16.gmra.mxu0 %vm86_vm6, %v6368_v0  ;;  %vm988_vm8 = vcmp.lt.s32.totalorder %v14650_v57, 13 }
 0x6d6   :  { %14647 = vst [vmem:[#allocation96_spill] sm:$0xff] %v12007_v27 }
 0x6d7   :  { %v5782_v45 = vpop.f32.mrf.mxu2  ;;  %v6160_v48 = vpop.f32.mrf.mxu3 }
 0x6d8   :  { %v5783_v10 = vadd.f32 %v5782_v45, %v5505_v47  ;;  %v5507_v15 = vpop.f32.mrf.mxu1 }
 0x6da   :  { %v6254_v49 = vadd.f32 %v6160_v48, %v5783_v10  ;;  %v6604_v31 = vpop.f32.mrf.mxu0 }
 0x6dc   :  { %v12012_v50 = vadd.f32 %v6602_v29, %v6254_v49 }
 0x6df   :  { %v5784_v61 = vpop.f32.mrf.mxu2  ;;  %v6162_v52 = vpop.f32.mrf.mxu3 }
 0x6e0   :  { %v5785_v56 = vadd.f32 %v5784_v61, %v5507_v15  ;;  %v5510_v11 = vpop.f32.mrf.mxu1  ;;  %v14651_v61 = vmov 0.0  }
 0x6e2   :  { %v6255_v35 = vadd.f32 %v6162_v52, %v5785_v56  ;;  %v6607_v27 = vpop.f32.mrf.mxu0  ;;  %v12024_v52 = vsel %vm988_vm8, 1.0, %v14651_v61  ;;  %v14653_v56 = vld [vmem:[#allocation28_spill] sm:$0xff] }
 0x6e3   :  { %8079 = vmatmul.msk.bf16.gmra.mxu1 %vm86_vm6, %v6368_v0  ;;  %14652 = vst [vmem:[#allocation99_spill] sm:$0xff] %v12024_v52  ;;  %vm990_vm2 = vcmp.lt.s32.totalorder %v14653_v56, 13  ;;  %v14658_v56 = vld [vmem:[#allocation34_spill] sm:$0xff] }
 0x6e4   :  { %v12015_v47 = vadd.f32 %v6604_v31, %v6255_v35  ;;  %8119 = vmatmul.msk.bf16.gmra.mxu2 %vm86_vm6, %v5926_v43  ;;  %8159 = vmatmul.msk.bf16.gmra.mxu3 %vm86_vm6, %v5927_v24  ;;  %vm994_vm10 = vcmp.lt.s32.totalorder %v14658_v56, 13  ;;  %v14661_v56 = vld [vmem:[#allocation36_spill] sm:$0xff] }
 0x6e5   :  { %8199 = vmatmul.msk.bf16.gmra.mxu0 %vm86_vm6, %v6369_v19  ;;  %vm996_vm11 = vcmp.lt.s32.totalorder %v14661_v56, 13  ;;  %v14663_v56 = vld [vmem:[#allocation40_spill] sm:$0xff] }
 0x6e6   :  { %14648 = vst [vmem:[#allocation97_spill] sm:$0xff] %v12015_v47  ;;  %vm998_vm12 = vcmp.lt.s32.totalorder %v14663_v56, 13  ;;  %v14666_v56 = vld [vmem:[#allocation42_spill] sm:$0xff] }
 0x6e7   :  { %v5787_v29 = vpop.f32.mrf.mxu2  ;;  %v6165_v45 = vpop.f32.mrf.mxu3  ;;  %vm1000_vm13 = vcmp.lt.s32.totalorder %v14666_v56, 13  ;;  %v14668_v56 = vld [vmem:[#allocation47_spill] sm:$0xff] }
 0x6e8   :  { %v5788_v48 = vadd.f32 %v5787_v29, %v5510_v11  ;;  %v5512_v10 = vpop.f32.mrf.mxu1  ;;  %v6717_v11 = vmul.f32 %v12024_v52, %v11839_v7  ;;  %v6787_v7 = vsel %vm86_vm6, %v11852_v1, 0.0  ;;  %vm1002_vm14 = vcmp.lt.s32.totalorder %v14668_v56, 13 }
 0x6e9   :  { %v12113_v56 = vsel %vm1002_vm14, 1.0, %v14651_v61 }
 0x6ea   :  { %v6256_v15 = vadd.f32 %v6165_v45, %v5788_v48  ;;  %v6609_v49 = vpop.f32.mrf.mxu0  ;;  %v14656_v45 = vld [vmem:[#allocation31_spill] sm:$0xff]  ;;  %14670 = vst [vmem:[#allocation109_spill] sm:$0xff] %v12113_v56 }
 0x6eb   :  { %vm992_vm9 = vcmp.lt.s32.totalorder %v14656_v45, 13 }
 0x6ec   :  { %v12020_v44 = vadd.f32 %v6607_v27, %v6256_v15  ;;  %v12032_v27 = vsel %vm990_vm2, 1.0, %v14651_v61  ;;  %v6781_v15 = vsel %vm86_vm6, %v6717_v11, 0.0  ;;  %v12041_v57 = vsel %vm992_vm9, 1.0, %v14651_v61 }
 0x6ed   :  { %14655 = vst [vmem:[#allocation101_spill] sm:$0xff] %v12032_v27 }
 0x6ee   :  { %14649 = vst [vmem:[#allocation98_spill] sm:$0xff] %v12020_v44  ;;  %v6791_v44 = vsel %vm86_vm6, %v11860_v25, 0.0 }
 0x6ef   :  { %v5789_v21 = vpop.f32.mrf.mxu2  ;;  %v6167_v32 = vpop.f32.mrf.mxu3  ;;  %14657 = vst [vmem:[#allocation102_spill] sm:$0xff] %v12041_v57 }
 0x6f0   :  { %v5790_v0 = vadd.f32 %v5789_v21, %v5512_v10  ;;  %v5515_v35 = vpop.f32.mrf.mxu1  ;;  %v12038_v21 = vmul.f32 %v12032_v27, %v11847_v26  ;;  %v12057_v27 = vsel %vm994_vm10, 1.0, %v14651_v61 }
 0x6f1   :  { %14660 = vst [vmem:[#allocation104_spill] sm:$0xff] %v12057_v27 }
 0x6f2   :  { %v6257_v31 = vadd.f32 %v6167_v32, %v5790_v0  ;;  %v6612_v43 = vpop.f32.mrf.mxu0  ;;  %v6780_v0 = vsel %vm86_vm6, %v11836_v51, 0.0  ;;  %v6785_v45 = vsel %vm86_vm6, %v12038_v21, 0.0 }
 0x6f4   :  { %v12027_v24 = vadd.f32 %v6609_v49, %v6257_v31  ;;  %v6783_v31 = vsel %vm86_vm6, %v11844_v6, 0.0 }
 0x6f6   :  { %14654 = vst [vmem:[#allocation100_spill] sm:$0xff] %v12027_v24 }
 0x6f7   :  { %v5792_v19 = vpop.f32.mrf.mxu2  ;;  %v6170_v29 = vpop.f32.mrf.mxu3 }
 0x6f8   :  { %v5793_v48 = vadd.f32 %v5792_v19, %v5515_v35  ;;  %v5517_v10 = vpop.f32.mrf.mxu1  ;;  %v6782_v19 = vadd.f32 %v6781_v15, %v6780_v0 }
 0x6fa   :  { %v6258_v49 = vadd.f32 %v6170_v29, %v5793_v48  ;;  %v6614_v32 = vpop.f32.mrf.mxu0  ;;  %v12054_v29 = vmul.f32 %v12041_v57, %v11855_v16  ;;  %v6784_v48 = vadd.f32 %v6783_v31, %v6782_v19  ;;  %v12066_v57 = vmul.f32 %v12057_v27, %v11863_v33 }
 0x6fb   :  { %v6795_v27 = vsel %vm86_vm6, %v11868_v38, 0.0  ;;  %v12095_v33 = vsel %vm1000_vm13, 1.0, %v14651_v61 }
 0x6fc   :  { %v12048_v35 = vadd.f32 %v6612_v43, %v6258_v49  ;;  %v6786_v49 = vadd.f32 %v6785_v45, %v6784_v48  ;;  %v6789_v0 = vsel %vm86_vm6, %v12054_v29, 0.0  ;;  %v6793_v45 = vsel %vm86_vm6, %v12066_v57, 0.0  ;;  %14667 = vst [vmem:[#allocation107_spill] sm:$0xff] %v12095_v33 }
 0x6fe   :  { %14659 = vst [vmem:[#allocation103_spill] sm:$0xff] %v12048_v35  ;;  %v6788_v16 = vadd.f32 %v6787_v7, %v6786_v49  ;;  %v12069_v35 = vsel %vm996_vm11, 1.0, %v14651_v61  ;;  %v12083_v7 = vsel %vm998_vm12, 1.0, %v14651_v61 }
 0x6ff   :  { %v5794_v52 = vpop.f32.mrf.mxu2  ;;  %v6172_v26 = vpop.f32.mrf.mxu3  ;;  %14662 = vst [vmem:[#allocation105_spill] sm:$0xff] %v12069_v35  ;;  %v12080_v48 = vmul.f32 %v12069_v35, %v11871_v3  ;;  %v12092_v35 = vmul.f32 %v12083_v7, %v11879_v46  ;;  %v6917_v46 = vmul.f32 %v12038_v21, %v12038_v21  ;;  %v6918_v21 = vmul.f32 %v11852_v1, %v11852_v1 }
 0x700   :  { %v5795_v43 = vadd.f32 %v5794_v52, %v5517_v10  ;;  %v5520_v15 = vpop.f32.mrf.mxu1  ;;  %v6790_v10 = vadd.f32 %v6789_v0, %v6788_v16  ;;  %14665 = vst [vmem:[#allocation60_spill] sm:$0xff] %v12083_v7 }
 0x702   :  { %v6259_v31 = vadd.f32 %v6172_v26, %v5795_v43  ;;  %v6617_v19 = vpop.f32.mrf.mxu0  ;;  %v6792_v26 = vadd.f32 %v6791_v44, %v6790_v10 }
 0x704   :  { %v12074_v52 = vadd.f32 %v6614_v32, %v6259_v31  ;;  %v6794_v0 = vadd.f32 %v6793_v45, %v6792_v26  ;;  %v6797_v31 = vsel %vm86_vm6, %v12080_v48, 0.0  ;;  %v6915_v45 = vmul.f32 %v6717_v11, %v6717_v11 }
 0x706   :  { %14664 = vst [vmem:[#allocation106_spill] sm:$0xff] %v12074_v52  ;;  %v6796_v3 = vadd.f32 %v6795_v27, %v6794_v0  ;;  %v6799_v52 = vsel %vm86_vm6, %v11876_v41, 0.0  ;;  %v6914_v27 = vmul.f32 %v11836_v51, %v11836_v51  ;;  %v6979_v7 = vsel %vm86_vm6, %v6915_v45, 0.0 }
 0x707   :  { %v5797_v43 = vpop.f32.mrf.mxu2  ;;  %v6175_v49 = vpop.f32.mrf.mxu3 }
 0x708   :  { %v5798_v32 = vadd.f32 %v5797_v43, %v5520_v15  ;;  %v5522_v16 = vpop.f32.mrf.mxu1  ;;  %v6798_v26 = vadd.f32 %v6797_v31, %v6796_v3  ;;  %v6801_v43 = vsel %vm86_vm6, %v12092_v35, 0.0  ;;  %v6803_v3 = vsel %vm86_vm6, %v11884_v20, 0.0  ;;  %v14671_v31 = vld [vmem:[#allocation45_spill] sm:$0xff] }
 0x709   :  { %vm1004_vm15 = vcmp.lt.s32.totalorder %v14671_v31, 13 }
 0x70a   :  { %v6260_v44 = vadd.f32 %v6175_v49, %v5798_v32  ;;  %v6619_v10 = vpop.f32.mrf.mxu0  ;;  %v12106_v49 = vmul.f32 %v12095_v33, %v11887_v40  ;;  %v6916_v32 = vmul.f32 %v11844_v6, %v11844_v6  ;;  %v6800_v0 = vadd.f32 %v6799_v52, %v6798_v26 }
 0x70b   :  { %v12125_v26 = vmul.f32 %v12113_v56, %v11895_v13  ;;  %v12130_v45 = vsel %vm1004_vm15, 1.0, %v14651_v61 }
 0x70c   :  { %v12100_v15 = vadd.f32 %v6617_v19, %v6260_v44  ;;  %v6802_v40 = vadd.f32 %v6801_v43, %v6800_v0  ;;  %v6805_v52 = vsel %vm86_vm6, %v12106_v49, 0.0  ;;  %14672 = vst [vmem:[#allocation110_spill] sm:$0xff] %v12130_v45  ;;  %v6807_v43 = vsel %vm86_vm6, %v11892_v22, 0.0  ;;  %v14673_v0 = vld [vmem:[#allocation48_spill] sm:$0xff] }
 0x70d   :  { %vm1006_vm0 = vcmp.lt.s32.totalorder %v14673_v0, 13  ;;  %v6920_v0 = vmul.f32 %v11860_v25, %v11860_v25 }
 0x70e   :  { %14669 = vst [vmem:[#allocation108_spill] sm:$0xff] %v12100_v15  ;;  %v6978_v15 = vsel %vm86_vm6, %v6914_v27, 0.0  ;;  %v6919_v27 = vmul.f32 %v12054_v29, %v12054_v29 }
 0x70f   :  { %v5799_v19 = vpop.f32.mrf.mxu2  ;;  %v6177_v11 = vpop.f32.mrf.mxu3 }
 0x710   :  { %v5800_v44 = vadd.f32 %v5799_v19, %v5522_v16  ;;  %v5525_v33 = vpop.f32.mrf.mxu1  ;;  %v6981_v16 = vsel %vm86_vm6, %v6916_v32, 0.0  ;;  %v6804_v19 = vadd.f32 %v6803_v3, %v6802_v40  ;;  %v6983_v40 = vsel %vm86_vm6, %v6917_v46, 0.0 }
 0x711   :  { %v6809_v32 = vsel %vm86_vm6, %v12125_v26, 0.0  ;;  %v12146_v3 = vmul.f32 %v12130_v45, %v11903_v5  ;;  %v6811_v46 = vsel %vm86_vm6, %v11900_v14, 0.0 }
 0x712   :  { %v6261_v6 = vadd.f32 %v6177_v11, %v5800_v44  ;;  %v6622_v51 = vpop.f32.mrf.mxu0  ;;  %v6980_v11 = vadd.f32 %v6979_v7, %v6978_v15  ;;  %v6806_v44 = vadd.f32 %v6805_v52, %v6804_v19  ;;  %v12151_v7 = vsel %vm1006_vm0, 1.0, %v14651_v61  ;;  %v14675_v52 = vld [vmem:[#allocation52_spill] sm:$0xff] }
 0x713   :  { %14674 = vst [vmem:[#allocation111_spill] sm:$0xff] %v12151_v7  ;;  %v6985_v15 = vsel %vm86_vm6, %v6918_v21, 0.0  ;;  %vm1008_vm1 = vcmp.lt.s32.totalorder %v14675_v52, 13  ;;  %v12166_v21 = vmul.f32 %v12151_v7, %v11911_v63 }
 0x714   :  { %v12137_v31 = vadd.f32 %v6619_v10, %v6261_v6  ;;  %v6982_v56 = vadd.f32 %v6981_v16, %v6980_v11  ;;  %v6808_v6 = vadd.f32 %v6807_v43, %v6806_v44  ;;  %v6987_v11 = vsel %vm86_vm6, %v6919_v27, 0.0 }
 0x715   :  { %v6921_v43 = vmul.f32 %v12066_v57, %v12066_v57  ;;  %v6813_v44 = vsel %vm86_vm6, %v12146_v3, 0.0  ;;  %v12172_v27 = vsel %vm1008_vm1, 1.0, %v14651_v61  ;;  %v6922_v57 = vmul.f32 %v11868_v38, %v11868_v38 }
 0x716   :  { %v6984_v16 = vadd.f32 %v6983_v40, %v6982_v56  ;;  %v6810_v5 = vadd.f32 %v6809_v32, %v6808_v6  ;;  %14676 = vst [vmem:[#allocation84_spill] sm:$0xff] %v12172_v27  ;;  %v6815_v40 = vsel %vm86_vm6, %v11908_v17, 0.0  ;;  %v14677_v32 = vld [vmem:[#allocation55_spill] sm:$0xff] }
 0x717   :  { %v5802_v10 = vpop.f32.mrf.mxu2  ;;  %v6180_v29 = vpop.f32.mrf.mxu3  ;;  %vm1010_vm3 = vcmp.lt.s32.totalorder %v14677_v32, 13 }
 0x718   :  { %v5803_v19 = vadd.f32 %v5802_v10, %v5525_v33  ;;  %v12157_v45 = vpop.f32.mrf.mxu1  ;;  %v6986_v33 = vadd.f32 %v6985_v15, %v6984_v16  ;;  %v6989_v10 = vsel %vm86_vm6, %v6920_v0, 0.0  ;;  %v6812_v56 = vadd.f32 %v6811_v46, %v6810_v5 }
 0x719   :  { %v6991_v15 = vsel %vm86_vm6, %v6921_v43, 0.0  ;;  %v6923_v5 = vmul.f32 %v12080_v48, %v12080_v48  ;;  %v6817_v0 = vsel %vm86_vm6, %v12166_v21, 0.0  ;;  %v12188_v46 = vmul.f32 %v12172_v27, %v11919_v30 }
 0x71a   :  { %v6262_v13 = vadd.f32 %v6180_v29, %v5803_v19  ;;  %v12168_v25 = vpop.f32.mrf.mxu0  ;;  %v6988_v29 = vadd.f32 %v6987_v11, %v6986_v33  ;;  %v6814_v52 = vadd.f32 %v6813_v44, %v6812_v56  ;;  %v12191_v32 = vsel %vm1010_vm3, 1.0, %v14651_v61  ;;  %v14679_v44 = vld [vmem:[#allocation58_spill] sm:$0xff] }
 0x71b   :  { %14678 = vst [vmem:[#allocation77_spill] sm:$0xff] %v12191_v32  ;;  %v6993_v11 = vsel %vm86_vm6, %v6922_v57, 0.0  ;;  %v6924_v48 = vmul.f32 %v11876_v41, %v11876_v41  ;;  %v6819_v43 = vsel %vm86_vm6, %v11916_v54, 0.0  ;;  %vm1012_vm4 = vcmp.lt.s32.totalorder %v14679_v44, 13 }
 0x71c   :  { %v12179_v6 = vadd.f32 %v6622_v51, %v6262_v13  ;;  %v6990_v19 = vadd.f32 %v6989_v10, %v6988_v29  ;;  %v6816_v16 = vadd.f32 %v6815_v40, %v6814_v52  ;;  %v6995_v40 = vsel %vm86_vm6, %v6923_v5, 0.0 }
 0x71d   :  { %v6925_v29 = vmul.f32 %v12092_v35, %v12092_v35  ;;  %v6821_v57 = vsel %vm86_vm6, %v12188_v46, 0.0  ;;  %v12212_v52 = vmul.f32 %v12191_v32, %v11927_v62  ;;  %v12217_v30 = vsel %vm1012_vm4, 1.0, %v14651_v61 }
 0x71e   :  { %v6992_v10 = vadd.f32 %v6991_v15, %v6990_v19  ;;  %v6818_v56 = vadd.f32 %v6817_v0, %v6816_v16  ;;  %14680 = vst [vmem:[#allocation92_spill] sm:$0xff] %v12217_v30  ;;  %v6997_v15 = vsel %vm86_vm6, %v6924_v48, 0.0  ;;  %v6926_v5 = vmul.f32 %v11884_v20, %v11884_v20 }
 0x71f   :  { %v12193_v51 = vpop.f32.mrf.mxu2  ;;  %v12195_v13 = vpop.f32.mrf.mxu3  ;;  %v6823_v35 = vsel %vm86_vm6, %v11924_v55, 0.0  ;;  %v6999_v16 = vsel %vm86_vm6, %v6925_v29, 0.0  ;;  %v6927_v32 = vmul.f32 %v12106_v49, %v12106_v49  ;;  %v6827_v49 = vsel %vm86_vm6, %v11932_v36, 0.0 }
 0x720   :  { %v12203_v33 = vpop.f32.mrf.mxu1  ;;  %v6994_v7 = vadd.f32 %v6993_v11, %v6992_v10  ;;  %v6820_v44 = vadd.f32 %v6819_v43, %v6818_v56  ;;  %v6825_v11 = vsel %vm86_vm6, %v12212_v52, 0.0  ;;  %v12231_v43 = vmul.f32 %v12217_v30, %v11935_v59 }
 0x721   :  { %v12243_v29 = vmul.f32 0.0, %v11940_v8  ;;  %v6930_v8 = vmul.f32 %v11900_v14, %v11900_v14 }
 0x722   :  { %v12214_v27 = vpop.f32.mrf.mxu0  ;;  %v6996_v0 = vadd.f32 %v6995_v40, %v6994_v7  ;;  %v6822_v19 = vadd.f32 %v6821_v57, %v6820_v44  ;;  %v7001_v7 = vsel %vm86_vm6, %v6926_v5, 0.0  ;;  %v6928_v40 = vmul.f32 %v11892_v22, %v11892_v22 }
 0x723   :  { %v6829_v5 = vsel %vm86_vm6, %v12231_v43, 0.0 }
 0x724   :  { %v6998_v48 = vadd.f32 %v6997_v15, %v6996_v0  ;;  %v6824_v10 = vadd.f32 %v6823_v35, %v6822_v19  ;;  %v7003_v35 = vsel %vm86_vm6, %v6927_v32, 0.0  ;;  %v6929_v0 = vmul.f32 %v12125_v26, %v12125_v26 }
 0x725   :  { %v12253_v19 = vmul.f32 0.0, %v11943_v28  ;;  %v6831_v32 = vsel %vm86_vm6, %v12243_v29, 0.0  ;;  %v12263_v26 = vmul.f32 0.0, %v11948_v58  ;;  %v6931_v28 = vmul.f32 %v12146_v3, %v12146_v3 }
 0x726   :  { %v7000_v44 = vadd.f32 %v6999_v16, %v6998_v48  ;;  %v6826_v15 = vadd.f32 %v6825_v11, %v6824_v10  ;;  %v7005_v16 = vsel %vm86_vm6, %v6928_v40, 0.0  ;;  %v7007_v10 = vsel %vm86_vm6, %v6929_v0, 0.0 }
 0x727   :  { %v12233_v56 = vpop.f32.mrf.mxu2  ;;  %v12235_v62 = vpop.f32.mrf.mxu3  ;;  %v12283_v3 = vmul.f32 0.0, %v11956_v60 }
 0x728   :  { %v12245_v57 = vpop.f32.mrf.mxu1  ;;  %v7002_v59 = vadd.f32 %v7001_v7, %v7000_v44  ;;  %v6828_v63 = vadd.f32 %v6827_v49, %v6826_v15  ;;  %v6833_v7 = vsel %vm86_vm6, %v12253_v19, 0.0  ;;  %v12271_v49 = vmul.f32 0.0, %v11951_v18 }
 0x729   :  { %v7009_v44 = vsel %vm86_vm6, %v6930_v8, 0.0 }
 0x72a   :  { %v12255_v30 = vpop.f32.mrf.mxu0  ;;  %v7004_v11 = vadd.f32 %v7003_v35, %v7002_v59  ;;  %v6830_v48 = vadd.f32 %v6829_v5, %v6828_v63  ;;  %v6932_v63 = vmul.f32 %v11908_v17, %v11908_v17  ;;  %v6835_v59 = vsel %vm86_vm6, %v12263_v26, 0.0  ;;  %v14681_v35 = vld [vmem:[#allocation62_spill] sm:$0xff] }
 0x72b   :  { %vm1020_vm5 = vcmp.lt.s32.totalorder %v14681_v35, 13 }
 0x72c   :  { %v7006_v40 = vadd.f32 %v7005_v16, %v7004_v11  ;;  %v6832_v15 = vadd.f32 %v6831_v32, %v6830_v48  ;;  %v7011_v16 = vsel %vm86_vm6, %v6931_v28, 0.0  ;;  %v6933_v32 = vmul.f32 %v12166_v21, %v12166_v21 }
 0x72d   :  { %v6837_v11 = vsel %vm86_vm6, %v12271_v49, 0.0  ;;  %v12294_v48 = vmul.f32 0.0, %v11959_v12  ;;  %v12299_v35 = vsel %vm1020_vm5, 1.0, %v14651_v61  ;;  %v6934_v28 = vmul.f32 %v11916_v54, %v11916_v54 }
 0x72e   :  { %v7008_v5 = vadd.f32 %v7007_v10, %v7006_v40  ;;  %v6834_v8 = vadd.f32 %v6833_v7, %v6832_v15  ;;  %14682 = vst [vmem:[#allocation39_spill] sm:$0xff] %v12299_v35  ;;  %v7013_v10 = vsel %vm86_vm6, %v6932_v63, 0.0  ;;  %v6839_v21 = vsel %vm86_vm6, %v12283_v3, 0.0  ;;  %v14683_v7 = vld [vmem:[#allocation67_spill] sm:$0xff] }
 0x72f   :  { %v12274_v14 = vpop.f32.mrf.mxu2  ;;  %v12276_v58 = vpop.f32.mrf.mxu3  ;;  %vm1022_vm7 = vcmp.lt.s32.totalorder %v14683_v7, 13  ;;  %v7015_v12 = vsel %vm86_vm6, %v6933_v32, 0.0  ;;  %v12314_v63 = vmul.f32 %v12299_v35, %v11967_v42  ;;  %v14685_v32 = vld [vmem:[#allocation69_spill] sm:$0xff]  ;;  %vm7576_vm5 = vcmask 257024  }
 0x730   :  { %v12286_v0 = vpop.f32.mrf.mxu1  ;;  %v7010_v60 = vadd.f32 %v7009_v44, %v7008_v5  ;;  %v6836_v17 = vadd.f32 %v6835_v59, %v6834_v8  ;;  %v6935_v44 = vmul.f32 %v12188_v46, %v12188_v46  ;;  %v6841_v59 = vsel %vm86_vm6, %v12294_v48, 0.0 }
 0x731   :  { %v12317_v54 = vsel %vm1022_vm7, 1.0, %v14651_v61  ;;  %v6936_v46 = vmul.f32 %v11924_v55, %v11924_v55  ;;  %vm1024_vm8 = vcmp.lt.s32.totalorder %v14685_v32, 13 }
 0x732   :  { %v12296_v18 = vpop.f32.mrf.mxu0  ;;  %v7012_v40 = vadd.f32 %v7011_v16, %v7010_v60  ;;  %v6838_v15 = vadd.f32 %v6837_v11, %v6836_v17  ;;  %14684 = vst [vmem:[#allocation95_spill] sm:$0xff] %v12317_v54  ;;  %v7017_v60 = vsel %vm86_vm6, %v6934_v28, 0.0  ;;  %v6843_v16 = vsel %vm86_vm6, %v11964_v2, 0.0 }
 0x733   :  { %v6845_v28 = vsel %vm86_vm6, %v12314_v63, 0.0  ;;  %v12338_v35 = vmul.f32 %v12317_v54, %v11975_v37  ;;  %v12343_v22 = vsel %vm1024_vm8, 1.0, %v14651_v61 }
 0x734   :  { %v7014_v5 = vadd.f32 %v7013_v10, %v7012_v40  ;;  %v6840_v8 = vadd.f32 %v6839_v21, %v6838_v15  ;;  %v7019_v40 = vsel %vm86_vm6, %v6935_v44, 0.0  ;;  %v6937_v15 = vmul.f32 %v12212_v52, %v12212_v52  ;;  %14686 = vst [vmem:[#allocation75_spill] sm:$0xff] %v12343_v22 }
 0x735   :  { %v6938_v44 = vmul.f32 %v11932_v36, %v11932_v36  ;;  %v6847_v52 = vsel %vm86_vm6, %v11972_v4, 0.0 }
 0x736   :  { %v7016_v10 = vadd.f32 %v7015_v12, %v7014_v5  ;;  %v6842_v21 = vadd.f32 %v6841_v59, %v6840_v8  ;;  %v7021_v12 = vsel %vm86_vm6, %v6936_v46, 0.0  ;;  %v14687_v59 = vld [vmem:[#allocation71_spill] sm:$0xff]  ;;  %v7023_v54 = vsel %vm86_vm6, %v6937_v15, 0.0 }
 0x737   :  { %v12319_v7 = vpop.f32.mrf.mxu2  ;;  %v12321_v17 = vpop.f32.mrf.mxu3  ;;  %vm1026_vm2 = vcmp.lt.s32.totalorder %v14687_v59, 13  ;;  %v12358_v46 = vmul.f32 %v12343_v22, %v11983_v9  ;;  %v6851_v15 = vsel %vm86_vm6, %v11980_v39, 0.0 }
 0x738   :  { %v12329_v11 = vpop.f32.mrf.mxu1  ;;  %v7018_v55 = vadd.f32 %v7017_v60, %v7016_v10  ;;  %v6844_v32 = vadd.f32 %v6843_v16, %v6842_v21  ;;  %v6939_v60 = vmul.f32 %v12231_v43, %v12231_v43  ;;  %v6849_v16 = vsel %vm86_vm6, %v12338_v35, 0.0 }
 0x739   :  { %v12361_v37 = vsel %vm1026_vm2, 1.0, %v14651_v61  ;;  %v6940_v43 = vmul.f32 %v12243_v29, %v12243_v29 }
 0x73a   :  { %v12340_v42 = vpop.f32.mrf.mxu0  ;;  %v7020_v5 = vadd.f32 %v7019_v40, %v7018_v55  ;;  %v6846_v8 = vadd.f32 %v6845_v28, %v6844_v32  ;;  %14688 = vst [vmem:[#allocation86_spill] sm:$0xff] %v12361_v37  ;;  %v7025_v40 = vsel %vm86_vm6, %v6938_v44, 0.0  ;;  %v14689_v28 = vld [vmem:[#allocation74_spill] sm:$0xff]  ;;  %v6853_v44 = vsel %vm86_vm6, %v12358_v46, 0.0 }
 0x73b   :  { %vm1028_vm9 = vcmp.lt.s32.totalorder %v14689_v28, 13  ;;  %v12382_v29 = vmul.f32 %v12361_v37, %v11991_v23 }
 0x73c   :  { %v7022_v10 = vadd.f32 %v7021_v12, %v7020_v5  ;;  %v6848_v21 = vadd.f32 %v6847_v52, %v6846_v8  ;;  %v7027_v5 = vsel %vm86_vm6, %v6939_v60, 0.0  ;;  %v6941_v8 = vmul.f32 %v12253_v19, %v12253_v19 }
 0x73d   :  { %v12387_v36 = vsel %vm1028_vm9, 1.0, %v14651_v61  ;;  %v6942_v60 = vmul.f32 %v12263_v26, %v12263_v26  ;;  %v6855_v19 = vsel %vm86_vm6, %v11988_v34, 0.0 }
 0x73e   :  { %v7024_v12 = vadd.f32 %v7023_v54, %v7022_v10  ;;  %v6850_v52 = vadd.f32 %v6849_v16, %v6848_v21  ;;  %14690 = vst [vmem:[#allocation20_spill] sm:$0xff] %v12387_v36  ;;  %v7029_v54 = vsel %vm86_vm6, %v6940_v43, 0.0  ;;  %v14691_v16 = vld [vmem:[#allocation76_spill] sm:$0xff]  ;;  %v7031_v37 = vsel %vm86_vm6, %v6941_v8, 0.0  ;;  %v14693_v8 = vld [vmem:[#allocation63_spill] sm:$0xff] }
 0x73f   :  { %v12363_v59 = vpop.f32.mrf.mxu2  ;;  %v12365_v55 = vpop.f32.mrf.mxu3  ;;  %vm1030_vm10 = vcmp.lt.s32.totalorder %v14691_v16, 13  ;;  %v12402_v43 = vmul.f32 %v12387_v36, %v11999_v53  ;;  %v14695_v53 = vld [vmem:[#allocation96_spill] sm:$0xff] }
 0x740   :  { %v12373_v32 = vpop.f32.mrf.mxu1  ;;  %v7026_v9 = vadd.f32 %v7025_v40, %v7024_v12  ;;  %v6852_v28 = vadd.f32 %v6851_v15, %v6850_v52  ;;  %v6943_v40 = vmul.f32 %v12271_v49, %v12271_v49  ;;  %v6857_v15 = vsel %vm86_vm6, %v12382_v29, 0.0 }
 0x741   :  { %v12405_v52 = vsel %vm1030_vm10, 1.0, %v14651_v61  ;;  %v6944_v49 = vmul.f32 %v12283_v3, %v12283_v3 }
 0x742   :  { %v12384_v22 = vpop.f32.mrf.mxu0  ;;  %v7028_v10 = vadd.f32 %v7027_v5, %v7026_v9  ;;  %v6854_v21 = vadd.f32 %v6853_v44, %v6852_v28  ;;  %14692 = vst [vmem:[#allocation35_spill] sm:$0xff] %v12405_v52  ;;  %v7033_v5 = vsel %vm86_vm6, %v6942_v60, 0.0  ;;  %v6859_v44 = vsel %vm86_vm6, %v14693_v8, 0.0  ;;  %v14694_v28 = vld [vmem:[#allocation78_spill] sm:$0xff] }
 0x743   :  { %vm1032_vm11 = vcmp.lt.s32.totalorder %v14694_v28, 13  ;;  %v6861_v60 = vsel %vm86_vm6, %v12402_v43, 0.0  ;;  %v12426_v3 = vmul.f32 %v12405_v52, %v14695_v53 }
 0x744   :  { %v7030_v26 = vadd.f32 %v7029_v54, %v7028_v10  ;;  %v6856_v12 = vadd.f32 %v6855_v19, %v6854_v21  ;;  %v7035_v10 = vsel %vm86_vm6, %v6943_v40, 0.0  ;;  %v6945_v21 = vmul.f32 %v12294_v48, %v12294_v48 }
 0x745   :  { %v12429_v28 = vsel %vm1032_vm11, 1.0, %v14651_v61  ;;  %v6946_v40 = vmul.f32 %v11964_v2, %v11964_v2 }
 0x746   :  { %v7032_v54 = vadd.f32 %v7031_v37, %v7030_v26  ;;  %v6858_v19 = vadd.f32 %v6857_v15, %v6856_v12  ;;  %14696 = vst [vmem:[#allocation41_spill] sm:$0xff] %v12429_v28  ;;  %v7037_v37 = vsel %vm86_vm6, %v6944_v49, 0.0  ;;  %v14697_v15 = vld [vmem:[#allocation38_spill] sm:$0xff]  ;;  %v14698_v26 = vld [vmem:[#allocation81_spill] sm:$0xff]  ;;  %v6865_v49 = vsel %vm86_vm6, %v12426_v3, 0.0 }
 0x747   :  { %v12407_v16 = vpop.f32.mrf.mxu2  ;;  %v12409_v9 = vpop.f32.mrf.mxu3  ;;  %v6863_v48 = vsel %vm86_vm6, %v14697_v15, 0.0  ;;  %vm1034_vm12 = vcmp.lt.s32.totalorder %v14698_v26, 13 }
 0x748   :  { %v12417_v36 = vpop.f32.mrf.mxu1  ;;  %v7034_v23 = vadd.f32 %v7033_v5, %v7032_v54  ;;  %v6860_v20 = vadd.f32 %v6859_v44, %v6858_v19  ;;  %v7039_v5 = vsel %vm86_vm6, %v6945_v21, 0.0  ;;  %v6947_v44 = vmul.f32 %v12314_v63, %v12314_v63  ;;  %v14700_v21 = vld [vmem:[#allocation79_spill] sm:$0xff] }
 0x749   :  { %v12446_v54 = vmul.f32 %v12429_v28, %v12015_v47  ;;  %v12449_v26 = vsel %vm1034_vm12, 1.0, %v14651_v61  ;;  %v6948_v63 = vmul.f32 %v11972_v4, %v11972_v4  ;;  %vm1036_vm13 = vcmp.lt.s32.totalorder %v14700_v21, 13 }
 0x74a   :  { %v12437_v12 = vpop.f32.mrf.mxu0  ;;  %v7036_v41 = vadd.f32 %v7035_v10, %v7034_v23  ;;  %v6862_v52 = vadd.f32 %v6861_v60, %v6860_v20  ;;  %14699 = vst [vmem:[#allocation18_spill] sm:$0xff] %v12449_v26  ;;  %v7041_v23 = vsel %vm86_vm6, %v6946_v40, 0.0  ;;  %v6867_v10 = vsel %vm86_vm6, %v12012_v50, 0.0 }
 0x74b   :  { %v7043_v40 = vsel %vm86_vm6, %v6947_v44, 0.0  ;;  %v6869_v28 = vsel %vm86_vm6, %v12446_v54, 0.0  ;;  %v12472_v47 = vmul.f32 %v12449_v26, %v12027_v24  ;;  %v14703_v44 = vld [vmem:[#allocation83_spill] sm:$0xff]  ;;  %v5810_v24 = vadd.f32 %v12274_v14, %v12245_v57 }
 0x74c   :  { %v7038_v19 = vadd.f32 %v7037_v37, %v7036_v41  ;;  %v6864_v53 = vadd.f32 %v6863_v48, %v6862_v52  ;;  %v6949_v41 = vmul.f32 %v12338_v35, %v12338_v35  ;;  %v5805_v37 = vadd.f32 %v12193_v51, %v12157_v45  ;;  %v14702_v51 = vld [vmem:[#allocation98_spill] sm:$0xff] }
 0x74d   :  { %v6950_v45 = vmul.f32 %v11980_v39, %v11980_v39  ;;  %v6871_v35 = vsel %vm86_vm6, %v14702_v51, 0.0  ;;  %vm1038_vm14 = vcmp.lt.s32.totalorder %v14703_v44, 13  ;;  %v14707_v44 = vld [vmem:[#allocation103_spill] sm:$0xff]  ;;  %v5808_v14 = vadd.f32 %v12233_v56, %v12203_v33 }
 0x74e   :  { %v7040_v60 = vadd.f32 %v7039_v5, %v7038_v19  ;;  %v6866_v52 = vadd.f32 %v6865_v49, %v6864_v53  ;;  %v12475_v19 = vsel %vm1036_vm13, 1.0, %v14651_v61  ;;  %v7045_v53 = vsel %vm86_vm6, %v6948_v63, 0.0 }
 0x74f   :  { %v12451_v2 = vpop.f32.mrf.mxu2  ;;  %v12453_v20 = vpop.f32.mrf.mxu3  ;;  %14701 = vst [vmem:[#allocation30_spill] sm:$0xff] %v12475_v19  ;;  %v7047_v4 = vsel %vm86_vm6, %v6949_v41, 0.0  ;;  %v5815_v33 = vadd.f32 %v12363_v59, %v12329_v11  ;;  %v6953_v11 = vmul.f32 %v12382_v29, %v12382_v29  ;;  %v6883_v29 = vsel %vm86_vm6, %v12179_v6, 0.0 }
 0x750   :  { %v12465_v48 = vpop.f32.mrf.mxu1  ;;  %v7042_v21 = vadd.f32 %v7041_v23, %v7040_v60  ;;  %v6868_v5 = vadd.f32 %v6867_v10, %v6866_v52  ;;  %v6263_v23 = vadd.f32 %v12195_v13, %v5805_v37  ;;  %v6873_v10 = vsel %vm86_vm6, %v12472_v47, 0.0  ;;  %v14704_v60 = vld [vmem:[#allocation106_spill] sm:$0xff]  ;;  %v14705_v52 = vld [vmem:[#allocation87_spill] sm:$0xff] }
 0x751   :  { %v12489_v63 = vmul.f32 %v12475_v19, %v14704_v60  ;;  %vm1040_vm15 = vcmp.lt.s32.totalorder %v14705_v52, 13  ;;  %v12499_v13 = vsel %vm1038_vm14, 1.0, %v14651_v61  ;;  %v6875_v52 = vsel %vm86_vm6, %v14707_v44, 0.0 }
 0x752   :  { %v7044_v49 = vadd.f32 %v7043_v40, %v7042_v21  ;;  %v6870_v26 = vadd.f32 %v6869_v28, %v6868_v5  ;;  %v12494_v39 = vpop.f32.mrf.mxu0  ;;  %v6951_v28 = vmul.f32 %v12358_v46, %v12358_v46  ;;  %14706 = vst [vmem:[#allocation43_spill] sm:$0xff] %v12499_v13  ;;  %v7049_v5 = vsel %vm86_vm6, %v6950_v45, 0.0 }
 0x753   :  { %v12510_v46 = vadd.f32 %v12168_v25, %v6263_v23  ;;  %v12516_v45 = vmul.f32 %v12499_v13, %v12137_v31  ;;  %v5813_v13 = vadd.f32 %v12319_v7, %v12286_v0  ;;  %v6267_v0 = vadd.f32 %v12365_v55, %v5815_v33 }
 0x754   :  { %v7046_v40 = vadd.f32 %v7045_v53, %v7044_v49  ;;  %v6872_v41 = vadd.f32 %v6871_v35, %v6870_v26  ;;  %v12507_v53 = vsel %vm1040_vm15, 1.0, %v14651_v61  ;;  %v6877_v26 = vsel %vm86_vm6, %v12489_v63, 0.0 }
 0x755   :  { %14708 = vst [vmem:[#allocation80_spill] sm:$0xff] %v12507_v53  ;;  %v6265_v35 = vadd.f32 %v12276_v58, %v5810_v24  ;;  %v7051_v56 = vsel %vm86_vm6, %v6951_v28, 0.0  ;;  %v5818_v58 = vadd.f32 %v12407_v16, %v12373_v32  ;;  %v6952_v24 = vmul.f32 %v11988_v34, %v11988_v34 }
 0x756   :  { %v7048_v57 = vadd.f32 %v7047_v4, %v7046_v40  ;;  %v6874_v19 = vadd.f32 %v6873_v10, %v6872_v41  ;;  %v14709_v10 = vld [vmem:[#allocation108_spill] sm:$0xff]  ;;  %v6264_v40 = vadd.f32 %v12235_v62, %v5808_v14  ;;  %v14710_v41 = vld [vmem:[#allocation89_spill] sm:$0xff]  ;;  %v6881_v62 = vsel %vm86_vm6, %v12516_v45, 0.0 }
 0x757   :  { %v5822_v37 = vpop.f32.mrf.mxu2  ;;  %v6200_v21 = vpop.f32.mrf.mxu3  ;;  %v6879_v25 = vsel %vm86_vm6, %v14709_v10, 0.0  ;;  %vm1042_vm0 = vcmp.lt.s32.totalorder %v14710_v41, 13  ;;  %v12541_v28 = vadd.f32 %v12255_v30, %v6265_v35  ;;  %v5820_v7 = vadd.f32 %v12451_v2, %v12417_v36 }
 0x758   :  { %v7050_v4 = vadd.f32 %v7049_v5, %v7048_v57  ;;  %v6876_v49 = vadd.f32 %v6875_v52, %v6874_v19  ;;  %v5547_v23 = vpop.f32.mrf.mxu1  ;;  %v12536_v19 = vmul.f32 %v12507_v53, %v12510_v46  ;;  %v12549_v16 = vsel %vm1042_vm0, 1.0, %v14651_v61  ;;  %v14712_v5 = vld [vmem:[#allocation91_spill] sm:$0xff] }
 0x759   :  { %14711 = vst [vmem:[#allocation27_spill] sm:$0xff] %v12549_v16  ;;  %vm1044_vm1 = vcmp.lt.s32.totalorder %v14712_v5, 13  ;;  %v12553_v57 = vadd.f32 %v12214_v27, %v6264_v40  ;;  %v6266_v30 = vadd.f32 %v12321_v17, %v5813_v13  ;;  %v6268_v55 = vadd.f32 %v12409_v9, %v5818_v58 }
 0x75a   :  { %v6878_v59 = vadd.f32 %v6877_v26, %v6876_v49  ;;  %v5823_v36 = vadd.f32 %v5822_v37, %v12465_v48  ;;  %v7053_v2 = vsel %vm86_vm6, %v6952_v24, 0.0  ;;  %v6954_v26 = vmul.f32 %v14693_v8, %v14693_v8  ;;  %v6644_v49 = vpop.f32.mrf.mxu0 }
 0x75b   :  { %v6885_v33 = vsel %vm86_vm6, %v12536_v19, 0.0  ;;  %v12565_v27 = vmul.f32 %v12549_v16, %v12541_v28  ;;  %v12568_v17 = vadd.f32 %v12340_v42, %v6267_v0  ;;  %v6269_v9 = vadd.f32 %v12453_v20, %v5820_v7  ;;  %v14753_v16 = vld [vmem:[#allocation16_spill] sm:$0xff] }
 0x75c   :  { %v6880_v32 = vadd.f32 %v6879_v25, %v6878_v59  ;;  %v7052_v13 = vadd.f32 %v7051_v56, %v7050_v4  ;;  %v7055_v37 = vsel %vm86_vm6, %v6953_v11, 0.0  ;;  %v12575_v40 = vsel %vm1044_vm1, 1.0, %v14651_v61 }
 0x75d   :  { %14713 = vst [vmem:[#allocation28_spill] sm:$0xff] %v12575_v40  ;;  %v6887_v41 = vsel %vm86_vm6, %v12553_v57, 0.0  ;;  %v12580_v58 = vadd.f32 %v12296_v18, %v6266_v30  ;;  %v12583_v42 = vadd.f32 %v12384_v22, %v6268_v55  ;;  %v6270_v20 = vadd.f32 %v6200_v21, %v5823_v36 }
 0x75e   :  { %v6882_v35 = vadd.f32 %v6881_v62, %v6880_v32  ;;  %v7057_v4 = vsel %vm86_vm6, %v6954_v26, 0.0  ;;  %v6955_v56 = vmul.f32 %v12402_v43, %v12402_v43  ;;  %v6889_v61 = vsel %vm86_vm6, %v12565_v27, 0.0 }
 0x75f   :  { %v5824_v52 = vpop.f32.mrf.mxu2  ;;  %v6202_v14 = vpop.f32.mrf.mxu3  ;;  %v12592_v59 = vmul.f32 %v12575_v40, %v12568_v17  ;;  %v12595_v18 = vadd.f32 %v12437_v12, %v6269_v9  ;;  %v6956_v62 = vmul.f32 %v14697_v15, %v14697_v15  ;;  %v6891_v32 = vsel %vm86_vm6, %v12580_v58, 0.0  ;;  %v14751_v40 = vld [vmem:[#allocation23_spill] sm:$0xff] }
 0x760   :  { %v5825_v48 = vadd.f32 %v5824_v52, %v5547_v23  ;;  %v6884_v25 = vadd.f32 %v6883_v29, %v6882_v35  ;;  %v7054_v23 = vadd.f32 %v7053_v2, %v7052_v13  ;;  %v5550_v11 = vpop.f32.mrf.mxu1  ;;  %v12602_v29 = vmul.f32 0.0, %v12583_v42 }
 0x761   :  { %v12605_v5 = vadd.f32 %v12494_v39, %v6270_v20  ;;  %v6957_v30 = vmul.f32 %v12426_v3, %v12426_v3  ;;  %v6893_v2 = vsel %vm86_vm6, %v12592_v59, 0.0  ;;  %v12613_v26 = vmul.f32 0.0, %v12595_v18 }
 0x762   :  { %v6886_v24 = vadd.f32 %v6885_v33, %v6884_v25  ;;  %v6271_v22 = vadd.f32 %v6202_v14, %v5825_v48  ;;  %v7056_v21 = vadd.f32 %v7055_v37, %v7054_v23  ;;  %v7059_v14 = vsel %vm86_vm6, %v6955_v56, 0.0  ;;  %v6647_v36 = vpop.f32.mrf.mxu0 }
 0x763   :  { %14714 = vst [vmem:[#allocation31_spill] sm:$0xff] %v12605_v5  ;;  %v7061_v39 = vsel %vm86_vm6, %v6956_v62, 0.0  ;;  %v6958_v9 = vmul.f32 %v12012_v50, %v12012_v50  ;;  %v6895_v3 = vsel %vm86_vm6, %v12602_v29, 0.0  ;;  %v12623_v37 = vmul.f32 0.0, %v12605_v5 }
 0x764   :  { %v6888_v0 = vadd.f32 %v6887_v41, %v6886_v24  ;;  %v7058_v12 = vadd.f32 %v7057_v4, %v7056_v21  ;;  %v12615_v35 = vadd.f32 %v6644_v49, %v6271_v22  ;;  %v7063_v41 = vsel %vm86_vm6, %v6957_v30, 0.0 }
 0x765   :  { %v6959_v49 = vmul.f32 %v12446_v54, %v12446_v54  ;;  %v6897_v4 = vsel %vm86_vm6, %v12613_v26, 0.0  ;;  %v7065_v24 = vsel %vm86_vm6, %v6958_v9, 0.0  ;;  %v6899_v54 = vsel %vm86_vm6, %v12623_v37, 0.0 }
 0x766   :  { %v6890_v55 = vadd.f32 %v6889_v61, %v6888_v0  ;;  %14715 = vst [vmem:[#allocation34_spill] sm:$0xff] %v12615_v35  ;;  %v7060_v13 = vadd.f32 %v7059_v14, %v7058_v12  ;;  %v12633_v56 = vmul.f32 0.0, %v12615_v35  ;;  %v14758_v35 = vld [vmem:[#allocation100_spill] sm:$0xff] }
 0x767   :  { %v5827_v7 = vpop.f32.mrf.mxu2  ;;  %v6205_v43 = vpop.f32.mrf.mxu3 }
 0x768   :  { %v5828_v52 = vadd.f32 %v5827_v7, %v5550_v11  ;;  %v6892_v48 = vadd.f32 %v6891_v32, %v6890_v55  ;;  %v7062_v23 = vadd.f32 %v7061_v39, %v7060_v13  ;;  %v6960_v11 = vmul.f32 %v14702_v51, %v14702_v51  ;;  %v5552_v22 = vpop.f32.mrf.mxu1 }
 0x769   :  { %v6961_v32 = vmul.f32 %v12472_v47, %v12472_v47  ;;  %v6901_v30 = vsel %vm86_vm6, %v12633_v56, 0.0 }
 0x76a   :  { %v6272_v33 = vadd.f32 %v6205_v43, %v5828_v52  ;;  %v6894_v20 = vadd.f32 %v6893_v2, %v6892_v48  ;;  %v7064_v62 = vadd.f32 %v7063_v41, %v7062_v23  ;;  %v7067_v43 = vsel %vm86_vm6, %v6959_v49, 0.0  ;;  %v6649_v39 = vpop.f32.mrf.mxu0 }
 0x76b   :  { %v6962_v2 = vmul.f32 %v14707_v44, %v14707_v44  ;;  %v7071_v47 = vsel %vm86_vm6, %v6961_v32, 0.0 }
 0x76c   :  { %v12625_v25 = vadd.f32 %v6647_v36, %v6272_v33  ;;  %v6896_v61 = vadd.f32 %v6895_v3, %v6894_v20  ;;  %v7066_v14 = vadd.f32 %v7065_v24, %v7064_v62  ;;  %v7069_v36 = vsel %vm86_vm6, %v6960_v11, 0.0 }
 0x76d   :  { %v6963_v3 = vmul.f32 %v12489_v63, %v12489_v63  ;;  %v7073_v23 = vsel %vm86_vm6, %v6962_v2, 0.0  ;;  %v6969_v2 = vmul.f32 %v12565_v27, %v12565_v27  ;;  %v6972_v27 = vmul.f32 %v12602_v29, %v12602_v29 }
 0x76e   :  { %14716 = vst [vmem:[#allocation36_spill] sm:$0xff] %v12625_v25  ;;  %v12641_v0 = vmul.f32 0.0, %v12625_v25  ;;  %v6898_v52 = vadd.f32 %v6897_v4, %v6896_v61  ;;  %v7068_v9 = vadd.f32 %v7067_v43, %v7066_v14  ;;  %v6964_v4 = vmul.f32 %v14709_v10, %v14709_v10 }
 0x76f   :  { %v5829_v21 = vpop.f32.mrf.mxu2  ;;  %v6207_v12 = vpop.f32.mrf.mxu3 }
 0x770   :  { %v5830_v7 = vadd.f32 %v5829_v21, %v5552_v22  ;;  %v6900_v33 = vadd.f32 %v6899_v54, %v6898_v52  ;;  %v6903_v48 = vsel %vm86_vm6, %v12641_v0, 0.0  ;;  %v7070_v49 = vadd.f32 %v7069_v36, %v7068_v9 }
 0x771   :  { %v7075_v22 = vsel %vm86_vm6, %v6963_v3, 0.0  ;;  %v6965_v21 = vmul.f32 %v12516_v45, %v12516_v45  ;;  %v7077_v54 = vsel %vm86_vm6, %v6964_v4, 0.0  ;;  %v6967_v52 = vmul.f32 %v12536_v19, %v12536_v19 }
 0x772   :  { %v6273_v55 = vadd.f32 %v6207_v12, %v5830_v7  ;;  %v6902_v41 = vadd.f32 %v6901_v30, %v6900_v33  ;;  %v7072_v11 = vadd.f32 %v7071_v47, %v7070_v49  ;;  %v6966_v7 = vmul.f32 %v12179_v6, %v12179_v6 }
 0x773   :  { %v7079_v32 = vsel %vm86_vm6, %v6965_v21, 0.0  ;;  %v6968_v45 = vmul.f32 %v12553_v57, %v12553_v57  ;;  %v7083_v36 = vsel %vm86_vm6, %v6967_v52, 0.0  ;;  %v6970_v19 = vmul.f32 %v12580_v58, %v12580_v58 }
 0x774   :  { %v12653_v13 = vadd.f32 %v6649_v39, %v6273_v55  ;;  %v6904_v24 = vadd.f32 %v6903_v48, %v6902_v41  ;;  %v7074_v63 = vadd.f32 %v7073_v23, %v7072_v11  ;;  %v7081_v30 = vsel %vm86_vm6, %v6966_v7, 0.0 }
 0x775   :  { %v7085_v9 = vsel %vm86_vm6, %v6968_v45, 0.0  ;;  %v7087_v47 = vsel %vm86_vm6, %v6969_v2, 0.0  ;;  %v6971_v3 = vmul.f32 %v12592_v59, %v12592_v59  ;;  %v7089_v23 = vsel %vm86_vm6, %v6970_v19, 0.0 }
 0x776   :  { %14717 = vst [vmem:[#allocation40_spill] sm:$0xff] %v12653_v13  ;;  %v6779_v20 = vmul.f32 0.0, %v12653_v13  ;;  %v7076_v43 = vadd.f32 %v7075_v22, %v7074_v63  ;;  %v6973_v11 = vmul.f32 %v12613_v26, %v12613_v26  ;;  %v7093_v21 = vsel %vm86_vm6, %v6972_v27, 0.0  ;;  %v14757_v13 = vld [vmem:[#allocation97_spill] sm:$0xff] }
 0x777   :  { %v6974_v59 = vmul.f32 %v12623_v37, %v12623_v37  ;;  %v6976_v26 = vmul.f32 %v12641_v0, %v12641_v0  ;;  %v14733_v0 = vld [vmem:[#allocation54_spill] sm:$0xff] }
 0x778   :  { %v6905_v61 = vsel %vm86_vm6, %v6779_v20, 0.0  ;;  %v7078_v14 = vadd.f32 %v7077_v54, %v7076_v43  ;;  %v7095_v63 = vsel %vm86_vm6, %v6973_v11, 0.0  ;;  %v6975_v54 = vmul.f32 %v12633_v56, %v12633_v56 }
 0x779   :  { %v6906_v62 = vadd.f32 %v6905_v61, %v6904_v24  ;;  %v7091_v24 = vsel %vm86_vm6, %v6971_v3, 0.0  ;;  %v7097_v43 = vsel %vm86_vm6, %v6974_v59, 0.0  ;;  %v7101_v37 = vsel %vm86_vm6, %v6976_v26, 0.0  ;;  %v14746_v26 = vld [vmem:[#allocation29_spill] sm:$0xff] }
 0x77a   :  { %v7080_v55 = vadd.f32 %v7079_v32, %v7078_v14  ;;  %v7099_v52 = vsel %vm86_vm6, %v6975_v54, 0.0  ;;  %v6977_v14 = vmul.f32 %v6779_v20, %v6779_v20  ;;  %v14720_v54 = vld [vmem:[#allocation50_spill] sm:$0xff]  ;;  %v14732_v20 = vld [vmem:[#allocation37_spill] sm:$0xff] }
 0x77b   :  { %v6907_v12 = vrot.slane %v6906_v62, 4  ;;  %v14755_v59 = vld [vmem:[#allocation33_spill] sm:$0xff] }
 0x77c   :  { %v7082_v39 = vadd.f32 %v7081_v30, %v7080_v55  ;;  %v7103_v56 = vsel %vm86_vm6, %v6977_v14, 0.0 }
 0x77d   :  { %v6908_v33 = vadd.f32 %v6907_v12, %v6906_v62 }
 0x77e   :  { %v7084_v48 = vadd.f32 %v7083_v36, %v7082_v39  ;;  %v14739_v39 = vld [vmem:[#allocation21_spill] sm:$0xff] }
 0x77f   :  { %v6909_v41 = vrot.slane %v6908_v33, 2 }
 0x780   :  { %v7086_v49 = vadd.f32 %v7085_v9, %v7084_v48 }
 0x781   :  { %v6910_v61 = vadd.f32 %v6909_v41, %v6908_v33  ;;  %v14740_v33 = vld [vmem:[#allocation57_spill] sm:$0xff] }
 0x782   :  { %v7088_v4 = vadd.f32 %v7087_v47, %v7086_v49 }
 0x783   :  { %v6911_v29 = vrot.slane %v6910_v61, 1 }
 0x784   :  { %v7090_v22 = vadd.f32 %v7089_v23, %v7088_v4 }
 0x785   :  { %v6912_v12 = vadd.f32 %v6911_v29, %v6910_v61  ;;  %v14754_v29 = vld [vmem:[#allocation25_spill] sm:$0xff] }
 0x786   :  { %v7092_v62 = vadd.f32 %v7091_v24, %v7090_v22 }
 0x787   :  { %v12701_v55 = vmul.f32 0.00295858, %v6912_v12  ;;  %v14723_v12 = vld [vmem:[#allocation64_spill] sm:$0xff] }
 0x788   :  { %v7094_v7 = vadd.f32 %v7093_v21, %v7092_v62  ;;  %v14718_v21 = vld [vmem:[#allocation46_spill] sm:$0xff]  ;;  %v14719_v62 = vld [vmem:[#allocation53_spill] sm:$0xff] }
 0x789   :  { %v7112_v23 = vmul.f32 %v12701_v55, %v12701_v55  ;;  %v7159_v53 = vsub.f32 %v12012_v50, %v12701_v55  ;;  %v7160_v34 = vsub.f32 %v14757_v13, %v12701_v55  ;;  %v7161_v25 = vsub.f32 %v14702_v51, %v12701_v55 }
 0x78a   :  { %v7096_v32 = vadd.f32 %v7095_v63, %v7094_v7  ;;  %v14721_v7 = vld [vmem:[#allocation56_spill] sm:$0xff]  ;;  %v7162_v8 = vsub.f32 %v14758_v35, %v12701_v55  ;;  %v7164_v14 = vsub.f32 %v14704_v60, %v12701_v55  ;;  %v7166_v13 = vsub.f32 %v12137_v31, %v12701_v55 }
 0x78b   :  { %v14749_v63 = vld [vmem:[#allocation44_spill] sm:$0xff]  ;;  %v7167_v51 = vsub.f32 %v12179_v6, %v12701_v55  ;;  %v7168_v35 = vsub.f32 %v12510_v46, %v12701_v55  ;;  %v7170_v60 = vsub.f32 %v12541_v28, %v12701_v55  ;;  %v7173_v31 = vsub.f32 %v12583_v42, %v12701_v55 }
 0x78c   :  { %v7098_v30 = vadd.f32 %v7097_v43, %v7096_v32  ;;  %v14722_v32 = vld [vmem:[#allocation61_spill] sm:$0xff]  ;;  %v14747_v43 = vld [vmem:[#allocation15_spill] sm:$0xff]  ;;  %v7174_v6 = vsub.f32 %v12595_v18, %v12701_v55  ;;  %v14759_v46 = vsub.f32 %v14718_v21, %v12701_v55  ;;  %v14760_v28 = vsub.f32 %v14719_v62, %v12701_v55 }
 0x78d   :  { %v14762_v18 = vsub.f32 %v14721_v7, %v12701_v55 }
 0x78e   :  { %v7100_v45 = vadd.f32 %v7099_v52, %v7098_v30  ;;  %v14724_v30 = vld [vmem:[#allocation65_spill] sm:$0xff] }
 0x790   :  { %v7102_v36 = vadd.f32 %v7101_v37, %v7100_v45 }
 0x792   :  { %v7104_v2 = vadd.f32 %v7103_v56, %v7102_v36  ;;  %v14725_v36 = vld [vmem:[#allocation66_spill] sm:$0xff]  ;;  %v14743_v56 = vld [vmem:[#allocation51_spill] sm:$0xff] }
 0x794   :  { %v7105_v9 = vrot.slane %v7104_v2, 4 }
 0x796   :  { %v7106_v19 = vadd.f32 %v7105_v9, %v7104_v2  ;;  %v14726_v9 = vld [vmem:[#allocation70_spill] sm:$0xff]  ;;  %v14742_v2 = vld [vmem:[#allocation88_spill] sm:$0xff] }
 0x798   :  { %v7107_v48 = vrot.slane %v7106_v19, 2 }
 0x79a   :  { %v7108_v47 = vadd.f32 %v7107_v48, %v7106_v19  ;;  %v14727_v48 = vld [vmem:[#allocation72_spill] sm:$0xff] }
 0x79b   :  { %v14741_v19 = vld [vmem:[#allocation68_spill] sm:$0xff] }
 0x79c   :  { %v7109_v3 = vrot.slane %v7108_v47, 1 }
 0x79e   :  { %v7110_v41 = vadd.f32 %v7109_v3, %v7108_v47  ;;  %v14728_v3 = vld [vmem:[#allocation82_spill] sm:$0xff]  ;;  %v14734_v47 = vld [vmem:[#allocation59_spill] sm:$0xff] }
 0x7a0   :  { %v7111_v49 = vmul.f32 0.00295858, %v7110_v41  ;;  %v14735_v41 = vld [vmem:[#allocation22_spill] sm:$0xff] }
 0x7a2   :  { %v7113_v27 = vsub.f32 %v7111_v49, %v7112_v23  ;;  %v14729_v49 = vld [vmem:[#allocation90_spill] sm:$0xff]  ;;  %v14736_v23 = vld [vmem:[#allocation73_spill] sm:$0xff] }
 0x7a4   :  { %v7114_v4 = vmax.f32 %v7113_v27, 0.0  ;;  %v14730_v27 = vld [vmem:[#allocation26_spill] sm:$0xff] }
 0x7a6   :  { %v7179_v24 = vadd.f32 1e-05, %v7114_v4  ;;  %v14737_v4 = vld [vmem:[#allocation85_spill] sm:$0xff] }
 0x7a8   :  { %8265 = vrsqrt.f32 %v7179_v24  ;;  %vm7186_vm3 = vweird.f32 %v7179_v24 }
 0x7ae   :  { %v8266_v11 = vpop.eup %8265 }
 0x7af   :  { %v7181_v61 = vmul.f32 %v8266_v11, %v7179_v24  ;;  %vm7187_vm6 = vweird.f32 %v8266_v11  ;;  %v7165_v24 = vsub.f32 %v14709_v10, %v12701_v55  ;;  %v7171_v10 = vsub.f32 %v12580_v58, %v12701_v55 }
 0x7b0   :  { %vm7188_vm4 = vmor %vm7186_vm3, %vm7187_vm6 }
 0x7b1   :  { %v7182_v22 = vmul.f32 %v8266_v11, %v7181_v61  ;;  %v14731_v61 = vld [vmem:[#allocation32_spill] sm:$0xff] }
 0x7b3   :  { %v7183_v45 = vmul.f32 0.5, %v7182_v22  ;;  %v14738_v22 = vld [vmem:[#allocation24_spill] sm:$0xff] }
 0x7b5   :  { %v7184_v52 = vsub.f32 1.5, %v7183_v45  ;;  %v7163_v45 = vsub.f32 %v14707_v44, %v12701_v55  ;;  %v7169_v44 = vsub.f32 %v12553_v57, %v12701_v55 }
 0x7b7   :  { %v7185_v37 = vmul.f32 %v8266_v11, %v7184_v52  ;;  %v14756_v52 = vld [vmem:[#allocation96_spill] sm:$0xff] }
 0x7b9   :  { %v12816_v50 = vsel %vm7188_vm4, %v8266_v11, %v7185_v37  ;;  %v7172_v11 = vsub.f32 %v12568_v17, %v12701_v55  ;;  %v14761_v17 = vsub.f32 %v14720_v54, %v12701_v55  ;;  %v14763_v37 = vsub.f32 %v11852_v1, %v12701_v55 }
 0x7ba   :  { %v12840_v57 = vmul.f32 %v12816_v50, %v14759_v46  ;;  %v12846_v58 = vmul.f32 %v12816_v50, %v14760_v28  ;;  %v12858_v21 = vmul.f32 %v12816_v50, %v14762_v18  ;;  %v14764_v46 = vsub.f32 %v14722_v32, %v12701_v55 }
 0x7bb   :  { %v12852_v42 = vmul.f32 %v12816_v50, %v14761_v17  ;;  %v12864_v62 = vmul.f32 %v12816_v50, %v14763_v37  ;;  %v14765_v28 = vsub.f32 %v14723_v12, %v12701_v55  ;;  %v14766_v17 = vsub.f32 %v14724_v30, %v12701_v55 }
 0x7bc   :  { %v12870_v54 = vmul.f32 %v12816_v50, %v14764_v46  ;;  %v14767_v18 = vsub.f32 %v11868_v38, %v12701_v55  ;;  %v14768_v37 = vsub.f32 %v14725_v36, %v12701_v55  ;;  %v14769_v46 = vsub.f32 %v14726_v9, %v12701_v55 }
 0x7bd   :  { %v12876_v7 = vmul.f32 %v12816_v50, %v14765_v28  ;;  %v12882_v1 = vmul.f32 %v12816_v50, %v14766_v17  ;;  %v14770_v28 = vsub.f32 %v14727_v48, %v12701_v55  ;;  %v14771_v17 = vsub.f32 %v14728_v3, %v12701_v55 }
 0x7be   :  { %v12888_v32 = vmul.f32 %v12816_v50, %v14767_v18  ;;  %v12894_v12 = vmul.f32 %v12816_v50, %v14768_v37  ;;  %v12900_v30 = vmul.f32 %v12816_v50, %v14769_v46  ;;  %v14772_v18 = vsub.f32 %v14729_v49, %v12701_v55 }
 0x7bf   :  { %v12906_v38 = vmul.f32 %v12816_v50, %v14770_v28  ;;  %v12912_v36 = vmul.f32 %v12816_v50, %v14771_v17  ;;  %v14773_v37 = vsub.f32 %v14730_v27, %v12701_v55  ;;  %v14774_v46 = vsub.f32 %v14731_v61, %v12701_v55 }
 0x7c0   :  { %v12918_v9 = vmul.f32 %v12816_v50, %v14772_v18  ;;  %v14775_v28 = vsub.f32 %v14732_v20, %v12701_v55  ;;  %v14776_v17 = vsub.f32 %v14733_v0, %v12701_v55  ;;  %v14777_v18 = vsub.f32 %v14734_v47, %v12701_v55 }
 0x7c1   :  { %v12924_v48 = vmul.f32 %v12816_v50, %v14773_v37  ;;  %v12930_v3 = vmul.f32 %v12816_v50, %v14774_v46  ;;  %v14778_v37 = vsub.f32 %v14735_v41, %v12701_v55  ;;  %v14779_v46 = vsub.f32 %v14736_v23, %v12701_v55 }
 0x7c2   :  { %v12936_v49 = vmul.f32 %v12816_v50, %v14775_v28  ;;  %v12942_v27 = vmul.f32 %v12816_v50, %v14776_v17  ;;  %v12948_v61 = vmul.f32 %v12816_v50, %v14777_v18  ;;  %v14780_v28 = vsub.f32 %v14737_v4, %v12701_v55 }
 0x7c3   :  { %v12954_v20 = vmul.f32 %v12816_v50, %v14778_v37  ;;  %v12960_v0 = vmul.f32 %v12816_v50, %v14779_v46  ;;  %v14781_v17 = vsub.f32 %v14738_v22, %v12701_v55  ;;  %v14782_v18 = vsub.f32 %v14739_v39, %v12701_v55 }
 0x7c4   :  { %v12966_v47 = vmul.f32 %v12816_v50, %v14780_v28  ;;  %v14783_v37 = vsub.f32 %v14740_v33, %v12701_v55  ;;  %v14784_v46 = vsub.f32 %v14741_v19, %v12701_v55  ;;  %v14785_v28 = vsub.f32 %v14742_v2, %v12701_v55 }
 0x7c5   :  { %v12972_v41 = vmul.f32 %v12816_v50, %v14781_v17  ;;  %v12978_v23 = vmul.f32 %v12816_v50, %v14782_v18  ;;  %v14786_v17 = vsub.f32 %v14743_v56, %v12701_v55  ;;  %v14787_v18 = vld [vmem:[#allocation93_spill] sm:$0xff] }
 0x7c6   :  { %v12984_v4 = vmul.f32 %v12816_v50, %v14783_v37  ;;  %v12990_v22 = vmul.f32 %v12816_v50, %v14784_v46  ;;  %v12996_v39 = vmul.f32 %v12816_v50, %v14785_v28  ;;  %v14788_v37 = vsub.f32 %v14787_v18, %v12701_v55  ;;  %v14790_v46 = vld [vmem:[#allocation94_spill] sm:$0xff] }
 0x7c7   :  { %v13002_v33 = vmul.f32 %v12816_v50, %v14786_v17  ;;  %v14791_v5 = vsub.f32 %v14790_v46, %v12701_v55  ;;  %v14792_v28 = vsub.f32 %v14746_v26, %v12701_v55  ;;  %v14794_v17 = vsub.f32 %v14747_v43, %v12701_v55 }
 0x7c8   :  { %v13008_v19 = vmul.f32 %v12816_v50, %v14788_v37  ;;  %v14795_v37 = vld [vmem:[#allocation17_spill] sm:$0xff] }
 0x7c9   :  { %v13014_v2 = vmul.f32 %v12816_v50, %v14791_v5  ;;  %v13020_v56 = vmul.f32 %v12816_v50, %v14792_v28  ;;  %v13026_v18 = vmul.f32 %v12816_v50, %v14794_v17  ;;  %v14798_v5 = vsub.f32 %v14749_v63, %v12701_v55  ;;  %v14799_v28 = vld [vmem:[#allocation49_spill] sm:$0xff] }
 0x7ca   :  { %14789 = vst [vmem:[#allocation42_spill] sm:$0xff] %v13008_v19  ;;  %v14796_v19 = vsub.f32 %v14795_v37, %v12701_v55  ;;  %v14802_v17 = vsub.f32 %v14751_v40, %v12701_v55 }
 0x7cb   :  { %14793 = vst [vmem:[#allocation47_spill] sm:$0xff] %v13020_v56  ;;  %v13038_v26 = vmul.f32 %v12816_v50, %v14798_v5  ;;  %v14800_v56 = vsub.f32 %v14799_v28, %v12701_v55  ;;  %v14806_v5 = vsub.f32 %v14753_v16, %v12701_v55 }
 0x7cc   :  { %v13032_v46 = vmul.f32 %v12816_v50, %v14796_v19  ;;  %v13050_v37 = vmul.f32 %v12816_v50, %v14802_v17  ;;  %v14803_v19 = vld [vmem:[#allocation14_spill] sm:$0xff]  ;;  %v14809_v17 = vsub.f32 %v14754_v29, %v12701_v55 }
 0x7cd   :  { %v13044_v43 = vmul.f32 %v12816_v50, %v14800_v56  ;;  %v13062_v28 = vmul.f32 %v12816_v50, %v14806_v5  ;;  %v14807_v56 = vld [vmem:[#allocation19_spill] sm:$0xff]  ;;  %v14812_v5 = vsub.f32 %v14755_v59, %v12701_v55  ;;  %v13104_v59 = vmul.f32 %v12816_v50, %v7160_v34 }
 0x7ce   :  { %14797 = vst [vmem:[#allocation45_spill] sm:$0xff] %v13032_v46  ;;  %v14804_v46 = vsub.f32 %v14803_v19, %v12701_v55  ;;  %v13074_v19 = vmul.f32 %v12816_v50, %v14809_v17  ;;  %v14814_v17 = vsub.f32 %v14756_v52, %v12701_v55  ;;  %v13116_v52 = vmul.f32 %v12816_v50, %v7164_v14 }
 0x7cf   :  { %14801 = vst [vmem:[#allocation48_spill] sm:$0xff] %v13044_v43  ;;  %v14808_v43 = vsub.f32 %v14807_v56, %v12701_v55  ;;  %v13086_v56 = vmul.f32 %v12816_v50, %v14812_v5  ;;  %v13107_v5 = vmul.f32 %v12816_v50, %v7161_v25  ;;  %v13124_v34 = vmul.f32 %v12816_v50, %v7166_v13 }
 0x7d0   :  { %v13056_v63 = vmul.f32 %v12816_v50, %v14804_v46  ;;  %v14810_v46 = vld [vmem:[#allocation63_spill] sm:$0xff]  ;;  %v13127_v25 = vmul.f32 %v12816_v50, %v7167_v51  ;;  %v13136_v14 = vmul.f32 %v12816_v50, %v7170_v60  ;;  %v13145_v13 = vmul.f32 %v12816_v50, %v7173_v31  ;;  %v14825_v60 = vld [vmem:[#allocation34_spill] sm:$0xff] }
 0x7d1   :  { %v13068_v40 = vmul.f32 %v12816_v50, %v14808_v43  ;;  %v14813_v43 = vsub.f32 %v14697_v15, %v12701_v55  ;;  %v13110_v15 = vmul.f32 %v12816_v50, %v7162_v8  ;;  %v13130_v8 = vmul.f32 %v12816_v50, %v7168_v35  ;;  %v14822_v35 = vld [vmem:[#allocation31_spill] sm:$0xff] }
 0x7d2   :  { %14805 = vst [vmem:[#allocation52_spill] sm:$0xff] %v13056_v63  ;;  %v14811_v63 = vsub.f32 %v14810_v46, %v12701_v55  ;;  %v13098_v46 = vmul.f32 %v12816_v50, %v14814_v17  ;;  %v13119_v17 = vmul.f32 %v12816_v50, %v7165_v24  ;;  %v13139_v24 = vmul.f32 %v12816_v50, %v7171_v10 }
 0x7d3   :  { %v13092_v29 = vmul.f32 %v12816_v50, %v14813_v43  ;;  %v13113_v43 = vmul.f32 %v12816_v50, %v7163_v45  ;;  %14816 = vst [vmem:[#allocation58_spill] sm:$0xff] %v13130_v8  ;;  %v13133_v45 = vmul.f32 %v12816_v50, %v7169_v44  ;;  %v13148_v51 = vmul.f32 %v12816_v50, %v7174_v6  ;;  %v14831_v6 = vld [vmem:[#allocation40_spill] sm:$0xff] }
 0x7d4   :  { %v13080_v16 = vmul.f32 %v12816_v50, %v14811_v63  ;;  %v13101_v63 = vmul.f32 %v12816_v50, %v7159_v53  ;;  %14815 = vst [vmem:[#allocation55_spill] sm:$0xff] %v13119_v17  ;;  %v13121_v53 = vld [vmem:[#allocation9 + $0x4] ss:$0 sm:$0xff]  ;;  %v13142_v17 = vmul.f32 %v12816_v50, %v7172_v11  ;;  %v14823_v8 = vsub.f32 %v14822_v35, %v12701_v55  ;;  %v14828_v11 = vld [vmem:[#allocation36_spill] sm:$0xff] }
 0x7d5   :  { %14817 = vst [vmem:[#allocation62_spill] sm:$0xff] %v13136_v14  ;;  %v14826_v14 = vsub.f32 %v14825_v60, %v12701_v55  ;;  %v7256_v60 = vmul.f32 %v13121_v53, %v12846_v58  ;;  %v7263_v58 = vmul.f32 %v13121_v53, %v12888_v32  ;;  %v7270_v32 = vmul.f32 %v13121_v53, %v12930_v3 }
 0x7d6   :  { %14818 = vst [vmem:[#allocation67_spill] sm:$0xff] %v13139_v24  ;;  %v13154_v44 = vmul.f32 %v12816_v50, %v14823_v8  ;;  %v7255_v8 = vmul.f32 %v13121_v53, %v12840_v57  ;;  %v7262_v57 = vmul.f32 %v13121_v53, %v12882_v1  ;;  %v13208_v1 = vmul.f32 %v13121_v53, %v12924_v48 }
 0x7d7   :  { %14819 = vst [vmem:[#allocation69_spill] sm:$0xff] %v13142_v17  ;;  %v13160_v10 = vmul.f32 %v12816_v50, %v14826_v14  ;;  %v14829_v17 = vsub.f32 %v14828_v11, %v12701_v55  ;;  %v7257_v14 = vmul.f32 %v13121_v53, %v12852_v42  ;;  %v7258_v11 = vmul.f32 %v13121_v53, %v12858_v21 }
 0x7d8   :  { %14820 = vst [vmem:[#allocation71_spill] sm:$0xff] %v13145_v13  ;;  %v7264_v42 = vmul.f32 %v13121_v53, %v12894_v12  ;;  %v7265_v21 = vmul.f32 %v13121_v53, %v12900_v30  ;;  %v13214_v12 = vmul.f32 %v13121_v53, %v12936_v49  ;;  %v13218_v30 = vmul.f32 %v13121_v53, %v12942_v27 }
 0x7d9   :  { %14821 = vst [vmem:[#allocation74_spill] sm:$0xff] %v13148_v51  ;;  %v13166_v31 = vmul.f32 %v12816_v50, %v14829_v17  ;;  %v14832_v51 = vsub.f32 %v14831_v6, %v12701_v55  ;;  %v7259_v17 = vmul.f32 %v13121_v53, %v12864_v62  ;;  %v7260_v55 = vmul.f32 %v13121_v53, %v12870_v54 }
 0x7da   :  { %14824 = vst [vmem:[#allocation76_spill] sm:$0xff] %v13154_v44  ;;  %v7266_v62 = vmul.f32 %v13121_v53, %v12906_v38  ;;  %v13202_v54 = vmul.f32 %v13121_v53, %v12912_v36  ;;  %v13222_v38 = vmul.f32 %v13121_v53, %v12948_v61  ;;  %v13226_v36 = vmul.f32 %v13121_v53, %v12954_v20 }
 0x7db   :  { %14827 = vst [vmem:[#allocation78_spill] sm:$0xff] %v13160_v10  ;;  %v13172_v35 = vmul.f32 %v12816_v50, %v14832_v51  ;;  %v7261_v50 = vmul.f32 %v13121_v53, %v12876_v7  ;;  %v13188_v51 = vld [vmem:[#allocation9 + $0x5] ss:$0 sm:$0xff]  ;;  %v7268_v7 = vmul.f32 %v13121_v53, %v12918_v9  ;;  %v13230_v9 = vmul.f32 %v13121_v53, %v12960_v0  ;;  %v14837_v10 = vld [vmem:[#allocation48_spill] sm:$0xff] }
 0x7dc   :  { %14830 = vst [vmem:[#allocation38_spill] sm:$0xff] %v13166_v31  ;;  %v13234_v48 = vmul.f32 %v13121_v53, %v12966_v47  ;;  %v7321_v3 = vadd.f32 %v13188_v51, %v7256_v60  ;;  %v13239_v49 = vmul.f32 %v13121_v53, %v12972_v41  ;;  %v13243_v27 = vmul.f32 %v13121_v53, %v12978_v23  ;;  %v14834_v41 = vld [vmem:[#allocation42_spill] sm:$0xff] }
 0x7dd   :  { %14833 = vst [vmem:[#allocation81_spill] sm:$0xff] %v13172_v35  ;;  %v13247_v61 = vmul.f32 %v13121_v53, %v12984_v4  ;;  %v13251_v20 = vmul.f32 %v13121_v53, %v12990_v22  ;;  %v13255_v0 = vmul.f32 %v13121_v53, %v12996_v39  ;;  %v13259_v47 = vmul.f32 %v13121_v53, %v13002_v33  ;;  %v14835_v22 = vld [vmem:[#allocation47_spill] sm:$0xff]  ;;  %v14836_v35 = vld [vmem:[#allocation45_spill] sm:$0xff] }
 0x7de   :  { %v13263_v23 = vmul.f32 %v13121_v53, %v14834_v41  ;;  %v7323_v6 = vadd.f32 %v13188_v51, %v7258_v11  ;;  %v13268_v4 = vmul.f32 %v13121_v53, %v13014_v2  ;;  %v13272_v60 = vmul.f32 %v13121_v53, %v14835_v22 }
 0x7df   :  { %v13276_v39 = vmul.f32 %v13121_v53, %v13026_v18  ;;  %v7320_v33 = vadd.f32 %v13188_v51, %v7255_v8  ;;  %v13281_v41 = vmul.f32 %v13121_v53, %v14836_v35  ;;  %v13285_v11 = vmul.f32 %v13121_v53, %v13038_v26  ;;  %v14838_v8 = vld [vmem:[#allocation52_spill] sm:$0xff] }
 0x7e0   :  { %v7325_v2 = vadd.f32 %v13188_v51, %v7260_v55  ;;  %v7385_v31 = vmax.f32 %v7321_v3, 0.0  ;;  %v13290_v22 = vmul.f32 %v13121_v53, %v14837_v10  ;;  %v13294_v18 = vmul.f32 %v13121_v53, %v13050_v37 }
 0x7e1   :  { %v13298_v44 = vmul.f32 %v13121_v53, %v14838_v8  ;;  %v7322_v35 = vadd.f32 %v13188_v51, %v7257_v14  ;;  %v13303_v26 = vmul.f32 %v13121_v53, %v13062_v28  ;;  %v13307_v55 = vmul.f32 %v13121_v53, %v13068_v40 }
 0x7e2   :  { %v7327_v10 = vadd.f32 %v13188_v51, %v7262_v57  ;;  %v7387_v3 = vmax.f32 %v7323_v6, 0.0  ;;  %v13312_v37 = vmul.f32 %v13121_v53, %v13074_v19  ;;  %v13316_v8 = vmul.f32 %v13121_v53, %v13080_v16  ;;  %v14842_v57 = vld [vmem:[#allocation99_spill] sm:$0xff] }
 0x7e3   :  { %14839 = vst [vmem:[#allocation79_spill] sm:$0xff] %v13307_v55  ;;  %v7324_v14 = vadd.f32 %v13188_v51, %v7259_v17  ;;  %v7384_v13 = vmax.f32 %v7320_v33, 0.0  ;;  %v13321_v28 = vmul.f32 %v13121_v53, %v13086_v56  ;;  %v7329_v40 = vadd.f32 %v13188_v51, %v7264_v42 }
 0x7e4   :  { %14840 = vst [vmem:[#allocation98_spill] sm:$0xff] %v13316_v8  ;;  %v7389_v55 = vmax.f32 %v7325_v2, 0.0  ;;  %v7449_v6 = vmul.f32 %v14842_v57, %v7385_v31  ;;  %v13327_v19 = vmul.f32 %v13121_v53, %v13092_v29  ;;  %v13331_v16 = vmul.f32 %v13121_v53, %v13098_v46  ;;  %v14846_v8 = vld [vmem:[#allocation101_spill] sm:$0xff] }
 0x7e5   :  { %14841 = vst [vmem:[#allocation83_spill] sm:$0xff] %v13321_v28  ;;  %v7326_v17 = vadd.f32 %v13188_v51, %v7261_v50  ;;  %v7386_v33 = vmax.f32 %v7322_v35, 0.0  ;;  %v13336_v56 = vmul.f32 %v13121_v53, %v13101_v63  ;;  %v7331_v42 = vadd.f32 %v13188_v51, %v7266_v62  ;;  %v14849_v28 = vld [vmem:[#allocation104_spill] sm:$0xff] }
 0x7e6   :  { %14843 = vst [vmem:[#allocation106_spill] sm:$0xff] %v13327_v19  ;;  %v7391_v2 = vmax.f32 %v7327_v10, 0.0  ;;  %v7451_v31 = vmul.f32 %v14846_v8, %v7387_v3  ;;  %v13342_v29 = vmul.f32 %v13121_v53, %v13104_v59  ;;  %v7328_v57 = vadd.f32 %v13188_v51, %v7263_v58 }
 0x7e7   :  { %14844 = vst [vmem:[#allocation87_spill] sm:$0xff] %v13331_v16  ;;  %v7388_v46 = vmax.f32 %v7324_v14, 0.0  ;;  %v7512_v19 = vpack.c.bf16 %v7384_v13, %v7384_v13  ;;  %v7333_v50 = vadd.f32 %v13188_v51, %v7268_v7  ;;  %v7393_v35 = vmax.f32 %v7329_v40, 0.0  ;;  %v14848_v16 = vld [vmem:[#allocation102_spill] sm:$0xff]  ;;  %v14850_v14 = vld [vmem:[#allocation105_spill] sm:$0xff] }
 0x7e8   :  { %14845 = vst [vmem:[#allocation103_spill] sm:$0xff] %v13336_v56  ;;  %v7453_v24 = vmul.f32 %v14848_v16, %v7389_v55  ;;  %v7513_v63 = vpack.c.bf16 %v7449_v6, %v7449_v6  ;;  %v7330_v56 = vadd.f32 %v13188_v51, %v7265_v21  ;;  %v7335_v62 = vadd.f32 %v13188_v51, %v7270_v32  ;;  %v14851_v16 = vld [vmem:[#allocation60_spill] sm:$0xff] }
 0x7e9   :  { %14847 = vst [vmem:[#allocation108_spill] sm:$0xff] %v13342_v29  ;;  %v7390_v10 = vmax.f32 %v7326_v17, 0.0  ;;  %v7514_v3 = vpack.c.bf16 %v7386_v33, %v7386_v33  ;;  %v7395_v8 = vmax.f32 %v7331_v42, 0.0  ;;  %v7455_v59 = vmul.f32 %v14849_v28, %v7391_v2 }
 0x7ea   :  { %v7515_v29 = vpack.c.bf16 %v7451_v31, %v7451_v31  ;;  %v13352_v13 = vmul.f32 %v13121_v53, %v13107_v5  ;;  %v7332_v58 = vadd.f32 %v13188_v51, %v13202_v54  ;;  %v7392_v7 = vmax.f32 %v7328_v57, 0.0  ;;  %7577 = vst.msk [vmem:[%s13787_s5] sm:$0xf] %vm7576_vm5, %v7512_v19  ;;  %v14852_v31 = vld [vmem:[#allocation107_spill] sm:$0xff] }
 0x7eb   :  { %v7516_v55 = vpack.c.bf16 %v7388_v46, %v7388_v46  ;;  %v7337_v21 = vadd.f32 %v13188_v51, %v13218_v30  ;;  %v7397_v32 = vmax.f32 %v7333_v50, 0.0  ;;  %v7457_v28 = vmul.f32 %v14850_v14, %v7393_v35  ;;  %7578 = vst.msk [vmem:[%s13787_s5 + $0x4] sm:$0xf] %vm7576_vm5, %v7513_v63  ;;  %v14853_v63 = vld [vmem:[#allocation109_spill] sm:$0xff] }
 0x7ec   :  { %v7517_v40 = vpack.c.bf16 %v7453_v24, %v7453_v24  ;;  %v13369_v5 = vmul.f32 %v13121_v53, %v13110_v15  ;;  %v7334_v54 = vadd.f32 %v13188_v51, %v13208_v1  ;;  %v7394_v6 = vmax.f32 %v7330_v56, 0.0  ;;  %7579 = vst.msk [vmem:[%s13787_s5 + $0x8] sm:$0xf] %vm7576_vm5, %v7514_v3 }
 0x7ed   :  { %v7518_v19 = vpack.c.bf16 %v7390_v10, %v7390_v10  ;;  %v7339_v24 = vadd.f32 %v13188_v51, %v13226_v36  ;;  %v7399_v30 = vmax.f32 %v7335_v62, 0.0  ;;  %v7459_v17 = vmul.f32 %v14851_v16, %v7395_v8  ;;  %7580 = vst.msk [vmem:[%s13787_s5 + $0xc] sm:$0xf] %vm7576_vm5, %v7515_v29 }
 0x7ee   :  { %v7519_v33 = vpack.c.bf16 %v7455_v59, %v7455_v59  ;;  %v13386_v15 = vmul.f32 %v13121_v53, %v13113_v43  ;;  %v7336_v1 = vadd.f32 %v13188_v51, %v13214_v12  ;;  %v7396_v56 = vmax.f32 %v7332_v58, 0.0  ;;  %7581 = vst.msk [vmem:[%s13787_s5 + $0x10] sm:$0xf] %vm7576_vm5, %v7516_v55 }
 0x7ef   :  { %v7520_v42 = vpack.c.bf16 %v7392_v7, %v7392_v7  ;;  %v7341_v36 = vadd.f32 %v13188_v51, %v13234_v48  ;;  %v7401_v2 = vmax.f32 %v7337_v21, 0.0  ;;  %v7461_v29 = vmul.f32 %v14852_v31, %v7397_v32  ;;  %7582 = vst.msk [vmem:[%s13787_s5 + $0x14] sm:$0xf] %vm7576_vm5, %v7517_v40  ;;  %v14855_v7 = vld [vmem:[#allocation110_spill] sm:$0xff] }
 0x7f0   :  { %v7521_v57 = vpack.c.bf16 %v7457_v28, %v7457_v28  ;;  %v13403_v43 = vmul.f32 %v13121_v53, %v13116_v52  ;;  %v7338_v12 = vadd.f32 %v13188_v51, %v13222_v38  ;;  %v7398_v46 = vmax.f32 %v7334_v54, 0.0  ;;  %7583 = vst.msk [vmem:[%s13787_s5 + $0x18] sm:$0xf] %vm7576_vm5, %v7518_v19  ;;  %v14854_v52 = vld [vmem:[#allocation55_spill] sm:$0xff] }
 0x7f1   :  { %v7522_v50 = vpack.c.bf16 %v7394_v6, %v7394_v6  ;;  %v7343_v48 = vadd.f32 %v13188_v51, %v13243_v27  ;;  %v7403_v35 = vmax.f32 %v7339_v24, 0.0  ;;  %v7463_v62 = vmul.f32 %v14853_v63, %v7399_v30  ;;  %7584 = vst.msk [vmem:[%s13787_s5 + $0x1c] sm:$0xf] %vm7576_vm5, %v7519_v33  ;;  %v14856_v54 = vld [vmem:[#allocation111_spill] sm:$0xff] }
 0x7f2   :  { %v7523_v10 = vpack.c.bf16 %v7459_v17, %v7459_v17  ;;  %v13420_v38 = vmul.f32 %v13121_v53, %v14854_v52  ;;  %v7340_v3 = vadd.f32 %v13188_v51, %v13230_v9  ;;  %v7400_v8 = vmax.f32 %v7336_v1, 0.0  ;;  %7585 = vst.msk [vmem:[%s13787_s5 + $0x20] sm:$0xf] %vm7576_vm5, %v7520_v42  ;;  %v14857_v17 = vld [vmem:[#allocation84_spill] sm:$0xff] }
 0x7f3   :  { %v7524_v59 = vpack.c.bf16 %v7396_v56, %v7396_v56  ;;  %v7345_v27 = vadd.f32 %v13188_v51, %v13251_v20  ;;  %v7405_v58 = vmax.f32 %v7341_v36, 0.0  ;;  %v7465_v55 = vmul.f32 %v14855_v7, %v7401_v2  ;;  %7586 = vst.msk [vmem:[%s13787_s5 + $0x24] sm:$0xf] %vm7576_vm5, %v7521_v57  ;;  %v14858_v2 = vld [vmem:[#allocation77_spill] sm:$0xff] }
 0x7f4   :  { %v7525_v21 = vpack.c.bf16 %v7461_v29, %v7461_v29  ;;  %v7342_v9 = vadd.f32 %v13188_v51, %v13239_v49  ;;  %v7346_v32 = vadd.f32 %v13188_v51, %v13255_v0  ;;  %v7402_v14 = vmax.f32 %v7338_v12, 0.0  ;;  %7587 = vst.msk [vmem:[%s13787_s5 + $0x28] sm:$0xf] %vm7576_vm5, %v7522_v50 }
 0x7f5   :  { %v7526_v28 = vpack.c.bf16 %v7398_v46, %v7398_v46  ;;  %v7347_v20 = vadd.f32 %v13188_v51, %v13259_v47  ;;  %v7407_v40 = vmax.f32 %v7343_v48, 0.0  ;;  %v7467_v6 = vmul.f32 %v14856_v54, %v7403_v35  ;;  %7588 = vst.msk [vmem:[%s13787_s5 + $0x2c] sm:$0xf] %vm7576_vm5, %v7523_v10  ;;  %v14859_v48 = vld [vmem:[#allocation92_spill] sm:$0xff] }
 0x7f6   :  { %v7527_v19 = vpack.c.bf16 %v7463_v62, %v7463_v62  ;;  %v7344_v49 = vadd.f32 %v13188_v51, %v13247_v61  ;;  %v7348_v0 = vadd.f32 %v13188_v51, %v13263_v23  ;;  %v7404_v24 = vmax.f32 %v7340_v3, 0.0  ;;  %7589 = vst.msk [vmem:[%s13787_s5 + $0x30] sm:$0xf] %vm7576_vm5, %v7524_v59 }
 0x7f7   :  { %v7528_v30 = vpack.c.bf16 %v7400_v8, %v7400_v8  ;;  %v7349_v47 = vadd.f32 %v13188_v51, %v13268_v4  ;;  %v7409_v16 = vmax.f32 %v7345_v27, 0.0  ;;  %v7469_v33 = vmul.f32 %v14857_v17, %v7405_v58  ;;  %7590 = vst.msk [vmem:[%s13787_s5 + $0x34] sm:$0xf] %vm7576_vm5, %v7525_v21 }
 0x7f8   :  { %v7529_v1 = vpack.c.bf16 %v7465_v55, %v7465_v55  ;;  %v7350_v61 = vadd.f32 %v13188_v51, %v13272_v60  ;;  %v7406_v23 = vmax.f32 %v7342_v9, 0.0  ;;  %v7410_v56 = vmax.f32 %v7346_v32, 0.0  ;;  %7591 = vst.msk [vmem:[%s13787_s5 + $0x38] sm:$0xf] %vm7576_vm5, %v7526_v28 }
 0x7f9   :  { %v7530_v42 = vpack.c.bf16 %v7402_v14, %v7402_v14  ;;  %v7351_v4 = vadd.f32 %v13188_v51, %v13276_v39  ;;  %v7411_v36 = vmax.f32 %v7347_v20, 0.0  ;;  %v7471_v31 = vmul.f32 %v14858_v2, %v7407_v40  ;;  %7592 = vst.msk [vmem:[%s13787_s5 + $0x3c] sm:$0xf] %vm7576_vm5, %v7527_v19  ;;  %v14867_v2 = vld [vmem:[#allocation95_spill] sm:$0xff] }
 0x7fa   :  { %v7531_v29 = vpack.c.bf16 %v7467_v6, %v7467_v6  ;;  %v13480_v60 = vmul.f32 %v13121_v53, %v13124_v34  ;;  %v7408_v57 = vmax.f32 %v7344_v49, 0.0  ;;  %v7412_v12 = vmax.f32 %v7348_v0, 0.0  ;;  %7593 = vst.msk [vmem:[%s13787_s5 + $0x40] sm:$0xf] %vm7576_vm5, %v7528_v30 }
 0x7fb   :  { %v7532_v46 = vpack.c.bf16 %v7404_v24, %v7404_v24  ;;  %v7353_v39 = vadd.f32 %v13188_v51, %v13285_v11  ;;  %v7413_v50 = vmax.f32 %v7349_v47, 0.0  ;;  %v7473_v35 = vmul.f32 %v14859_v48, %v7409_v16  ;;  %7594 = vst.msk [vmem:[%s13787_s5 + $0x44] sm:$0xf] %vm7576_vm5, %v7529_v1  ;;  %v14863_v47 = vld [vmem:[#allocation39_spill] sm:$0xff] }
 0x7fc   :  { %v7533_v63 = vpack.c.bf16 %v7469_v33, %v7469_v33  ;;  %v13495_v34 = vmul.f32 %v13121_v53, %v13127_v25  ;;  %v7414_v62 = vmax.f32 %v7350_v61, 0.0  ;;  %v7474_v10 = vmul.f32 0.0, %v7410_v56  ;;  %7595 = vst.msk [vmem:[%s13787_s5 + $0x48] sm:$0xf] %vm7576_vm5, %v7530_v42  ;;  %v14860_v25 = vld [vmem:[#allocation58_spill] sm:$0xff]  ;;  %v14865_v1 = vld [vmem:[#allocation79_spill] sm:$0xff] }
 0x7fd   :  { %v7534_v52 = vpack.c.bf16 %v7406_v23, %v7406_v23  ;;  %v7355_v11 = vadd.f32 %v13188_v51, %v13294_v18  ;;  %v7415_v3 = vmax.f32 %v7351_v4, 0.0  ;;  %v7475_v8 = vmul.f32 0.0, %v7411_v36  ;;  %7596 = vst.msk [vmem:[%s13787_s5 + $0x4c] sm:$0xf] %vm7576_vm5, %v7531_v29  ;;  %v14866_v42 = vld [vmem:[#allocation87_spill] sm:$0xff] }
 0x7fe   :  { %v7535_v59 = vpack.c.bf16 %v7471_v31, %v7471_v31  ;;  %v13509_v27 = vmul.f32 %v13121_v53, %v14860_v25  ;;  %v7352_v58 = vadd.f32 %v13188_v51, %v13281_v41  ;;  %v7476_v7 = vmul.f32 0.0, %v7412_v12  ;;  %7597 = vst.msk [vmem:[%s13787_s5 + $0x50] sm:$0xf] %vm7576_vm5, %v7532_v46  ;;  %v14869_v46 = vld [vmem:[#allocation98_spill] sm:$0xff] }
 0x7ff   :  { %v7536_v55 = vpack.c.bf16 %v7408_v57, %v7408_v57  ;;  %v7357_v18 = vadd.f32 %v13188_v51, %v13303_v26  ;;  %v7417_v21 = vmax.f32 %v7353_v39, 0.0  ;;  %v7477_v9 = vmul.f32 0.0, %v7413_v50  ;;  %7598 = vst.msk [vmem:[%s13787_s5 + $0x54] sm:$0xf] %vm7576_vm5, %v7533_v63  ;;  %v14868_v57 = vld [vmem:[#allocation69_spill] sm:$0xff] }
 0x800   :  { %v7537_v32 = vpack.c.bf16 %v7473_v35, %v7473_v35  ;;  %v13525_v41 = vmul.f32 %v13121_v53, %v13133_v45  ;;  %v7354_v14 = vadd.f32 %v13188_v51, %v13290_v22  ;;  %v7478_v28 = vmul.f32 0.0, %v7414_v62  ;;  %7599 = vst.msk [vmem:[%s13787_s5 + $0x58] sm:$0xf] %vm7576_vm5, %v7534_v52  ;;  %v14861_v45 = vld [vmem:[#allocation62_spill] sm:$0xff]  ;;  %v14870_v35 = vld [vmem:[#allocation108_spill] sm:$0xff] }
 0x801   :  { %v7538_v20 = vpack.c.bf16 %v7474_v10, %v7474_v10  ;;  %v7359_v26 = vadd.f32 %v13188_v51, %v13312_v37  ;;  %v7419_v40 = vmax.f32 %v7355_v11, 0.0  ;;  %v7479_v54 = vmul.f32 0.0, %v7415_v3  ;;  %7600 = vst.msk [vmem:[%s13787_s5 + $0x5c] sm:$0xf] %vm7576_vm5, %v7535_v59  ;;  %v14862_v37 = vld [vmem:[#allocation83_spill] sm:$0xff]  ;;  %v14873_v59 = vld [vmem:[#allocation106_spill] sm:$0xff] }
 0x802   :  { %v7539_v6 = vpack.c.bf16 %v7475_v8, %v7475_v8  ;;  %v13541_v22 = vmul.f32 %v13121_v53, %v14861_v45  ;;  %v7356_v19 = vadd.f32 %v13188_v51, %v13298_v44  ;;  %v7416_v49 = vmax.f32 %v7352_v58, 0.0  ;;  %7601 = vst.msk [vmem:[%s13787_s5 + $0x60] sm:$0xf] %vm7576_vm5, %v7536_v55  ;;  %v14864_v44 = vld [vmem:[#allocation67_spill] sm:$0xff]  ;;  %v14877_v45 = vld [vmem:[#allocation20_spill] sm:$0xff] }
 0x803   :  { %v7540_v0 = vpack.c.bf16 %v7476_v7, %v7476_v7  ;;  %v7361_v24 = vadd.f32 %v13188_v51, %v14862_v37  ;;  %v7421_v30 = vmax.f32 %v7357_v18, 0.0  ;;  %v7481_v16 = vmul.f32 %v14863_v47, %v7417_v21  ;;  %7602 = vst.msk [vmem:[%s13787_s5 + $0x64] sm:$0xf] %vm7576_vm5, %v7537_v32  ;;  %v14871_v10 = vld [vmem:[#allocation75_spill] sm:$0xff]  ;;  %v14874_v21 = vld [vmem:[#allocation86_spill] sm:$0xff] }
 0x804   :  { %v7541_v17 = vpack.c.bf16 %v7477_v9, %v7477_v9  ;;  %v13558_v33 = vmul.f32 %v13121_v53, %v14864_v44  ;;  %v7358_v61 = vadd.f32 %v13188_v51, %v14865_v1  ;;  %v7418_v23 = vmax.f32 %v7354_v14, 0.0  ;;  %7603 = vst.msk [vmem:[%s13787_s5 + $0x68] sm:$0xf] %vm7576_vm5, %v7538_v20  ;;  %v14872_v3 = vld [vmem:[#allocation71_spill] sm:$0xff]  ;;  %v14875_v14 = vld [vmem:[#allocation74_spill] sm:$0xff] }
 0x805   :  { %v7542_v56 = vpack.c.bf16 %v7478_v28, %v7478_v28  ;;  %v7363_v4 = vadd.f32 %v13188_v51, %v14866_v42  ;;  %v7423_v36 = vmax.f32 %v7359_v26, 0.0  ;;  %v7483_v31 = vmul.f32 %v14867_v2, %v7419_v40  ;;  %7604 = vst.msk [vmem:[%s13787_s5 + $0x6c] sm:$0xf] %vm7576_vm5, %v7539_v6  ;;  %v14876_v20 = vld [vmem:[#allocation103_spill] sm:$0xff] }
 0x806   :  { %v7543_v29 = vpack.c.bf16 %v7479_v54, %v7479_v54  ;;  %v13575_v12 = vmul.f32 %v13121_v53, %v14868_v57  ;;  %v7360_v39 = vadd.f32 %v13188_v51, %v14869_v46  ;;  %v7420_v50 = vmax.f32 %v7356_v19, 0.0  ;;  %7605 = vst.msk [vmem:[%s13787_s5 + $0x70] sm:$0xf] %vm7576_vm5, %v7540_v0  ;;  %v14878_v0 = vld [vmem:[#allocation76_spill] sm:$0xff] }
 0x807   :  { %v7544_v48 = vpack.c.bf16 %v7416_v49, %v7416_v49  ;;  %v7365_v63 = vadd.f32 %v13188_v51, %v14870_v35  ;;  %v7425_v62 = vmax.f32 %v7361_v24, 0.0  ;;  %v7485_v52 = vmul.f32 %v14871_v10, %v7421_v30  ;;  %7606 = vst.msk [vmem:[%s13787_s5 + $0x74] sm:$0xf] %vm7576_vm5, %v7541_v17  ;;  %v14879_v17 = vld [vmem:[#allocation35_spill] sm:$0xff] }
 0x808   :  { %v7545_v11 = vpack.c.bf16 %v7481_v16, %v7481_v16  ;;  %v7313_v8 = vmul.f32 %v13121_v53, %v14872_v3  ;;  %v7362_v25 = vadd.f32 %v13188_v51, %v14873_v59  ;;  %v7422_v58 = vmax.f32 %v7358_v61, 0.0  ;;  %7607 = vst.msk [vmem:[%s13787_s5 + $0x78] sm:$0xf] %vm7576_vm5, %v7542_v56  ;;  %v14885_v59 = vld [vmem:[#allocation30_spill] sm:$0xff] }
 0x809   :  { %v7546_v7 = vpack.c.bf16 %v7418_v23, %v7418_v23  ;;  %v7367_v55 = vadd.f32 %v13188_v51, %v13369_v5  ;;  %v7427_v18 = vmax.f32 %v7363_v4, 0.0  ;;  %v7487_v9 = vmul.f32 %v14874_v21, %v7423_v36  ;;  %7608 = vst.msk [vmem:[%s13787_s5 + $0x7c] sm:$0xf] %vm7576_vm5, %v7543_v29  ;;  %v14881_v36 = vld [vmem:[#allocation41_spill] sm:$0xff]  ;;  %v14886_v21 = vld [vmem:[#allocation43_spill] sm:$0xff] }
 0x80a   :  { %v7547_v32 = vpack.c.bf16 %v7483_v31, %v7483_v31  ;;  %v7314_v28 = vmul.f32 %v13121_v53, %v14875_v14  ;;  %v7364_v26 = vadd.f32 %v13188_v51, %v14876_v20  ;;  %v7424_v40 = vmax.f32 %v7360_v39, 0.0  ;;  %7609 = vst.msk [vmem:[%s13787_s5 + $0x80] sm:$0xf] %vm7576_vm5, %v7544_v48  ;;  %v14883_v48 = vld [vmem:[#allocation18_spill] sm:$0xff] }
 0x80b   :  { %v7548_v54 = vpack.c.bf16 %v7420_v50, %v7420_v50  ;;  %v7369_v5 = vadd.f32 %v13188_v51, %v13403_v43  ;;  %v7429_v6 = vmax.f32 %v7365_v63, 0.0  ;;  %v7489_v19 = vmul.f32 %v14877_v45, %v7425_v62  ;;  %7610 = vst.msk [vmem:[%s13787_s5 + $0x84] sm:$0xf] %vm7576_vm5, %v7545_v11 }
 0x80c   :  { %v7549_v49 = vpack.c.bf16 %v7485_v52, %v7485_v52  ;;  %v7315_v37 = vmul.f32 %v13121_v53, %v14878_v0  ;;  %v7366_v24 = vadd.f32 %v13188_v51, %v13352_v13  ;;  %v7426_v30 = vmax.f32 %v7362_v25, 0.0  ;;  %7611 = vst.msk [vmem:[%s13787_s5 + $0x88] sm:$0xf] %vm7576_vm5, %v7546_v7  ;;  %v14880_v13 = vld [vmem:[#allocation78_spill] sm:$0xff] }
 0x80d   :  { %v7550_v47 = vpack.c.bf16 %v7422_v58, %v7422_v58  ;;  %v7371_v43 = vadd.f32 %v13188_v51, %v13480_v60  ;;  %v7431_v16 = vmax.f32 %v7367_v55, 0.0  ;;  %v7491_v44 = vmul.f32 %v14879_v17, %v7427_v18  ;;  %7612 = vst.msk [vmem:[%s13787_s5 + $0x8c] sm:$0xf] %vm7576_vm5, %v7547_v32 }
 0x80e   :  { %v7551_v1 = vpack.c.bf16 %v7487_v9, %v7487_v9  ;;  %v7316_v61 = vmul.f32 %v13121_v53, %v14880_v13  ;;  %v7368_v23 = vadd.f32 %v13188_v51, %v13386_v15  ;;  %v7428_v56 = vmax.f32 %v7364_v26, 0.0  ;;  %7613 = vst.msk [vmem:[%s13787_s5 + $0x90] sm:$0xf] %vm7576_vm5, %v7548_v54  ;;  %v14882_v15 = vld [vmem:[#allocation38_spill] sm:$0xff] }
 0x80f   :  { %v7552_v42 = vpack.c.bf16 %v7424_v40, %v7424_v40  ;;  %v7373_v60 = vadd.f32 %v13188_v51, %v13509_v27  ;;  %v7433_v4 = vmax.f32 %v7369_v5, 0.0  ;;  %v7493_v2 = vmul.f32 %v14881_v36, %v7429_v6  ;;  %7614 = vst.msk [vmem:[%s13787_s5 + $0x94] sm:$0xf] %vm7576_vm5, %v7549_v49  ;;  %v14887_v40 = vld [vmem:[#allocation80_spill] sm:$0xff] }
 0x810   :  { %v7553_v31 = vpack.c.bf16 %v7489_v19, %v7489_v19  ;;  %v7317_v29 = vmul.f32 %v13121_v53, %v14882_v15  ;;  %v7370_v57 = vadd.f32 %v13188_v51, %v13420_v38  ;;  %v7430_v46 = vmax.f32 %v7366_v24, 0.0  ;;  %7615 = vst.msk [vmem:[%s13787_s5 + $0x98] sm:$0xf] %vm7576_vm5, %v7550_v47  ;;  %v14884_v38 = vld [vmem:[#allocation81_spill] sm:$0xff] }
 0x811   :  { %v7554_v39 = vpack.c.bf16 %v7426_v30, %v7426_v30  ;;  %v7375_v27 = vadd.f32 %v13188_v51, %v13541_v22  ;;  %v7435_v50 = vmax.f32 %v7371_v43, 0.0  ;;  %v7495_v35 = vmul.f32 %v14883_v48, %v7431_v16  ;;  %7616 = vst.msk [vmem:[%s13787_s5 + $0x9c] sm:$0xf] %vm7576_vm5, %v7551_v1 }
 0x812   :  { %v7555_v63 = vpack.c.bf16 %v7491_v44, %v7491_v44  ;;  %v7318_v62 = vmul.f32 %v13121_v53, %v14884_v38  ;;  %v7372_v10 = vadd.f32 %v13188_v51, %v13495_v34  ;;  %v7432_v52 = vmax.f32 %v7368_v23, 0.0  ;;  %7617 = vst.msk [vmem:[%s13787_s5 + $0xa0] sm:$0xf] %vm7576_vm5, %v7552_v42  ;;  %v14889_v44 = vld [vmem:[#allocation28_spill] sm:$0xff] }
 0x813   :  { %v7556_v11 = vpack.c.bf16 %v7428_v56, %v7428_v56  ;;  %v7377_v22 = vadd.f32 %v13188_v51, %v13575_v12  ;;  %v7437_v3 = vmax.f32 %v7373_v60, 0.0  ;;  %v7497_v25 = vmul.f32 %v14885_v59, %v7433_v4  ;;  %7618 = vst.msk [vmem:[%s13787_s5 + $0xa4] sm:$0xf] %vm7576_vm5, %v7553_v31 }
 0x814   :  { %v7557_v58 = vpack.c.bf16 %v7493_v2, %v7493_v2  ;;  %v7374_v53 = vadd.f32 %v13188_v51, %v13525_v41  ;;  %v7378_v34 = vadd.f32 %v13188_v51, %v7313_v8  ;;  %v7434_v7 = vmax.f32 %v7370_v57, 0.0  ;;  %7619 = vst.msk [vmem:[%s13787_s5 + $0xa8] sm:$0xf] %vm7576_vm5, %v7554_v39 }
 0x815   :  { %v7558_v55 = vpack.c.bf16 %v7430_v46, %v7430_v46  ;;  %v7379_v12 = vadd.f32 %v13188_v51, %v7314_v28  ;;  %v7439_v18 = vmax.f32 %v7375_v27, 0.0  ;;  %v7499_v9 = vmul.f32 %v14886_v21, %v7435_v50  ;;  %7620 = vst.msk [vmem:[%s13787_s5 + $0xac] sm:$0xf] %vm7576_vm5, %v7555_v63 }
 0x816   :  { %v7559_v32 = vpack.c.bf16 %v7495_v35, %v7495_v35  ;;  %v7376_v41 = vadd.f32 %v13188_v51, %v13558_v33  ;;  %v7380_v8 = vadd.f32 %v13188_v51, %v7315_v37  ;;  %v7436_v14 = vmax.f32 %v7372_v10, 0.0  ;;  %7621 = vst.msk [vmem:[%s13787_s5 + $0xb0] sm:$0xf] %vm7576_vm5, %v7556_v11  ;;  %v14888_v37 = vld [vmem:[#allocation27_spill] sm:$0xff] }
 0x817   :  { %v7560_v20 = vpack.c.bf16 %v7432_v52, %v7432_v52  ;;  %v7381_v28 = vadd.f32 %v13188_v51, %v7316_v61  ;;  %v7441_v26 = vmax.f32 %v7377_v22, 0.0  ;;  %v7501_v54 = vmul.f32 %v14887_v40, %v7437_v3  ;;  %7622 = vst.msk [vmem:[%s13787_s5 + $0xb4] sm:$0xf] %vm7576_vm5, %v7557_v58 }
 0x818   :  { %v7561_v5 = vpack.c.bf16 %v7497_v25, %v7497_v25  ;;  %v7382_v33 = vadd.f32 %v13188_v51, %v7317_v29  ;;  %v7438_v6 = vmax.f32 %v7374_v53, 0.0  ;;  %v7442_v45 = vmax.f32 %v7378_v34, 0.0  ;;  %7623 = vst.msk [vmem:[%s13787_s5 + $0xb8] sm:$0xf] %vm7576_vm5, %v7558_v55 }
 0x819   :  { %v7562_v19 = vpack.c.bf16 %v7434_v7, %v7434_v7  ;;  %v7383_v49 = vadd.f32 %v13188_v51, %v7318_v62  ;;  %v7443_v0 = vmax.f32 %v7379_v12, 0.0  ;;  %v7503_v24 = vmul.f32 %v14888_v37, %v7439_v18  ;;  %7624 = vst.msk [vmem:[%s13787_s5 + $0xbc] sm:$0xf] %vm7576_vm5, %v7559_v32 }
 0x81a   :  { %v7563_v30 = vpack.c.bf16 %v7499_v9, %v7499_v9  ;;  %v7440_v47 = vmax.f32 %v7376_v41, 0.0  ;;  %v7444_v43 = vmax.f32 %v7380_v8, 0.0  ;;  %v7564_v16 = vpack.c.bf16 %v7436_v14, %v7436_v14  ;;  %7625 = vst.msk [vmem:[%s13787_s5 + $0xc0] sm:$0xf] %vm7576_vm5, %v7560_v20 }
 0x81b   :  { %v7445_v17 = vmax.f32 %v7381_v28, 0.0  ;;  %v7505_v51 = vmul.f32 %v14889_v44, %v7441_v26  ;;  %v7565_v1 = vpack.c.bf16 %v7501_v54, %v7501_v54  ;;  %7626 = vst.msk [vmem:[%s13787_s5 + $0xc4] sm:$0xf] %vm7576_vm5, %v7561_v5  ;;  %v7446_v13 = vmax.f32 %v7382_v33, 0.0 }
 0x81c   :  { %v7506_v61 = vmul.f32 0.0, %v7442_v45  ;;  %v7566_v23 = vpack.c.bf16 %v7438_v6, %v7438_v6  ;;  %7627 = vst.msk [vmem:[%s13787_s5 + $0xc8] sm:$0xf] %vm7576_vm5, %v7562_v19  ;;  %v7447_v56 = vmax.f32 %v7383_v49, 0.0  ;;  %v7507_v42 = vmul.f32 0.0, %v7443_v0 }
 0x81d   :  { %v7567_v60 = vpack.c.bf16 %v7503_v24, %v7503_v24  ;;  %7628 = vst.msk [vmem:[%s13787_s5 + $0xcc] sm:$0xf] %vm7576_vm5, %v7563_v30  ;;  %v7508_v4 = vmul.f32 0.0, %v7444_v43  ;;  %v7568_v36 = vpack.c.bf16 %v7440_v47, %v7440_v47  ;;  %v7509_v2 = vmul.f32 0.0, %v7445_v17 }
 0x81e   :  { %7629 = vst.msk [vmem:[%s13787_s5 + $0xd0] sm:$0xf] %vm7576_vm5, %v7564_v16  ;;  %v7569_v31 = vpack.c.bf16 %v7505_v51, %v7505_v51  ;;  %v7510_v15 = vmul.f32 0.0, %v7446_v13  ;;  %v7570_v29 = vpack.c.bf16 %v7506_v61, %v7506_v61  ;;  %v7511_v57 = vmul.f32 0.0, %v7447_v56 }
 0x81f   :  { %7630 = vst.msk [vmem:[%s13787_s5 + $0xd4] sm:$0xf] %vm7576_vm5, %v7565_v1  ;;  %v7571_v46 = vpack.c.bf16 %v7507_v42, %v7507_v42  ;;  %v7572_v39 = vpack.c.bf16 %v7508_v4, %v7508_v4  ;;  %v7573_v27 = vpack.c.bf16 %v7509_v2, %v7509_v2 }
 0x820   :  { %7631 = vst.msk [vmem:[%s13787_s5 + $0xd8] sm:$0xf] %vm7576_vm5, %v7566_v23  ;;  %v7574_v50 = vpack.c.bf16 %v7510_v15, %v7510_v15  ;;  %v7575_v48 = vpack.c.bf16 %v7511_v57, %v7511_v57 }
 0x821   :  { %7632 = vst.msk [vmem:[%s13787_s5 + $0xdc] sm:$0xf] %vm7576_vm5, %v7567_v60 }
 0x822   :  { %7633 = vst.msk [vmem:[%s13787_s5 + $0xe0] sm:$0xf] %vm7576_vm5, %v7568_v36 }
 0x823   :  { %7634 = vst.msk [vmem:[%s13787_s5 + $0xe4] sm:$0xf] %vm7576_vm5, %v7569_v31 }
 0x824   :  { %7635 = vst.msk [vmem:[%s13787_s5 + $0xe8] sm:$0xf] %vm7576_vm5, %v7570_v29 }
 0x825   :  { %7636 = vst.msk [vmem:[%s13787_s5 + $0xec] sm:$0xf] %vm7576_vm5, %v7571_v46 }
 0x826   :  { %7637 = vst.msk [vmem:[%s13787_s5 + $0xf0] sm:$0xf] %vm7576_vm5, %v7572_v39 }
 0x827   :  { %7638 = vst.msk [vmem:[%s13787_s5 + $0xf4] sm:$0xf] %vm7576_vm5, %v7573_v27 }
 0x828   :  { %7639 = vst.msk [vmem:[%s13787_s5 + $0xf8] sm:$0xf] %vm7576_vm5, %v7574_v50 }
 0x829   :  { %7640 = vst.msk [vmem:[%s13787_s5 + $0xfc] sm:$0xf] %vm7576_vm5, %v7575_v48 }
 0x82a   :  { %7645 = vsyncpa [#allocation5], 1 }
 0x82b   :  { %7646 = vsyncpa [#allocation7], 1 }
 0x82c   :  { %7647 = vsyncpa [#allocation10], 1 }

</bundles_post_ra>
